<compile_context>
chip_gen: v7x
topology: tpu7x:2x2x1
jax: 0.10.0
libtpu: 0.0.40
codegen_flags: <defaults>
</compile_context>

<pallas_src>
import functools

import jax
import jax.numpy as jnp
from jax import lax
from jax.experimental import pallas as pl
from jax.experimental.pallas import tpu as pltpu

INPUT_DIM = 3
HIDDEN_DIM = 50
OUTPUT_DIM = 1

GATE = 128         # per-gate lane width (HIDDEN_DIM zero-padded to a full lane tile)
DIN_PAD = 8        # input feature dim padded to a sublane multiple
MAX_BLOCK_B = 128  # per-grid-step batch block (rows); multiple of 8


# ----------------------------------------------------------------------------
# Fused Pallas kernel: BiLSTM -> LSTM1 -> LSTM2 -> time-sum -> FC
# ----------------------------------------------------------------------------
def _fused_kernel(x_ref,                                     # (1, T*BB, DIN_PAD)
                  wih_f_ref, whh_f_ref, b_f_ref,             # BiLSTM fwd
                  wih_r_ref, whh_r_ref, b_r_ref,             # BiLSTM bwd
                  wih1_f_ref, wih1_r_ref, whh1_ref, b1_ref,  # LSTM1
                  wih2_ref, whh2_ref, b2_ref,                # LSTM2
                  fcw_ref, fcb_ref,                          # FC
                  out_ref,                                   # (BB, GATE)
                  gxf_ref, gxr_ref, hf_ref, hr_ref,          # VMEM scratch
                  *, T, BB, unroll):
    G = GATE

    def lstm_cell(gates, c):
        # PyTorch gate order (i, f, g, o); each slice is one full 128-lane tile.
        i = jax.nn.sigmoid(gates[:, 0 * G:1 * G])
        f = jax.nn.sigmoid(gates[:, 1 * G:2 * G])
        g = jnp.tanh(gates[:, 2 * G:3 * G])
        o = jax.nn.sigmoid(gates[:, 3 * G:4 * G])
        c_new = f * c + i * g
        h_new = o * jnp.tanh(c_new)
        return h_new, c_new

    x = x_ref[0]                                             # (T*BB, DIN_PAD)
    z = jnp.zeros((BB, G), jnp.float32)

    # --- Stage 1: hoisted BiLSTM input projections (both directions) --------
    gxf_ref[...] = jnp.dot(x, wih_f_ref[...],
                           preferred_element_type=jnp.float32) + b_f_ref[...]
    gxr_ref[...] = jnp.dot(x, wih_r_ref[...],
                           preferred_element_type=jnp.float32) + b_r_ref[...]

    # --- Stage 2: interleaved fwd/bwd BiLSTM recurrences (2-way ILP) --------
    whh_f = whh_f_ref[...]                                   # hoisted out of loop
    whh_r = whh_r_ref[...]

    def bi_step(t, carry):
        h_f, c_f, h_r, c_r = carry
        row_f = pl.multiple_of(t * BB, 8)
        row_r = pl.multiple_of((T - 1 - t) * BB, 8)
        gates_f = gxf_ref[pl.ds(row_f, BB), :] + jnp.dot(
            h_f, whh_f, preferred_element_type=jnp.float32)
        gates_r = gxr_ref[pl.ds(row_r, BB), :] + jnp.dot(
            h_r, whh_r, preferred_element_type=jnp.float32)
        h_f, c_f = lstm_cell(gates_f, c_f)
        h_r, c_r = lstm_cell(gates_r, c_r)
        hf_ref[pl.ds(row_f, BB), :] = h_f
        hr_ref[pl.ds(row_r, BB), :] = h_r
        return (h_f, c_f, h_r, c_r)

    lax.fori_loop(0, T, bi_step, (z, z, z, z), unroll=unroll)

    # --- Stage 3: hoisted LSTM1 input projection (concat == two matmuls) ----
    # gx buffers are free again: reuse gxf for LSTM1's gate projections.
    gxf_ref[...] = (
        jnp.dot(hf_ref[...], wih1_f_ref[...], preferred_element_type=jnp.float32)
        + jnp.dot(hr_ref[...], wih1_r_ref[...], preferred_element_type=jnp.float32)
        + b1_ref[...])

    # --- Stage 4: skew-fused LSTM1 / LSTM2 recurrences + time-sum -----------
    whh1 = whh1_ref[...]
    wih2 = wih2_ref[...]
    whh2 = whh2_ref[...]
    b2 = b2_ref[...]

    # Prologue: LSTM1 step 0 (h1 = c1 = 0 -> gates are just gx1[0]).
    h1, c1 = lstm_cell(gxf_ref[pl.ds(0, BB), :], z)

    def skew_step(s, carry):
        h1, c1, h2, c2, acc = carry
        # LSTM2 step s-1 (consumes the carried h1_{s-1}); independent of the
        # LSTM1 step below -> both issue in the same iteration (ILP).
        gates2 = (jnp.dot(h1, wih2, preferred_element_type=jnp.float32) + b2
                  + jnp.dot(h2, whh2, preferred_element_type=jnp.float32))
        h2_new, c2_new = lstm_cell(gates2, c2)
        acc = acc + h2_new
        # LSTM1 step s.
        row = pl.multiple_of(s * BB, 8)
        gates1 = gxf_ref[pl.ds(row, BB), :] + jnp.dot(
            h1, whh1, preferred_element_type=jnp.float32)
        h1_new, c1_new = lstm_cell(gates1, c1)
        return (h1_new, c1_new, h2_new, c2_new, acc)

    h1, c1, h2, c2, acc = lax.fori_loop(
        1, T, skew_step, (h1, c1, z, z, z), unroll=unroll)

    # Epilogue: LSTM2 step T-1.
    gates2 = (jnp.dot(h1, wih2, preferred_element_type=jnp.float32) + b2
              + jnp.dot(h2, whh2, preferred_element_type=jnp.float32))
    h2, _ = lstm_cell(gates2, c2)
    acc = acc + h2

    # --- Stage 5: final linear layer (lane-dense padded output) -------------
    out_ref[...] = jnp.dot(acc, fcw_ref[...],
                           preferred_element_type=jnp.float32) + fcb_ref[...]


def _fused_forward(x_blocks, T, BB, NB, p):
    G = GATE
    unroll = True if T <= 32 else 8

    weights = (p["bi_f_wih"], p["bi_f_whh"], p["bi_f_b"],
               p["bi_r_wih"], p["bi_r_whh"], p["bi_r_b"],
               p["l1_wih_f"], p["l1_wih_r"], p["l1_whh"], p["l1_b"],
               p["l2_wih"], p["l2_whh"], p["l2_b"],
               p["fc_w"], p["fc_b"])

    in_specs = [pl.BlockSpec((1, T * BB, DIN_PAD), lambda b: (b, 0, 0))]
    in_specs += [pl.BlockSpec(w.shape, lambda b: (0, 0)) for w in weights]
    out_spec = pl.BlockSpec((BB, G), lambda b: (b, 0))

    # VMEM budget guard (matters for long traces / large batch blocks; v7x has
    # only 64 MiB physical VMEM).
    scratch_bytes = (2 * (T * BB * 4 * G) + 2 * (T * BB * G)) * 4
    weight_bytes = sum(int(w.size) * 4 for w in weights)
    block_bytes = (T * BB * DIN_PAD + BB * G) * 4
    need = scratch_bytes + 2 * (weight_bytes + block_bytes) + (2 << 20)
    cp_kwargs = dict(dimension_semantics=("parallel",))
    if need > (32 << 20):
        cp_kwargs["vmem_limit_bytes"] = int(min(need, 64 << 20))
        # TODO(synk): for very long traces, time-chunk the hoisted gate
        # projections (pltpu.emit_pipeline over T blocks) instead of growing VMEM.

    # Advisory cost estimate for XLA's scheduler.
    def mm_flops(m, k, n):
        return 2 * m * k * n

    per_block_flops = (
        2 * mm_flops(T * BB, DIN_PAD, 4 * G)        # BiLSTM input projections
        + 2 * T * mm_flops(BB, G, 4 * G)            # BiLSTM recurrences
        + 2 * mm_flops(T * BB, G, 4 * G)            # LSTM1 input projection
        + T * mm_flops(BB, G, 4 * G)                # LSTM1 recurrence
        + 2 * T * mm_flops(BB, G, 4 * G)            # LSTM2 in-proj + recurrence
        + mm_flops(BB, G, G))                       # FC
    flops = NB * per_block_flops
    transcendentals = NB * 4 * T * 5 * BB * G       # 3 sigmoid + 2 tanh / cell
    bytes_accessed = (int(x_blocks.size) + NB * BB * G) * 4 + weight_bytes

    return pl.pallas_call(
        functools.partial(_fused_kernel, T=T, BB=BB, unroll=unroll),
        grid=(NB,),
        out_shape=jax.ShapeDtypeStruct((NB * BB, G), jnp.float32),
        in_specs=in_specs,
        out_specs=out_spec,
        scratch_shapes=[
            pltpu.VMEM((T * BB, 4 * G), jnp.float32),  # gx fwd (reused for LSTM1)
            pltpu.VMEM((T * BB, 4 * G), jnp.float32),  # gx bwd
            pltpu.VMEM((T * BB, G), jnp.float32),      # BiLSTM fwd hidden states
            pltpu.VMEM((T * BB, G), jnp.float32),      # BiLSTM bwd hidden states
        ],
        compiler_params=pltpu.CompilerParams(**cp_kwargs),
        cost_estimate=pl.CostEstimate(
            flops=int(flops),
            transcendentals=int(transcendentals),
            bytes_accessed=int(bytes_accessed)),
    )(x_blocks, *weights)


# ----------------------------------------------------------------------------
# Parameter init (logical shapes, PyTorch-style uniform(-k, k)) and packing
# ----------------------------------------------------------------------------
def init_params(key, input_dim=INPUT_DIM, hidden_dim=HIDDEN_DIM,
                output_dim=OUTPUT_DIM):
    k = 1.0 / jnp.sqrt(jnp.float32(hidden_dim))

    def u(key, shape):
        return jax.random.uniform(key, shape, jnp.float32, -k, k)

    names_shapes = {
        "bi_f_wih": (input_dim, 4 * hidden_dim),
        "bi_f_whh": (hidden_dim, 4 * hidden_dim),
        "bi_f_b":   (1, 4 * hidden_dim),
        "bi_r_wih": (input_dim, 4 * hidden_dim),
        "bi_r_whh": (hidden_dim, 4 * hidden_dim),
        "bi_r_b":   (1, 4 * hidden_dim),
        "l1_wih": (2 * hidden_dim, 4 * hidden_dim),
        "l1_whh": (hidden_dim, 4 * hidden_dim),
        "l1_b":   (1, 4 * hidden_dim),
        "l2_wih": (hidden_dim, 4 * hidden_dim),
        "l2_whh": (hidden_dim, 4 * hidden_dim),
        "l2_b":   (1, 4 * hidden_dim),
        "fc_w": (hidden_dim, output_dim),
        "fc_b": (1, output_dim),
    }
    keys = jax.random.split(key, len(names_shapes))
    return {name: u(kk, shape)
            for kk, (name, shape) in zip(keys, names_shapes.items())}


def _pad_gate_cols(w, h=HIDDEN_DIM, g=GATE):
    """(rows, 4h) -> (rows, 4g): each gate block zero-padded to g lanes."""
    parts = [jnp.pad(w[:, k * h:(k + 1) * h], ((0, 0), (0, g - h)))
             for k in range(4)]
    return jnp.concatenate(parts, axis=1)


def _pad_rows(w, rows):
    return jnp.pad(w, ((0, rows - w.shape[0]), (0, 0)))


def pack_params(p, h=HIDDEN_DIM, g=GATE):
    """Pad the logical (H=50) weights into the lane-aligned kernel layout.
    When importing real PyTorch weights: wih = weight_ih_l0.T, whh = weight_hh_l0.T,
    b = (bias_ih_l0 + bias_hh_l0)[None, :]."""
    pk = {}
    for d in ("bi_f", "bi_r"):
        pk[f"{d}_wih"] = _pad_rows(_pad_gate_cols(p[f"{d}_wih"]), DIN_PAD)  # (8, 4G)
        pk[f"{d}_whh"] = _pad_rows(_pad_gate_cols(p[f"{d}_whh"]), g)        # (G, 4G)
        pk[f"{d}_b"] = _pad_gate_cols(p[f"{d}_b"])                          # (1, 4G)
    w1 = _pad_gate_cols(p["l1_wih"])                  # (2h, 4g)
    pk["l1_wih_f"] = _pad_rows(w1[:h], g)             # rows acting on h_fwd
    pk["l1_wih_r"] = _pad_rows(w1[h:], g)             # rows acting on h_bwd
    pk["l1_whh"] = _pad_rows(_pad_gate_cols(p["l1_whh"]), g)
    pk["l1_b"] = _pad_gate_cols(p["l1_b"])
    pk["l2_wih"] = _pad_rows(_pad_gate_cols(p["l2_wih"]), g)
    pk["l2_whh"] = _pad_rows(_pad_gate_cols(p["l2_whh"]), g)
    pk["l2_b"] = _pad_gate_cols(p["l2_b"])
    pk["fc_w"] = jnp.pad(p["fc_w"], ((0, g - h), (0, g - p["fc_w"].shape[1])))
    pk["fc_b"] = jnp.pad(p["fc_b"], ((0, 0), (0, g - p["fc_b"].shape[1])))
    return pk


# ----------------------------------------------------------------------------
# Model forward (wrapper around the single fused pallas_call)
# ----------------------------------------------------------------------------
@jax.jit
def model_forward(packed_params, trace, aux):
    """trace: (B, T, input_dim) batch-first (PyTorch convention). aux unused."""
    del aux  # unused by Model_1_0.forward
    B, T, d = trace.shape
    B8 = ((B + 7) // 8) * 8                                    # sublane-pad batch
    BB = min(B8, MAX_BLOCK_B)                                  # per-grid-step block
    BP = ((B8 + BB - 1) // BB) * BB
    NB = BP // BB
    x = jnp.transpose(trace, (1, 0, 2)).astype(jnp.float32)    # (T, B, d) time-major
    x = jnp.pad(x, ((0, 0), (0, BP - B), (0, DIN_PAD - d)))    # (T, BP, DIN_PAD)
    x = x.reshape(T, NB, BB, DIN_PAD).transpose(1, 0, 2, 3)    # (NB, T, BB, D)
    x_blocks = x.reshape(NB, T * BB, DIN_PAD)
    out = _fused_forward(x_blocks, T, BB, NB, packed_params)   # (BP, GATE)
    return out[:B, :OUTPUT_DIM]


# ----------------------------------------------------------------------------
# Pure-JAX reference (for self-check, uses the logical/unpadded params)
# ----------------------------------------------------------------------------
def _ref_lstm(x_tm, wih, whh, b):
    T, B, _ = x_tm.shape
    H = whh.shape[0]

    def step(carry, x_t):
        h, c = carry
        gates = x_t @ wih + h @ whh + b
        i = jax.nn.sigmoid(gates[:, 0 * H:1 * H])
        f = jax.nn.sigmoid(gates[:, 1 * H:2 * H])
        g = jnp.tanh(gates[:, 2 * H:3 * H])
        o = jax.nn.sigmoid(gates[:, 3 * H:4 * H])
        c = f * c + i * g
        h = o * jnp.tanh(c)
        return (h, c), h

    init = (jnp.zeros((B, H), jnp.float32), jnp.zeros((B, H), jnp.float32))
    _, hs = lax.scan(step, init, x_tm)
    return hs


def _ref_forward(params, trace, aux):
    del aux
    x_tm = jnp.transpose(trace, (1, 0, 2)).astype(jnp.float32)
    h_f = _ref_lstm(x_tm, params["bi_f_wih"], params["bi_f_whh"], params["bi_f_b"])
    h_b = _ref_lstm(x_tm[::-1], params["bi_r_wih"], params["bi_r_whh"],
                    params["bi_r_b"])[::-1]
    h_bi = jnp.concatenate([h_f, h_b], axis=-1)
    h1 = _ref_lstm(h_bi, params["l1_wih"], params["l1_whh"], params["l1_b"])
    h2 = _ref_lstm(h1, params["l2_wih"], params["l2_whh"], params["l2_b"])
    return jnp.sum(h2, axis=0) @ params["fc_w"] + params["fc_b"]


# ----------------------------------------------------------------------------
if __name__ == "__main__":
    key = jax.random.PRNGKey(0)
    k_params, k_trace, k_aux = jax.random.split(key, 3)

    B, T = 2, 8
    params = init_params(k_params)
    packed = pack_params(params)
    trace = jax.random.normal(k_trace, (B, T, INPUT_DIM), jnp.float32)
    aux = jax.random.normal(k_aux, (B, 4), jnp.float32)  # unused by forward

    out = model_forward(packed, trace, aux)
    out = jax.block_until_ready(out)

    ref = _ref_forward(params, trace, aux)
    assert out.shape == (B, OUTPUT_DIM)
    assert jnp.allclose(out, ref, atol=1e-4, rtol=1e-4), (out, ref)

    print("KERNEL_OK")
</pallas_src>

<mosaic_0001>
module attributes {stable_mosaic.version = 11 : i64} {
  func.func @_fused_kernel(%arg0: i32, %arg1: memref<1x64x8xf32, #tpu.memory_space<vmem>>, %arg2: memref<8x512xf32, #tpu.memory_space<vmem>>, %arg3: memref<128x512xf32, #tpu.memory_space<vmem>>, %arg4: memref<1x512xf32, #tpu.memory_space<vmem>>, %arg5: memref<8x512xf32, #tpu.memory_space<vmem>>, %arg6: memref<128x512xf32, #tpu.memory_space<vmem>>, %arg7: memref<1x512xf32, #tpu.memory_space<vmem>>, %arg8: memref<128x512xf32, #tpu.memory_space<vmem>>, %arg9: memref<128x512xf32, #tpu.memory_space<vmem>>, %arg10: memref<128x512xf32, #tpu.memory_space<vmem>>, %arg11: memref<1x512xf32, #tpu.memory_space<vmem>>, %arg12: memref<128x512xf32, #tpu.memory_space<vmem>>, %arg13: memref<128x512xf32, #tpu.memory_space<vmem>>, %arg14: memref<1x512xf32, #tpu.memory_space<vmem>>, %arg15: memref<128x128xf32, #tpu.memory_space<vmem>>, %arg16: memref<1x128xf32, #tpu.memory_space<vmem>>, %arg17: memref<8x128xf32, #tpu.memory_space<vmem>>, %arg18: memref<64x512xf32, #tpu.memory_space<vmem>>, %arg19: memref<64x512xf32, #tpu.memory_space<vmem>>, %arg20: memref<64x128xf32, #tpu.memory_space<vmem>>, %arg21: memref<64x128xf32, #tpu.memory_space<vmem>>) attributes {dimension_semantics = [#tpu.dimension_semantics<parallel>], iteration_bounds = array<i64: 1>, scalar_prefetch = 0 : i64, scratch_operands = 4 : i64, tpu.core_type = #tpu.core_type<tc>, window_params = [{transform_indices = @transform_0, window_bounds = array<i64: 1, 64, 8>}, {pipeline_mode = #tpu.pipeline_mode<synchronous>, transform_indices = @transform_1, window_bounds = array<i64: 8, 512>}, {pipeline_mode = #tpu.pipeline_mode<synchronous>, transform_indices = @transform_2, window_bounds = array<i64: 128, 512>}, {pipeline_mode = #tpu.pipeline_mode<synchronous>, transform_indices = @transform_3, window_bounds = array<i64: 1, 512>}, {pipeline_mode = #tpu.pipeline_mode<synchronous>, transform_indices = @transform_4, window_bounds = array<i64: 8, 512>}, {pipeline_mode = #tpu.pipeline_mode<synchronous>, transform_indices = @transform_5, window_bounds = array<i64: 128, 512>}, {pipeline_mode = #tpu.pipeline_mode<synchronous>, transform_indices = @transform_6, window_bounds = array<i64: 1, 512>}, {pipeline_mode = #tpu.pipeline_mode<synchronous>, transform_indices = @transform_7, window_bounds = array<i64: 128, 512>}, {pipeline_mode = #tpu.pipeline_mode<synchronous>, transform_indices = @transform_8, window_bounds = array<i64: 128, 512>}, {pipeline_mode = #tpu.pipeline_mode<synchronous>, transform_indices = @transform_9, window_bounds = array<i64: 128, 512>}, {pipeline_mode = #tpu.pipeline_mode<synchronous>, transform_indices = @transform_10, window_bounds = array<i64: 1, 512>}, {pipeline_mode = #tpu.pipeline_mode<synchronous>, transform_indices = @transform_11, window_bounds = array<i64: 128, 512>}, {pipeline_mode = #tpu.pipeline_mode<synchronous>, transform_indices = @transform_12, window_bounds = array<i64: 128, 512>}, {pipeline_mode = #tpu.pipeline_mode<synchronous>, transform_indices = @transform_13, window_bounds = array<i64: 1, 512>}, {pipeline_mode = #tpu.pipeline_mode<synchronous>, transform_indices = @transform_14, window_bounds = array<i64: 128, 128>}, {pipeline_mode = #tpu.pipeline_mode<synchronous>, transform_indices = @transform_15, window_bounds = array<i64: 1, 128>}, {transform_indices = @transform_16, window_bounds = array<i64: 8, 128>}]} {
    %c0 = arith.constant 0 : index
    %c0_0 = arith.constant 0 : index
    %c0_1 = arith.constant 0 : index
    %0 = vector.load %arg1[%c0, %c0_0, %c0_1] : memref<1x64x8xf32, #tpu.memory_space<vmem>>, vector<1x64x8xf32>
    %1 = vector.shape_cast %0 : vector<1x64x8xf32> to vector<64x8xf32>
    %cst = arith.constant 0.000000e+00 : f32
    %2 = vector.broadcast %cst : f32 to vector<8x128xf32>
    %c0_2 = arith.constant 0 : index
    %c0_3 = arith.constant 0 : index
    %3 = vector.load %arg2[%c0_2, %c0_3] : memref<8x512xf32, #tpu.memory_space<vmem>>, vector<8x512xf32>
    %cst_4 = arith.constant dense<0.000000e+00> : vector<64x512xf32>
    %4 = tpu.matmul %1, %3, %cst_4 {dimension_numbers = #tpu.dot_dimension_numbers<[1], [0], [0], [1], [0, 0, 1, 1], [], []>} : vector<64x8xf32>, vector<8x512xf32>, vector<64x512xf32> -> vector<64x512xf32>
    %c0_5 = arith.constant 0 : index
    %c0_6 = arith.constant 0 : index
    %5 = vector.load %arg4[%c0_5, %c0_6] : memref<1x512xf32, #tpu.memory_space<vmem>>, vector<1x512xf32>
    %6 = vector.broadcast %5 : vector<1x512xf32> to vector<64x512xf32>
    %7 = arith.addf %4, %6 : vector<64x512xf32>
    %c0_7 = arith.constant 0 : index
    %c0_8 = arith.constant 0 : index
    %8 = vector.load %arg18[%c0_7, %c0_8] : memref<64x512xf32, #tpu.memory_space<vmem>>, vector<64x512xf32>
    tpu.vector_store %arg18[%c0_7, %c0_8], %7 {strides = array<i32>} : memref<64x512xf32, #tpu.memory_space<vmem>>, vector<64x512xf32>,
    %c0_9 = arith.constant 0 : index
    %c0_10 = arith.constant 0 : index
    %9 = vector.load %arg5[%c0_9, %c0_10] : memref<8x512xf32, #tpu.memory_space<vmem>>, vector<8x512xf32>
    %cst_11 = arith.constant dense<0.000000e+00> : vector<64x512xf32>
    %10 = tpu.matmul %1, %9, %cst_11 {dimension_numbers = #tpu.dot_dimension_numbers<[1], [0], [0], [1], [0, 0, 1, 1], [], []>} : vector<64x8xf32>, vector<8x512xf32>, vector<64x512xf32> -> vector<64x512xf32>
    %c0_12 = arith.constant 0 : index
    %c0_13 = arith.constant 0 : index
    %11 = vector.load %arg7[%c0_12, %c0_13] : memref<1x512xf32, #tpu.memory_space<vmem>>, vector<1x512xf32>
    %12 = vector.broadcast %11 : vector<1x512xf32> to vector<64x512xf32>
    %13 = arith.addf %10, %12 : vector<64x512xf32>
    %c0_14 = arith.constant 0 : index
    %c0_15 = arith.constant 0 : index
    %14 = vector.load %arg19[%c0_14, %c0_15] : memref<64x512xf32, #tpu.memory_space<vmem>>, vector<64x512xf32>
    tpu.vector_store %arg19[%c0_14, %c0_15], %13 {strides = array<i32>} : memref<64x512xf32, #tpu.memory_space<vmem>>, vector<64x512xf32>,
    %c0_16 = arith.constant 0 : index
    %c0_17 = arith.constant 0 : index
    %15 = vector.load %arg3[%c0_16, %c0_17] : memref<128x512xf32, #tpu.memory_space<vmem>>, vector<128x512xf32>
    %c0_18 = arith.constant 0 : index
    %c0_19 = arith.constant 0 : index
    %16 = vector.load %arg6[%c0_18, %c0_19] : memref<128x512xf32, #tpu.memory_space<vmem>>, vector<128x512xf32>
    %c0_i32 = arith.constant 0 : i32
    %c8_i32 = arith.constant 8 : i32
    %17 = arith.muli %c0_i32, %c8_i32 : i32
    %18 = tpu.assume_multiple %17, 8 : i32
    %c7_i32 = arith.constant 7 : i32
    %19 = arith.subi %c7_i32, %c0_i32 : i32
    %c8_i32_20 = arith.constant 8 : i32
    %20 = arith.muli %19, %c8_i32_20 : i32
    %21 = tpu.assume_multiple %20, 8 : i32
    %22 = arith.index_cast %18 : i32 to index
    %c0_21 = arith.constant 0 : index
    %23 = vector.load %arg18[%22, %c0_21] : memref<64x512xf32, #tpu.memory_space<vmem>>, vector<8x512xf32>
    %cst_22 = arith.constant dense<0.000000e+00> : vector<8x512xf32>
    %24 = tpu.matmul %2, %15, %cst_22 {dimension_numbers = #tpu.dot_dimension_numbers<[1], [0], [0], [1], [0, 0, 1, 1], [], []>} : vector<8x128xf32>, vector<128x512xf32>, vector<8x512xf32> -> vector<8x512xf32>
    %25 = arith.addf %23, %24 : vector<8x512xf32>
    %26 = arith.index_cast %21 : i32 to index
    %c0_23 = arith.constant 0 : index
    %27 = vector.load %arg19[%26, %c0_23] : memref<64x512xf32, #tpu.memory_space<vmem>>, vector<8x512xf32>
    %cst_24 = arith.constant dense<0.000000e+00> : vector<8x512xf32>
    %28 = tpu.matmul %2, %16, %cst_24 {dimension_numbers = #tpu.dot_dimension_numbers<[1], [0], [0], [1], [0, 0, 1, 1], [], []>} : vector<8x128xf32>, vector<128x512xf32>, vector<8x512xf32> -> vector<8x512xf32>
    %29 = arith.addf %27, %28 : vector<8x512xf32>
    %30 = vector.extract_strided_slice %25 {offsets = [0, 0], sizes = [8, 128], strides = [1, 1]} : vector<8x512xf32> to vector<8x128xf32>
    %31 = arith.negf %30 : vector<8x128xf32>
    %32 = math.exp %31 : vector<8x128xf32>
    %cst_25 = arith.constant 1.000000e+00 : f32
    %33 = vector.broadcast %cst_25 : f32 to vector<8x128xf32>
    %34 = arith.addf %33, %32 : vector<8x128xf32>
    %35 = arith.divf %33, %34 : vector<8x128xf32>
    %36 = vector.extract_strided_slice %25 {offsets = [0, 128], sizes = [8, 128], strides = [1, 1]} : vector<8x512xf32> to vector<8x128xf32>
    %37 = arith.negf %36 : vector<8x128xf32>
    %38 = math.exp %37 : vector<8x128xf32>
    %cst_26 = arith.constant 1.000000e+00 : f32
    %39 = vector.broadcast %cst_26 : f32 to vector<8x128xf32>
    %40 = arith.addf %39, %38 : vector<8x128xf32>
    %41 = arith.divf %39, %40 : vector<8x128xf32>
    %42 = vector.extract_strided_slice %25 {offsets = [0, 256], sizes = [8, 128], strides = [1, 1]} : vector<8x512xf32> to vector<8x128xf32>
    %43 = math.tanh %42 : vector<8x128xf32>
    %44 = vector.extract_strided_slice %25 {offsets = [0, 384], sizes = [8, 128], strides = [1, 1]} : vector<8x512xf32> to vector<8x128xf32>
    %45 = arith.negf %44 : vector<8x128xf32>
    %46 = math.exp %45 : vector<8x128xf32>
    %cst_27 = arith.constant 1.000000e+00 : f32
    %47 = vector.broadcast %cst_27 : f32 to vector<8x128xf32>
    %48 = arith.addf %47, %46 : vector<8x128xf32>
    %49 = arith.divf %47, %48 : vector<8x128xf32>
    %50 = arith.mulf %41, %2 : vector<8x128xf32>
    %51 = arith.mulf %35, %43 : vector<8x128xf32>
    %52 = arith.addf %50, %51 : vector<8x128xf32>
    %53 = math.tanh %52 : vector<8x128xf32>
    %54 = arith.mulf %49, %53 : vector<8x128xf32>
    %55 = vector.extract_strided_slice %29 {offsets = [0, 0], sizes = [8, 128], strides = [1, 1]} : vector<8x512xf32> to vector<8x128xf32>
    %56 = arith.negf %55 : vector<8x128xf32>
    %57 = math.exp %56 : vector<8x128xf32>
    %cst_28 = arith.constant 1.000000e+00 : f32
    %58 = vector.broadcast %cst_28 : f32 to vector<8x128xf32>
    %59 = arith.addf %58, %57 : vector<8x128xf32>
    %60 = arith.divf %58, %59 : vector<8x128xf32>
    %61 = vector.extract_strided_slice %29 {offsets = [0, 128], sizes = [8, 128], strides = [1, 1]} : vector<8x512xf32> to vector<8x128xf32>
    %62 = arith.negf %61 : vector<8x128xf32>
    %63 = math.exp %62 : vector<8x128xf32>
    %cst_29 = arith.constant 1.000000e+00 : f32
    %64 = vector.broadcast %cst_29 : f32 to vector<8x128xf32>
    %65 = arith.addf %64, %63 : vector<8x128xf32>
    %66 = arith.divf %64, %65 : vector<8x128xf32>
    %67 = vector.extract_strided_slice %29 {offsets = [0, 256], sizes = [8, 128], strides = [1, 1]} : vector<8x512xf32> to vector<8x128xf32>
    %68 = math.tanh %67 : vector<8x128xf32>
    %69 = vector.extract_strided_slice %29 {offsets = [0, 384], sizes = [8, 128], strides = [1, 1]} : vector<8x512xf32> to vector<8x128xf32>
    %70 = arith.negf %69 : vector<8x128xf32>
    %71 = math.exp %70 : vector<8x128xf32>
    %cst_30 = arith.constant 1.000000e+00 : f32
    %72 = vector.broadcast %cst_30 : f32 to vector<8x128xf32>
    %73 = arith.addf %72, %71 : vector<8x128xf32>
    %74 = arith.divf %72, %73 : vector<8x128xf32>
    %75 = arith.mulf %66, %2 : vector<8x128xf32>
    %76 = arith.mulf %60, %68 : vector<8x128xf32>
    %77 = arith.addf %75, %76 : vector<8x128xf32>
    %78 = math.tanh %77 : vector<8x128xf32>
    %79 = arith.mulf %74, %78 : vector<8x128xf32>
    %80 = arith.index_cast %18 : i32 to index
    %c0_31 = arith.constant 0 : index
    %81 = vector.load %arg20[%80, %c0_31] : memref<64x128xf32, #tpu.memory_space<vmem>>, vector<8x128xf32>
    tpu.vector_store %arg20[%80, %c0_31], %54 {strides = array<i32>} : memref<64x128xf32, #tpu.memory_space<vmem>>, vector<8x128xf32>,
    %82 = arith.index_cast %21 : i32 to index
    %c0_32 = arith.constant 0 : index
    %83 = vector.load %arg21[%82, %c0_32] : memref<64x128xf32, #tpu.memory_space<vmem>>, vector<8x128xf32>
    tpu.vector_store %arg21[%82, %c0_32], %79 {strides = array<i32>} : memref<64x128xf32, #tpu.memory_space<vmem>>, vector<8x128xf32>,
    %c1_i32 = arith.constant 1 : i32
    %c8_i32_33 = arith.constant 8 : i32
    %84 = arith.muli %c1_i32, %c8_i32_33 : i32
    %85 = tpu.assume_multiple %84, 8 : i32
    %c7_i32_34 = arith.constant 7 : i32
    %86 = arith.subi %c7_i32_34, %c1_i32 : i32
    %c8_i32_35 = arith.constant 8 : i32
    %87 = arith.muli %86, %c8_i32_35 : i32
    %88 = tpu.assume_multiple %87, 8 : i32
    %89 = arith.index_cast %85 : i32 to index
    %c0_36 = arith.constant 0 : index
    %90 = vector.load %arg18[%89, %c0_36] : memref<64x512xf32, #tpu.memory_space<vmem>>, vector<8x512xf32>
    %cst_37 = arith.constant dense<0.000000e+00> : vector<8x512xf32>
    %91 = tpu.matmul %54, %15, %cst_37 {dimension_numbers = #tpu.dot_dimension_numbers<[1], [0], [0], [1], [0, 0, 1, 1], [], []>} : vector<8x128xf32>, vector<128x512xf32>, vector<8x512xf32> -> vector<8x512xf32>
    %92 = arith.addf %90, %91 : vector<8x512xf32>
    %93 = arith.index_cast %88 : i32 to index
    %c0_38 = arith.constant 0 : index
    %94 = vector.load %arg19[%93, %c0_38] : memref<64x512xf32, #tpu.memory_space<vmem>>, vector<8x512xf32>
    %cst_39 = arith.constant dense<0.000000e+00> : vector<8x512xf32>
    %95 = tpu.matmul %79, %16, %cst_39 {dimension_numbers = #tpu.dot_dimension_numbers<[1], [0], [0], [1], [0, 0, 1, 1], [], []>} : vector<8x128xf32>, vector<128x512xf32>, vector<8x512xf32> -> vector<8x512xf32>
    %96 = arith.addf %94, %95 : vector<8x512xf32>
    %97 = vector.extract_strided_slice %92 {offsets = [0, 0], sizes = [8, 128], strides = [1, 1]} : vector<8x512xf32> to vector<8x128xf32>
    %98 = arith.negf %97 : vector<8x128xf32>
    %99 = math.exp %98 : vector<8x128xf32>
    %cst_40 = arith.constant 1.000000e+00 : f32
    %100 = vector.broadcast %cst_40 : f32 to vector<8x128xf32>
    %101 = arith.addf %100, %99 : vector<8x128xf32>
    %102 = arith.divf %100, %101 : vector<8x128xf32>
    %103 = vector.extract_strided_slice %92 {offsets = [0, 128], sizes = [8, 128], strides = [1, 1]} : vector<8x512xf32> to vector<8x128xf32>
    %104 = arith.negf %103 : vector<8x128xf32>
    %105 = math.exp %104 : vector<8x128xf32>
    %cst_41 = arith.constant 1.000000e+00 : f32
    %106 = vector.broadcast %cst_41 : f32 to vector<8x128xf32>
    %107 = arith.addf %106, %105 : vector<8x128xf32>
    %108 = arith.divf %106, %107 : vector<8x128xf32>
    %109 = vector.extract_strided_slice %92 {offsets = [0, 256], sizes = [8, 128], strides = [1, 1]} : vector<8x512xf32> to vector<8x128xf32>
    %110 = math.tanh %109 : vector<8x128xf32>
    %111 = vector.extract_strided_slice %92 {offsets = [0, 384], sizes = [8, 128], strides = [1, 1]} : vector<8x512xf32> to vector<8x128xf32>
    %112 = arith.negf %111 : vector<8x128xf32>
    %113 = math.exp %112 : vector<8x128xf32>
    %cst_42 = arith.constant 1.000000e+00 : f32
    %114 = vector.broadcast %cst_42 : f32 to vector<8x128xf32>
    %115 = arith.addf %114, %113 : vector<8x128xf32>
    %116 = arith.divf %114, %115 : vector<8x128xf32>
    %117 = arith.mulf %108, %52 : vector<8x128xf32>
    %118 = arith.mulf %102, %110 : vector<8x128xf32>
    %119 = arith.addf %117, %118 : vector<8x128xf32>
    %120 = math.tanh %119 : vector<8x128xf32>
    %121 = arith.mulf %116, %120 : vector<8x128xf32>
    %122 = vector.extract_strided_slice %96 {offsets = [0, 0], sizes = [8, 128], strides = [1, 1]} : vector<8x512xf32> to vector<8x128xf32>
    %123 = arith.negf %122 : vector<8x128xf32>
    %124 = math.exp %123 : vector<8x128xf32>
    %cst_43 = arith.constant 1.000000e+00 : f32
    %125 = vector.broadcast %cst_43 : f32 to vector<8x128xf32>
    %126 = arith.addf %125, %124 : vector<8x128xf32>
    %127 = arith.divf %125, %126 : vector<8x128xf32>
    %128 = vector.extract_strided_slice %96 {offsets = [0, 128], sizes = [8, 128], strides = [1, 1]} : vector<8x512xf32> to vector<8x128xf32>
    %129 = arith.negf %128 : vector<8x128xf32>
    %130 = math.exp %129 : vector<8x128xf32>
    %cst_44 = arith.constant 1.000000e+00 : f32
    %131 = vector.broadcast %cst_44 : f32 to vector<8x128xf32>
    %132 = arith.addf %131, %130 : vector<8x128xf32>
    %133 = arith.divf %131, %132 : vector<8x128xf32>
    %134 = vector.extract_strided_slice %96 {offsets = [0, 256], sizes = [8, 128], strides = [1, 1]} : vector<8x512xf32> to vector<8x128xf32>
    %135 = math.tanh %134 : vector<8x128xf32>
    %136 = vector.extract_strided_slice %96 {offsets = [0, 384], sizes = [8, 128], strides = [1, 1]} : vector<8x512xf32> to vector<8x128xf32>
    %137 = arith.negf %136 : vector<8x128xf32>
    %138 = math.exp %137 : vector<8x128xf32>
    %cst_45 = arith.constant 1.000000e+00 : f32
    %139 = vector.broadcast %cst_45 : f32 to vector<8x128xf32>
    %140 = arith.addf %139, %138 : vector<8x128xf32>
    %141 = arith.divf %139, %140 : vector<8x128xf32>
    %142 = arith.mulf %133, %77 : vector<8x128xf32>
    %143 = arith.mulf %127, %135 : vector<8x128xf32>
    %144 = arith.addf %142, %143 : vector<8x128xf32>
    %145 = math.tanh %144 : vector<8x128xf32>
    %146 = arith.mulf %141, %145 : vector<8x128xf32>
    %147 = arith.index_cast %85 : i32 to index
    %c0_46 = arith.constant 0 : index
    %148 = vector.load %arg20[%147, %c0_46] : memref<64x128xf32, #tpu.memory_space<vmem>>, vector<8x128xf32>
    tpu.vector_store %arg20[%147, %c0_46], %121 {strides = array<i32>} : memref<64x128xf32, #tpu.memory_space<vmem>>, vector<8x128xf32>,
    %149 = arith.index_cast %88 : i32 to index
    %c0_47 = arith.constant 0 : index
    %150 = vector.load %arg21[%149, %c0_47] : memref<64x128xf32, #tpu.memory_space<vmem>>, vector<8x128xf32>
    tpu.vector_store %arg21[%149, %c0_47], %146 {strides = array<i32>} : memref<64x128xf32, #tpu.memory_space<vmem>>, vector<8x128xf32>,
    %c2_i32 = arith.constant 2 : i32
    %c8_i32_48 = arith.constant 8 : i32
    %151 = arith.muli %c2_i32, %c8_i32_48 : i32
    %152 = tpu.assume_multiple %151, 8 : i32
    %c7_i32_49 = arith.constant 7 : i32
    %153 = arith.subi %c7_i32_49, %c2_i32 : i32
    %c8_i32_50 = arith.constant 8 : i32
    %154 = arith.muli %153, %c8_i32_50 : i32
    %155 = tpu.assume_multiple %154, 8 : i32
    %156 = arith.index_cast %152 : i32 to index
    %c0_51 = arith.constant 0 : index
    %157 = vector.load %arg18[%156, %c0_51] : memref<64x512xf32, #tpu.memory_space<vmem>>, vector<8x512xf32>
    %cst_52 = arith.constant dense<0.000000e+00> : vector<8x512xf32>
    %158 = tpu.matmul %121, %15, %cst_52 {dimension_numbers = #tpu.dot_dimension_numbers<[1], [0], [0], [1], [0, 0, 1, 1], [], []>} : vector<8x128xf32>, vector<128x512xf32>, vector<8x512xf32> -> vector<8x512xf32>
    %159 = arith.addf %157, %158 : vector<8x512xf32>
    %160 = arith.index_cast %155 : i32 to index
    %c0_53 = arith.constant 0 : index
    %161 = vector.load %arg19[%160, %c0_53] : memref<64x512xf32, #tpu.memory_space<vmem>>, vector<8x512xf32>
    %cst_54 = arith.constant dense<0.000000e+00> : vector<8x512xf32>
    %162 = tpu.matmul %146, %16, %cst_54 {dimension_numbers = #tpu.dot_dimension_numbers<[1], [0], [0], [1], [0, 0, 1, 1], [], []>} : vector<8x128xf32>, vector<128x512xf32>, vector<8x512xf32> -> vector<8x512xf32>
    %163 = arith.addf %161, %162 : vector<8x512xf32>
    %164 = vector.extract_strided_slice %159 {offsets = [0, 0], sizes = [8, 128], strides = [1, 1]} : vector<8x512xf32> to vector<8x128xf32>
    %165 = arith.negf %164 : vector<8x128xf32>
    %166 = math.exp %165 : vector<8x128xf32>
    %cst_55 = arith.constant 1.000000e+00 : f32
    %167 = vector.broadcast %cst_55 : f32 to vector<8x128xf32>
    %168 = arith.addf %167, %166 : vector<8x128xf32>
    %169 = arith.divf %167, %168 : vector<8x128xf32>
    %170 = vector.extract_strided_slice %159 {offsets = [0, 128], sizes = [8, 128], strides = [1, 1]} : vector<8x512xf32> to vector<8x128xf32>
    %171 = arith.negf %170 : vector<8x128xf32>
    %172 = math.exp %171 : vector<8x128xf32>
    %cst_56 = arith.constant 1.000000e+00 : f32
    %173 = vector.broadcast %cst_56 : f32 to vector<8x128xf32>
    %174 = arith.addf %173, %172 : vector<8x128xf32>
    %175 = arith.divf %173, %174 : vector<8x128xf32>
    %176 = vector.extract_strided_slice %159 {offsets = [0, 256], sizes = [8, 128], strides = [1, 1]} : vector<8x512xf32> to vector<8x128xf32>
    %177 = math.tanh %176 : vector<8x128xf32>
    %178 = vector.extract_strided_slice %159 {offsets = [0, 384], sizes = [8, 128], strides = [1, 1]} : vector<8x512xf32> to vector<8x128xf32>
    %179 = arith.negf %178 : vector<8x128xf32>
    %180 = math.exp %179 : vector<8x128xf32>
    %cst_57 = arith.constant 1.000000e+00 : f32
    %181 = vector.broadcast %cst_57 : f32 to vector<8x128xf32>
    %182 = arith.addf %181, %180 : vector<8x128xf32>
    %183 = arith.divf %181, %182 : vector<8x128xf32>
    %184 = arith.mulf %175, %119 : vector<8x128xf32>
    %185 = arith.mulf %169, %177 : vector<8x128xf32>
    %186 = arith.addf %184, %185 : vector<8x128xf32>
    %187 = math.tanh %186 : vector<8x128xf32>
    %188 = arith.mulf %183, %187 : vector<8x128xf32>
    %189 = vector.extract_strided_slice %163 {offsets = [0, 0], sizes = [8, 128], strides = [1, 1]} : vector<8x512xf32> to vector<8x128xf32>
    %190 = arith.negf %189 : vector<8x128xf32>
    %191 = math.exp %190 : vector<8x128xf32>
    %cst_58 = arith.constant 1.000000e+00 : f32
    %192 = vector.broadcast %cst_58 : f32 to vector<8x128xf32>
    %193 = arith.addf %192, %191 : vector<8x128xf32>
    %194 = arith.divf %192, %193 : vector<8x128xf32>
    %195 = vector.extract_strided_slice %163 {offsets = [0, 128], sizes = [8, 128], strides = [1, 1]} : vector<8x512xf32> to vector<8x128xf32>
    %196 = arith.negf %195 : vector<8x128xf32>
    %197 = math.exp %196 : vector<8x128xf32>
    %cst_59 = arith.constant 1.000000e+00 : f32
    %198 = vector.broadcast %cst_59 : f32 to vector<8x128xf32>
    %199 = arith.addf %198, %197 : vector<8x128xf32>
    %200 = arith.divf %198, %199 : vector<8x128xf32>
    %201 = vector.extract_strided_slice %163 {offsets = [0, 256], sizes = [8, 128], strides = [1, 1]} : vector<8x512xf32> to vector<8x128xf32>
    %202 = math.tanh %201 : vector<8x128xf32>
    %203 = vector.extract_strided_slice %163 {offsets = [0, 384], sizes = [8, 128], strides = [1, 1]} : vector<8x512xf32> to vector<8x128xf32>
    %204 = arith.negf %203 : vector<8x128xf32>
    %205 = math.exp %204 : vector<8x128xf32>
    %cst_60 = arith.constant 1.000000e+00 : f32
    %206 = vector.broadcast %cst_60 : f32 to vector<8x128xf32>
    %207 = arith.addf %206, %205 : vector<8x128xf32>
    %208 = arith.divf %206, %207 : vector<8x128xf32>
    %209 = arith.mulf %200, %144 : vector<8x128xf32>
    %210 = arith.mulf %194, %202 : vector<8x128xf32>
    %211 = arith.addf %209, %210 : vector<8x128xf32>
    %212 = math.tanh %211 : vector<8x128xf32>
    %213 = arith.mulf %208, %212 : vector<8x128xf32>
    %214 = arith.index_cast %152 : i32 to index
    %c0_61 = arith.constant 0 : index
    %215 = vector.load %arg20[%214, %c0_61] : memref<64x128xf32, #tpu.memory_space<vmem>>, vector<8x128xf32>
    tpu.vector_store %arg20[%214, %c0_61], %188 {strides = array<i32>} : memref<64x128xf32, #tpu.memory_space<vmem>>, vector<8x128xf32>,
    %216 = arith.index_cast %155 : i32 to index
    %c0_62 = arith.constant 0 : index
    %217 = vector.load %arg21[%216, %c0_62] : memref<64x128xf32, #tpu.memory_space<vmem>>, vector<8x128xf32>
    tpu.vector_store %arg21[%216, %c0_62], %213 {strides = array<i32>} : memref<64x128xf32, #tpu.memory_space<vmem>>, vector<8x128xf32>,
    %c3_i32 = arith.constant 3 : i32
    %c8_i32_63 = arith.constant 8 : i32
    %218 = arith.muli %c3_i32, %c8_i32_63 : i32
    %219 = tpu.assume_multiple %218, 8 : i32
    %c7_i32_64 = arith.constant 7 : i32
    %220 = arith.subi %c7_i32_64, %c3_i32 : i32
    %c8_i32_65 = arith.constant 8 : i32
    %221 = arith.muli %220, %c8_i32_65 : i32
    %222 = tpu.assume_multiple %221, 8 : i32
    %223 = arith.index_cast %219 : i32 to index
    %c0_66 = arith.constant 0 : index
    %224 = vector.load %arg18[%223, %c0_66] : memref<64x512xf32, #tpu.memory_space<vmem>>, vector<8x512xf32>
    %cst_67 = arith.constant dense<0.000000e+00> : vector<8x512xf32>
    %225 = tpu.matmul %188, %15, %cst_67 {dimension_numbers = #tpu.dot_dimension_numbers<[1], [0], [0], [1], [0, 0, 1, 1], [], []>} : vector<8x128xf32>, vector<128x512xf32>, vector<8x512xf32> -> vector<8x512xf32>
    %226 = arith.addf %224, %225 : vector<8x512xf32>
    %227 = arith.index_cast %222 : i32 to index
    %c0_68 = arith.constant 0 : index
    %228 = vector.load %arg19[%227, %c0_68] : memref<64x512xf32, #tpu.memory_space<vmem>>, vector<8x512xf32>
    %cst_69 = arith.constant dense<0.000000e+00> : vector<8x512xf32>
    %229 = tpu.matmul %213, %16, %cst_69 {dimension_numbers = #tpu.dot_dimension_numbers<[1], [0], [0], [1], [0, 0, 1, 1], [], []>} : vector<8x128xf32>, vector<128x512xf32>, vector<8x512xf32> -> vector<8x512xf32>
    %230 = arith.addf %228, %229 : vector<8x512xf32>
    %231 = vector.extract_strided_slice %226 {offsets = [0, 0], sizes = [8, 128], strides = [1, 1]} : vector<8x512xf32> to vector<8x128xf32>
    %232 = arith.negf %231 : vector<8x128xf32>
    %233 = math.exp %232 : vector<8x128xf32>
    %cst_70 = arith.constant 1.000000e+00 : f32
    %234 = vector.broadcast %cst_70 : f32 to vector<8x128xf32>
    %235 = arith.addf %234, %233 : vector<8x128xf32>
    %236 = arith.divf %234, %235 : vector<8x128xf32>
    %237 = vector.extract_strided_slice %226 {offsets = [0, 128], sizes = [8, 128], strides = [1, 1]} : vector<8x512xf32> to vector<8x128xf32>
    %238 = arith.negf %237 : vector<8x128xf32>
    %239 = math.exp %238 : vector<8x128xf32>
    %cst_71 = arith.constant 1.000000e+00 : f32
    %240 = vector.broadcast %cst_71 : f32 to vector<8x128xf32>
    %241 = arith.addf %240, %239 : vector<8x128xf32>
    %242 = arith.divf %240, %241 : vector<8x128xf32>
    %243 = vector.extract_strided_slice %226 {offsets = [0, 256], sizes = [8, 128], strides = [1, 1]} : vector<8x512xf32> to vector<8x128xf32>
    %244 = math.tanh %243 : vector<8x128xf32>
    %245 = vector.extract_strided_slice %226 {offsets = [0, 384], sizes = [8, 128], strides = [1, 1]} : vector<8x512xf32> to vector<8x128xf32>
    %246 = arith.negf %245 : vector<8x128xf32>
    %247 = math.exp %246 : vector<8x128xf32>
    %cst_72 = arith.constant 1.000000e+00 : f32
    %248 = vector.broadcast %cst_72 : f32 to vector<8x128xf32>
    %249 = arith.addf %248, %247 : vector<8x128xf32>
    %250 = arith.divf %248, %249 : vector<8x128xf32>
    %251 = arith.mulf %242, %186 : vector<8x128xf32>
    %252 = arith.mulf %236, %244 : vector<8x128xf32>
    %253 = arith.addf %251, %252 : vector<8x128xf32>
    %254 = math.tanh %253 : vector<8x128xf32>
    %255 = arith.mulf %250, %254 : vector<8x128xf32>
    %256 = vector.extract_strided_slice %230 {offsets = [0, 0], sizes = [8, 128], strides = [1, 1]} : vector<8x512xf32> to vector<8x128xf32>
    %257 = arith.negf %256 : vector<8x128xf32>
    %258 = math.exp %257 : vector<8x128xf32>
    %cst_73 = arith.constant 1.000000e+00 : f32
    %259 = vector.broadcast %cst_73 : f32 to vector<8x128xf32>
    %260 = arith.addf %259, %258 : vector<8x128xf32>
    %261 = arith.divf %259, %260 : vector<8x128xf32>
    %262 = vector.extract_strided_slice %230 {offsets = [0, 128], sizes = [8, 128], strides = [1, 1]} : vector<8x512xf32> to vector<8x128xf32>
    %263 = arith.negf %262 : vector<8x128xf32>
    %264 = math.exp %263 : vector<8x128xf32>
    %cst_74 = arith.constant 1.000000e+00 : f32
    %265 = vector.broadcast %cst_74 : f32 to vector<8x128xf32>
    %266 = arith.addf %265, %264 : vector<8x128xf32>
    %267 = arith.divf %265, %266 : vector<8x128xf32>
    %268 = vector.extract_strided_slice %230 {offsets = [0, 256], sizes = [8, 128], strides = [1, 1]} : vector<8x512xf32> to vector<8x128xf32>
    %269 = math.tanh %268 : vector<8x128xf32>
    %270 = vector.extract_strided_slice %230 {offsets = [0, 384], sizes = [8, 128], strides = [1, 1]} : vector<8x512xf32> to vector<8x128xf32>
    %271 = arith.negf %270 : vector<8x128xf32>
    %272 = math.exp %271 : vector<8x128xf32>
    %cst_75 = arith.constant 1.000000e+00 : f32
    %273 = vector.broadcast %cst_75 : f32 to vector<8x128xf32>
    %274 = arith.addf %273, %272 : vector<8x128xf32>
    %275 = arith.divf %273, %274 : vector<8x128xf32>
    %276 = arith.mulf %267, %211 : vector<8x128xf32>
    %277 = arith.mulf %261, %269 : vector<8x128xf32>
    %278 = arith.addf %276, %277 : vector<8x128xf32>
    %279 = math.tanh %278 : vector<8x128xf32>
    %280 = arith.mulf %275, %279 : vector<8x128xf32>
    %281 = arith.index_cast %219 : i32 to index
    %c0_76 = arith.constant 0 : index
    %282 = vector.load %arg20[%281, %c0_76] : memref<64x128xf32, #tpu.memory_space<vmem>>, vector<8x128xf32>
    tpu.vector_store %arg20[%281, %c0_76], %255 {strides = array<i32>} : memref<64x128xf32, #tpu.memory_space<vmem>>, vector<8x128xf32>,
    %283 = arith.index_cast %222 : i32 to index
    %c0_77 = arith.constant 0 : index
    %284 = vector.load %arg21[%283, %c0_77] : memref<64x128xf32, #tpu.memory_space<vmem>>, vector<8x128xf32>
    tpu.vector_store %arg21[%283, %c0_77], %280 {strides = array<i32>} : memref<64x128xf32, #tpu.memory_space<vmem>>, vector<8x128xf32>,
    %c4_i32 = arith.constant 4 : i32
    %c8_i32_78 = arith.constant 8 : i32
    %285 = arith.muli %c4_i32, %c8_i32_78 : i32
    %286 = tpu.assume_multiple %285, 8 : i32
    %c7_i32_79 = arith.constant 7 : i32
    %287 = arith.subi %c7_i32_79, %c4_i32 : i32
    %c8_i32_80 = arith.constant 8 : i32
    %288 = arith.muli %287, %c8_i32_80 : i32
    %289 = tpu.assume_multiple %288, 8 : i32
    %290 = arith.index_cast %286 : i32 to index
    %c0_81 = arith.constant 0 : index
    %291 = vector.load %arg18[%290, %c0_81] : memref<64x512xf32, #tpu.memory_space<vmem>>, vector<8x512xf32>
    %cst_82 = arith.constant dense<0.000000e+00> : vector<8x512xf32>
    %292 = tpu.matmul %255, %15, %cst_82 {dimension_numbers = #tpu.dot_dimension_numbers<[1], [0], [0], [1], [0, 0, 1, 1], [], []>} : vector<8x128xf32>, vector<128x512xf32>, vector<8x512xf32> -> vector<8x512xf32>
    %293 = arith.addf %291, %292 : vector<8x512xf32>
    %294 = arith.index_cast %289 : i32 to index
    %c0_83 = arith.constant 0 : index
    %295 = vector.load %arg19[%294, %c0_83] : memref<64x512xf32, #tpu.memory_space<vmem>>, vector<8x512xf32>
    %cst_84 = arith.constant dense<0.000000e+00> : vector<8x512xf32>
    %296 = tpu.matmul %280, %16, %cst_84 {dimension_numbers = #tpu.dot_dimension_numbers<[1], [0], [0], [1], [0, 0, 1, 1], [], []>} : vector<8x128xf32>, vector<128x512xf32>, vector<8x512xf32> -> vector<8x512xf32>
    %297 = arith.addf %295, %296 : vector<8x512xf32>
    %298 = vector.extract_strided_slice %293 {offsets = [0, 0], sizes = [8, 128], strides = [1, 1]} : vector<8x512xf32> to vector<8x128xf32>
    %299 = arith.negf %298 : vector<8x128xf32>
    %300 = math.exp %299 : vector<8x128xf32>
    %cst_85 = arith.constant 1.000000e+00 : f32
    %301 = vector.broadcast %cst_85 : f32 to vector<8x128xf32>
    %302 = arith.addf %301, %300 : vector<8x128xf32>
    %303 = arith.divf %301, %302 : vector<8x128xf32>
    %304 = vector.extract_strided_slice %293 {offsets = [0, 128], sizes = [8, 128], strides = [1, 1]} : vector<8x512xf32> to vector<8x128xf32>
    %305 = arith.negf %304 : vector<8x128xf32>
    %306 = math.exp %305 : vector<8x128xf32>
    %cst_86 = arith.constant 1.000000e+00 : f32
    %307 = vector.broadcast %cst_86 : f32 to vector<8x128xf32>
    %308 = arith.addf %307, %306 : vector<8x128xf32>
    %309 = arith.divf %307, %308 : vector<8x128xf32>
    %310 = vector.extract_strided_slice %293 {offsets = [0, 256], sizes = [8, 128], strides = [1, 1]} : vector<8x512xf32> to vector<8x128xf32>
    %311 = math.tanh %310 : vector<8x128xf32>
    %312 = vector.extract_strided_slice %293 {offsets = [0, 384], sizes = [8, 128], strides = [1, 1]} : vector<8x512xf32> to vector<8x128xf32>
    %313 = arith.negf %312 : vector<8x128xf32>
    %314 = math.exp %313 : vector<8x128xf32>
    %cst_87 = arith.constant 1.000000e+00 : f32
    %315 = vector.broadcast %cst_87 : f32 to vector<8x128xf32>
    %316 = arith.addf %315, %314 : vector<8x128xf32>
    %317 = arith.divf %315, %316 : vector<8x128xf32>
    %318 = arith.mulf %309, %253 : vector<8x128xf32>
    %319 = arith.mulf %303, %311 : vector<8x128xf32>
    %320 = arith.addf %318, %319 : vector<8x128xf32>
    %321 = math.tanh %320 : vector<8x128xf32>
    %322 = arith.mulf %317, %321 : vector<8x128xf32>
    %323 = vector.extract_strided_slice %297 {offsets = [0, 0], sizes = [8, 128], strides = [1, 1]} : vector<8x512xf32> to vector<8x128xf32>
    %324 = arith.negf %323 : vector<8x128xf32>
    %325 = math.exp %324 : vector<8x128xf32>
    %cst_88 = arith.constant 1.000000e+00 : f32
    %326 = vector.broadcast %cst_88 : f32 to vector<8x128xf32>
    %327 = arith.addf %326, %325 : vector<8x128xf32>
    %328 = arith.divf %326, %327 : vector<8x128xf32>
    %329 = vector.extract_strided_slice %297 {offsets = [0, 128], sizes = [8, 128], strides = [1, 1]} : vector<8x512xf32> to vector<8x128xf32>
    %330 = arith.negf %329 : vector<8x128xf32>
    %331 = math.exp %330 : vector<8x128xf32>
    %cst_89 = arith.constant 1.000000e+00 : f32
    %332 = vector.broadcast %cst_89 : f32 to vector<8x128xf32>
    %333 = arith.addf %332, %331 : vector<8x128xf32>
    %334 = arith.divf %332, %333 : vector<8x128xf32>
    %335 = vector.extract_strided_slice %297 {offsets = [0, 256], sizes = [8, 128], strides = [1, 1]} : vector<8x512xf32> to vector<8x128xf32>
    %336 = math.tanh %335 : vector<8x128xf32>
    %337 = vector.extract_strided_slice %297 {offsets = [0, 384], sizes = [8, 128], strides = [1, 1]} : vector<8x512xf32> to vector<8x128xf32>
    %338 = arith.negf %337 : vector<8x128xf32>
    %339 = math.exp %338 : vector<8x128xf32>
    %cst_90 = arith.constant 1.000000e+00 : f32
    %340 = vector.broadcast %cst_90 : f32 to vector<8x128xf32>
    %341 = arith.addf %340, %339 : vector<8x128xf32>
    %342 = arith.divf %340, %341 : vector<8x128xf32>
    %343 = arith.mulf %334, %278 : vector<8x128xf32>
    %344 = arith.mulf %328, %336 : vector<8x128xf32>
    %345 = arith.addf %343, %344 : vector<8x128xf32>
    %346 = math.tanh %345 : vector<8x128xf32>
    %347 = arith.mulf %342, %346 : vector<8x128xf32>
    %348 = arith.index_cast %286 : i32 to index
    %c0_91 = arith.constant 0 : index
    %349 = vector.load %arg20[%348, %c0_91] : memref<64x128xf32, #tpu.memory_space<vmem>>, vector<8x128xf32>
    tpu.vector_store %arg20[%348, %c0_91], %322 {strides = array<i32>} : memref<64x128xf32, #tpu.memory_space<vmem>>, vector<8x128xf32>,
    %350 = arith.index_cast %289 : i32 to index
    %c0_92 = arith.constant 0 : index
    %351 = vector.load %arg21[%350, %c0_92] : memref<64x128xf32, #tpu.memory_space<vmem>>, vector<8x128xf32>
    tpu.vector_store %arg21[%350, %c0_92], %347 {strides = array<i32>} : memref<64x128xf32, #tpu.memory_space<vmem>>, vector<8x128xf32>,
    %c5_i32 = arith.constant 5 : i32
    %c8_i32_93 = arith.constant 8 : i32
    %352 = arith.muli %c5_i32, %c8_i32_93 : i32
    %353 = tpu.assume_multiple %352, 8 : i32
    %c7_i32_94 = arith.constant 7 : i32
    %354 = arith.subi %c7_i32_94, %c5_i32 : i32
    %c8_i32_95 = arith.constant 8 : i32
    %355 = arith.muli %354, %c8_i32_95 : i32
    %356 = tpu.assume_multiple %355, 8 : i32
    %357 = arith.index_cast %353 : i32 to index
    %c0_96 = arith.constant 0 : index
    %358 = vector.load %arg18[%357, %c0_96] : memref<64x512xf32, #tpu.memory_space<vmem>>, vector<8x512xf32>
    %cst_97 = arith.constant dense<0.000000e+00> : vector<8x512xf32>
    %359 = tpu.matmul %322, %15, %cst_97 {dimension_numbers = #tpu.dot_dimension_numbers<[1], [0], [0], [1], [0, 0, 1, 1], [], []>} : vector<8x128xf32>, vector<128x512xf32>, vector<8x512xf32> -> vector<8x512xf32>
    %360 = arith.addf %358, %359 : vector<8x512xf32>
    %361 = arith.index_cast %356 : i32 to index
    %c0_98 = arith.constant 0 : index
    %362 = vector.load %arg19[%361, %c0_98] : memref<64x512xf32, #tpu.memory_space<vmem>>, vector<8x512xf32>
    %cst_99 = arith.constant dense<0.000000e+00> : vector<8x512xf32>
    %363 = tpu.matmul %347, %16, %cst_99 {dimension_numbers = #tpu.dot_dimension_numbers<[1], [0], [0], [1], [0, 0, 1, 1], [], []>} : vector<8x128xf32>, vector<128x512xf32>, vector<8x512xf32> -> vector<8x512xf32>
    %364 = arith.addf %362, %363 : vector<8x512xf32>
    %365 = vector.extract_strided_slice %360 {offsets = [0, 0], sizes = [8, 128], strides = [1, 1]} : vector<8x512xf32> to vector<8x128xf32>
    %366 = arith.negf %365 : vector<8x128xf32>
    %367 = math.exp %366 : vector<8x128xf32>
    %cst_100 = arith.constant 1.000000e+00 : f32
    %368 = vector.broadcast %cst_100 : f32 to vector<8x128xf32>
    %369 = arith.addf %368, %367 : vector<8x128xf32>
    %370 = arith.divf %368, %369 : vector<8x128xf32>
    %371 = vector.extract_strided_slice %360 {offsets = [0, 128], sizes = [8, 128], strides = [1, 1]} : vector<8x512xf32> to vector<8x128xf32>
    %372 = arith.negf %371 : vector<8x128xf32>
    %373 = math.exp %372 : vector<8x128xf32>
    %cst_101 = arith.constant 1.000000e+00 : f32
    %374 = vector.broadcast %cst_101 : f32 to vector<8x128xf32>
    %375 = arith.addf %374, %373 : vector<8x128xf32>
    %376 = arith.divf %374, %375 : vector<8x128xf32>
    %377 = vector.extract_strided_slice %360 {offsets = [0, 256], sizes = [8, 128], strides = [1, 1]} : vector<8x512xf32> to vector<8x128xf32>
    %378 = math.tanh %377 : vector<8x128xf32>
    %379 = vector.extract_strided_slice %360 {offsets = [0, 384], sizes = [8, 128], strides = [1, 1]} : vector<8x512xf32> to vector<8x128xf32>
    %380 = arith.negf %379 : vector<8x128xf32>
    %381 = math.exp %380 : vector<8x128xf32>
    %cst_102 = arith.constant 1.000000e+00 : f32
    %382 = vector.broadcast %cst_102 : f32 to vector<8x128xf32>
    %383 = arith.addf %382, %381 : vector<8x128xf32>
    %384 = arith.divf %382, %383 : vector<8x128xf32>
    %385 = arith.mulf %376, %320 : vector<8x128xf32>
    %386 = arith.mulf %370, %378 : vector<8x128xf32>
    %387 = arith.addf %385, %386 : vector<8x128xf32>
    %388 = math.tanh %387 : vector<8x128xf32>
    %389 = arith.mulf %384, %388 : vector<8x128xf32>
    %390 = vector.extract_strided_slice %364 {offsets = [0, 0], sizes = [8, 128], strides = [1, 1]} : vector<8x512xf32> to vector<8x128xf32>
    %391 = arith.negf %390 : vector<8x128xf32>
    %392 = math.exp %391 : vector<8x128xf32>
    %cst_103 = arith.constant 1.000000e+00 : f32
    %393 = vector.broadcast %cst_103 : f32 to vector<8x128xf32>
    %394 = arith.addf %393, %392 : vector<8x128xf32>
    %395 = arith.divf %393, %394 : vector<8x128xf32>
    %396 = vector.extract_strided_slice %364 {offsets = [0, 128], sizes = [8, 128], strides = [1, 1]} : vector<8x512xf32> to vector<8x128xf32>
    %397 = arith.negf %396 : vector<8x128xf32>
    %398 = math.exp %397 : vector<8x128xf32>
    %cst_104 = arith.constant 1.000000e+00 : f32
    %399 = vector.broadcast %cst_104 : f32 to vector<8x128xf32>
    %400 = arith.addf %399, %398 : vector<8x128xf32>
    %401 = arith.divf %399, %400 : vector<8x128xf32>
    %402 = vector.extract_strided_slice %364 {offsets = [0, 256], sizes = [8, 128], strides = [1, 1]} : vector<8x512xf32> to vector<8x128xf32>
    %403 = math.tanh %402 : vector<8x128xf32>
    %404 = vector.extract_strided_slice %364 {offsets = [0, 384], sizes = [8, 128], strides = [1, 1]} : vector<8x512xf32> to vector<8x128xf32>
    %405 = arith.negf %404 : vector<8x128xf32>
    %406 = math.exp %405 : vector<8x128xf32>
    %cst_105 = arith.constant 1.000000e+00 : f32
    %407 = vector.broadcast %cst_105 : f32 to vector<8x128xf32>
    %408 = arith.addf %407, %406 : vector<8x128xf32>
    %409 = arith.divf %407, %408 : vector<8x128xf32>
    %410 = arith.mulf %401, %345 : vector<8x128xf32>
    %411 = arith.mulf %395, %403 : vector<8x128xf32>
    %412 = arith.addf %410, %411 : vector<8x128xf32>
    %413 = math.tanh %412 : vector<8x128xf32>
    %414 = arith.mulf %409, %413 : vector<8x128xf32>
    %415 = arith.index_cast %353 : i32 to index
    %c0_106 = arith.constant 0 : index
    %416 = vector.load %arg20[%415, %c0_106] : memref<64x128xf32, #tpu.memory_space<vmem>>, vector<8x128xf32>
    tpu.vector_store %arg20[%415, %c0_106], %389 {strides = array<i32>} : memref<64x128xf32, #tpu.memory_space<vmem>>, vector<8x128xf32>,
    %417 = arith.index_cast %356 : i32 to index
    %c0_107 = arith.constant 0 : index
    %418 = vector.load %arg21[%417, %c0_107] : memref<64x128xf32, #tpu.memory_space<vmem>>, vector<8x128xf32>
    tpu.vector_store %arg21[%417, %c0_107], %414 {strides = array<i32>} : memref<64x128xf32, #tpu.memory_space<vmem>>, vector<8x128xf32>,
    %c6_i32 = arith.constant 6 : i32
    %c8_i32_108 = arith.constant 8 : i32
    %419 = arith.muli %c6_i32, %c8_i32_108 : i32
    %420 = tpu.assume_multiple %419, 8 : i32
    %c7_i32_109 = arith.constant 7 : i32
    %421 = arith.subi %c7_i32_109, %c6_i32 : i32
    %c8_i32_110 = arith.constant 8 : i32
    %422 = arith.muli %421, %c8_i32_110 : i32
    %423 = tpu.assume_multiple %422, 8 : i32
    %424 = arith.index_cast %420 : i32 to index
    %c0_111 = arith.constant 0 : index
    %425 = vector.load %arg18[%424, %c0_111] : memref<64x512xf32, #tpu.memory_space<vmem>>, vector<8x512xf32>
    %cst_112 = arith.constant dense<0.000000e+00> : vector<8x512xf32>
    %426 = tpu.matmul %389, %15, %cst_112 {dimension_numbers = #tpu.dot_dimension_numbers<[1], [0], [0], [1], [0, 0, 1, 1], [], []>} : vector<8x128xf32>, vector<128x512xf32>, vector<8x512xf32> -> vector<8x512xf32>
    %427 = arith.addf %425, %426 : vector<8x512xf32>
    %428 = arith.index_cast %423 : i32 to index
    %c0_113 = arith.constant 0 : index
    %429 = vector.load %arg19[%428, %c0_113] : memref<64x512xf32, #tpu.memory_space<vmem>>, vector<8x512xf32>
    %cst_114 = arith.constant dense<0.000000e+00> : vector<8x512xf32>
    %430 = tpu.matmul %414, %16, %cst_114 {dimension_numbers = #tpu.dot_dimension_numbers<[1], [0], [0], [1], [0, 0, 1, 1], [], []>} : vector<8x128xf32>, vector<128x512xf32>, vector<8x512xf32> -> vector<8x512xf32>
    %431 = arith.addf %429, %430 : vector<8x512xf32>
    %432 = vector.extract_strided_slice %427 {offsets = [0, 0], sizes = [8, 128], strides = [1, 1]} : vector<8x512xf32> to vector<8x128xf32>
    %433 = arith.negf %432 : vector<8x128xf32>
    %434 = math.exp %433 : vector<8x128xf32>
    %cst_115 = arith.constant 1.000000e+00 : f32
    %435 = vector.broadcast %cst_115 : f32 to vector<8x128xf32>
    %436 = arith.addf %435, %434 : vector<8x128xf32>
    %437 = arith.divf %435, %436 : vector<8x128xf32>
    %438 = vector.extract_strided_slice %427 {offsets = [0, 128], sizes = [8, 128], strides = [1, 1]} : vector<8x512xf32> to vector<8x128xf32>
    %439 = arith.negf %438 : vector<8x128xf32>
    %440 = math.exp %439 : vector<8x128xf32>
    %cst_116 = arith.constant 1.000000e+00 : f32
    %441 = vector.broadcast %cst_116 : f32 to vector<8x128xf32>
    %442 = arith.addf %441, %440 : vector<8x128xf32>
    %443 = arith.divf %441, %442 : vector<8x128xf32>
    %444 = vector.extract_strided_slice %427 {offsets = [0, 256], sizes = [8, 128], strides = [1, 1]} : vector<8x512xf32> to vector<8x128xf32>
    %445 = math.tanh %444 : vector<8x128xf32>
    %446 = vector.extract_strided_slice %427 {offsets = [0, 384], sizes = [8, 128], strides = [1, 1]} : vector<8x512xf32> to vector<8x128xf32>
    %447 = arith.negf %446 : vector<8x128xf32>
    %448 = math.exp %447 : vector<8x128xf32>
    %cst_117 = arith.constant 1.000000e+00 : f32
    %449 = vector.broadcast %cst_117 : f32 to vector<8x128xf32>
    %450 = arith.addf %449, %448 : vector<8x128xf32>
    %451 = arith.divf %449, %450 : vector<8x128xf32>
    %452 = arith.mulf %443, %387 : vector<8x128xf32>
    %453 = arith.mulf %437, %445 : vector<8x128xf32>
    %454 = arith.addf %452, %453 : vector<8x128xf32>
    %455 = math.tanh %454 : vector<8x128xf32>
    %456 = arith.mulf %451, %455 : vector<8x128xf32>
    %457 = vector.extract_strided_slice %431 {offsets = [0, 0], sizes = [8, 128], strides = [1, 1]} : vector<8x512xf32> to vector<8x128xf32>
    %458 = arith.negf %457 : vector<8x128xf32>
    %459 = math.exp %458 : vector<8x128xf32>
    %cst_118 = arith.constant 1.000000e+00 : f32
    %460 = vector.broadcast %cst_118 : f32 to vector<8x128xf32>
    %461 = arith.addf %460, %459 : vector<8x128xf32>
    %462 = arith.divf %460, %461 : vector<8x128xf32>
    %463 = vector.extract_strided_slice %431 {offsets = [0, 128], sizes = [8, 128], strides = [1, 1]} : vector<8x512xf32> to vector<8x128xf32>
    %464 = arith.negf %463 : vector<8x128xf32>
    %465 = math.exp %464 : vector<8x128xf32>
    %cst_119 = arith.constant 1.000000e+00 : f32
    %466 = vector.broadcast %cst_119 : f32 to vector<8x128xf32>
    %467 = arith.addf %466, %465 : vector<8x128xf32>
    %468 = arith.divf %466, %467 : vector<8x128xf32>
    %469 = vector.extract_strided_slice %431 {offsets = [0, 256], sizes = [8, 128], strides = [1, 1]} : vector<8x512xf32> to vector<8x128xf32>
    %470 = math.tanh %469 : vector<8x128xf32>
    %471 = vector.extract_strided_slice %431 {offsets = [0, 384], sizes = [8, 128], strides = [1, 1]} : vector<8x512xf32> to vector<8x128xf32>
    %472 = arith.negf %471 : vector<8x128xf32>
    %473 = math.exp %472 : vector<8x128xf32>
    %cst_120 = arith.constant 1.000000e+00 : f32
    %474 = vector.broadcast %cst_120 : f32 to vector<8x128xf32>
    %475 = arith.addf %474, %473 : vector<8x128xf32>
    %476 = arith.divf %474, %475 : vector<8x128xf32>
    %477 = arith.mulf %468, %412 : vector<8x128xf32>
    %478 = arith.mulf %462, %470 : vector<8x128xf32>
    %479 = arith.addf %477, %478 : vector<8x128xf32>
    %480 = math.tanh %479 : vector<8x128xf32>
    %481 = arith.mulf %476, %480 : vector<8x128xf32>
    %482 = arith.index_cast %420 : i32 to index
    %c0_121 = arith.constant 0 : index
    %483 = vector.load %arg20[%482, %c0_121] : memref<64x128xf32, #tpu.memory_space<vmem>>, vector<8x128xf32>
    tpu.vector_store %arg20[%482, %c0_121], %456 {strides = array<i32>} : memref<64x128xf32, #tpu.memory_space<vmem>>, vector<8x128xf32>,
    %484 = arith.index_cast %423 : i32 to index
    %c0_122 = arith.constant 0 : index
    %485 = vector.load %arg21[%484, %c0_122] : memref<64x128xf32, #tpu.memory_space<vmem>>, vector<8x128xf32>
    tpu.vector_store %arg21[%484, %c0_122], %481 {strides = array<i32>} : memref<64x128xf32, #tpu.memory_space<vmem>>, vector<8x128xf32>,
    %c7_i32_123 = arith.constant 7 : i32
    %c8_i32_124 = arith.constant 8 : i32
    %486 = arith.muli %c7_i32_123, %c8_i32_124 : i32
    %487 = tpu.assume_multiple %486, 8 : i32
    %c7_i32_125 = arith.constant 7 : i32
    %488 = arith.subi %c7_i32_125, %c7_i32_123 : i32
    %c8_i32_126 = arith.constant 8 : i32
    %489 = arith.muli %488, %c8_i32_126 : i32
    %490 = tpu.assume_multiple %489, 8 : i32
    %491 = arith.index_cast %487 : i32 to index
    %c0_127 = arith.constant 0 : index
    %492 = vector.load %arg18[%491, %c0_127] : memref<64x512xf32, #tpu.memory_space<vmem>>, vector<8x512xf32>
    %cst_128 = arith.constant dense<0.000000e+00> : vector<8x512xf32>
    %493 = tpu.matmul %456, %15, %cst_128 {dimension_numbers = #tpu.dot_dimension_numbers<[1], [0], [0], [1], [0, 0, 1, 1], [], []>} : vector<8x128xf32>, vector<128x512xf32>, vector<8x512xf32> -> vector<8x512xf32>
    %494 = arith.addf %492, %493 : vector<8x512xf32>
    %495 = arith.index_cast %490 : i32 to index
    %c0_129 = arith.constant 0 : index
    %496 = vector.load %arg19[%495, %c0_129] : memref<64x512xf32, #tpu.memory_space<vmem>>, vector<8x512xf32>
    %cst_130 = arith.constant dense<0.000000e+00> : vector<8x512xf32>
    %497 = tpu.matmul %481, %16, %cst_130 {dimension_numbers = #tpu.dot_dimension_numbers<[1], [0], [0], [1], [0, 0, 1, 1], [], []>} : vector<8x128xf32>, vector<128x512xf32>, vector<8x512xf32> -> vector<8x512xf32>
    %498 = arith.addf %496, %497 : vector<8x512xf32>
    %499 = vector.extract_strided_slice %494 {offsets = [0, 0], sizes = [8, 128], strides = [1, 1]} : vector<8x512xf32> to vector<8x128xf32>
    %500 = arith.negf %499 : vector<8x128xf32>
    %501 = math.exp %500 : vector<8x128xf32>
    %cst_131 = arith.constant 1.000000e+00 : f32
    %502 = vector.broadcast %cst_131 : f32 to vector<8x128xf32>
    %503 = arith.addf %502, %501 : vector<8x128xf32>
    %504 = arith.divf %502, %503 : vector<8x128xf32>
    %505 = vector.extract_strided_slice %494 {offsets = [0, 128], sizes = [8, 128], strides = [1, 1]} : vector<8x512xf32> to vector<8x128xf32>
    %506 = arith.negf %505 : vector<8x128xf32>
    %507 = math.exp %506 : vector<8x128xf32>
    %cst_132 = arith.constant 1.000000e+00 : f32
    %508 = vector.broadcast %cst_132 : f32 to vector<8x128xf32>
    %509 = arith.addf %508, %507 : vector<8x128xf32>
    %510 = arith.divf %508, %509 : vector<8x128xf32>
    %511 = vector.extract_strided_slice %494 {offsets = [0, 256], sizes = [8, 128], strides = [1, 1]} : vector<8x512xf32> to vector<8x128xf32>
    %512 = math.tanh %511 : vector<8x128xf32>
    %513 = vector.extract_strided_slice %494 {offsets = [0, 384], sizes = [8, 128], strides = [1, 1]} : vector<8x512xf32> to vector<8x128xf32>
    %514 = arith.negf %513 : vector<8x128xf32>
    %515 = math.exp %514 : vector<8x128xf32>
    %cst_133 = arith.constant 1.000000e+00 : f32
    %516 = vector.broadcast %cst_133 : f32 to vector<8x128xf32>
    %517 = arith.addf %516, %515 : vector<8x128xf32>
    %518 = arith.divf %516, %517 : vector<8x128xf32>
    %519 = arith.mulf %510, %454 : vector<8x128xf32>
    %520 = arith.mulf %504, %512 : vector<8x128xf32>
    %521 = arith.addf %519, %520 : vector<8x128xf32>
    %522 = math.tanh %521 : vector<8x128xf32>
    %523 = arith.mulf %518, %522 : vector<8x128xf32>
    %524 = vector.extract_strided_slice %498 {offsets = [0, 0], sizes = [8, 128], strides = [1, 1]} : vector<8x512xf32> to vector<8x128xf32>
    %525 = arith.negf %524 : vector<8x128xf32>
    %526 = math.exp %525 : vector<8x128xf32>
    %cst_134 = arith.constant 1.000000e+00 : f32
    %527 = vector.broadcast %cst_134 : f32 to vector<8x128xf32>
    %528 = arith.addf %527, %526 : vector<8x128xf32>
    %529 = arith.divf %527, %528 : vector<8x128xf32>
    %530 = vector.extract_strided_slice %498 {offsets = [0, 128], sizes = [8, 128], strides = [1, 1]} : vector<8x512xf32> to vector<8x128xf32>
    %531 = arith.negf %530 : vector<8x128xf32>
    %532 = math.exp %531 : vector<8x128xf32>
    %cst_135 = arith.constant 1.000000e+00 : f32
    %533 = vector.broadcast %cst_135 : f32 to vector<8x128xf32>
    %534 = arith.addf %533, %532 : vector<8x128xf32>
    %535 = arith.divf %533, %534 : vector<8x128xf32>
    %536 = vector.extract_strided_slice %498 {offsets = [0, 256], sizes = [8, 128], strides = [1, 1]} : vector<8x512xf32> to vector<8x128xf32>
    %537 = math.tanh %536 : vector<8x128xf32>
    %538 = vector.extract_strided_slice %498 {offsets = [0, 384], sizes = [8, 128], strides = [1, 1]} : vector<8x512xf32> to vector<8x128xf32>
    %539 = arith.negf %538 : vector<8x128xf32>
    %540 = math.exp %539 : vector<8x128xf32>
    %cst_136 = arith.constant 1.000000e+00 : f32
    %541 = vector.broadcast %cst_136 : f32 to vector<8x128xf32>
    %542 = arith.addf %541, %540 : vector<8x128xf32>
    %543 = arith.divf %541, %542 : vector<8x128xf32>
    %544 = arith.mulf %535, %479 : vector<8x128xf32>
    %545 = arith.mulf %529, %537 : vector<8x128xf32>
    %546 = arith.addf %544, %545 : vector<8x128xf32>
    %547 = math.tanh %546 : vector<8x128xf32>
    %548 = arith.mulf %543, %547 : vector<8x128xf32>
    %549 = arith.index_cast %487 : i32 to index
    %c0_137 = arith.constant 0 : index
    %550 = vector.load %arg20[%549, %c0_137] : memref<64x128xf32, #tpu.memory_space<vmem>>, vector<8x128xf32>
    tpu.vector_store %arg20[%549, %c0_137], %523 {strides = array<i32>} : memref<64x128xf32, #tpu.memory_space<vmem>>, vector<8x128xf32>,
    %551 = arith.index_cast %490 : i32 to index
    %c0_138 = arith.constant 0 : index
    %552 = vector.load %arg21[%551, %c0_138] : memref<64x128xf32, #tpu.memory_space<vmem>>, vector<8x128xf32>
    tpu.vector_store %arg21[%551, %c0_138], %548 {strides = array<i32>} : memref<64x128xf32, #tpu.memory_space<vmem>>, vector<8x128xf32>,
    %c8_i32_139 = arith.constant 8 : i32
    %c0_140 = arith.constant 0 : index
    %c0_141 = arith.constant 0 : index
    %553 = vector.load %arg20[%c0_140, %c0_141] : memref<64x128xf32, #tpu.memory_space<vmem>>, vector<64x128xf32>
    %c0_142 = arith.constant 0 : index
    %c0_143 = arith.constant 0 : index
    %554 = vector.load %arg8[%c0_142, %c0_143] : memref<128x512xf32, #tpu.memory_space<vmem>>, vector<128x512xf32>
    %cst_144 = arith.constant dense<0.000000e+00> : vector<64x512xf32>
    %555 = tpu.matmul %553, %554, %cst_144 {dimension_numbers = #tpu.dot_dimension_numbers<[1], [0], [0], [1], [0, 0, 1, 1], [], []>} : vector<64x128xf32>, vector<128x512xf32>, vector<64x512xf32> -> vector<64x512xf32>
    %c0_145 = arith.constant 0 : index
    %c0_146 = arith.constant 0 : index
    %556 = vector.load %arg21[%c0_145, %c0_146] : memref<64x128xf32, #tpu.memory_space<vmem>>, vector<64x128xf32>
    %c0_147 = arith.constant 0 : index
    %c0_148 = arith.constant 0 : index
    %557 = vector.load %arg9[%c0_147, %c0_148] : memref<128x512xf32, #tpu.memory_space<vmem>>, vector<128x512xf32>
    %cst_149 = arith.constant dense<0.000000e+00> : vector<64x512xf32>
    %558 = tpu.matmul %556, %557, %cst_149 {dimension_numbers = #tpu.dot_dimension_numbers<[1], [0], [0], [1], [0, 0, 1, 1], [], []>} : vector<64x128xf32>, vector<128x512xf32>, vector<64x512xf32> -> vector<64x512xf32>
    %559 = arith.addf %555, %558 : vector<64x512xf32>
    %c0_150 = arith.constant 0 : index
    %c0_151 = arith.constant 0 : index
    %560 = vector.load %arg11[%c0_150, %c0_151] : memref<1x512xf32, #tpu.memory_space<vmem>>, vector<1x512xf32>
    %561 = vector.broadcast %560 : vector<1x512xf32> to vector<64x512xf32>
    %562 = arith.addf %559, %561 : vector<64x512xf32>
    %c0_152 = arith.constant 0 : index
    %c0_153 = arith.constant 0 : index
    %563 = vector.load %arg18[%c0_152, %c0_153] : memref<64x512xf32, #tpu.memory_space<vmem>>, vector<64x512xf32>
    tpu.vector_store %arg18[%c0_152, %c0_153], %562 {strides = array<i32>} : memref<64x512xf32, #tpu.memory_space<vmem>>, vector<64x512xf32>,
    %c0_154 = arith.constant 0 : index
    %c0_155 = arith.constant 0 : index
    %564 = vector.load %arg10[%c0_154, %c0_155] : memref<128x512xf32, #tpu.memory_space<vmem>>, vector<128x512xf32>
    %c0_156 = arith.constant 0 : index
    %c0_157 = arith.constant 0 : index
    %565 = vector.load %arg12[%c0_156, %c0_157] : memref<128x512xf32, #tpu.memory_space<vmem>>, vector<128x512xf32>
    %c0_158 = arith.constant 0 : index
    %c0_159 = arith.constant 0 : index
    %566 = vector.load %arg13[%c0_158, %c0_159] : memref<128x512xf32, #tpu.memory_space<vmem>>, vector<128x512xf32>
    %c0_160 = arith.constant 0 : index
    %c0_161 = arith.constant 0 : index
    %567 = vector.load %arg14[%c0_160, %c0_161] : memref<1x512xf32, #tpu.memory_space<vmem>>, vector<1x512xf32>
    %c0_162 = arith.constant 0 : index
    %c0_163 = arith.constant 0 : index
    %568 = vector.load %arg18[%c0_162, %c0_163] : memref<64x512xf32, #tpu.memory_space<vmem>>, vector<8x512xf32>
    %569 = vector.extract_strided_slice %568 {offsets = [0, 0], sizes = [8, 128], strides = [1, 1]} : vector<8x512xf32> to vector<8x128xf32>
    %570 = arith.negf %569 : vector<8x128xf32>
    %571 = math.exp %570 : vector<8x128xf32>
    %cst_164 = arith.constant 1.000000e+00 : f32
    %572 = vector.broadcast %cst_164 : f32 to vector<8x128xf32>
    %573 = arith.addf %572, %571 : vector<8x128xf32>
    %574 = arith.divf %572, %573 : vector<8x128xf32>
    %575 = vector.extract_strided_slice %568 {offsets = [0, 128], sizes = [8, 128], strides = [1, 1]} : vector<8x512xf32> to vector<8x128xf32>
    %576 = arith.negf %575 : vector<8x128xf32>
    %577 = math.exp %576 : vector<8x128xf32>
    %cst_165 = arith.constant 1.000000e+00 : f32
    %578 = vector.broadcast %cst_165 : f32 to vector<8x128xf32>
    %579 = arith.addf %578, %577 : vector<8x128xf32>
    %580 = arith.divf %578, %579 : vector<8x128xf32>
    %581 = vector.extract_strided_slice %568 {offsets = [0, 256], sizes = [8, 128], strides = [1, 1]} : vector<8x512xf32> to vector<8x128xf32>
    %582 = math.tanh %581 : vector<8x128xf32>
    %583 = vector.extract_strided_slice %568 {offsets = [0, 384], sizes = [8, 128], strides = [1, 1]} : vector<8x512xf32> to vector<8x128xf32>
    %584 = arith.negf %583 : vector<8x128xf32>
    %585 = math.exp %584 : vector<8x128xf32>
    %cst_166 = arith.constant 1.000000e+00 : f32
    %586 = vector.broadcast %cst_166 : f32 to vector<8x128xf32>
    %587 = arith.addf %586, %585 : vector<8x128xf32>
    %588 = arith.divf %586, %587 : vector<8x128xf32>
    %589 = arith.mulf %580, %2 : vector<8x128xf32>
    %590 = arith.mulf %574, %582 : vector<8x128xf32>
    %591 = arith.addf %589, %590 : vector<8x128xf32>
    %592 = math.tanh %591 : vector<8x128xf32>
    %593 = arith.mulf %588, %592 : vector<8x128xf32>
    %c1_i32_167 = arith.constant 1 : i32
    %cst_168 = arith.constant dense<0.000000e+00> : vector<8x512xf32>
    %594 = tpu.matmul %593, %565, %cst_168 {dimension_numbers = #tpu.dot_dimension_numbers<[1], [0], [0], [1], [0, 0, 1, 1], [], []>} : vector<8x128xf32>, vector<128x512xf32>, vector<8x512xf32> -> vector<8x512xf32>
    %595 = vector.broadcast %567 : vector<1x512xf32> to vector<8x512xf32>
    %596 = arith.addf %594, %595 : vector<8x512xf32>
    %cst_169 = arith.constant dense<0.000000e+00> : vector<8x512xf32>
    %597 = tpu.matmul %2, %566, %cst_169 {dimension_numbers = #tpu.dot_dimension_numbers<[1], [0], [0], [1], [0, 0, 1, 1], [], []>} : vector<8x128xf32>, vector<128x512xf32>, vector<8x512xf32> -> vector<8x512xf32>
    %598 = arith.addf %596, %597 : vector<8x512xf32>
    %599 = vector.extract_strided_slice %598 {offsets = [0, 0], sizes = [8, 128], strides = [1, 1]} : vector<8x512xf32> to vector<8x128xf32>
    %600 = arith.negf %599 : vector<8x128xf32>
    %601 = math.exp %600 : vector<8x128xf32>
    %cst_170 = arith.constant 1.000000e+00 : f32
    %602 = vector.broadcast %cst_170 : f32 to vector<8x128xf32>
    %603 = arith.addf %602, %601 : vector<8x128xf32>
    %604 = arith.divf %602, %603 : vector<8x128xf32>
    %605 = vector.extract_strided_slice %598 {offsets = [0, 128], sizes = [8, 128], strides = [1, 1]} : vector<8x512xf32> to vector<8x128xf32>
    %606 = arith.negf %605 : vector<8x128xf32>
    %607 = math.exp %606 : vector<8x128xf32>
    %cst_171 = arith.constant 1.000000e+00 : f32
    %608 = vector.broadcast %cst_171 : f32 to vector<8x128xf32>
    %609 = arith.addf %608, %607 : vector<8x128xf32>
    %610 = arith.divf %608, %609 : vector<8x128xf32>
    %611 = vector.extract_strided_slice %598 {offsets = [0, 256], sizes = [8, 128], strides = [1, 1]} : vector<8x512xf32> to vector<8x128xf32>
    %612 = math.tanh %611 : vector<8x128xf32>
    %613 = vector.extract_strided_slice %598 {offsets = [0, 384], sizes = [8, 128], strides = [1, 1]} : vector<8x512xf32> to vector<8x128xf32>
    %614 = arith.negf %613 : vector<8x128xf32>
    %615 = math.exp %614 : vector<8x128xf32>
    %cst_172 = arith.constant 1.000000e+00 : f32
    %616 = vector.broadcast %cst_172 : f32 to vector<8x128xf32>
    %617 = arith.addf %616, %615 : vector<8x128xf32>
    %618 = arith.divf %616, %617 : vector<8x128xf32>
    %619 = arith.mulf %610, %2 : vector<8x128xf32>
    %620 = arith.mulf %604, %612 : vector<8x128xf32>
    %621 = arith.addf %619, %620 : vector<8x128xf32>
    %622 = math.tanh %621 : vector<8x128xf32>
    %623 = arith.mulf %618, %622 : vector<8x128xf32>
    %624 = arith.addf %2, %623 : vector<8x128xf32>
    %c8_i32_173 = arith.constant 8 : i32
    %625 = arith.muli %c1_i32_167, %c8_i32_173 : i32
    %626 = tpu.assume_multiple %625, 8 : i32
    %627 = arith.index_cast %626 : i32 to index
    %c0_174 = arith.constant 0 : index
    %628 = vector.load %arg18[%627, %c0_174] : memref<64x512xf32, #tpu.memory_space<vmem>>, vector<8x512xf32>
    %cst_175 = arith.constant dense<0.000000e+00> : vector<8x512xf32>
    %629 = tpu.matmul %593, %564, %cst_175 {dimension_numbers = #tpu.dot_dimension_numbers<[1], [0], [0], [1], [0, 0, 1, 1], [], []>} : vector<8x128xf32>, vector<128x512xf32>, vector<8x512xf32> -> vector<8x512xf32>
    %630 = arith.addf %628, %629 : vector<8x512xf32>
    %631 = vector.extract_strided_slice %630 {offsets = [0, 0], sizes = [8, 128], strides = [1, 1]} : vector<8x512xf32> to vector<8x128xf32>
    %632 = arith.negf %631 : vector<8x128xf32>
    %633 = math.exp %632 : vector<8x128xf32>
    %cst_176 = arith.constant 1.000000e+00 : f32
    %634 = vector.broadcast %cst_176 : f32 to vector<8x128xf32>
    %635 = arith.addf %634, %633 : vector<8x128xf32>
    %636 = arith.divf %634, %635 : vector<8x128xf32>
    %637 = vector.extract_strided_slice %630 {offsets = [0, 128], sizes = [8, 128], strides = [1, 1]} : vector<8x512xf32> to vector<8x128xf32>
    %638 = arith.negf %637 : vector<8x128xf32>
    %639 = math.exp %638 : vector<8x128xf32>
    %cst_177 = arith.constant 1.000000e+00 : f32
    %640 = vector.broadcast %cst_177 : f32 to vector<8x128xf32>
    %641 = arith.addf %640, %639 : vector<8x128xf32>
    %642 = arith.divf %640, %641 : vector<8x128xf32>
    %643 = vector.extract_strided_slice %630 {offsets = [0, 256], sizes = [8, 128], strides = [1, 1]} : vector<8x512xf32> to vector<8x128xf32>
    %644 = math.tanh %643 : vector<8x128xf32>
    %645 = vector.extract_strided_slice %630 {offsets = [0, 384], sizes = [8, 128], strides = [1, 1]} : vector<8x512xf32> to vector<8x128xf32>
    %646 = arith.negf %645 : vector<8x128xf32>
    %647 = math.exp %646 : vector<8x128xf32>
    %cst_178 = arith.constant 1.000000e+00 : f32
    %648 = vector.broadcast %cst_178 : f32 to vector<8x128xf32>
    %649 = arith.addf %648, %647 : vector<8x128xf32>
    %650 = arith.divf %648, %649 : vector<8x128xf32>
    %651 = arith.mulf %642, %591 : vector<8x128xf32>
    %652 = arith.mulf %636, %644 : vector<8x128xf32>
    %653 = arith.addf %651, %652 : vector<8x128xf32>
    %654 = math.tanh %653 : vector<8x128xf32>
    %655 = arith.mulf %650, %654 : vector<8x128xf32>
    %c2_i32_179 = arith.constant 2 : i32
    %cst_180 = arith.constant dense<0.000000e+00> : vector<8x512xf32>
    %656 = tpu.matmul %655, %565, %cst_180 {dimension_numbers = #tpu.dot_dimension_numbers<[1], [0], [0], [1], [0, 0, 1, 1], [], []>} : vector<8x128xf32>, vector<128x512xf32>, vector<8x512xf32> -> vector<8x512xf32>
    %657 = vector.broadcast %567 : vector<1x512xf32> to vector<8x512xf32>
    %658 = arith.addf %656, %657 : vector<8x512xf32>
    %cst_181 = arith.constant dense<0.000000e+00> : vector<8x512xf32>
    %659 = tpu.matmul %623, %566, %cst_181 {dimension_numbers = #tpu.dot_dimension_numbers<[1], [0], [0], [1], [0, 0, 1, 1], [], []>} : vector<8x128xf32>, vector<128x512xf32>, vector<8x512xf32> -> vector<8x512xf32>
    %660 = arith.addf %658, %659 : vector<8x512xf32>
    %661 = vector.extract_strided_slice %660 {offsets = [0, 0], sizes = [8, 128], strides = [1, 1]} : vector<8x512xf32> to vector<8x128xf32>
    %662 = arith.negf %661 : vector<8x128xf32>
    %663 = math.exp %662 : vector<8x128xf32>
    %cst_182 = arith.constant 1.000000e+00 : f32
    %664 = vector.broadcast %cst_182 : f32 to vector<8x128xf32>
    %665 = arith.addf %664, %663 : vector<8x128xf32>
    %666 = arith.divf %664, %665 : vector<8x128xf32>
    %667 = vector.extract_strided_slice %660 {offsets = [0, 128], sizes = [8, 128], strides = [1, 1]} : vector<8x512xf32> to vector<8x128xf32>
    %668 = arith.negf %667 : vector<8x128xf32>
    %669 = math.exp %668 : vector<8x128xf32>
    %cst_183 = arith.constant 1.000000e+00 : f32
    %670 = vector.broadcast %cst_183 : f32 to vector<8x128xf32>
    %671 = arith.addf %670, %669 : vector<8x128xf32>
    %672 = arith.divf %670, %671 : vector<8x128xf32>
    %673 = vector.extract_strided_slice %660 {offsets = [0, 256], sizes = [8, 128], strides = [1, 1]} : vector<8x512xf32> to vector<8x128xf32>
    %674 = math.tanh %673 : vector<8x128xf32>
    %675 = vector.extract_strided_slice %660 {offsets = [0, 384], sizes = [8, 128], strides = [1, 1]} : vector<8x512xf32> to vector<8x128xf32>
    %676 = arith.negf %675 : vector<8x128xf32>
    %677 = math.exp %676 : vector<8x128xf32>
    %cst_184 = arith.constant 1.000000e+00 : f32
    %678 = vector.broadcast %cst_184 : f32 to vector<8x128xf32>
    %679 = arith.addf %678, %677 : vector<8x128xf32>
    %680 = arith.divf %678, %679 : vector<8x128xf32>
    %681 = arith.mulf %672, %621 : vector<8x128xf32>
    %682 = arith.mulf %666, %674 : vector<8x128xf32>
    %683 = arith.addf %681, %682 : vector<8x128xf32>
    %684 = math.tanh %683 : vector<8x128xf32>
    %685 = arith.mulf %680, %684 : vector<8x128xf32>
    %686 = arith.addf %624, %685 : vector<8x128xf32>
    %c8_i32_185 = arith.constant 8 : i32
    %687 = arith.muli %c2_i32_179, %c8_i32_185 : i32
    %688 = tpu.assume_multiple %687, 8 : i32
    %689 = arith.index_cast %688 : i32 to index
    %c0_186 = arith.constant 0 : index
    %690 = vector.load %arg18[%689, %c0_186] : memref<64x512xf32, #tpu.memory_space<vmem>>, vector<8x512xf32>
    %cst_187 = arith.constant dense<0.000000e+00> : vector<8x512xf32>
    %691 = tpu.matmul %655, %564, %cst_187 {dimension_numbers = #tpu.dot_dimension_numbers<[1], [0], [0], [1], [0, 0, 1, 1], [], []>} : vector<8x128xf32>, vector<128x512xf32>, vector<8x512xf32> -> vector<8x512xf32>
    %692 = arith.addf %690, %691 : vector<8x512xf32>
    %693 = vector.extract_strided_slice %692 {offsets = [0, 0], sizes = [8, 128], strides = [1, 1]} : vector<8x512xf32> to vector<8x128xf32>
    %694 = arith.negf %693 : vector<8x128xf32>
    %695 = math.exp %694 : vector<8x128xf32>
    %cst_188 = arith.constant 1.000000e+00 : f32
    %696 = vector.broadcast %cst_188 : f32 to vector<8x128xf32>
    %697 = arith.addf %696, %695 : vector<8x128xf32>
    %698 = arith.divf %696, %697 : vector<8x128xf32>
    %699 = vector.extract_strided_slice %692 {offsets = [0, 128], sizes = [8, 128], strides = [1, 1]} : vector<8x512xf32> to vector<8x128xf32>
    %700 = arith.negf %699 : vector<8x128xf32>
    %701 = math.exp %700 : vector<8x128xf32>
    %cst_189 = arith.constant 1.000000e+00 : f32
    %702 = vector.broadcast %cst_189 : f32 to vector<8x128xf32>
    %703 = arith.addf %702, %701 : vector<8x128xf32>
    %704 = arith.divf %702, %703 : vector<8x128xf32>
    %705 = vector.extract_strided_slice %692 {offsets = [0, 256], sizes = [8, 128], strides = [1, 1]} : vector<8x512xf32> to vector<8x128xf32>
    %706 = math.tanh %705 : vector<8x128xf32>
    %707 = vector.extract_strided_slice %692 {offsets = [0, 384], sizes = [8, 128], strides = [1, 1]} : vector<8x512xf32> to vector<8x128xf32>
    %708 = arith.negf %707 : vector<8x128xf32>
    %709 = math.exp %708 : vector<8x128xf32>
    %cst_190 = arith.constant 1.000000e+00 : f32
    %710 = vector.broadcast %cst_190 : f32 to vector<8x128xf32>
    %711 = arith.addf %710, %709 : vector<8x128xf32>
    %712 = arith.divf %710, %711 : vector<8x128xf32>
    %713 = arith.mulf %704, %653 : vector<8x128xf32>
    %714 = arith.mulf %698, %706 : vector<8x128xf32>
    %715 = arith.addf %713, %714 : vector<8x128xf32>
    %716 = math.tanh %715 : vector<8x128xf32>
    %717 = arith.mulf %712, %716 : vector<8x128xf32>
    %c3_i32_191 = arith.constant 3 : i32
    %cst_192 = arith.constant dense<0.000000e+00> : vector<8x512xf32>
    %718 = tpu.matmul %717, %565, %cst_192 {dimension_numbers = #tpu.dot_dimension_numbers<[1], [0], [0], [1], [0, 0, 1, 1], [], []>} : vector<8x128xf32>, vector<128x512xf32>, vector<8x512xf32> -> vector<8x512xf32>
    %719 = vector.broadcast %567 : vector<1x512xf32> to vector<8x512xf32>
    %720 = arith.addf %718, %719 : vector<8x512xf32>
    %cst_193 = arith.constant dense<0.000000e+00> : vector<8x512xf32>
    %721 = tpu.matmul %685, %566, %cst_193 {dimension_numbers = #tpu.dot_dimension_numbers<[1], [0], [0], [1], [0, 0, 1, 1], [], []>} : vector<8x128xf32>, vector<128x512xf32>, vector<8x512xf32> -> vector<8x512xf32>
    %722 = arith.addf %720, %721 : vector<8x512xf32>
    %723 = vector.extract_strided_slice %722 {offsets = [0, 0], sizes = [8, 128], strides = [1, 1]} : vector<8x512xf32> to vector<8x128xf32>
    %724 = arith.negf %723 : vector<8x128xf32>
    %725 = math.exp %724 : vector<8x128xf32>
    %cst_194 = arith.constant 1.000000e+00 : f32
    %726 = vector.broadcast %cst_194 : f32 to vector<8x128xf32>
    %727 = arith.addf %726, %725 : vector<8x128xf32>
    %728 = arith.divf %726, %727 : vector<8x128xf32>
    %729 = vector.extract_strided_slice %722 {offsets = [0, 128], sizes = [8, 128], strides = [1, 1]} : vector<8x512xf32> to vector<8x128xf32>
    %730 = arith.negf %729 : vector<8x128xf32>
    %731 = math.exp %730 : vector<8x128xf32>
    %cst_195 = arith.constant 1.000000e+00 : f32
    %732 = vector.broadcast %cst_195 : f32 to vector<8x128xf32>
    %733 = arith.addf %732, %731 : vector<8x128xf32>
    %734 = arith.divf %732, %733 : vector<8x128xf32>
    %735 = vector.extract_strided_slice %722 {offsets = [0, 256], sizes = [8, 128], strides = [1, 1]} : vector<8x512xf32> to vector<8x128xf32>
    %736 = math.tanh %735 : vector<8x128xf32>
    %737 = vector.extract_strided_slice %722 {offsets = [0, 384], sizes = [8, 128], strides = [1, 1]} : vector<8x512xf32> to vector<8x128xf32>
    %738 = arith.negf %737 : vector<8x128xf32>
    %739 = math.exp %738 : vector<8x128xf32>
    %cst_196 = arith.constant 1.000000e+00 : f32
    %740 = vector.broadcast %cst_196 : f32 to vector<8x128xf32>
    %741 = arith.addf %740, %739 : vector<8x128xf32>
    %742 = arith.divf %740, %741 : vector<8x128xf32>
    %743 = arith.mulf %734, %683 : vector<8x128xf32>
    %744 = arith.mulf %728, %736 : vector<8x128xf32>
    %745 = arith.addf %743, %744 : vector<8x128xf32>
    %746 = math.tanh %745 : vector<8x128xf32>
    %747 = arith.mulf %742, %746 : vector<8x128xf32>
    %748 = arith.addf %686, %747 : vector<8x128xf32>
    %c8_i32_197 = arith.constant 8 : i32
    %749 = arith.muli %c3_i32_191, %c8_i32_197 : i32
    %750 = tpu.assume_multiple %749, 8 : i32
    %751 = arith.index_cast %750 : i32 to index
    %c0_198 = arith.constant 0 : index
    %752 = vector.load %arg18[%751, %c0_198] : memref<64x512xf32, #tpu.memory_space<vmem>>, vector<8x512xf32>
    %cst_199 = arith.constant dense<0.000000e+00> : vector<8x512xf32>
    %753 = tpu.matmul %717, %564, %cst_199 {dimension_numbers = #tpu.dot_dimension_numbers<[1], [0], [0], [1], [0, 0, 1, 1], [], []>} : vector<8x128xf32>, vector<128x512xf32>, vector<8x512xf32> -> vector<8x512xf32>
    %754 = arith.addf %752, %753 : vector<8x512xf32>
    %755 = vector.extract_strided_slice %754 {offsets = [0, 0], sizes = [8, 128], strides = [1, 1]} : vector<8x512xf32> to vector<8x128xf32>
    %756 = arith.negf %755 : vector<8x128xf32>
    %757 = math.exp %756 : vector<8x128xf32>
    %cst_200 = arith.constant 1.000000e+00 : f32
    %758 = vector.broadcast %cst_200 : f32 to vector<8x128xf32>
    %759 = arith.addf %758, %757 : vector<8x128xf32>
    %760 = arith.divf %758, %759 : vector<8x128xf32>
    %761 = vector.extract_strided_slice %754 {offsets = [0, 128], sizes = [8, 128], strides = [1, 1]} : vector<8x512xf32> to vector<8x128xf32>
    %762 = arith.negf %761 : vector<8x128xf32>
    %763 = math.exp %762 : vector<8x128xf32>
    %cst_201 = arith.constant 1.000000e+00 : f32
    %764 = vector.broadcast %cst_201 : f32 to vector<8x128xf32>
    %765 = arith.addf %764, %763 : vector<8x128xf32>
    %766 = arith.divf %764, %765 : vector<8x128xf32>
    %767 = vector.extract_strided_slice %754 {offsets = [0, 256], sizes = [8, 128], strides = [1, 1]} : vector<8x512xf32> to vector<8x128xf32>
    %768 = math.tanh %767 : vector<8x128xf32>
    %769 = vector.extract_strided_slice %754 {offsets = [0, 384], sizes = [8, 128], strides = [1, 1]} : vector<8x512xf32> to vector<8x128xf32>
    %770 = arith.negf %769 : vector<8x128xf32>
    %771 = math.exp %770 : vector<8x128xf32>
    %cst_202 = arith.constant 1.000000e+00 : f32
    %772 = vector.broadcast %cst_202 : f32 to vector<8x128xf32>
    %773 = arith.addf %772, %771 : vector<8x128xf32>
    %774 = arith.divf %772, %773 : vector<8x128xf32>
    %775 = arith.mulf %766, %715 : vector<8x128xf32>
    %776 = arith.mulf %760, %768 : vector<8x128xf32>
    %777 = arith.addf %775, %776 : vector<8x128xf32>
    %778 = math.tanh %777 : vector<8x128xf32>
    %779 = arith.mulf %774, %778 : vector<8x128xf32>
    %c4_i32_203 = arith.constant 4 : i32
    %cst_204 = arith.constant dense<0.000000e+00> : vector<8x512xf32>
    %780 = tpu.matmul %779, %565, %cst_204 {dimension_numbers = #tpu.dot_dimension_numbers<[1], [0], [0], [1], [0, 0, 1, 1], [], []>} : vector<8x128xf32>, vector<128x512xf32>, vector<8x512xf32> -> vector<8x512xf32>
    %781 = vector.broadcast %567 : vector<1x512xf32> to vector<8x512xf32>
    %782 = arith.addf %780, %781 : vector<8x512xf32>
    %cst_205 = arith.constant dense<0.000000e+00> : vector<8x512xf32>
    %783 = tpu.matmul %747, %566, %cst_205 {dimension_numbers = #tpu.dot_dimension_numbers<[1], [0], [0], [1], [0, 0, 1, 1], [], []>} : vector<8x128xf32>, vector<128x512xf32>, vector<8x512xf32> -> vector<8x512xf32>
    %784 = arith.addf %782, %783 : vector<8x512xf32>
    %785 = vector.extract_strided_slice %784 {offsets = [0, 0], sizes = [8, 128], strides = [1, 1]} : vector<8x512xf32> to vector<8x128xf32>
    %786 = arith.negf %785 : vector<8x128xf32>
    %787 = math.exp %786 : vector<8x128xf32>
    %cst_206 = arith.constant 1.000000e+00 : f32
    %788 = vector.broadcast %cst_206 : f32 to vector<8x128xf32>
    %789 = arith.addf %788, %787 : vector<8x128xf32>
    %790 = arith.divf %788, %789 : vector<8x128xf32>
    %791 = vector.extract_strided_slice %784 {offsets = [0, 128], sizes = [8, 128], strides = [1, 1]} : vector<8x512xf32> to vector<8x128xf32>
    %792 = arith.negf %791 : vector<8x128xf32>
    %793 = math.exp %792 : vector<8x128xf32>
    %cst_207 = arith.constant 1.000000e+00 : f32
    %794 = vector.broadcast %cst_207 : f32 to vector<8x128xf32>
    %795 = arith.addf %794, %793 : vector<8x128xf32>
    %796 = arith.divf %794, %795 : vector<8x128xf32>
    %797 = vector.extract_strided_slice %784 {offsets = [0, 256], sizes = [8, 128], strides = [1, 1]} : vector<8x512xf32> to vector<8x128xf32>
    %798 = math.tanh %797 : vector<8x128xf32>
    %799 = vector.extract_strided_slice %784 {offsets = [0, 384], sizes = [8, 128], strides = [1, 1]} : vector<8x512xf32> to vector<8x128xf32>
    %800 = arith.negf %799 : vector<8x128xf32>
    %801 = math.exp %800 : vector<8x128xf32>
    %cst_208 = arith.constant 1.000000e+00 : f32
    %802 = vector.broadcast %cst_208 : f32 to vector<8x128xf32>
    %803 = arith.addf %802, %801 : vector<8x128xf32>
    %804 = arith.divf %802, %803 : vector<8x128xf32>
    %805 = arith.mulf %796, %745 : vector<8x128xf32>
    %806 = arith.mulf %790, %798 : vector<8x128xf32>
    %807 = arith.addf %805, %806 : vector<8x128xf32>
    %808 = math.tanh %807 : vector<8x128xf32>
    %809 = arith.mulf %804, %808 : vector<8x128xf32>
    %810 = arith.addf %748, %809 : vector<8x128xf32>
    %c8_i32_209 = arith.constant 8 : i32
    %811 = arith.muli %c4_i32_203, %c8_i32_209 : i32
    %812 = tpu.assume_multiple %811, 8 : i32
    %813 = arith.index_cast %812 : i32 to index
    %c0_210 = arith.constant 0 : index
    %814 = vector.load %arg18[%813, %c0_210] : memref<64x512xf32, #tpu.memory_space<vmem>>, vector<8x512xf32>
    %cst_211 = arith.constant dense<0.000000e+00> : vector<8x512xf32>
    %815 = tpu.matmul %779, %564, %cst_211 {dimension_numbers = #tpu.dot_dimension_numbers<[1], [0], [0], [1], [0, 0, 1, 1], [], []>} : vector<8x128xf32>, vector<128x512xf32>, vector<8x512xf32> -> vector<8x512xf32>
    %816 = arith.addf %814, %815 : vector<8x512xf32>
    %817 = vector.extract_strided_slice %816 {offsets = [0, 0], sizes = [8, 128], strides = [1, 1]} : vector<8x512xf32> to vector<8x128xf32>
    %818 = arith.negf %817 : vector<8x128xf32>
    %819 = math.exp %818 : vector<8x128xf32>
    %cst_212 = arith.constant 1.000000e+00 : f32
    %820 = vector.broadcast %cst_212 : f32 to vector<8x128xf32>
    %821 = arith.addf %820, %819 : vector<8x128xf32>
    %822 = arith.divf %820, %821 : vector<8x128xf32>
    %823 = vector.extract_strided_slice %816 {offsets = [0, 128], sizes = [8, 128], strides = [1, 1]} : vector<8x512xf32> to vector<8x128xf32>
    %824 = arith.negf %823 : vector<8x128xf32>
    %825 = math.exp %824 : vector<8x128xf32>
    %cst_213 = arith.constant 1.000000e+00 : f32
    %826 = vector.broadcast %cst_213 : f32 to vector<8x128xf32>
    %827 = arith.addf %826, %825 : vector<8x128xf32>
    %828 = arith.divf %826, %827 : vector<8x128xf32>
    %829 = vector.extract_strided_slice %816 {offsets = [0, 256], sizes = [8, 128], strides = [1, 1]} : vector<8x512xf32> to vector<8x128xf32>
    %830 = math.tanh %829 : vector<8x128xf32>
    %831 = vector.extract_strided_slice %816 {offsets = [0, 384], sizes = [8, 128], strides = [1, 1]} : vector<8x512xf32> to vector<8x128xf32>
    %832 = arith.negf %831 : vector<8x128xf32>
    %833 = math.exp %832 : vector<8x128xf32>
    %cst_214 = arith.constant 1.000000e+00 : f32
    %834 = vector.broadcast %cst_214 : f32 to vector<8x128xf32>
    %835 = arith.addf %834, %833 : vector<8x128xf32>
    %836 = arith.divf %834, %835 : vector<8x128xf32>
    %837 = arith.mulf %828, %777 : vector<8x128xf32>
    %838 = arith.mulf %822, %830 : vector<8x128xf32>
    %839 = arith.addf %837, %838 : vector<8x128xf32>
    %840 = math.tanh %839 : vector<8x128xf32>
    %841 = arith.mulf %836, %840 : vector<8x128xf32>
    %c5_i32_215 = arith.constant 5 : i32
    %cst_216 = arith.constant dense<0.000000e+00> : vector<8x512xf32>
    %842 = tpu.matmul %841, %565, %cst_216 {dimension_numbers = #tpu.dot_dimension_numbers<[1], [0], [0], [1], [0, 0, 1, 1], [], []>} : vector<8x128xf32>, vector<128x512xf32>, vector<8x512xf32> -> vector<8x512xf32>
    %843 = vector.broadcast %567 : vector<1x512xf32> to vector<8x512xf32>
    %844 = arith.addf %842, %843 : vector<8x512xf32>
    %cst_217 = arith.constant dense<0.000000e+00> : vector<8x512xf32>
    %845 = tpu.matmul %809, %566, %cst_217 {dimension_numbers = #tpu.dot_dimension_numbers<[1], [0], [0], [1], [0, 0, 1, 1], [], []>} : vector<8x128xf32>, vector<128x512xf32>, vector<8x512xf32> -> vector<8x512xf32>
    %846 = arith.addf %844, %845 : vector<8x512xf32>
    %847 = vector.extract_strided_slice %846 {offsets = [0, 0], sizes = [8, 128], strides = [1, 1]} : vector<8x512xf32> to vector<8x128xf32>
    %848 = arith.negf %847 : vector<8x128xf32>
    %849 = math.exp %848 : vector<8x128xf32>
    %cst_218 = arith.constant 1.000000e+00 : f32
    %850 = vector.broadcast %cst_218 : f32 to vector<8x128xf32>
    %851 = arith.addf %850, %849 : vector<8x128xf32>
    %852 = arith.divf %850, %851 : vector<8x128xf32>
    %853 = vector.extract_strided_slice %846 {offsets = [0, 128], sizes = [8, 128], strides = [1, 1]} : vector<8x512xf32> to vector<8x128xf32>
    %854 = arith.negf %853 : vector<8x128xf32>
    %855 = math.exp %854 : vector<8x128xf32>
    %cst_219 = arith.constant 1.000000e+00 : f32
    %856 = vector.broadcast %cst_219 : f32 to vector<8x128xf32>
    %857 = arith.addf %856, %855 : vector<8x128xf32>
    %858 = arith.divf %856, %857 : vector<8x128xf32>
    %859 = vector.extract_strided_slice %846 {offsets = [0, 256], sizes = [8, 128], strides = [1, 1]} : vector<8x512xf32> to vector<8x128xf32>
    %860 = math.tanh %859 : vector<8x128xf32>
    %861 = vector.extract_strided_slice %846 {offsets = [0, 384], sizes = [8, 128], strides = [1, 1]} : vector<8x512xf32> to vector<8x128xf32>
    %862 = arith.negf %861 : vector<8x128xf32>
    %863 = math.exp %862 : vector<8x128xf32>
    %cst_220 = arith.constant 1.000000e+00 : f32
    %864 = vector.broadcast %cst_220 : f32 to vector<8x128xf32>
    %865 = arith.addf %864, %863 : vector<8x128xf32>
    %866 = arith.divf %864, %865 : vector<8x128xf32>
    %867 = arith.mulf %858, %807 : vector<8x128xf32>
    %868 = arith.mulf %852, %860 : vector<8x128xf32>
    %869 = arith.addf %867, %868 : vector<8x128xf32>
    %870 = math.tanh %869 : vector<8x128xf32>
    %871 = arith.mulf %866, %870 : vector<8x128xf32>
    %872 = arith.addf %810, %871 : vector<8x128xf32>
    %c8_i32_221 = arith.constant 8 : i32
    %873 = arith.muli %c5_i32_215, %c8_i32_221 : i32
    %874 = tpu.assume_multiple %873, 8 : i32
    %875 = arith.index_cast %874 : i32 to index
    %c0_222 = arith.constant 0 : index
    %876 = vector.load %arg18[%875, %c0_222] : memref<64x512xf32, #tpu.memory_space<vmem>>, vector<8x512xf32>
    %cst_223 = arith.constant dense<0.000000e+00> : vector<8x512xf32>
    %877 = tpu.matmul %841, %564, %cst_223 {dimension_numbers = #tpu.dot_dimension_numbers<[1], [0], [0], [1], [0, 0, 1, 1], [], []>} : vector<8x128xf32>, vector<128x512xf32>, vector<8x512xf32> -> vector<8x512xf32>
    %878 = arith.addf %876, %877 : vector<8x512xf32>
    %879 = vector.extract_strided_slice %878 {offsets = [0, 0], sizes = [8, 128], strides = [1, 1]} : vector<8x512xf32> to vector<8x128xf32>
    %880 = arith.negf %879 : vector<8x128xf32>
    %881 = math.exp %880 : vector<8x128xf32>
    %cst_224 = arith.constant 1.000000e+00 : f32
    %882 = vector.broadcast %cst_224 : f32 to vector<8x128xf32>
    %883 = arith.addf %882, %881 : vector<8x128xf32>
    %884 = arith.divf %882, %883 : vector<8x128xf32>
    %885 = vector.extract_strided_slice %878 {offsets = [0, 128], sizes = [8, 128], strides = [1, 1]} : vector<8x512xf32> to vector<8x128xf32>
    %886 = arith.negf %885 : vector<8x128xf32>
    %887 = math.exp %886 : vector<8x128xf32>
    %cst_225 = arith.constant 1.000000e+00 : f32
    %888 = vector.broadcast %cst_225 : f32 to vector<8x128xf32>
    %889 = arith.addf %888, %887 : vector<8x128xf32>
    %890 = arith.divf %888, %889 : vector<8x128xf32>
    %891 = vector.extract_strided_slice %878 {offsets = [0, 256], sizes = [8, 128], strides = [1, 1]} : vector<8x512xf32> to vector<8x128xf32>
    %892 = math.tanh %891 : vector<8x128xf32>
    %893 = vector.extract_strided_slice %878 {offsets = [0, 384], sizes = [8, 128], strides = [1, 1]} : vector<8x512xf32> to vector<8x128xf32>
    %894 = arith.negf %893 : vector<8x128xf32>
    %895 = math.exp %894 : vector<8x128xf32>
    %cst_226 = arith.constant 1.000000e+00 : f32
    %896 = vector.broadcast %cst_226 : f32 to vector<8x128xf32>
    %897 = arith.addf %896, %895 : vector<8x128xf32>
    %898 = arith.divf %896, %897 : vector<8x128xf32>
    %899 = arith.mulf %890, %839 : vector<8x128xf32>
    %900 = arith.mulf %884, %892 : vector<8x128xf32>
    %901 = arith.addf %899, %900 : vector<8x128xf32>
    %902 = math.tanh %901 : vector<8x128xf32>
    %903 = arith.mulf %898, %902 : vector<8x128xf32>
    %c6_i32_227 = arith.constant 6 : i32
    %cst_228 = arith.constant dense<0.000000e+00> : vector<8x512xf32>
    %904 = tpu.matmul %903, %565, %cst_228 {dimension_numbers = #tpu.dot_dimension_numbers<[1], [0], [0], [1], [0, 0, 1, 1], [], []>} : vector<8x128xf32>, vector<128x512xf32>, vector<8x512xf32> -> vector<8x512xf32>
    %905 = vector.broadcast %567 : vector<1x512xf32> to vector<8x512xf32>
    %906 = arith.addf %904, %905 : vector<8x512xf32>
    %cst_229 = arith.constant dense<0.000000e+00> : vector<8x512xf32>
    %907 = tpu.matmul %871, %566, %cst_229 {dimension_numbers = #tpu.dot_dimension_numbers<[1], [0], [0], [1], [0, 0, 1, 1], [], []>} : vector<8x128xf32>, vector<128x512xf32>, vector<8x512xf32> -> vector<8x512xf32>
    %908 = arith.addf %906, %907 : vector<8x512xf32>
    %909 = vector.extract_strided_slice %908 {offsets = [0, 0], sizes = [8, 128], strides = [1, 1]} : vector<8x512xf32> to vector<8x128xf32>
    %910 = arith.negf %909 : vector<8x128xf32>
    %911 = math.exp %910 : vector<8x128xf32>
    %cst_230 = arith.constant 1.000000e+00 : f32
    %912 = vector.broadcast %cst_230 : f32 to vector<8x128xf32>
    %913 = arith.addf %912, %911 : vector<8x128xf32>
    %914 = arith.divf %912, %913 : vector<8x128xf32>
    %915 = vector.extract_strided_slice %908 {offsets = [0, 128], sizes = [8, 128], strides = [1, 1]} : vector<8x512xf32> to vector<8x128xf32>
    %916 = arith.negf %915 : vector<8x128xf32>
    %917 = math.exp %916 : vector<8x128xf32>
    %cst_231 = arith.constant 1.000000e+00 : f32
    %918 = vector.broadcast %cst_231 : f32 to vector<8x128xf32>
    %919 = arith.addf %918, %917 : vector<8x128xf32>
    %920 = arith.divf %918, %919 : vector<8x128xf32>
    %921 = vector.extract_strided_slice %908 {offsets = [0, 256], sizes = [8, 128], strides = [1, 1]} : vector<8x512xf32> to vector<8x128xf32>
    %922 = math.tanh %921 : vector<8x128xf32>
    %923 = vector.extract_strided_slice %908 {offsets = [0, 384], sizes = [8, 128], strides = [1, 1]} : vector<8x512xf32> to vector<8x128xf32>
    %924 = arith.negf %923 : vector<8x128xf32>
    %925 = math.exp %924 : vector<8x128xf32>
    %cst_232 = arith.constant 1.000000e+00 : f32
    %926 = vector.broadcast %cst_232 : f32 to vector<8x128xf32>
    %927 = arith.addf %926, %925 : vector<8x128xf32>
    %928 = arith.divf %926, %927 : vector<8x128xf32>
    %929 = arith.mulf %920, %869 : vector<8x128xf32>
    %930 = arith.mulf %914, %922 : vector<8x128xf32>
    %931 = arith.addf %929, %930 : vector<8x128xf32>
    %932 = math.tanh %931 : vector<8x128xf32>
    %933 = arith.mulf %928, %932 : vector<8x128xf32>
    %934 = arith.addf %872, %933 : vector<8x128xf32>
    %c8_i32_233 = arith.constant 8 : i32
    %935 = arith.muli %c6_i32_227, %c8_i32_233 : i32
    %936 = tpu.assume_multiple %935, 8 : i32
    %937 = arith.index_cast %936 : i32 to index
    %c0_234 = arith.constant 0 : index
    %938 = vector.load %arg18[%937, %c0_234] : memref<64x512xf32, #tpu.memory_space<vmem>>, vector<8x512xf32>
    %cst_235 = arith.constant dense<0.000000e+00> : vector<8x512xf32>
    %939 = tpu.matmul %903, %564, %cst_235 {dimension_numbers = #tpu.dot_dimension_numbers<[1], [0], [0], [1], [0, 0, 1, 1], [], []>} : vector<8x128xf32>, vector<128x512xf32>, vector<8x512xf32> -> vector<8x512xf32>
    %940 = arith.addf %938, %939 : vector<8x512xf32>
    %941 = vector.extract_strided_slice %940 {offsets = [0, 0], sizes = [8, 128], strides = [1, 1]} : vector<8x512xf32> to vector<8x128xf32>
    %942 = arith.negf %941 : vector<8x128xf32>
    %943 = math.exp %942 : vector<8x128xf32>
    %cst_236 = arith.constant 1.000000e+00 : f32
    %944 = vector.broadcast %cst_236 : f32 to vector<8x128xf32>
    %945 = arith.addf %944, %943 : vector<8x128xf32>
    %946 = arith.divf %944, %945 : vector<8x128xf32>
    %947 = vector.extract_strided_slice %940 {offsets = [0, 128], sizes = [8, 128], strides = [1, 1]} : vector<8x512xf32> to vector<8x128xf32>
    %948 = arith.negf %947 : vector<8x128xf32>
    %949 = math.exp %948 : vector<8x128xf32>
    %cst_237 = arith.constant 1.000000e+00 : f32
    %950 = vector.broadcast %cst_237 : f32 to vector<8x128xf32>
    %951 = arith.addf %950, %949 : vector<8x128xf32>
    %952 = arith.divf %950, %951 : vector<8x128xf32>
    %953 = vector.extract_strided_slice %940 {offsets = [0, 256], sizes = [8, 128], strides = [1, 1]} : vector<8x512xf32> to vector<8x128xf32>
    %954 = math.tanh %953 : vector<8x128xf32>
    %955 = vector.extract_strided_slice %940 {offsets = [0, 384], sizes = [8, 128], strides = [1, 1]} : vector<8x512xf32> to vector<8x128xf32>
    %956 = arith.negf %955 : vector<8x128xf32>
    %957 = math.exp %956 : vector<8x128xf32>
    %cst_238 = arith.constant 1.000000e+00 : f32
    %958 = vector.broadcast %cst_238 : f32 to vector<8x128xf32>
    %959 = arith.addf %958, %957 : vector<8x128xf32>
    %960 = arith.divf %958, %959 : vector<8x128xf32>
    %961 = arith.mulf %952, %901 : vector<8x128xf32>
    %962 = arith.mulf %946, %954 : vector<8x128xf32>
    %963 = arith.addf %961, %962 : vector<8x128xf32>
    %964 = math.tanh %963 : vector<8x128xf32>
    %965 = arith.mulf %960, %964 : vector<8x128xf32>
    %c7_i32_239 = arith.constant 7 : i32
    %cst_240 = arith.constant dense<0.000000e+00> : vector<8x512xf32>
    %966 = tpu.matmul %965, %565, %cst_240 {dimension_numbers = #tpu.dot_dimension_numbers<[1], [0], [0], [1], [0, 0, 1, 1], [], []>} : vector<8x128xf32>, vector<128x512xf32>, vector<8x512xf32> -> vector<8x512xf32>
    %967 = vector.broadcast %567 : vector<1x512xf32> to vector<8x512xf32>
    %968 = arith.addf %966, %967 : vector<8x512xf32>
    %cst_241 = arith.constant dense<0.000000e+00> : vector<8x512xf32>
    %969 = tpu.matmul %933, %566, %cst_241 {dimension_numbers = #tpu.dot_dimension_numbers<[1], [0], [0], [1], [0, 0, 1, 1], [], []>} : vector<8x128xf32>, vector<128x512xf32>, vector<8x512xf32> -> vector<8x512xf32>
    %970 = arith.addf %968, %969 : vector<8x512xf32>
    %971 = vector.extract_strided_slice %970 {offsets = [0, 0], sizes = [8, 128], strides = [1, 1]} : vector<8x512xf32> to vector<8x128xf32>
    %972 = arith.negf %971 : vector<8x128xf32>
    %973 = math.exp %972 : vector<8x128xf32>
    %cst_242 = arith.constant 1.000000e+00 : f32
    %974 = vector.broadcast %cst_242 : f32 to vector<8x128xf32>
    %975 = arith.addf %974, %973 : vector<8x128xf32>
    %976 = arith.divf %974, %975 : vector<8x128xf32>
    %977 = vector.extract_strided_slice %970 {offsets = [0, 128], sizes = [8, 128], strides = [1, 1]} : vector<8x512xf32> to vector<8x128xf32>
    %978 = arith.negf %977 : vector<8x128xf32>
    %979 = math.exp %978 : vector<8x128xf32>
    %cst_243 = arith.constant 1.000000e+00 : f32
    %980 = vector.broadcast %cst_243 : f32 to vector<8x128xf32>
    %981 = arith.addf %980, %979 : vector<8x128xf32>
    %982 = arith.divf %980, %981 : vector<8x128xf32>
    %983 = vector.extract_strided_slice %970 {offsets = [0, 256], sizes = [8, 128], strides = [1, 1]} : vector<8x512xf32> to vector<8x128xf32>
    %984 = math.tanh %983 : vector<8x128xf32>
    %985 = vector.extract_strided_slice %970 {offsets = [0, 384], sizes = [8, 128], strides = [1, 1]} : vector<8x512xf32> to vector<8x128xf32>
    %986 = arith.negf %985 : vector<8x128xf32>
    %987 = math.exp %986 : vector<8x128xf32>
    %cst_244 = arith.constant 1.000000e+00 : f32
    %988 = vector.broadcast %cst_244 : f32 to vector<8x128xf32>
    %989 = arith.addf %988, %987 : vector<8x128xf32>
    %990 = arith.divf %988, %989 : vector<8x128xf32>
    %991 = arith.mulf %982, %931 : vector<8x128xf32>
    %992 = arith.mulf %976, %984 : vector<8x128xf32>
    %993 = arith.addf %991, %992 : vector<8x128xf32>
    %994 = math.tanh %993 : vector<8x128xf32>
    %995 = arith.mulf %990, %994 : vector<8x128xf32>
    %996 = arith.addf %934, %995 : vector<8x128xf32>
    %c8_i32_245 = arith.constant 8 : i32
    %997 = arith.muli %c7_i32_239, %c8_i32_245 : i32
    %998 = tpu.assume_multiple %997, 8 : i32
    %999 = arith.index_cast %998 : i32 to index
    %c0_246 = arith.constant 0 : index
    %1000 = vector.load %arg18[%999, %c0_246] : memref<64x512xf32, #tpu.memory_space<vmem>>, vector<8x512xf32>
    %cst_247 = arith.constant dense<0.000000e+00> : vector<8x512xf32>
    %1001 = tpu.matmul %965, %564, %cst_247 {dimension_numbers = #tpu.dot_dimension_numbers<[1], [0], [0], [1], [0, 0, 1, 1], [], []>} : vector<8x128xf32>, vector<128x512xf32>, vector<8x512xf32> -> vector<8x512xf32>
    %1002 = arith.addf %1000, %1001 : vector<8x512xf32>
    %1003 = vector.extract_strided_slice %1002 {offsets = [0, 0], sizes = [8, 128], strides = [1, 1]} : vector<8x512xf32> to vector<8x128xf32>
    %1004 = arith.negf %1003 : vector<8x128xf32>
    %1005 = math.exp %1004 : vector<8x128xf32>
    %cst_248 = arith.constant 1.000000e+00 : f32
    %1006 = vector.broadcast %cst_248 : f32 to vector<8x128xf32>
    %1007 = arith.addf %1006, %1005 : vector<8x128xf32>
    %1008 = arith.divf %1006, %1007 : vector<8x128xf32>
    %1009 = vector.extract_strided_slice %1002 {offsets = [0, 128], sizes = [8, 128], strides = [1, 1]} : vector<8x512xf32> to vector<8x128xf32>
    %1010 = arith.negf %1009 : vector<8x128xf32>
    %1011 = math.exp %1010 : vector<8x128xf32>
    %cst_249 = arith.constant 1.000000e+00 : f32
    %1012 = vector.broadcast %cst_249 : f32 to vector<8x128xf32>
    %1013 = arith.addf %1012, %1011 : vector<8x128xf32>
    %1014 = arith.divf %1012, %1013 : vector<8x128xf32>
    %1015 = vector.extract_strided_slice %1002 {offsets = [0, 256], sizes = [8, 128], strides = [1, 1]} : vector<8x512xf32> to vector<8x128xf32>
    %1016 = math.tanh %1015 : vector<8x128xf32>
    %1017 = vector.extract_strided_slice %1002 {offsets = [0, 384], sizes = [8, 128], strides = [1, 1]} : vector<8x512xf32> to vector<8x128xf32>
    %1018 = arith.negf %1017 : vector<8x128xf32>
    %1019 = math.exp %1018 : vector<8x128xf32>
    %cst_250 = arith.constant 1.000000e+00 : f32
    %1020 = vector.broadcast %cst_250 : f32 to vector<8x128xf32>
    %1021 = arith.addf %1020, %1019 : vector<8x128xf32>
    %1022 = arith.divf %1020, %1021 : vector<8x128xf32>
    %1023 = arith.mulf %1014, %963 : vector<8x128xf32>
    %1024 = arith.mulf %1008, %1016 : vector<8x128xf32>
    %1025 = arith.addf %1023, %1024 : vector<8x128xf32>
    %1026 = math.tanh %1025 : vector<8x128xf32>
    %1027 = arith.mulf %1022, %1026 : vector<8x128xf32>
    %c7_i32_251 = arith.constant 7 : i32
    %cst_252 = arith.constant dense<0.000000e+00> : vector<8x512xf32>
    %1028 = tpu.matmul %1027, %565, %cst_252 {dimension_numbers = #tpu.dot_dimension_numbers<[1], [0], [0], [1], [0, 0, 1, 1], [], []>} : vector<8x128xf32>, vector<128x512xf32>, vector<8x512xf32> -> vector<8x512xf32>
    %1029 = vector.broadcast %567 : vector<1x512xf32> to vector<8x512xf32>
    %1030 = arith.addf %1028, %1029 : vector<8x512xf32>
    %cst_253 = arith.constant dense<0.000000e+00> : vector<8x512xf32>
    %1031 = tpu.matmul %995, %566, %cst_253 {dimension_numbers = #tpu.dot_dimension_numbers<[1], [0], [0], [1], [0, 0, 1, 1], [], []>} : vector<8x128xf32>, vector<128x512xf32>, vector<8x512xf32> -> vector<8x512xf32>
    %1032 = arith.addf %1030, %1031 : vector<8x512xf32>
    %1033 = vector.extract_strided_slice %1032 {offsets = [0, 0], sizes = [8, 128], strides = [1, 1]} : vector<8x512xf32> to vector<8x128xf32>
    %1034 = arith.negf %1033 : vector<8x128xf32>
    %1035 = math.exp %1034 : vector<8x128xf32>
    %cst_254 = arith.constant 1.000000e+00 : f32
    %1036 = vector.broadcast %cst_254 : f32 to vector<8x128xf32>
    %1037 = arith.addf %1036, %1035 : vector<8x128xf32>
    %1038 = arith.divf %1036, %1037 : vector<8x128xf32>
    %1039 = vector.extract_strided_slice %1032 {offsets = [0, 128], sizes = [8, 128], strides = [1, 1]} : vector<8x512xf32> to vector<8x128xf32>
    %1040 = arith.negf %1039 : vector<8x128xf32>
    %1041 = math.exp %1040 : vector<8x128xf32>
    %cst_255 = arith.constant 1.000000e+00 : f32
    %1042 = vector.broadcast %cst_255 : f32 to vector<8x128xf32>
    %1043 = arith.addf %1042, %1041 : vector<8x128xf32>
    %1044 = arith.divf %1042, %1043 : vector<8x128xf32>
    %1045 = vector.extract_strided_slice %1032 {offsets = [0, 256], sizes = [8, 128], strides = [1, 1]} : vector<8x512xf32> to vector<8x128xf32>
    %1046 = math.tanh %1045 : vector<8x128xf32>
    %1047 = vector.extract_strided_slice %1032 {offsets = [0, 384], sizes = [8, 128], strides = [1, 1]} : vector<8x512xf32> to vector<8x128xf32>
    %1048 = arith.negf %1047 : vector<8x128xf32>
    %1049 = math.exp %1048 : vector<8x128xf32>
    %cst_256 = arith.constant 1.000000e+00 : f32
    %1050 = vector.broadcast %cst_256 : f32 to vector<8x128xf32>
    %1051 = arith.addf %1050, %1049 : vector<8x128xf32>
    %1052 = arith.divf %1050, %1051 : vector<8x128xf32>
    %1053 = arith.mulf %1044, %993 : vector<8x128xf32>
    %1054 = arith.mulf %1038, %1046 : vector<8x128xf32>
    %1055 = arith.addf %1053, %1054 : vector<8x128xf32>
    %1056 = math.tanh %1055 : vector<8x128xf32>
    %1057 = arith.mulf %1052, %1056 : vector<8x128xf32>
    %1058 = arith.addf %996, %1057 : vector<8x128xf32>
    %c0_257 = arith.constant 0 : index
    %c0_258 = arith.constant 0 : index
    %1059 = vector.load %arg15[%c0_257, %c0_258] : memref<128x128xf32, #tpu.memory_space<vmem>>, vector<128x128xf32>
    %cst_259 = arith.constant dense<0.000000e+00> : vector<8x128xf32>
    %1060 = tpu.matmul %1058, %1059, %cst_259 {dimension_numbers = #tpu.dot_dimension_numbers<[1], [0], [0], [1], [0, 0, 1, 1], [], []>} : vector<8x128xf32>, vector<128x128xf32>, vector<8x128xf32> -> vector<8x128xf32>
    %c0_260 = arith.constant 0 : index
    %c0_261 = arith.constant 0 : index
    %1061 = vector.load %arg16[%c0_260, %c0_261] : memref<1x128xf32, #tpu.memory_space<vmem>>, vector<1x128xf32>
    %1062 = vector.broadcast %1061 : vector<1x128xf32> to vector<8x128xf32>
    %1063 = arith.addf %1060, %1062 : vector<8x128xf32>
    %c0_262 = arith.constant 0 : index
    %c0_263 = arith.constant 0 : index
    %1064 = vector.load %arg17[%c0_262, %c0_263] : memref<8x128xf32, #tpu.memory_space<vmem>>, vector<8x128xf32>
    tpu.vector_store %arg17[%c0_262, %c0_263], %1063 {strides = array<i32>} : memref<8x128xf32, #tpu.memory_space<vmem>>, vector<8x128xf32>,
    return
  }
  func.func @transform_0(%arg0: i32) -> (i32, i32, i32) {
    %c0_i32 = arith.constant 0 : i32
    %c0_i32_0 = arith.constant 0 : i32
    %c0_i32_1 = arith.constant 0 : i32
    return %arg0, %c0_i32, %c0_i32_0 : i32, i32, i32
  }
  func.func @transform_1(%arg0: i32) -> (i32, i32) {
    %c0_i32 = arith.constant 0 : i32
    %c0_i32_0 = arith.constant 0 : i32
    %c0_i32_1 = arith.constant 0 : i32
    return %c0_i32, %c0_i32_0 : i32, i32
  }
  func.func @transform_2(%arg0: i32) -> (i32, i32) {
    %c0_i32 = arith.constant 0 : i32
    %c0_i32_0 = arith.constant 0 : i32
    %c0_i32_1 = arith.constant 0 : i32
    return %c0_i32, %c0_i32_0 : i32, i32
  }
  func.func @transform_3(%arg0: i32) -> (i32, i32) {
    %c0_i32 = arith.constant 0 : i32
    %c0_i32_0 = arith.constant 0 : i32
    %c0_i32_1 = arith.constant 0 : i32
    return %c0_i32, %c0_i32_0 : i32, i32
  }
  func.func @transform_4(%arg0: i32) -> (i32, i32) {
    %c0_i32 = arith.constant 0 : i32
    %c0_i32_0 = arith.constant 0 : i32
    %c0_i32_1 = arith.constant 0 : i32
    return %c0_i32, %c0_i32_0 : i32, i32
  }
  func.func @transform_5(%arg0: i32) -> (i32, i32) {
    %c0_i32 = arith.constant 0 : i32
    %c0_i32_0 = arith.constant 0 : i32
    %c0_i32_1 = arith.constant 0 : i32
    return %c0_i32, %c0_i32_0 : i32, i32
  }
  func.func @transform_6(%arg0: i32) -> (i32, i32) {
    %c0_i32 = arith.constant 0 : i32
    %c0_i32_0 = arith.constant 0 : i32
    %c0_i32_1 = arith.constant 0 : i32
    return %c0_i32, %c0_i32_0 : i32, i32
  }
  func.func @transform_7(%arg0: i32) -> (i32, i32) {
    %c0_i32 = arith.constant 0 : i32
    %c0_i32_0 = arith.constant 0 : i32
    %c0_i32_1 = arith.constant 0 : i32
    return %c0_i32, %c0_i32_0 : i32, i32
  }
  func.func @transform_8(%arg0: i32) -> (i32, i32) {
    %c0_i32 = arith.constant 0 : i32
    %c0_i32_0 = arith.constant 0 : i32
    %c0_i32_1 = arith.constant 0 : i32
    return %c0_i32, %c0_i32_0 : i32, i32
  }
  func.func @transform_9(%arg0: i32) -> (i32, i32) {
    %c0_i32 = arith.constant 0 : i32
    %c0_i32_0 = arith.constant 0 : i32
    %c0_i32_1 = arith.constant 0 : i32
    return %c0_i32, %c0_i32_0 : i32, i32
  }
  func.func @transform_10(%arg0: i32) -> (i32, i32) {
    %c0_i32 = arith.constant 0 : i32
    %c0_i32_0 = arith.constant 0 : i32
    %c0_i32_1 = arith.constant 0 : i32
    return %c0_i32, %c0_i32_0 : i32, i32
  }
  func.func @transform_11(%arg0: i32) -> (i32, i32) {
    %c0_i32 = arith.constant 0 : i32
    %c0_i32_0 = arith.constant 0 : i32
    %c0_i32_1 = arith.constant 0 : i32
    return %c0_i32, %c0_i32_0 : i32, i32
  }
  func.func @transform_12(%arg0: i32) -> (i32, i32) {
    %c0_i32 = arith.constant 0 : i32
    %c0_i32_0 = arith.constant 0 : i32
    %c0_i32_1 = arith.constant 0 : i32
    return %c0_i32, %c0_i32_0 : i32, i32
  }
  func.func @transform_13(%arg0: i32) -> (i32, i32) {
    %c0_i32 = arith.constant 0 : i32
    %c0_i32_0 = arith.constant 0 : i32
    %c0_i32_1 = arith.constant 0 : i32
    return %c0_i32, %c0_i32_0 : i32, i32
  }
  func.func @transform_14(%arg0: i32) -> (i32, i32) {
    %c0_i32 = arith.constant 0 : i32
    %c0_i32_0 = arith.constant 0 : i32
    %c0_i32_1 = arith.constant 0 : i32
    return %c0_i32, %c0_i32_0 : i32, i32
  }
  func.func @transform_15(%arg0: i32) -> (i32, i32) {
    %c0_i32 = arith.constant 0 : i32
    %c0_i32_0 = arith.constant 0 : i32
    %c0_i32_1 = arith.constant 0 : i32
    return %c0_i32, %c0_i32_0 : i32, i32
  }
  func.func @transform_16(%arg0: i32) -> (i32, i32) {
    %c0_i32 = arith.constant 0 : i32
    %c0_i32_0 = arith.constant 0 : i32
    return %arg0, %c0_i32 : i32, i32
  }
}

</mosaic_0001>

<bundles_post_ra>
// kernel: model_forward.1
= control target key start
LH: loop header
LB: loop body
LE: loop exit
PB: predicated region body
PF: predicated region fallthrough
CT: control target
= control target key end

     0   :  { %s15092_s0 = inlined_call_operand.vmem [shape: f32[1,64,8], index: 0, kind: input, shape index: {}]   ;;  %s15093_s1 = inlined_call_operand.hbm [shape: f32[8,512], index: 1, kind: input, shape index: {}]   ;;  %s15094_s2 = inlined_call_operand.hbm [shape: f32[128,512], index: 2, kind: input, shape index: {}]   ;;  %s15095_s3 = inlined_call_operand.hbm [shape: f32[1,512], index: 3, kind: input, shape index: {}]   ;;  %s15096_s4 = inlined_call_operand.hbm [shape: f32[8,512], index: 4, kind: input, shape index: {}]   ;;  %s15097_s5 = inlined_call_operand.hbm [shape: f32[128,512], index: 5, kind: input, shape index: {}]   ;;  %s15098_s6 = inlined_call_operand.hbm [shape: f32[1,512], index: 6, kind: input, shape index: {}]   ;;  %s15099_s7 = inlined_call_operand.hbm [shape: f32[128,512], index: 7, kind: input, shape index: {}]   ;;  %s15100_s8 = inlined_call_operand.hbm [shape: f32[128,512], index: 8, kind: input, shape index: {}]   ;;  %s15101_s9 = inlined_call_operand.hbm [shape: f32[128,512], index: 9, kind: input, shape index: {}]   ;;  %s15102_s10 = inlined_call_operand.hbm [shape: f32[1,512], index: 10, kind: input, shape index: {}]   ;;  %s15103_s11 = inlined_call_operand.hbm [shape: f32[128,512], index: 11, kind: input, shape index: {}]   ;;  %s15104_s12 = inlined_call_operand.hbm [shape: f32[128,512], index: 12, kind: input, shape index: {}]   ;;  %s15105_s13 = inlined_call_operand.vmem [shape: f32[1,512], index: 13, kind: input, shape index: {}]   ;;  %s15106_s14 = inlined_call_operand.vmem [shape: f32[128,128], index: 14, kind: input, shape index: {}]   ;;  %s15107_s15 = inlined_call_operand.vmem [shape: f32[1,128], index: 15, kind: input, shape index: {}]   ;;  %s15108_s16 = inlined_call_operand.vmem [shape: f32[8,128], index: 16, kind: output, shape index: {}]  }
   0x1   :  { %15431 = sst [smem:[#allocation137_spill]] %s15092_s0 }
   0x2   :  { %15432 = sst [smem:[#allocation138_spill]] %s15108_s16 }
   0x3   :  { %21 = vsyncpa [#allocation7], 0 }
   0x4   :  { %22 = vsyncpa [#allocation9], 0 }
   0x5   :  { %23 = vsyncpa [#allocation12], 0 }
   0x6   :  { %24 = vsyncpa [#allocation15], 0 }
   0x7   :  { %25 = vsyncpa [#allocation18], 0 }
   0x8   :  { %26 = vsyncpa [#allocation21], 0 }
   0x9   :  { %27 = vsyncpa [#allocation24], 0  ;;  %s12472_s21 = smov [#allocation8]   ;;  %s12194_s25 = scalar_lea.hbm %s15094_s2, 8192 }
   0xa   :  { %s45_s22 = sshll.u32 %s12472_s21, 4  ;;  %p12195_p0 = scmp.ne.s32.totalorder %s15094_s2, %s12194_s25  ;;  %s46_s22 = int_to_ptr.vmem [resolvable:$true] %s45_s22 }
   0xb   :  { %p12198_p1 = scmp.lt.u32.totalorder %s12194_s25, %s15094_s2 }
   0xd   :  { %p12200_p2 = pnand %p12198_p1, %p12195_p0 }
   0xf   :  { %12203 = shalt.err (!%p12200_p2)
}
  0x10   :  { %s12204_s30 = scalar_lea.vmem %s46_s22, 8192  ;;  %p12209_p4 = scmp.lt.s32.totalorder %s46_s22, %s46_s22 }
  0x11   :  { %p12205_p3 = scmp.ne.s32.totalorder %s46_s22, %s12204_s30  ;;  %p12210_p5 = scmp.lt.s32.totalorder %s12204_s30, %s12204_s30 }
  0x13   :  { %p12211_p6 = por %p12210_p5, %p12209_p4 }
  0x15   :  { %p12212_p7 = pnand %p12211_p6, %p12205_p3 }
  0x17   :  { %12215 = shalt.err (!%p12212_p7)
}
  0x18   :  { %s12473_s0 = smov 512   ;;  %s12474_s17 = smov 32  }
  0x19   :  { %51 = dma.hbm_to_vmem [thread:$0]  %s15094_s2, 8192, %s46_s22, [#allocation9], %s12473_s0, %s12473_s0, %s12474_s17  }
  0x1a   :  { %s12475_s20 = smov [#allocation11]   ;;  %s12476_s23 = smov [#allocation14]  }
  0x1b   :  { %s68_s21 = sshll.u32 %s12475_s20, 4  ;;  %s90_s24 = sshll.u32 %s12476_s23, 4  ;;  %s69_s21 = int_to_ptr.vmem [resolvable:$true] %s68_s21  ;;  %s91_s24 = int_to_ptr.vmem [resolvable:$true] %s90_s24 }
  0x1c   :  { %s12216_s27 = scalar_lea.hbm %s15096_s4, 512 }
  0x1d   :  { %p12217_p8 = scmp.ne.s32.totalorder %s15096_s4, %s12216_s27  ;;  %p12220_p9 = scmp.lt.u32.totalorder %s12216_s27, %s15096_s4 }
  0x1f   :  { %p12222_p10 = pnand %p12220_p9, %p12217_p8 }
  0x21   :  { %12225 = shalt.err (!%p12222_p10)
}
  0x22   :  { %s12226_s2 = scalar_lea.vmem %s69_s21, 512  ;;  %p12231_p12 = scmp.lt.s32.totalorder %s69_s21, %s69_s21 }
  0x23   :  { %p12227_p11 = scmp.ne.s32.totalorder %s69_s21, %s12226_s2  ;;  %p12232_p13 = scmp.lt.s32.totalorder %s12226_s2, %s12226_s2 }
  0x25   :  { %p12233_p0 = por %p12232_p13, %p12231_p12 }
  0x27   :  { %p12234_p1 = pnand %p12233_p0, %p12227_p11 }
  0x29   :  { %12237 = shalt.err (!%p12234_p1)
}
  0x2a   :  { %71 = dma.hbm_to_vmem [thread:$0]  %s15096_s4, 512, %s69_s21, [#allocation12]  }
  0x2b   :  { %s12238_s23 = scalar_lea.hbm %s15098_s6, 64 }
  0x2c   :  { %p12239_p2 = scmp.ne.s32.totalorder %s15098_s6, %s12238_s23  ;;  %p12242_p3 = scmp.lt.u32.totalorder %s12238_s23, %s15098_s6 }
  0x2e   :  { %p12244_p4 = pnand %p12242_p3, %p12239_p2 }
  0x30   :  { %12247 = shalt.err (!%p12244_p4)
}
  0x31   :  { %s12248_s28 = scalar_lea.vmem %s91_s24, 64  ;;  %p12253_p6 = scmp.lt.s32.totalorder %s91_s24, %s91_s24 }
  0x32   :  { %p12249_p5 = scmp.ne.s32.totalorder %s91_s24, %s12248_s28  ;;  %p12254_p7 = scmp.lt.s32.totalorder %s12248_s28, %s12248_s28 }
  0x34   :  { %p12255_p8 = por %p12254_p7, %p12253_p6 }
  0x36   :  { %p12256_p9 = pnand %p12255_p8, %p12249_p5 }
  0x38   :  { %12259 = shalt.err (!%p12256_p9)
}
  0x39   :  { %93 = dma.hbm_to_vmem [thread:$0]  %s15098_s6, 64, %s91_s24, [#allocation15]  }
  0x3a   :  { %s12477_s29 = smov [#allocation17]   ;;  %s12478_s2 = smov [#allocation20]  }
  0x3b   :  { %s111_s30 = sshll.u32 %s12477_s29, 4  ;;  %s136_s22 = sshll.u32 %s12478_s2, 4  ;;  %s112_s30 = int_to_ptr.vmem [resolvable:$true] %s111_s30  ;;  %s137_s22 = int_to_ptr.vmem [resolvable:$true] %s136_s22 }
  0x3c   :  { %s12260_s20 = scalar_lea.hbm %s15100_s8, 8192 }
  0x3d   :  { %p12261_p10 = scmp.ne.s32.totalorder %s15100_s8, %s12260_s20  ;;  %p12264_p11 = scmp.lt.u32.totalorder %s12260_s20, %s15100_s8 }
  0x3f   :  { %p12266_p12 = pnand %p12264_p11, %p12261_p10 }
  0x41   :  { %12269 = shalt.err (!%p12266_p12)
}
  0x42   :  { %s12270_s6 = scalar_lea.vmem %s112_s30, 8192  ;;  %p12275_p0 = scmp.lt.s32.totalorder %s112_s30, %s112_s30 }
  0x43   :  { %p12271_p13 = scmp.ne.s32.totalorder %s112_s30, %s12270_s6  ;;  %p12276_p1 = scmp.lt.s32.totalorder %s12270_s6, %s12270_s6 }
  0x45   :  { %p12277_p2 = por %p12276_p1, %p12275_p0 }
  0x47   :  { %p12278_p3 = pnand %p12277_p2, %p12271_p13 }
  0x49   :  { %12281 = shalt.err (!%p12278_p3)
}
  0x4a   :  { %117 = dma.hbm_to_vmem [thread:$0]  %s15100_s8, 8192, %s112_s30, [#allocation18], %s12473_s0, %s12473_s0, %s12474_s17  }
  0x4b   :  { %s12282_s21 = scalar_lea.hbm %s15102_s10, 64 }
  0x4c   :  { %p12283_p4 = scmp.ne.s32.totalorder %s15102_s10, %s12282_s21  ;;  %p12286_p5 = scmp.lt.u32.totalorder %s12282_s21, %s15102_s10 }
  0x4e   :  { %p12288_p6 = pnand %p12286_p5, %p12283_p4 }
  0x50   :  { %12291 = shalt.err (!%p12288_p6)
}
  0x51   :  { %s12292_s20 = scalar_lea.vmem %s137_s22, 64  ;;  %p12297_p8 = scmp.lt.s32.totalorder %s137_s22, %s137_s22 }
  0x52   :  { %p12293_p7 = scmp.ne.s32.totalorder %s137_s22, %s12292_s20  ;;  %p12298_p9 = scmp.lt.s32.totalorder %s12292_s20, %s12292_s20 }
  0x54   :  { %p12299_p10 = por %p12298_p9, %p12297_p8 }
  0x56   :  { %p12300_p11 = pnand %p12299_p10, %p12293_p7 }
  0x58   :  { %12303 = shalt.err (!%p12300_p11)
}
  0x59   :  { %139 = dma.hbm_to_vmem [thread:$0]  %s15102_s10, 64, %s137_s22, [#allocation21]  }
  0x5a   :  { %s12479_s23 = smov [#allocation6]   ;;  %s12480_s25 = smov [#allocation10]  }
  0x5b   :  { %s36_s16 = sshll.u32 %s12479_s23, 4  ;;  %s58_s26 = sshll.u32 %s12480_s25, 4  ;;  %s37_s16 = int_to_ptr.vmem [resolvable:$true] %s36_s16  ;;  %s59_s26 = int_to_ptr.vmem [resolvable:$true] %s58_s26 }
  0x5c   :  { %s12304_s27 = scalar_lea.hbm %s15093_s1, 512 }
  0x5d   :  { %p12305_p12 = scmp.ne.s32.totalorder %s15093_s1, %s12304_s27  ;;  %p12308_p13 = scmp.lt.u32.totalorder %s12304_s27, %s15093_s1 }
  0x5f   :  { %p12310_p0 = pnand %p12308_p13, %p12305_p12 }
  0x61   :  { %12313 = shalt.err (!%p12310_p0)
}
  0x62   :  { %s12314_s10 = scalar_lea.vmem %s37_s16, 512  ;;  %p12319_p2 = scmp.lt.s32.totalorder %s37_s16, %s37_s16 }
  0x63   :  { %p12315_p1 = scmp.ne.s32.totalorder %s37_s16, %s12314_s10  ;;  %p12320_p3 = scmp.lt.s32.totalorder %s12314_s10, %s12314_s10 }
  0x65   :  { %p12321_p4 = por %p12320_p3, %p12319_p2 }
  0x67   :  { %p12322_p5 = pnand %p12321_p4, %p12315_p1 }
  0x69   :  { %12325 = shalt.err (!%p12322_p5)
}
  0x6a   :  { %39 = dma.hbm_to_vmem [thread:$0]  %s15093_s1, 512, %s37_s16, [#allocation7]  }
  0x6b   :  { %s12326_s20 = scalar_lea.hbm %s15095_s3, 64 }
  0x6c   :  { %p12327_p6 = scmp.ne.s32.totalorder %s15095_s3, %s12326_s20  ;;  %p12330_p7 = scmp.lt.u32.totalorder %s12326_s20, %s15095_s3 }
  0x6e   :  { %p12332_p8 = pnand %p12330_p7, %p12327_p6 }
  0x70   :  { %12335 = shalt.err (!%p12332_p8)
}
  0x71   :  { %s12336_s6 = scalar_lea.vmem %s59_s26, 64  ;;  %p12341_p10 = scmp.lt.s32.totalorder %s59_s26, %s59_s26 }
  0x72   :  { %p12337_p9 = scmp.ne.s32.totalorder %s59_s26, %s12336_s6  ;;  %p12342_p11 = scmp.lt.s32.totalorder %s12336_s6, %s12336_s6 }
  0x74   :  { %p12343_p12 = por %p12342_p11, %p12341_p10 }
  0x76   :  { %p12344_p13 = pnand %p12343_p12, %p12337_p9 }
  0x78   :  { %12347 = shalt.err (!%p12344_p13)
}
  0x79   :  { %61 = dma.hbm_to_vmem [thread:$0]  %s15095_s3, 64, %s59_s26, [#allocation9]  }
  0x7a   :  { %s12481_s24 = smov [#allocation13]   ;;  %s12482_s28 = smov [#allocation16]  }
  0x7b   :  { %s77_s27 = sshll.u32 %s12481_s24, 4  ;;  %s99_s4 = sshll.u32 %s12482_s28, 4  ;;  %s78_s27 = int_to_ptr.vmem [resolvable:$true] %s77_s27  ;;  %s100_s4 = int_to_ptr.vmem [resolvable:$true] %s99_s4 }
  0x7c   :  { %s12348_s10 = scalar_lea.hbm %s15097_s5, 8192 }
  0x7d   :  { %p12349_p0 = scmp.ne.s32.totalorder %s15097_s5, %s12348_s10  ;;  %p12352_p1 = scmp.lt.u32.totalorder %s12348_s10, %s15097_s5 }
  0x7f   :  { %p12354_p2 = pnand %p12352_p1, %p12349_p0 }
  0x81   :  { %12357 = shalt.err (!%p12354_p2)
}
  0x82   :  { %s12358_s3 = scalar_lea.vmem %s78_s27, 8192  ;;  %p12363_p4 = scmp.lt.s32.totalorder %s78_s27, %s78_s27 }
  0x83   :  { %p12359_p3 = scmp.ne.s32.totalorder %s78_s27, %s12358_s3  ;;  %p12364_p5 = scmp.lt.s32.totalorder %s12358_s3, %s12358_s3 }
  0x85   :  { %p12365_p6 = por %p12364_p5, %p12363_p4 }
  0x87   :  { %p12366_p7 = pnand %p12365_p6, %p12359_p3 }
  0x89   :  { %12369 = shalt.err (!%p12366_p7)
}
  0x8a   :  { %83 = dma.hbm_to_vmem [thread:$0]  %s15097_s5, 8192, %s78_s27, [#allocation12], %s12473_s0, %s12473_s0, %s12474_s17  }
  0x8b   :  { %s12370_s23 = scalar_lea.hbm %s15099_s7, 8192 }
  0x8c   :  { %p12371_p8 = scmp.ne.s32.totalorder %s15099_s7, %s12370_s23  ;;  %p12374_p9 = scmp.lt.u32.totalorder %s12370_s23, %s15099_s7 }
  0x8e   :  { %p12376_p10 = pnand %p12374_p9, %p12371_p8 }
  0x90   :  { %12379 = shalt.err (!%p12376_p10)
}
  0x91   :  { %s12380_s24 = scalar_lea.vmem %s100_s4, 8192  ;;  %p12385_p12 = scmp.lt.s32.totalorder %s100_s4, %s100_s4 }
  0x92   :  { %p12381_p11 = scmp.ne.s32.totalorder %s100_s4, %s12380_s24  ;;  %p12386_p13 = scmp.lt.s32.totalorder %s12380_s24, %s12380_s24 }
  0x94   :  { %p12387_p0 = por %p12386_p13, %p12385_p12 }
  0x96   :  { %p12388_p1 = pnand %p12387_p0, %p12381_p11 }
  0x98   :  { %12391 = shalt.err (!%p12388_p1)
}
  0x99   :  { %105 = dma.hbm_to_vmem [thread:$0]  %s15099_s7, 8192, %s100_s4, [#allocation15], %s12473_s0, %s12473_s0, %s12474_s17  }
  0x9a   :  { %s12483_s28 = smov [#allocation19]   ;;  %s12484_s29 = smov [#allocation22]  }
  0x9b   :  { %s123_s21 = sshll.u32 %s12483_s28, 4  ;;  %s145_s10 = sshll.u32 %s12484_s29, 4  ;;  %s124_s21 = int_to_ptr.vmem [resolvable:$true] %s123_s21  ;;  %s146_s10 = int_to_ptr.vmem [resolvable:$true] %s145_s10 }
  0x9c   :  { %s12392_s18 = scalar_lea.hbm %s15101_s9, 8192 }
  0x9d   :  { %p12393_p2 = scmp.ne.s32.totalorder %s15101_s9, %s12392_s18  ;;  %p12396_p3 = scmp.lt.u32.totalorder %s12392_s18, %s15101_s9 }
  0x9f   :  { %p12398_p4 = pnand %p12396_p3, %p12393_p2 }
  0xa1   :  { %12401 = shalt.err (!%p12398_p4)
}
  0xa2   :  { %s12402_s7 = scalar_lea.vmem %s124_s21, 8192  ;;  %p12407_p6 = scmp.lt.s32.totalorder %s124_s21, %s124_s21 }
  0xa3   :  { %p12403_p5 = scmp.ne.s32.totalorder %s124_s21, %s12402_s7  ;;  %p12408_p7 = scmp.lt.s32.totalorder %s12402_s7, %s12402_s7 }
  0xa5   :  { %p12409_p8 = por %p12408_p7, %p12407_p6 }
  0xa7   :  { %p12410_p9 = pnand %p12409_p8, %p12403_p5 }
  0xa9   :  { %12413 = shalt.err (!%p12410_p9)
}
  0xaa   :  { %129 = dma.hbm_to_vmem [thread:$0]  %s15101_s9, 8192, %s124_s21, [#allocation18], %s12473_s0, %s12473_s0, %s12474_s17  }
  0xab   :  { %s12414_s25 = scalar_lea.hbm %s15103_s11, 8192 }
  0xac   :  { %p12415_p10 = scmp.ne.s32.totalorder %s15103_s11, %s12414_s25  ;;  %p12418_p11 = scmp.lt.u32.totalorder %s12414_s25, %s15103_s11 }
  0xae   :  { %p12420_p12 = pnand %p12418_p11, %p12415_p10 }
  0xb0   :  { %12423 = shalt.err (!%p12420_p12)
}
  0xb1   :  { %s12424_s5 = scalar_lea.vmem %s146_s10, 8192  ;;  %p12429_p0 = scmp.lt.s32.totalorder %s146_s10, %s146_s10 }
  0xb2   :  { %p12425_p13 = scmp.ne.s32.totalorder %s146_s10, %s12424_s5  ;;  %p12430_p1 = scmp.lt.s32.totalorder %s12424_s5, %s12424_s5 }
  0xb4   :  { %p12431_p2 = por %p12430_p1, %p12429_p0 }
  0xb6   :  { %p12432_p3 = pnand %p12431_p2, %p12425_p13 }
  0xb8   :  { %12435 = shalt.err (!%p12432_p3)
}
  0xb9   :  { %151 = dma.hbm_to_vmem [thread:$0]  %s15103_s11, 8192, %s146_s10, [#allocation21], %s12473_s0, %s12473_s0, %s12474_s17  }
  0xba   :  { %s12485_s28 = smov [#allocation23]   ;;  %s12436_s2 = scalar_lea.hbm %s15104_s12, 8192 }
  0xbb   :  { %s157_s21 = sshll.u32 %s12485_s28, 4  ;;  %p12437_p4 = scmp.ne.s32.totalorder %s15104_s12, %s12436_s2  ;;  %s158_s21 = int_to_ptr.vmem [resolvable:$true] %s157_s21 }
  0xbc   :  { %p12440_p5 = scmp.lt.u32.totalorder %s12436_s2, %s15104_s12 }
  0xbe   :  { %p12442_p6 = pnand %p12440_p5, %p12437_p4 }
  0xc0   :  { %12445 = shalt.err (!%p12442_p6)
}
  0xc1   :  { %s12446_s20 = scalar_lea.vmem %s158_s21, 8192  ;;  %p12451_p8 = scmp.lt.s32.totalorder %s158_s21, %s158_s21 }
  0xc2   :  { %p12447_p7 = scmp.ne.s32.totalorder %s158_s21, %s12446_s20  ;;  %p12452_p9 = scmp.lt.s32.totalorder %s12446_s20, %s12446_s20 }
  0xc4   :  { %p12453_p10 = por %p12452_p9, %p12451_p8 }
  0xc6   :  { %p12454_p11 = pnand %p12453_p10, %p12447_p7 }
  0xc8   :  { %12457 = shalt.err (!%p12454_p11)
}
  0xc9   :  { %163 = dma.hbm_to_vmem [thread:$0]  %s15104_s12, 8192, %s158_s21, [#allocation24], %s12473_s0, %s12473_s0, %s12474_s17  }
  0xca   :  { %12458 = dma.done.wait [#allocation7], 512  }
  0xcb   :  { %12459 = vsyncadd [#allocation7], 4294966784 }
  0xcc   :  { %12460 = dma.done.wait [#allocation9], 8256  }
  0xcd   :  { %12461 = vsyncadd [#allocation9], 4294959040 }
  0xce   :  { %12462 = dma.done.wait [#allocation12], 8704  }
  0xcf   :  { %12463 = vsyncadd [#allocation12], 4294958592 }
  0xd0   :  { %12464 = dma.done.wait [#allocation15], 8256  }
  0xd1   :  { %12465 = vsyncadd [#allocation15], 4294959040 }
  0xd2   :  { %12466 = dma.done.wait [#allocation18], 16384  }
  0xd3   :  { %12467 = vsyncadd [#allocation18], 4294950912 }
  0xd4   :  { %12468 = dma.done.wait [#allocation21], 8256  }
  0xd5   :  { %12469 = vsyncadd [#allocation21], 4294959040 }
  0xd6   :  { %12470 = dma.done.wait [#allocation24], 8192  }
  0xd7   :  { %12471 = vsyncadd [#allocation24], 4294959104  ;;  %v15112_v0 = vmov 0.0   ;;  %v215_v1 = vld [vmem:[#allocation6 + $0x8] sm:$0xff]  ;;  %v214_v2 = vld [vmem:[#allocation6] sm:$0xff]  ;;  %s15433_s17 = sld [smem:[#allocation137_spill]] }
  0xd8   :  { %329 = vmatprep.mubr.f32.mxu0 %v15112_v0  ;;  %353 = vmatprep.mubr.f32.mxu1 %v15112_v0  ;;  %vm240_vm0 = vcmask 64512   ;;  %v217_v5 = vld [vmem:[#allocation6 + $0x18] sm:$0xff]  ;;  %v216_v6 = vld [vmem:[#allocation6 + $0x10] sm:$0xff]  ;;  %v808_v10 = vld [vmem:[#allocation8 + $0x8] sm:$0xff]  ;;  %vm12488_vm1 = vmmov 0   ;;  %s16152_s26 = sld [smem:[#allocation138_spill]] }
  0xd9   :  { %265 = vmatprep.subr.mxu0 %v215_v1  ;;  %11383 = vmatprep.subr.mxu1 %v215_v1  ;;  %v524_v9 = vld [vmem:[#allocation11 + $0x8] sm:$0xff]  ;;  %v526_v12 = vld [vmem:[#allocation11 + $0x18] sm:$0xff]  ;;  %v523_v13 = vld [vmem:[#allocation11] sm:$0xff] }
  0xda   :  { %266 = vmatpush1.msra.mxu0 %v214_v2  ;;  %11384 = vmatpush1.msra.mxu1 %v214_v2  ;;  %v812_v11 = vld [vmem:[#allocation8 + $0x28] sm:$0xff]  ;;  %v807_v19 = vld [vmem:[#allocation8] sm:$0xff]  ;;  %v810_v24 = vld [vmem:[#allocation8 + $0x18] sm:$0xff] }
  0xdb   :  { %378 = vmatprep.subr.mxu1 %v217_v5  ;;  %549 = vmatprep.subr.mxu0 %v524_v9  ;;  %v12767_v14 = vpack.c.bf16 %v812_v11, %v808_v10  ;;  %v811_v20 = vld [vmem:[#allocation8 + $0x20] sm:$0xff]  ;;  %v816_v21 = vld [vmem:[#allocation8 + $0x48] sm:$0xff]  ;;  %v814_v25 = vld [vmem:[#allocation8 + $0x38] sm:$0xff] }
  0xdc   :  { %v820_v22 = vld [vmem:[#allocation8 + $0x68] sm:$0xff]  ;;  %v12808_v23 = vpack.c.bf16 %v811_v20, %v807_v19  ;;  %v525_v26 = vld [vmem:[#allocation11 + $0x10] sm:$0xff]  ;;  %v815_v27 = vld [vmem:[#allocation8 + $0x40] sm:$0xff]  ;;  %v12812_v32 = vpack.c.bf16 %v814_v25, %v810_v24 }
  0xdd   :  { %v12744_v3 = vld [vmem:[%s15433_s17] sm:$0xff]  ;;  %v12758_v7 = vld [vmem:[%s15433_s17 + $0x8] sm:$0xff]  ;;  %v12778_v15 = vld [vmem:[%s15433_s17 + $0x10] sm:$0xff]  ;;  %v12810_v29 = vpack.c.bf16 %v820_v22, %v816_v21 }
  0xde   :  { %v12749_v4 = vld [vmem:[%s15433_s17 + $0x20] sm:$0xff]  ;;  %8554 = vmatmul.mubr.msk.f32.vlgmr.msra.gmra.mrb[0].mxu0 %vm240_vm0, %v12744_v3  ;;  %v12764_v8 = vld [vmem:[%s15433_s17 + $0x28] sm:$0xff]  ;;  %v12783_v16 = vld [vmem:[%s15433_s17 + $0x30] sm:$0xff] }
  0xdf   :  { %8558 = vmatmul.mubr.msk.f32.vlgmr.msra.gmra.mrb[0].mxu1 %vm240_vm0, %v12749_v4  ;;  %335 = vmatprep.mubr.f32.mxu0 %v15112_v0  ;;  %v12795_v17 = vld [vmem:[%s15433_s17 + $0x18] sm:$0xff]  ;;  %v819_v28 = vld [vmem:[#allocation8 + $0x60] sm:$0xff]  ;;  %15434 = vst [vmem:[#allocation32_spill] sm:$0xff] %v12810_v29  ;;  %v824_v30 = vld [vmem:[#allocation8 + $0x88] sm:$0xff] }
  0xe0   :  { %379 = vmatpush1.msra.mxu1 %v216_v6  ;;  %359 = vmatprep.mubr.f32.mxu1 %v15112_v0  ;;  %v12800_v18 = vld [vmem:[%s15433_s17 + $0x38] sm:$0xff]  ;;  %v828_v31 = vld [vmem:[#allocation8 + $0xa8] sm:$0xff]  ;;  %v12819_v33 = vpack.c.bf16 %v819_v28, %v815_v27  ;;  %v823_v35 = vld [vmem:[#allocation8 + $0x80] sm:$0xff] }
  0xe1   :  { %662 = vmatprep.subr.mxu1 %v526_v12  ;;  %550 = vmatpush1.msra.mxu0 %v523_v13  ;;  %v12823_v34 = vpack.c.bf16 %v828_v31, %v824_v30  ;;  %v827_v36 = vld [vmem:[#allocation8 + $0xa0] sm:$0xff]  ;;  %v832_v37 = vld [vmem:[#allocation8 + $0xc8] sm:$0xff]  ;;  %v809_v11 = vld [vmem:[#allocation8 + $0x10] sm:$0xff] }
  0xe2   :  { %8555 = vmatmul.mubr.msk.f32.gmra.mrb[2].mxu0 %vm240_vm0, %v12758_v7  ;;  %8736 = vmatprep.subr.bf16.mxu0 %v12767_v14  ;;  %15435 = vst [vmem:[#allocation33_spill] sm:$0xff] %v12819_v33  ;;  %v836_v38 = vld [vmem:[#allocation8 + $0xe8] sm:$0xff]  ;;  %v12833_v39 = vpack.c.bf16 %v827_v36, %v823_v35  ;;  %v831_v41 = vld [vmem:[#allocation8 + $0xc0] sm:$0xff]  ;;  %v813_v13 = vld [vmem:[#allocation8 + $0x30] sm:$0xff] }
  0xe3   :  { %8559 = vmatmul.mubr.msk.f32.gmra.mrb[2].mxu1 %vm240_vm0, %v12764_v8  ;;  %341 = vmatprep.mubr.f32.mxu0 %v15112_v0  ;;  %15436 = vst [vmem:[#allocation34_spill] sm:$0xff] %v12823_v34  ;;  %v12837_v40 = vpack.c.bf16 %v836_v38, %v832_v37  ;;  %v835_v42 = vld [vmem:[#allocation8 + $0xe0] sm:$0xff]  ;;  %v840_v43 = vld [vmem:[#allocation8 + $0x108] sm:$0xff]  ;;  %v818_v21 = vld [vmem:[#allocation8 + $0x58] sm:$0xff] }
  0xe4   :  { %365 = vmatprep.mubr.f32.mxu1 %v15112_v0  ;;  %15437 = vst [vmem:[#allocation35_spill] sm:$0xff] %v12833_v39  ;;  %v844_v44 = vld [vmem:[#allocation8 + $0x128] sm:$0xff]  ;;  %v12845_v45 = vpack.c.bf16 %v835_v42, %v831_v41  ;;  %v839_v47 = vld [vmem:[#allocation8 + $0x100] sm:$0xff]  ;;  %v822_v22 = vld [vmem:[#allocation8 + $0x78] sm:$0xff] }
  0xe5   :  { %15438 = vst [vmem:[#allocation36_spill] sm:$0xff] %v12837_v40  ;;  %v12849_v46 = vpack.c.bf16 %v844_v44, %v840_v43  ;;  %v843_v48 = vld [vmem:[#allocation8 + $0x120] sm:$0xff]  ;;  %v848_v49 = vld [vmem:[#allocation8 + $0x148] sm:$0xff]  ;;  %v817_v28 = vld [vmem:[#allocation8 + $0x50] sm:$0xff]  ;;  %v12911_v30 = vpack.c.bf16 %v822_v22, %v818_v21 }
  0xe6   :  { %8556 = vmatmul.mubr.msk.f32.gmra.mrb[4].mxu0 %vm240_vm0, %v12778_v15  ;;  %15439 = vst [vmem:[#allocation37_spill] sm:$0xff] %v12845_v45  ;;  %v852_v50 = vld [vmem:[#allocation8 + $0x168] sm:$0xff]  ;;  %v12857_v51 = vpack.c.bf16 %v843_v48, %v839_v47  ;;  %v847_v53 = vld [vmem:[#allocation8 + $0x140] sm:$0xff]  ;;  %v821_v31 = vld [vmem:[#allocation8 + $0x70] sm:$0xff] }
  0xe7   :  { %8560 = vmatmul.mubr.msk.f32.gmra.mrb[4].mxu1 %vm240_vm0, %v12783_v16  ;;  %347 = vmatprep.mubr.f32.mxu0 %v15112_v0  ;;  %15440 = vst [vmem:[#allocation38_spill] sm:$0xff] %v12849_v46  ;;  %v12861_v52 = vpack.c.bf16 %v852_v50, %v848_v49  ;;  %v851_v54 = vld [vmem:[#allocation8 + $0x160] sm:$0xff]  ;;  %v856_v55 = vld [vmem:[#allocation8 + $0x188] sm:$0xff]  ;;  %v826_v38 = vld [vmem:[#allocation8 + $0x98] sm:$0xff]  ;;  %v12920_v44 = vpack.c.bf16 %v821_v31, %v817_v28 }
  0xe8   :  { %371 = vmatprep.mubr.f32.mxu1 %v15112_v0  ;;  %15441 = vst [vmem:[#allocation39_spill] sm:$0xff] %v12857_v51  ;;  %v860_v56 = vld [vmem:[#allocation8 + $0x1a8] sm:$0xff]  ;;  %v12869_v57 = vpack.c.bf16 %v851_v54, %v847_v53  ;;  %v855_v59 = vld [vmem:[#allocation8 + $0x180] sm:$0xff]  ;;  %v830_v41 = vld [vmem:[#allocation8 + $0xb8] sm:$0xff] }
  0xe9   :  { %15442 = vst [vmem:[#allocation40_spill] sm:$0xff] %v12861_v52  ;;  %v12873_v58 = vpack.c.bf16 %v860_v56, %v856_v55  ;;  %v859_v60 = vld [vmem:[#allocation8 + $0x1a0] sm:$0xff]  ;;  %v864_v61 = vld [vmem:[#allocation8 + $0x1c8] sm:$0xff]  ;;  %15449 = vst [vmem:[#allocation47_spill] sm:$0xff] %v12920_v44  ;;  %v12926_v49 = vpack.c.bf16 %v830_v41, %v826_v38 }
  0xea   :  { %8557 = vmatmul.mubr.msk.f32.gmra.mrb[6].mxu0 %vm240_vm0, %v12795_v17  ;;  %15443 = vst [vmem:[#allocation41_spill] sm:$0xff] %v12869_v57  ;;  %v868_v62 = vld [vmem:[#allocation8 + $0x1e8] sm:$0xff]  ;;  %v12881_v63 = vpack.c.bf16 %v859_v60, %v855_v59  ;;  %v863_v2 = vld [vmem:[#allocation8 + $0x1c0] sm:$0xff]  ;;  %v825_v48 = vld [vmem:[#allocation8 + $0x90] sm:$0xff] }
  0xeb   :  { %8561 = vmatmul.mubr.msk.f32.gmra.mrb[6].mxu1 %vm240_vm0, %v12800_v18  ;;  %613 = vmatprep.mubr.f32.mxu0 %v15112_v0  ;;  %15444 = vst [vmem:[#allocation42_spill] sm:$0xff] %v12873_v58  ;;  %v12885_v1 = vpack.c.bf16 %v868_v62, %v864_v61  ;;  %v867_v5 = vld [vmem:[#allocation8 + $0x1e0] sm:$0xff]  ;;  %v872_v6 = vld [vmem:[#allocation13 + $0x8] sm:$0xff]  ;;  %15450 = vst [vmem:[#allocation48_spill] sm:$0xff] %v12926_v49 }
  0xec   :  { %442 = vmatprep.mubr.f32.mxu1 %v15112_v0  ;;  %15445 = vst [vmem:[#allocation43_spill] sm:$0xff] %v12881_v63  ;;  %v876_v9 = vld [vmem:[#allocation13 + $0x28] sm:$0xff]  ;;  %v12893_v10 = vpack.c.bf16 %v867_v5, %v863_v2  ;;  %v871_v19 = vld [vmem:[#allocation13] sm:$0xff]  ;;  %v834_v55 = vld [vmem:[#allocation8 + $0xd8] sm:$0xff] }
  0xed   :  { %15446 = vst [vmem:[#allocation44_spill] sm:$0xff] %v12885_v1  ;;  %v12897_v12 = vpack.c.bf16 %v876_v9, %v872_v6  ;;  %v875_v20 = vld [vmem:[#allocation13 + $0x20] sm:$0xff]  ;;  %v880_v24 = vld [vmem:[#allocation13 + $0x48] sm:$0xff]  ;;  %v838_v56 = vld [vmem:[#allocation8 + $0xf8] sm:$0xff] }
  0xee   :  { %8570 = vmatmul.mubr.msk.f32.vlgmr.msra.gmra.mrb[8].mxu0 %vm240_vm0, %v12744_v3  ;;  %15447 = vst [vmem:[#allocation45_spill] sm:$0xff] %v12893_v10  ;;  %v884_v25 = vld [vmem:[#allocation13 + $0x68] sm:$0xff]  ;;  %v12907_v27 = vpack.c.bf16 %v875_v20, %v871_v19  ;;  %v879_v35 = vld [vmem:[#allocation13 + $0x40] sm:$0xff]  ;;  %v12942_v5 = vpack.c.bf16 %v838_v56, %v834_v55  ;;  %v846_v19 = vld [vmem:[#allocation8 + $0x138] sm:$0xff] }
  0xef   :  { %8562 = vmatmul.mubr.msk.f32.vlgmr.msra.gmra.mrb[8].mxu1 %vm240_vm0, %v12744_v3  ;;  %8738 = vmatpush1.bf16.msra.mxu0 %v12808_v23  ;;  %15448 = vst [vmem:[#allocation46_spill] sm:$0xff] %v12897_v12  ;;  %v883_v36 = vld [vmem:[#allocation13 + $0x60] sm:$0xff]  ;;  %v12913_v37 = vpack.c.bf16 %v884_v25, %v880_v24  ;;  %v888_v42 = vld [vmem:[#allocation13 + $0x88] sm:$0xff]  ;;  %v850_v38 = vld [vmem:[#allocation8 + $0x158] sm:$0xff] }
  0xf0   :  { %663 = vmatpush1.msra.mxu1 %v525_v26  ;;  %448 = vmatprep.mubr.f32.mxu1 %v15112_v0  ;;  %v12905_v26 = vpack.c.bf16 %v813_v13, %v809_v11  ;;  %v892_v43 = vld [vmem:[#allocation13 + $0xa8] sm:$0xff]  ;;  %v12922_v47 = vpack.c.bf16 %v883_v36, %v879_v35  ;;  %v887_v50 = vld [vmem:[#allocation13 + $0x80] sm:$0xff]  ;;  %15452 = vst [vmem:[#allocation50_spill] sm:$0xff] %v12942_v5  ;;  %v842_v13 = vld [vmem:[#allocation8 + $0x118] sm:$0xff] }
  0xf1   :  { %619 = vmatprep.mubr.f32.mxu0 %v15112_v0  ;;  %8740 = vmatprep.subr.bf16.mxu0 %v12810_v29  ;;  %v891_v53 = vld [vmem:[#allocation13 + $0xa0] sm:$0xff]  ;;  %v12929_v54 = vpack.c.bf16 %v892_v43, %v888_v42  ;;  %v896_v59 = vld [vmem:[#allocation13 + $0xc8] sm:$0xff]  ;;  %v12957_v28 = vpack.c.bf16 %v846_v19, %v842_v13  ;;  %v854_v41 = vld [vmem:[#allocation8 + $0x178] sm:$0xff] }
  0xf2   :  { %8768 = vmatprep.subr.bf16.mxu1 %v12812_v32  ;;  %8571 = vmatmul.mubr.msk.f32.gmra.mrb[10].mxu0 %vm240_vm0, %v12758_v7  ;;  %v900_v60 = vld [vmem:[#allocation13 + $0xe8] sm:$0xff]  ;;  %v12938_v62 = vpack.c.bf16 %v891_v53, %v887_v50  ;;  %v895_v9 = vld [vmem:[#allocation13 + $0xc0] sm:$0xff]  ;;  %v12972_v53 = vpack.c.bf16 %v854_v41, %v850_v38 }
  0xf3   :  { %8563 = vmatmul.mubr.msk.f32.gmra.mrb[10].mxu1 %vm240_vm0, %v12758_v7  ;;  %8742 = vmatpush1.bf16.msra.mxu0 %v12819_v33  ;;  %v833_v2 = vld [vmem:[#allocation8 + $0xd0] sm:$0xff]  ;;  %v12945_v11 = vpack.c.bf16 %v900_v60, %v896_v59  ;;  %15454 = vst [vmem:[#allocation52_spill] sm:$0xff] %v12957_v28  ;;  %v903_v35 = vld [vmem:[#allocation13 + $0x100] sm:$0xff]  ;;  %v858_v60 = vld [vmem:[#allocation8 + $0x198] sm:$0xff] }
  0xf4   :  { %454 = vmatprep.mubr.f32.mxu1 %v15112_v0  ;;  %625 = vmatprep.mubr.f32.mxu0 %v15112_v0  ;;  %v837_v6 = vld [vmem:[#allocation8 + $0xf0] sm:$0xff]  ;;  %15456 = vst [vmem:[#allocation54_spill] sm:$0xff] %v12972_v53  ;;  %v911_v56 = vld [vmem:[#allocation13 + $0x140] sm:$0xff] }
  0xf5   :  { %8744 = vmatprep.subr.bf16.mxu0 %v12823_v34  ;;  %v904_v20 = vld [vmem:[#allocation13 + $0x108] sm:$0xff]  ;;  %v12951_v22 = vpack.c.bf16 %v837_v6, %v833_v2  ;;  %v862_v2 = vld [vmem:[#allocation8 + $0x1b8] sm:$0xff] }
  0xf6   :  { %8572 = vmatmul.mubr.msk.f32.gmra.mrb[12].mxu0 %vm240_vm0, %v12778_v15  ;;  %v908_v21 = vld [vmem:[#allocation13 + $0x128] sm:$0xff] }
  0xf7   :  { %8564 = vmatmul.mubr.msk.f32.gmra.mrb[12].mxu1 %vm240_vm0, %v12778_v15  ;;  %8746 = vmatpush1.bf16.msra.mxu0 %v12833_v39  ;;  %15453 = vst [vmem:[#allocation51_spill] sm:$0xff] %v12951_v22  ;;  %v841_v25 = vld [vmem:[#allocation8 + $0x110] sm:$0xff]  ;;  %v12960_v36 = vpack.c.bf16 %v908_v21, %v904_v20  ;;  %v12987_v20 = vpack.c.bf16 %v862_v2, %v858_v60  ;;  %v874_v2 = vld [vmem:[#allocation13 + $0x18] sm:$0xff] }
  0xf8   :  { %460 = vmatprep.mubr.f32.mxu1 %v15112_v0  ;;  %631 = vmatprep.mubr.f32.mxu0 %v15112_v0  ;;  %v845_v31 = vld [vmem:[#allocation8 + $0x130] sm:$0xff] }
  0xf9   :  { %8748 = vmatprep.subr.bf16.mxu0 %v12837_v40  ;;  %v912_v42 = vld [vmem:[#allocation13 + $0x148] sm:$0xff]  ;;  %15458 = vst [vmem:[#allocation56_spill] sm:$0xff] %v12987_v20 }
  0xfa   :  { %8573 = vmatmul.mubr.msk.f32.gmra.mrb[14].mxu0 %vm240_vm0, %v12795_v17  ;;  %v916_v43 = vld [vmem:[#allocation13 + $0x168] sm:$0xff] }
  0xfb   :  { %8565 = vmatmul.mubr.msk.f32.gmra.mrb[14].mxu1 %vm240_vm0, %v12795_v17  ;;  %8750 = vmatpush1.bf16.msra.mxu0 %v12845_v45  ;;  %v849_v50 = vld [vmem:[#allocation8 + $0x150] sm:$0xff]  ;;  %v12975_v59 = vpack.c.bf16 %v916_v43, %v912_v42 }
  0xfc   :  { %466 = vmatprep.mubr.f32.mxu1 %v15112_v0  ;;  %637 = vmatprep.mubr.f32.mxu0 %v15112_v0  ;;  %v853_v55 = vld [vmem:[#allocation8 + $0x170] sm:$0xff] }
  0xfd   :  { %8752 = vmatprep.subr.bf16.mxu0 %v12849_v46  ;;  %v920_v6 = vld [vmem:[#allocation13 + $0x188] sm:$0xff] }
  0xfe   :  { %8574 = vmatmul.mubr.msk.f32.gmra.mrb[16].mxu0 %vm240_vm0, %v12749_v4  ;;  %v857_v19 = vld [vmem:[#allocation8 + $0x190] sm:$0xff] }
  0xff   :  { %8566 = vmatmul.mubr.msk.f32.gmra.mrb[16].mxu1 %vm240_vm0, %v12749_v4  ;;  %8754 = vmatpush1.bf16.msra.mxu0 %v12857_v51  ;;  %v861_v21 = vld [vmem:[#allocation8 + $0x1b0] sm:$0xff] }
 0x100   :  { %472 = vmatprep.mubr.f32.mxu1 %v15112_v0  ;;  %643 = vmatprep.mubr.f32.mxu0 %v15112_v0  ;;  %v928_v38 = vld [vmem:[#allocation13 + $0x1c8] sm:$0xff]  ;;  %v12996_v42 = vpack.c.bf16 %v861_v21, %v857_v19 }
 0x101   :  { %8756 = vmatprep.subr.bf16.mxu0 %v12861_v52  ;;  %v932_v41 = vld [vmem:[#allocation13 + $0x1e8] sm:$0xff] }
 0x102   :  { %8575 = vmatmul.mubr.msk.f32.gmra.mrb[18].mxu0 %vm240_vm0, %v12764_v8  ;;  %15459 = vst [vmem:[#allocation57_spill] sm:$0xff] %v12996_v42  ;;  %v13005_v60 = vpack.c.bf16 %v932_v41, %v928_v38  ;;  %v881_v41 = vld [vmem:[#allocation13 + $0x50] sm:$0xff] }
 0x103   :  { %8567 = vmatmul.mubr.msk.f32.gmra.mrb[18].mxu1 %vm240_vm0, %v12764_v8  ;;  %8758 = vmatpush1.bf16.msra.mxu0 %v12869_v57 }
 0x104   :  { %478 = vmatprep.mubr.f32.mxu1 %v15112_v0  ;;  %649 = vmatprep.mubr.f32.mxu0 %v15112_v0 }
 0x105   :  { %8760 = vmatprep.subr.bf16.mxu0 %v12873_v58 }
 0x106   :  { %8576 = vmatmul.mubr.msk.f32.gmra.mrb[20].mxu0 %vm240_vm0, %v12783_v16 }
 0x107   :  { %8568 = vmatmul.mubr.msk.f32.gmra.mrb[20].mxu1 %vm240_vm0, %v12783_v16  ;;  %8762 = vmatpush1.bf16.msra.mxu0 %v12881_v63 }
 0x108   :  { %484 = vmatprep.mubr.f32.mxu1 %v15112_v0  ;;  %655 = vmatprep.mubr.f32.mxu0 %v15112_v0 }
 0x109   :  { %8764 = vmatprep.subr.bf16.mxu0 %v12885_v1 }
 0x10a   :  { %8577 = vmatmul.mubr.msk.f32.gmra.mrb[22].mxu0 %vm240_vm0, %v12800_v18 }
 0x10b   :  { %8569 = vmatmul.mubr.msk.f32.gmra.mrb[22].mxu1 %vm240_vm0, %v12800_v18  ;;  %8766 = vmatpush1.bf16.msra.mxu0 %v12893_v10 }
 0x10c   :  { %726 = vmatprep.mubr.f32.mxu1 %v15112_v0  ;;  %1006 = vmatprep.mubr.f32.mxu0 %v15112_v0 }
 0x10d   :  { %8800 = vmatprep.subr.bf16.mxu0 %v12897_v12 }
 0x10e   :  { %1007 = vmatmul.mubr.f32.vlgmr.msra.gmra.mrb[0].mxu0 %v15112_v0 }
 0x10f   :  { %8578 = vmatmul.mubr.msk.f32.vlgmr.msra.gmra.mrb[24].mxu1 %vm240_vm0, %v12744_v3  ;;  %8802 = vmatpush1.bf16.msra.mxu0 %v12907_v27  ;;  %v829_v3 = vld [vmem:[#allocation8 + $0xb0] sm:$0xff] }
 0x110   :  { %8770 = vmatpush1.bf16.msra.mxu1 %v12905_v26  ;;  %732 = vmatprep.mubr.f32.mxu1 %v15112_v0  ;;  %v12936_v61 = vpack.c.bf16 %v829_v3, %v825_v48  ;;  %v12966_v48 = vpack.c.bf16 %v845_v31, %v841_v25  ;;  %v919_v25 = vld [vmem:[#allocation13 + $0x180] sm:$0xff] }
 0x111   :  { %8772 = vmatprep.subr.bf16.mxu1 %v12911_v30  ;;  %8804 = vmatprep.subr.bf16.mxu0 %v12913_v37 }
 0x112   :  { %1159 = vmatprep.mubr.f32.mxu0 %v15112_v0  ;;  %15451 = vst [vmem:[#allocation49_spill] sm:$0xff] %v12936_v61  ;;  %15455 = vst [vmem:[#allocation53_spill] sm:$0xff] %v12966_v48 }
 0x113   :  { %8579 = vmatmul.mubr.msk.f32.gmra.mrb[26].mxu1 %vm240_vm0, %v12758_v7  ;;  %8806 = vmatpush1.bf16.msra.mxu0 %v12922_v47  ;;  %v899_v7 = vld [vmem:[#allocation13 + $0xe0] sm:$0xff] }
 0x114   :  { %8774 = vmatpush1.bf16.msra.mxu1 %v12920_v44  ;;  %738 = vmatprep.mubr.f32.mxu1 %v15112_v0  ;;  %v12953_v24 = vpack.c.bf16 %v899_v7, %v895_v9  ;;  %v924_v9 = vld [vmem:[#allocation13 + $0x1a8] sm:$0xff]  ;;  %v12981_v7 = vpack.c.bf16 %v853_v55, %v849_v50 }
 0x115   :  { %8776 = vmatprep.subr.bf16.mxu1 %v12926_v49  ;;  %8808 = vmatprep.subr.bf16.mxu0 %v12929_v54  ;;  %v12990_v31 = vpack.c.bf16 %v924_v9, %v920_v6  ;;  %v865_v50 = vld [vmem:[#allocation8 + $0x1d0] sm:$0xff]  ;;  %v878_v6 = vld [vmem:[#allocation13 + $0x38] sm:$0xff] }
 0x116   :  { %15457 = vst [vmem:[#allocation55_spill] sm:$0xff] %v12981_v7  ;;  %v13017_v21 = vpack.c.bf16 %v878_v6, %v874_v2  ;;  %v889_v2 = vld [vmem:[#allocation13 + $0x90] sm:$0xff] }
 0x117   :  { %8580 = vmatmul.mubr.msk.f32.gmra.mrb[28].mxu1 %vm240_vm0, %v12778_v15  ;;  %8810 = vmatpush1.bf16.msra.mxu0 %v12938_v62  ;;  %v907_v15 = vld [vmem:[#allocation13 + $0x120] sm:$0xff]  ;;  %v893_v6 = vld [vmem:[#allocation13 + $0xb0] sm:$0xff] }
 0x118   :  { %8778 = vmatpush1.bf16.msra.mxu1 %v12936_v61  ;;  %744 = vmatprep.mubr.f32.mxu1 %v15112_v0  ;;  %v12968_v3 = vpack.c.bf16 %v907_v15, %v903_v35  ;;  %v866_v35 = vld [vmem:[#allocation8 + $0x1d8] sm:$0xff]  ;;  %15462 = vst [vmem:[#allocation60_spill] sm:$0xff] %v13017_v21 }
 0x119   :  { %8780 = vmatprep.subr.bf16.mxu1 %v12942_v5  ;;  %8812 = vmatprep.subr.bf16.mxu0 %v12945_v11  ;;  %v870_v15 = vld [vmem:[#allocation8 + $0x1f8] sm:$0xff] }
 0x11a   :  { %v13002_v55 = vpack.c.bf16 %v870_v15, %v866_v35  ;;  %v882_v35 = vld [vmem:[#allocation13 + $0x58] sm:$0xff] }
 0x11b   :  { %8581 = vmatmul.mubr.msk.f32.gmra.mrb[30].mxu1 %vm240_vm0, %v12795_v17  ;;  %8814 = vmatpush1.bf16.msra.mxu0 %v12953_v24  ;;  %v915_v17 = vld [vmem:[#allocation13 + $0x160] sm:$0xff] }
 0x11c   :  { %8782 = vmatpush1.bf16.msra.mxu1 %v12951_v22  ;;  %750 = vmatprep.mubr.f32.mxu1 %v15112_v0  ;;  %v12983_v13 = vpack.c.bf16 %v915_v17, %v911_v56  ;;  %15460 = vst [vmem:[#allocation58_spill] sm:$0xff] %v13002_v55  ;;  %v869_v56 = vld [vmem:[#allocation8 + $0x1f0] sm:$0xff]  ;;  %v927_v17 = vld [vmem:[#allocation13 + $0x1c0] sm:$0xff] }
 0x11d   :  { %8784 = vmatprep.subr.bf16.mxu1 %v12957_v28  ;;  %8816 = vmatprep.subr.bf16.mxu0 %v12960_v36  ;;  %v13011_v9 = vpack.c.bf16 %v869_v56, %v865_v50  ;;  %v885_v50 = vld [vmem:[#allocation13 + $0x70] sm:$0xff]  ;;  %v890_v56 = vld [vmem:[#allocation13 + $0x98] sm:$0xff] }
 0x11f   :  { %8582 = vmatmul.mubr.msk.f32.gmra.mrb[32].mxu1 %vm240_vm0, %v12749_v4  ;;  %8818 = vmatpush1.bf16.msra.mxu0 %v12968_v3  ;;  %v923_v4 = vld [vmem:[#allocation13 + $0x1a0] sm:$0xff]  ;;  %15461 = vst [vmem:[#allocation59_spill] sm:$0xff] %v13011_v9 }
 0x120   :  { %8786 = vmatpush1.bf16.msra.mxu1 %v12966_v48  ;;  %756 = vmatprep.mubr.f32.mxu1 %v15112_v0  ;;  %v12998_v43 = vpack.c.bf16 %v923_v4, %v919_v25  ;;  %v873_v25 = vld [vmem:[#allocation13 + $0x10] sm:$0xff] }
 0x121   :  { %8788 = vmatprep.subr.bf16.mxu1 %v12972_v53  ;;  %8820 = vmatprep.subr.bf16.mxu0 %v12975_v59  ;;  %v877_v4 = vld [vmem:[#allocation13 + $0x30] sm:$0xff] }
 0x122   :  { %v13024_v15 = vpack.c.bf16 %v877_v4, %v873_v25  ;;  %v898_v25 = vld [vmem:[#allocation13 + $0xd8] sm:$0xff] }
 0x123   :  { %8583 = vmatmul.mubr.msk.f32.gmra.mrb[34].mxu1 %vm240_vm0, %v12764_v8  ;;  %8822 = vmatpush1.bf16.msra.mxu0 %v12983_v13  ;;  %v931_v8 = vld [vmem:[#allocation13 + $0x1e0] sm:$0xff]  ;;  %v902_v4 = vld [vmem:[#allocation13 + $0xf8] sm:$0xff] }
 0x124   :  { %8790 = vmatpush1.bf16.msra.mxu1 %v12981_v7  ;;  %762 = vmatprep.mubr.f32.mxu1 %v15112_v0  ;;  %v13013_v19 = vpack.c.bf16 %v931_v8, %v927_v17  ;;  %v894_v17 = vld [vmem:[#allocation13 + $0xb8] sm:$0xff] }
 0x125   :  { %8792 = vmatprep.subr.bf16.mxu1 %v12987_v20  ;;  %8824 = vmatprep.subr.bf16.mxu0 %v12990_v31  ;;  %v13038_v8 = vpack.c.bf16 %v894_v17, %v890_v56  ;;  %v906_v56 = vld [vmem:[#allocation13 + $0x118] sm:$0xff] }
 0x126   :  { %v910_v17 = vld [vmem:[#allocation13 + $0x138] sm:$0xff] }
 0x127   :  { %8584 = vmatmul.mubr.msk.f32.gmra.mrb[36].mxu1 %vm240_vm0, %v12783_v16  ;;  %8826 = vmatpush1.bf16.msra.mxu0 %v12998_v43  ;;  %v886_v16 = vld [vmem:[#allocation13 + $0x78] sm:$0xff] }
 0x128   :  { %8794 = vmatpush1.bf16.msra.mxu1 %v12996_v42  ;;  %768 = vmatprep.mubr.f32.mxu1 %v15112_v0  ;;  %v13028_v38 = vpack.c.bf16 %v886_v16, %v882_v35  ;;  %v13044_v35 = vpack.c.bf16 %v893_v6, %v889_v2  ;;  %v13047_v16 = vpack.c.bf16 %v902_v4, %v898_v25  ;;  %v905_v6 = vld [vmem:[#allocation13 + $0x110] sm:$0xff]  ;;  %v914_v25 = vld [vmem:[#allocation13 + $0x158] sm:$0xff] }
 0x129   :  { %8796 = vmatprep.subr.bf16.mxu1 %v13002_v55  ;;  %8828 = vmatprep.subr.bf16.mxu0 %v13005_v60  ;;  %v13055_v2 = vpack.c.bf16 %v910_v17, %v906_v56  ;;  %v918_v4 = vld [vmem:[#allocation13 + $0x178] sm:$0xff] }
 0x12a   :  { %v922_v56 = vld [vmem:[#allocation13 + $0x198] sm:$0xff] }
 0x12b   :  { %8585 = vmatmul.mubr.msk.f32.gmra.mrb[38].mxu1 %vm240_vm0, %v12800_v18  ;;  %8830 = vmatpush1.bf16.msra.mxu0 %v13013_v19  ;;  %v13034_v18 = vpack.c.bf16 %v885_v50, %v881_v41  ;;  %v897_v41 = vld [vmem:[#allocation13 + $0xd0] sm:$0xff]  ;;  %v926_v17 = vld [vmem:[#allocation13 + $0x1b8] sm:$0xff] }
 0x12c   :  { %8798 = vmatpush1.bf16.msra.mxu1 %v13011_v9  ;;  %1077 = vmatprep.mubr.f32.mxu1 %v15112_v0  ;;  %v901_v50 = vld [vmem:[#allocation13 + $0xf0] sm:$0xff] }
 0x12d   :  { %8832 = vmatprep.subr.bf16.mxu1 %v13017_v21  ;;  %8864 = vmatprep.subr.bf16.mxu0 %v12767_v14 }
 0x12e   :  { %1160 = vmatmul.mubr.f32.vlgmr.msra.gmra.mrb[22].mxu0 %v15112_v0 }
 0x12f   :  { %1078 = vmatmul.mubr.f32.vlgmr.msra.gmra.mrb[8].mxu1 %v15112_v0  ;;  %8866 = vmatpush1.bf16.msra.mxu0 %v12808_v23 }
 0x130   :  { %8834 = vmatpush1.bf16.msra.mxu1 %v13024_v15  ;;  %1230 = vmatprep.mubr.f32.mxu1 %v15112_v0 }
 0x131   :  { %8836 = vmatprep.subr.bf16.mxu1 %v13028_v38  ;;  %8868 = vmatprep.subr.bf16.mxu0 %v12810_v29  ;;  %v13052_v29 = vpack.c.bf16 %v901_v50, %v897_v41  ;;  %v13063_v41 = vpack.c.bf16 %v918_v4, %v914_v25  ;;  %v913_v50 = vld [vmem:[#allocation13 + $0x150] sm:$0xff]  ;;  %v930_v25 = vld [vmem:[#allocation13 + $0x1d8] sm:$0xff] }
 0x132   :  { %1363 = vmatprep.mubr.f32.mxu0 %v15112_v0  ;;  %v909_v0 = vld [vmem:[#allocation13 + $0x130] sm:$0xff]  ;;  %v934_v4 = vld [vmem:[#allocation13 + $0x1f8] sm:$0xff] }
 0x133   :  { %8870 = vmatpush1.bf16.msra.mxu0 %v12819_v33  ;;  %v13060_v33 = vpack.c.bf16 %v909_v0, %v905_v6  ;;  %v13071_v0 = vpack.c.bf16 %v926_v17, %v922_v56  ;;  %v921_v6 = vld [vmem:[#allocation13 + $0x190] sm:$0xff] }
 0x134   :  { %8838 = vmatpush1.bf16.msra.mxu1 %v13034_v18  ;;  %8872 = vmatprep.subr.bf16.mxu0 %v12823_v34  ;;  %v917_v34 = vld [vmem:[#allocation13 + $0x170] sm:$0xff] }
 0x135   :  { %8840 = vmatprep.subr.bf16.mxu1 %v13038_v8 }
 0x137   :  { %8874 = vmatpush1.bf16.msra.mxu0 %v12833_v39  ;;  %v13068_v39 = vpack.c.bf16 %v917_v34, %v913_v50  ;;  %v13079_v34 = vpack.c.bf16 %v934_v4, %v930_v25  ;;  %v929_v50 = vld [vmem:[#allocation13 + $0x1d0] sm:$0xff] }
 0x138   :  { %8842 = vmatpush1.bf16.msra.mxu1 %v13044_v35  ;;  %8876 = vmatprep.subr.bf16.mxu0 %v12837_v40  ;;  %v925_v40 = vld [vmem:[#allocation13 + $0x1b0] sm:$0xff] }
 0x139   :  { %8844 = vmatprep.subr.bf16.mxu1 %v13047_v16 }
 0x13b   :  { %8878 = vmatpush1.bf16.msra.mxu0 %v12845_v45  ;;  %v13076_v45 = vpack.c.bf16 %v925_v40, %v921_v6  ;;  %v15463_v40 = vmov 0.0  }
 0x13c   :  { %8846 = vmatpush1.bf16.msra.mxu1 %v13052_v29  ;;  %8880 = vmatprep.subr.bf16.mxu0 %v12849_v46  ;;  %v933_v46 = vld [vmem:[#allocation13 + $0x1f0] sm:$0xff] }
 0x13d   :  { %8848 = vmatprep.subr.bf16.mxu1 %v13055_v2  ;;  %v13084_v56 = vpack.c.bf16 %v933_v46, %v929_v50 }
 0x13f   :  { %8882 = vmatpush1.bf16.msra.mxu0 %v12857_v51 }
 0x140   :  { %8850 = vmatpush1.bf16.msra.mxu1 %v13060_v33  ;;  %8884 = vmatprep.subr.bf16.mxu0 %v12861_v52 }
 0x141   :  { %8852 = vmatprep.subr.bf16.mxu1 %v13063_v41 }
 0x143   :  { %8886 = vmatpush1.bf16.msra.mxu0 %v12869_v57 }
 0x144   :  { %8854 = vmatpush1.bf16.msra.mxu1 %v13068_v39  ;;  %8888 = vmatprep.subr.bf16.mxu0 %v12873_v58 }
 0x145   :  { %8856 = vmatprep.subr.bf16.mxu1 %v13071_v0 }
 0x147   :  { %8890 = vmatpush1.bf16.msra.mxu0 %v12881_v63 }
 0x148   :  { %8858 = vmatpush1.bf16.msra.mxu1 %v13076_v45  ;;  %8892 = vmatprep.subr.bf16.mxu0 %v12885_v1 }
 0x149   :  { %8860 = vmatprep.subr.bf16.mxu1 %v13079_v34 }
 0x14b   :  { %8894 = vmatpush1.bf16.msra.mxu0 %v12893_v10 }
 0x14c   :  { %8862 = vmatpush1.bf16.msra.mxu1 %v13084_v56  ;;  %8928 = vmatprep.subr.bf16.mxu0 %v12897_v12 }
 0x14d   :  { %8896 = vmatprep.subr.bf16.mxu1 %v12812_v32 }
 0x14f   :  { %1231 = vmatmul.mubr.f32.vlgmr.msra.gmra.mrb[38].mxu1 %v15463_v40 }
 0x150   :  { %8898 = vmatpush1.bf16.msra.mxu1 %v12905_v26  ;;  %1434 = vmatprep.mubr.f32.mxu1 %v15463_v40 }
 0x151   :  { %8900 = vmatprep.subr.bf16.mxu1 %v12911_v30 }
 0x154   :  { %8902 = vmatpush1.bf16.msra.mxu1 %v12920_v44 }
 0x155   :  { %8904 = vmatprep.subr.bf16.mxu1 %v12926_v49 }
 0x158   :  { %8906 = vmatpush1.bf16.msra.mxu1 %v12936_v61 }
 0x159   :  { %8908 = vmatprep.subr.bf16.mxu1 %v12942_v5 }
 0x15c   :  { %8910 = vmatpush1.bf16.msra.mxu1 %v12951_v22 }
 0x15d   :  { %8912 = vmatprep.subr.bf16.mxu1 %v12957_v28 }
 0x160   :  { %8914 = vmatpush1.bf16.msra.mxu1 %v12966_v48 }
 0x161   :  { %8916 = vmatprep.subr.bf16.mxu1 %v12972_v53 }
 0x164   :  { %8918 = vmatpush1.bf16.msra.mxu1 %v12981_v7 }
 0x165   :  { %8920 = vmatprep.subr.bf16.mxu1 %v12987_v20 }
 0x168   :  { %8922 = vmatpush1.bf16.msra.mxu1 %v12996_v42 }
 0x169   :  { %8924 = vmatprep.subr.bf16.mxu1 %v13002_v55  ;;  %v220_v55 = vlaneseq }
 0x16c   :  { %8926 = vmatpush1.bf16.msra.mxu1 %v13011_v9  ;;  %v221_v9 = vshrl.u32 %v220_v55, 7 }
 0x16d   :  { %8960 = vmatprep.subr.bf16.mxu1 %v13017_v21 }
 0x16e   :  { %v13127_v42 = vsub.s32 1, %v221_v9  ;;  %v13139_v55 = vsub.s32 2, %v221_v9  ;;  %v13141_v20 = vsub.s32 3, %v221_v9 }
 0x170   :  { %15472 = vst [vmem:[#allocation69_spill] sm:$0xff] %v13127_v42  ;;  %15476 = vst [vmem:[#allocation73_spill] sm:$0xff] %v13139_v55 }
 0x171   :  { %15477 = vst [vmem:[#allocation74_spill] sm:$0xff] %v13141_v20 }
 0x1b2   :  { %v13111_v46 = vpop.f32.mrb[0].mxu1 }
 0x1b3   :  { %15464 = vst [vmem:[#allocation61_spill] sm:$0xff] %v13111_v46  ;;  %v13113_v17 = vpop.f32.mrb[1].mxu1  ;;  %v218_v46 = vld [vmem:[#allocation10] sm:$0xf] }
 0x1b4   :  { %15465 = vst [vmem:[#allocation62_spill] sm:$0xff] %v13113_v17  ;;  %v13129_v17 = vsub.s32 0, %v221_v9  ;;  %v13144_v57 = vrot.slane %v218_v46, %v13139_v55  ;;  %v13147_v52 = vrot.slane %v218_v46, %v13141_v20 }
 0x1b6   :  { %v13115_v6 = vpop.f32.mrb[2].mxu1  ;;  %15473 = vst [vmem:[#allocation70_spill] sm:$0xff] %v13129_v17  ;;  %15478 = vst [vmem:[#allocation75_spill] sm:$0xff] %v13144_v57 }
 0x1b7   :  { %15466 = vst [vmem:[#allocation63_spill] sm:$0xff] %v13115_v6  ;;  %v13117_v25 = vpop.f32.mrb[3].mxu1  ;;  %v13132_v6 = vrot.slane %v218_v46, %v13127_v42 }
 0x1b8   :  { %15467 = vst [vmem:[#allocation64_spill] sm:$0xff] %v13117_v25 }
 0x1b9   :  { %15474 = vst [vmem:[#allocation71_spill] sm:$0xff] %v13132_v6 }
 0x1ba   :  { %v13119_v4 = vpop.f32.mrb[4].mxu1 }
 0x1bb   :  { %15468 = vst [vmem:[#allocation65_spill] sm:$0xff] %v13119_v4  ;;  %v13121_v50 = vpop.f32.mrb[5].mxu1  ;;  %v13135_v4 = vrot.slane %v218_v46, %v13129_v17 }
 0x1bc   :  { %15469 = vst [vmem:[#allocation66_spill] sm:$0xff] %v13121_v50 }
 0x1bd   :  { %15475 = vst [vmem:[#allocation72_spill] sm:$0xff] %v13135_v4 }
 0x1be   :  { %v13123_v12 = vpop.f32.mrb[6].mxu1 }
 0x1bf   :  { %15470 = vst [vmem:[#allocation67_spill] sm:$0xff] %v13123_v12  ;;  %v13125_v10 = vpop.f32.mrb[7].mxu1 }
 0x1c0   :  { %15471 = vst [vmem:[#allocation68_spill] sm:$0xff] %v13125_v10 }
 0x1e1   :  { %v1008_v1 = vpop.f32.mrb[0].mxu0 }
 0x1e2   :  { %v1010_v21 = vpop.f32.mrb[1].mxu0  ;;  %v11385_v12 = vadd.f32 %v1008_v1, %v13135_v4 }
 0x1e3   :  { %v11386_v50 = vadd.f32 %v1010_v21, %v13132_v6 }
 0x1e4   :  { %v8586_v25 = vmul.f32 -1.442695, %v11385_v12  ;;  %v527_v12 = vld [vmem:[#allocation14] sm:$0xf] }
 0x1e5   :  { %v8587_v10 = vmul.f32 -1.442695, %v11386_v50 }
 0x1e7   :  { %11682 = vpow2.f32 %v8587_v10 }
 0x1e8   :  { %11684 = vpow2.f32 %v8586_v25 }
 0x1f1   :  { %v11683_v63 = vpop.eup %11682 }
 0x1f2   :  { %v11685_v58 = vpop.eup %11684  ;;  %v1250_v7 = vadd.f32 1.0, %v11683_v63  ;;  %v13152_v63 = vrot.slane %v527_v12, %v13127_v42 }
 0x1f3   :  { %v1244_v53 = vadd.f32 1.0, %v11685_v58  ;;  %v13155_v58 = vrot.slane %v527_v12, %v13129_v17 }
 0x1f4   :  { %11686 = vrcp.f32 %v1250_v7  ;;  %15479 = vst [vmem:[#allocation76_spill] sm:$0xff] %v13152_v63 }
 0x1f5   :  { %11688 = vrcp.f32 %v1244_v53 }
 0x1fe   :  { %v11687_v4 = vpop.eup %11686 }
 0x1ff   :  { %v1260_v51 = vmul.f32 0.0, %v11687_v4  ;;  %v13166_v4 = vrot.slane %v527_v12, %v13141_v20  ;;  %v15495_v20 = vld [vmem:[#allocation42_spill] sm:$0xff] }
 0x201   :  { %v1161_v21 = vpop.f32.mrb[22].mxu0 }
 0x202   :  { %v1079_v1 = vpop.f32.mrb[8].mxu1  ;;  %v1163_v25 = vpop.f32.mrb[23].mxu0  ;;  %v11439_v7 = vadd.f32 %v1161_v21, %v13155_v58 }
 0x203   :  { %v11409_v10 = vadd.f32 %v1079_v1, %v13144_v57  ;;  %v1081_v50 = vpop.f32.mrb[9].mxu1  ;;  %v11440_v46 = vadd.f32 %v1163_v25, %v13152_v63  ;;  %v11689_v1 = vpop.eup %11688  ;;  %v13163_v63 = vrot.slane %v527_v12, %v13139_v55  ;;  %v15494_v55 = vld [vmem:[#allocation55_spill] sm:$0xff] }
 0x204   :  { %v11410_v9 = vadd.f32 %v1081_v50, %v13147_v52  ;;  %v8589_v53 = vmul.f32 -1.442695, %v11439_v7 }
 0x205   :  { %11690 = vtanh.f32 %v11409_v10  ;;  %v8590_v57 = vmul.f32 -1.442695, %v11440_v46 }
 0x206   :  { %v8588_v6 = vmul.f32 -1.442695, %v11410_v9 }
 0x208   :  { %11692 = vpow2.f32 %v8588_v6 }
 0x209   :  { %11694 = vpow2.f32 %v8590_v57 }
 0x20a   :  { %11696 = vpow2.f32 %v8589_v53 }
 0x20f   :  { %v11691_v48 = vpop.eup %11690 }
 0x210   :  { %v1261_v50 = vmul.f32 %v11691_v48, %v11689_v1 }
 0x212   :  { %v13159_v10 = vadd.f32 %v1261_v50, %v1260_v51  ;;  %v11693_v42 = vpop.eup %11692 }
 0x213   :  { %v1257_v9 = vadd.f32 1.0, %v11693_v42  ;;  %v11695_v6 = vpop.eup %11694 }
 0x214   :  { %11698 = vtanh.f32 %v13159_v10  ;;  %v11697_v25 = vpop.eup %11696  ;;  %v1274_v21 = vadd.f32 1.0, %v11695_v6 }
 0x215   :  { %11700 = vrcp.f32 %v1257_v9  ;;  %v1268_v46 = vadd.f32 1.0, %v11697_v25 }
 0x216   :  { %11702 = vrcp.f32 %v1274_v21 }
 0x217   :  { %11704 = vrcp.f32 %v1268_v46 }
 0x21e   :  { %v11699_v17 = vpop.eup %11698 }
 0x21f   :  { %v11701_v51 = vpop.eup %11700 }
 0x220   :  { %v13168_v57 = vmul.f32 %v11701_v51, %v11699_v17  ;;  %v11703_v17 = vpop.eup %11702 }
 0x221   :  { %v11705_v53 = vpop.eup %11704  ;;  %v1284_v9 = vmul.f32 0.0, %v11703_v17  ;;  %v15485_v17 = vld [vmem:[#allocation35_spill] sm:$0xff] }
 0x222   :  { %v1232_v48 = vpop.f32.mrb[38].mxu1  ;;  %15480 = vst [vmem:[#allocation77_spill] sm:$0xff] %v13168_v57  ;;  %1364 = vmatmul.mubr.f32.vlgmr.msra.gmra.mrb[2].mxu0 %v13168_v57  ;;  %1435 = vmatmul.mubr.f32.vlgmr.msra.gmra.mrb[10].mxu1 %v13168_v57  ;;  %v15496_v57 = vld [vmem:[#allocation56_spill] sm:$0xff] }
 0x223   :  { %v11455_v42 = vadd.f32 %v1232_v48, %v13163_v63  ;;  %v1234_v7 = vpop.f32.mrb[39].mxu1  ;;  %8930 = vmatpush1.bf16.msra.mxu0 %v12907_v27  ;;  %8962 = vmatpush1.bf16.msra.mxu1 %v13024_v15 }
 0x224   :  { %v11456_v1 = vadd.f32 %v1234_v7, %v13166_v4  ;;  %8932 = vmatprep.subr.bf16.mxu0 %v12913_v37  ;;  %8964 = vmatprep.subr.bf16.mxu1 %v13028_v38  ;;  %v15482_v7 = vld [vmem:[#allocation32_spill] sm:$0xff] }
 0x225   :  { %11706 = vtanh.f32 %v11455_v42  ;;  %1516 = vmatprep.mubr.f32.mxu0 %v15463_v40  ;;  %1587 = vmatprep.mubr.f32.mxu1 %v15463_v40 }
 0x226   :  { %v8591_v12 = vmul.f32 -1.442695, %v11456_v1  ;;  %v15483_v1 = vld [vmem:[#allocation33_spill] sm:$0xff] }
 0x227   :  { %8934 = vmatpush1.bf16.msra.mxu0 %v12922_v47  ;;  %8966 = vmatpush1.bf16.msra.mxu1 %v13034_v18 }
 0x228   :  { %11708 = vpow2.f32 %v8591_v12  ;;  %8936 = vmatprep.subr.bf16.mxu0 %v12929_v54  ;;  %8968 = vmatprep.subr.bf16.mxu1 %v13038_v8  ;;  %v15484_v12 = vld [vmem:[#allocation34_spill] sm:$0xff] }
 0x22b   :  { %8938 = vmatpush1.bf16.msra.mxu0 %v12938_v62  ;;  %8970 = vmatpush1.bf16.msra.mxu1 %v13044_v35 }
 0x22c   :  { %8940 = vmatprep.subr.bf16.mxu0 %v12945_v11  ;;  %8972 = vmatprep.subr.bf16.mxu1 %v13047_v16 }
 0x22f   :  { %v11707_v50 = vpop.eup %11706  ;;  %8942 = vmatpush1.bf16.msra.mxu0 %v12953_v24  ;;  %8974 = vmatpush1.bf16.msra.mxu1 %v13052_v29 }
 0x230   :  { %v1285_v6 = vmul.f32 %v11707_v50, %v11705_v53  ;;  %8944 = vmatprep.subr.bf16.mxu0 %v12960_v36  ;;  %8976 = vmatprep.subr.bf16.mxu1 %v13055_v2  ;;  %v15486_v53 = vld [vmem:[#allocation36_spill] sm:$0xff]  ;;  %v15487_v50 = vld [vmem:[#allocation37_spill] sm:$0xff] }
 0x232   :  { %v11709_v25 = vpop.eup %11708  ;;  %v13190_v21 = vadd.f32 %v1285_v6, %v1284_v9  ;;  %v15488_v9 = vld [vmem:[#allocation38_spill] sm:$0xff]  ;;  %v15489_v6 = vld [vmem:[#allocation39_spill] sm:$0xff] }
 0x233   :  { %v1281_v46 = vadd.f32 1.0, %v11709_v25  ;;  %8946 = vmatpush1.bf16.msra.mxu0 %v12968_v3  ;;  %8978 = vmatpush1.bf16.msra.mxu1 %v13060_v33  ;;  %v15490_v25 = vld [vmem:[#allocation53_spill] sm:$0xff] }
 0x234   :  { %11710 = vtanh.f32 %v13190_v21  ;;  %8948 = vmatprep.subr.bf16.mxu0 %v12975_v59  ;;  %8980 = vmatprep.subr.bf16.mxu1 %v13063_v41 }
 0x235   :  { %11712 = vrcp.f32 %v1281_v46  ;;  %v15491_v46 = vld [vmem:[#allocation40_spill] sm:$0xff] }
 0x237   :  { %8950 = vmatpush1.bf16.msra.mxu0 %v12983_v13  ;;  %8982 = vmatpush1.bf16.msra.mxu1 %v13068_v39 }
 0x238   :  { %8952 = vmatprep.subr.bf16.mxu0 %v12990_v31  ;;  %8984 = vmatprep.subr.bf16.mxu1 %v13071_v0 }
 0x23b   :  { %8954 = vmatpush1.bf16.msra.mxu0 %v12998_v43  ;;  %8986 = vmatpush1.bf16.msra.mxu1 %v13076_v45 }
 0x23c   :  { %8956 = vmatprep.subr.bf16.mxu0 %v13005_v60  ;;  %8988 = vmatprep.subr.bf16.mxu1 %v13079_v34 }
 0x23e   :  { %v11711_v51 = vpop.eup %11710 }
 0x23f   :  { %v11713_v48 = vpop.eup %11712  ;;  %8958 = vmatpush1.bf16.msra.mxu0 %v13013_v19  ;;  %8990 = vmatpush1.bf16.msra.mxu1 %v13084_v56 }
 0x240   :  { %v13207_v42 = vmul.f32 %v11713_v48, %v11711_v51  ;;  %8992 = vmatprep.subr.bf16.mxu0 %v12767_v14  ;;  %9024 = vmatprep.subr.bf16.mxu1 %v12812_v32  ;;  %v15492_v51 = vld [vmem:[#allocation54_spill] sm:$0xff]  ;;  %v15493_v48 = vld [vmem:[#allocation41_spill] sm:$0xff] }
 0x242   :  { %15481 = vst [vmem:[#allocation78_spill] sm:$0xff] %v13207_v42  ;;  %1517 = vmatmul.mubr.f32.vlgmr.msra.gmra.mrb[20].mxu0 %v13207_v42  ;;  %1588 = vmatmul.mubr.f32.vlgmr.msra.gmra.mrb[36].mxu1 %v13207_v42  ;;  %v15497_v42 = vld [vmem:[#allocation43_spill] sm:$0xff] }
 0x243   :  { %8994 = vmatpush1.bf16.msra.mxu0 %v12808_v23  ;;  %9026 = vmatpush1.bf16.msra.mxu1 %v12905_v26 }
 0x244   :  { %8996 = vmatprep.subr.bf16.mxu0 %v15482_v7  ;;  %9028 = vmatprep.subr.bf16.mxu1 %v12911_v30 }
 0x245   :  { %1721 = vmatprep.mubr.f32.mxu0 %v15463_v40  ;;  %1792 = vmatprep.mubr.f32.mxu1 %v15463_v40 }
 0x247   :  { %8998 = vmatpush1.bf16.msra.mxu0 %v15483_v1  ;;  %9030 = vmatpush1.bf16.msra.mxu1 %v12920_v44 }
 0x248   :  { %9000 = vmatprep.subr.bf16.mxu0 %v15484_v12  ;;  %9032 = vmatprep.subr.bf16.mxu1 %v12926_v49 }
 0x24b   :  { %9002 = vmatpush1.bf16.msra.mxu0 %v15485_v17  ;;  %9034 = vmatpush1.bf16.msra.mxu1 %v12936_v61 }
 0x24c   :  { %9004 = vmatprep.subr.bf16.mxu0 %v15486_v53  ;;  %9036 = vmatprep.subr.bf16.mxu1 %v12942_v5  ;;  %v15506_v5 = vld [vmem:[#allocation71_spill] sm:$0xff] }
 0x24f   :  { %9006 = vmatpush1.bf16.msra.mxu0 %v15487_v50  ;;  %9038 = vmatpush1.bf16.msra.mxu1 %v12951_v22  ;;  %v15505_v22 = vld [vmem:[#allocation72_spill] sm:$0xff] }
 0x250   :  { %9008 = vmatprep.subr.bf16.mxu0 %v15488_v9  ;;  %9040 = vmatprep.subr.bf16.mxu1 %v12957_v28  ;;  %v15498_v9 = vld [vmem:[#allocation57_spill] sm:$0xff]  ;;  %v15499_v28 = vld [vmem:[#allocation44_spill] sm:$0xff] }
 0x253   :  { %9010 = vmatpush1.bf16.msra.mxu0 %v15489_v6  ;;  %9042 = vmatpush1.bf16.msra.mxu1 %v15490_v25  ;;  %v15500_v6 = vld [vmem:[#allocation58_spill] sm:$0xff]  ;;  %v15501_v25 = vld [vmem:[#allocation45_spill] sm:$0xff] }
 0x254   :  { %9012 = vmatprep.subr.bf16.mxu0 %v15491_v46  ;;  %9044 = vmatprep.subr.bf16.mxu1 %v15492_v51  ;;  %v15502_v46 = vld [vmem:[#allocation59_spill] sm:$0xff]  ;;  %v15503_v51 = vld [vmem:[#allocation46_spill] sm:$0xff] }
 0x257   :  { %9014 = vmatpush1.bf16.msra.mxu0 %v15493_v48  ;;  %9046 = vmatpush1.bf16.msra.mxu1 %v15494_v55  ;;  %v15504_v48 = vld [vmem:[#allocation60_spill] sm:$0xff] }
 0x258   :  { %9016 = vmatprep.subr.bf16.mxu0 %v15495_v20  ;;  %9048 = vmatprep.subr.bf16.mxu1 %v15496_v57 }
 0x25b   :  { %9018 = vmatpush1.bf16.msra.mxu0 %v15497_v42  ;;  %9050 = vmatpush1.bf16.msra.mxu1 %v15498_v9 }
 0x25c   :  { %9020 = vmatprep.subr.bf16.mxu0 %v15499_v28  ;;  %9052 = vmatprep.subr.bf16.mxu1 %v15500_v6 }
 0x25f   :  { %9022 = vmatpush1.bf16.msra.mxu0 %v15501_v25  ;;  %9054 = vmatpush1.bf16.msra.mxu1 %v15502_v46  ;;  %v15507_v46 = vld [vmem:[#allocation75_spill] sm:$0xff] }
 0x260   :  { %9056 = vmatprep.subr.bf16.mxu0 %v15503_v51  ;;  %9088 = vmatprep.subr.bf16.mxu1 %v15504_v48 }
 0x2f5   :  { %v1365_v55 = vpop.f32.mrb[2].mxu0  ;;  %v1436_v20 = vpop.f32.mrb[10].mxu1 }
 0x2f6   :  { %v11387_v57 = vadd.f32 %v1365_v55, %v15505_v22  ;;  %v1367_v50 = vpop.f32.mrb[3].mxu0  ;;  %v1438_v42 = vpop.f32.mrb[11].mxu1  ;;  %v11411_v61 = vadd.f32 %v1436_v20, %v15507_v46 }
 0x2f7   :  { %v11388_v9 = vadd.f32 %v1367_v50, %v15506_v5  ;;  %v11412_v25 = vadd.f32 %v1438_v42, %v13147_v52 }
 0x2f8   :  { %v8592_v53 = vmul.f32 -1.442695, %v11387_v57 }
 0x2f9   :  { %v8593_v28 = vmul.f32 -1.442695, %v11388_v9  ;;  %v8594_v6 = vmul.f32 -1.442695, %v11412_v25 }
 0x2fa   :  { %11714 = vpow2.f32 %v8592_v53 }
 0x2fb   :  { %11716 = vpow2.f32 %v8593_v28 }
 0x2fc   :  { %11718 = vpow2.f32 %v8594_v6 }
 0x2fd   :  { %11720 = vtanh.f32 %v11411_v61 }
 0x304   :  { %v11715_v51 = vpop.eup %11714 }
 0x305   :  { %v11717_v17 = vpop.eup %11716  ;;  %v1601_v48 = vadd.f32 1.0, %v11715_v51 }
 0x306   :  { %v1607_v49 = vadd.f32 1.0, %v11717_v17  ;;  %v11719_v55 = vpop.eup %11718  ;;  %v15508_v17 = vld [vmem:[#allocation76_spill] sm:$0xff] }
 0x307   :  { %11722 = vrcp.f32 %v1601_v48  ;;  %v11721_v22 = vpop.eup %11720  ;;  %v1614_v53 = vadd.f32 1.0, %v11719_v55 }
 0x308   :  { %11724 = vrcp.f32 %v1607_v49 }
 0x309   :  { %11726 = vrcp.f32 %v1614_v53 }
 0x311   :  { %v11723_v50 = vpop.eup %11722 }
 0x312   :  { %v11725_v57 = vpop.eup %11724  ;;  %v1618_v9 = vmul.f32 %v11723_v50, %v11721_v22 }
 0x313   :  { %v1617_v28 = vmul.f32 %v11725_v57, %v13159_v10  ;;  %v11727_v10 = vpop.eup %11726 }
 0x315   :  { %v13254_v42 = vadd.f32 %v1618_v9, %v1617_v28  ;;  %v1518_v25 = vpop.f32.mrb[20].mxu0  ;;  %v1589_v20 = vpop.f32.mrb[36].mxu1 }
 0x316   :  { %v11437_v51 = vadd.f32 %v1518_v25, %v13155_v58  ;;  %v1520_v6 = vpop.f32.mrb[21].mxu0  ;;  %v1591_v61 = vpop.f32.mrb[37].mxu1  ;;  %v11453_v57 = vadd.f32 %v1589_v20, %v13163_v63 }
 0x317   :  { %v11438_v48 = vadd.f32 %v1520_v6, %v15508_v17  ;;  %11728 = vtanh.f32 %v13254_v42  ;;  %v11454_v22 = vadd.f32 %v1591_v61, %v13166_v4 }
 0x318   :  { %v8595_v49 = vmul.f32 -1.442695, %v11437_v51 }
 0x319   :  { %v8596_v46 = vmul.f32 -1.442695, %v11438_v48  ;;  %v8597_v50 = vmul.f32 -1.442695, %v11454_v22 }
 0x31a   :  { %11730 = vpow2.f32 %v8595_v49 }
 0x31b   :  { %11732 = vpow2.f32 %v8596_v46 }
 0x31c   :  { %11734 = vpow2.f32 %v8597_v50 }
 0x31d   :  { %11736 = vtanh.f32 %v11453_v57  ;;  %v15511_v57 = vld [vmem:[#allocation48_spill] sm:$0xff] }
 0x321   :  { %v11729_v55 = vpop.eup %11728 }
 0x322   :  { %v13261_v9 = vmul.f32 %v11729_v55, %v11727_v10 }
 0x324   :  { %15509 = vst [vmem:[#allocation32_spill] sm:$0xff] %v13261_v9  ;;  %v11731_v53 = vpop.eup %11730  ;;  %1722 = vmatmul.mubr.f32.vlgmr.msra.gmra.mrb[4].mxu0 %v13261_v9  ;;  %1793 = vmatmul.mubr.f32.vlgmr.msra.gmra.mrb[12].mxu1 %v13261_v9  ;;  %v15525_v9 = vld [vmem:[#allocation55_spill] sm:$0xff] }
 0x325   :  { %v11733_v28 = vpop.eup %11732  ;;  %v1625_v25 = vadd.f32 1.0, %v11731_v53  ;;  %9058 = vmatpush1.bf16.msra.mxu0 %v12907_v27  ;;  %9090 = vmatpush1.bf16.msra.mxu1 %v13024_v15  ;;  %v15512_v53 = vld [vmem:[#allocation35_spill] sm:$0xff] }
 0x326   :  { %v1631_v46 = vadd.f32 1.0, %v11733_v28  ;;  %9060 = vmatprep.subr.bf16.mxu0 %v12913_v37  ;;  %9092 = vmatprep.subr.bf16.mxu1 %v13028_v38  ;;  %v11735_v20 = vpop.eup %11734  ;;  %v15513_v28 = vld [vmem:[#allocation49_spill] sm:$0xff] }
 0x327   :  { %11738 = vrcp.f32 %v1625_v25  ;;  %1874 = vmatprep.mubr.f32.mxu0 %v15463_v40  ;;  %1945 = vmatprep.mubr.f32.mxu1 %v15463_v40  ;;  %v11737_v51 = vpop.eup %11736  ;;  %v1638_v49 = vadd.f32 1.0, %v11735_v20  ;;  %v15514_v25 = vld [vmem:[#allocation36_spill] sm:$0xff]  ;;  %v15516_v20 = vld [vmem:[#allocation37_spill] sm:$0xff] }
 0x328   :  { %11740 = vrcp.f32 %v1631_v46  ;;  %v15515_v46 = vld [vmem:[#allocation50_spill] sm:$0xff] }
 0x329   :  { %9062 = vmatpush1.bf16.msra.mxu0 %v12922_v47  ;;  %9094 = vmatpush1.bf16.msra.mxu1 %v13034_v18  ;;  %11742 = vrcp.f32 %v1638_v49  ;;  %v15521_v49 = vld [vmem:[#allocation53_spill] sm:$0xff] }
 0x32a   :  { %9064 = vmatprep.subr.bf16.mxu0 %v12929_v54  ;;  %9096 = vmatprep.subr.bf16.mxu1 %v13038_v8 }
 0x32d   :  { %9066 = vmatpush1.bf16.msra.mxu0 %v12938_v62  ;;  %9098 = vmatpush1.bf16.msra.mxu1 %v13044_v35 }
 0x32e   :  { %9068 = vmatprep.subr.bf16.mxu0 %v12945_v11  ;;  %9100 = vmatprep.subr.bf16.mxu1 %v13047_v16 }
 0x331   :  { %v11739_v6 = vpop.eup %11738  ;;  %9070 = vmatpush1.bf16.msra.mxu0 %v12953_v24  ;;  %9102 = vmatpush1.bf16.msra.mxu1 %v13052_v29 }
 0x332   :  { %v11741_v61 = vpop.eup %11740  ;;  %v1642_v48 = vmul.f32 %v11739_v6, %v11737_v51  ;;  %9072 = vmatprep.subr.bf16.mxu0 %v12960_v36  ;;  %9104 = vmatprep.subr.bf16.mxu1 %v13055_v2  ;;  %v15517_v51 = vld [vmem:[#allocation51_spill] sm:$0xff]  ;;  %v15518_v6 = vld [vmem:[#allocation38_spill] sm:$0xff] }
 0x333   :  { %v1641_v22 = vmul.f32 %v11741_v61, %v13190_v21  ;;  %v11743_v21 = vpop.eup %11742  ;;  %v15519_v61 = vld [vmem:[#allocation52_spill] sm:$0xff] }
 0x335   :  { %v13284_v10 = vadd.f32 %v1642_v48, %v1641_v22  ;;  %9074 = vmatpush1.bf16.msra.mxu0 %v12968_v3  ;;  %9106 = vmatpush1.bf16.msra.mxu1 %v13060_v33  ;;  %v15520_v48 = vld [vmem:[#allocation39_spill] sm:$0xff]  ;;  %v15522_v22 = vld [vmem:[#allocation40_spill] sm:$0xff] }
 0x336   :  { %9076 = vmatprep.subr.bf16.mxu0 %v12975_v59  ;;  %9108 = vmatprep.subr.bf16.mxu1 %v13063_v41 }
 0x337   :  { %11744 = vtanh.f32 %v13284_v10 }
 0x339   :  { %9078 = vmatpush1.bf16.msra.mxu0 %v12983_v13  ;;  %9110 = vmatpush1.bf16.msra.mxu1 %v13068_v39 }
 0x33a   :  { %9080 = vmatprep.subr.bf16.mxu0 %v12990_v31  ;;  %9112 = vmatprep.subr.bf16.mxu1 %v13071_v0 }
 0x33d   :  { %9082 = vmatpush1.bf16.msra.mxu0 %v12998_v43  ;;  %9114 = vmatpush1.bf16.msra.mxu1 %v13076_v45 }
 0x33e   :  { %9084 = vmatprep.subr.bf16.mxu0 %v13005_v60  ;;  %9116 = vmatprep.subr.bf16.mxu1 %v13079_v34 }
 0x341   :  { %v11745_v55 = vpop.eup %11744  ;;  %9086 = vmatpush1.bf16.msra.mxu0 %v13013_v19  ;;  %9118 = vmatpush1.bf16.msra.mxu1 %v13084_v56 }
 0x342   :  { %v13301_v50 = vmul.f32 %v11745_v55, %v11743_v21  ;;  %9120 = vmatprep.subr.bf16.mxu0 %v12767_v14  ;;  %9152 = vmatprep.subr.bf16.mxu1 %v12812_v32  ;;  %v15523_v21 = vld [vmem:[#allocation54_spill] sm:$0xff]  ;;  %v15524_v55 = vld [vmem:[#allocation41_spill] sm:$0xff] }
 0x344   :  { %15510 = vst [vmem:[#allocation33_spill] sm:$0xff] %v13301_v50  ;;  %1875 = vmatmul.mubr.f32.vlgmr.msra.gmra.mrb[18].mxu0 %v13301_v50  ;;  %1946 = vmatmul.mubr.f32.vlgmr.msra.gmra.mrb[34].mxu1 %v13301_v50  ;;  %v15526_v50 = vld [vmem:[#allocation42_spill] sm:$0xff] }
 0x345   :  { %9122 = vmatpush1.bf16.msra.mxu0 %v12808_v23  ;;  %9154 = vmatpush1.bf16.msra.mxu1 %v12905_v26 }
 0x346   :  { %9124 = vmatprep.subr.bf16.mxu0 %v15482_v7  ;;  %9156 = vmatprep.subr.bf16.mxu1 %v12911_v30 }
 0x347   :  { %2079 = vmatprep.mubr.f32.mxu0 %v15463_v40  ;;  %2150 = vmatprep.mubr.f32.mxu1 %v15463_v40 }
 0x349   :  { %9126 = vmatpush1.bf16.msra.mxu0 %v15483_v1  ;;  %9158 = vmatpush1.bf16.msra.mxu1 %v12920_v44 }
 0x34a   :  { %9128 = vmatprep.subr.bf16.mxu0 %v15484_v12  ;;  %9160 = vmatprep.subr.bf16.mxu1 %v15511_v57 }
 0x34d   :  { %9130 = vmatpush1.bf16.msra.mxu0 %v15512_v53  ;;  %9162 = vmatpush1.bf16.msra.mxu1 %v15513_v28 }
 0x34e   :  { %9132 = vmatprep.subr.bf16.mxu0 %v15514_v25  ;;  %9164 = vmatprep.subr.bf16.mxu1 %v15515_v46  ;;  %v15536_v46 = vld [vmem:[#allocation72_spill] sm:$0xff] }
 0x351   :  { %9134 = vmatpush1.bf16.msra.mxu0 %v15516_v20  ;;  %9166 = vmatpush1.bf16.msra.mxu1 %v15517_v51  ;;  %v15527_v20 = vld [vmem:[#allocation56_spill] sm:$0xff]  ;;  %v15528_v51 = vld [vmem:[#allocation43_spill] sm:$0xff] }
 0x352   :  { %9136 = vmatprep.subr.bf16.mxu0 %v15518_v6  ;;  %9168 = vmatprep.subr.bf16.mxu1 %v15519_v61  ;;  %v15529_v6 = vld [vmem:[#allocation57_spill] sm:$0xff]  ;;  %v15530_v61 = vld [vmem:[#allocation44_spill] sm:$0xff] }
 0x355   :  { %9138 = vmatpush1.bf16.msra.mxu0 %v15520_v48  ;;  %9170 = vmatpush1.bf16.msra.mxu1 %v15521_v49  ;;  %v15531_v48 = vld [vmem:[#allocation58_spill] sm:$0xff]  ;;  %v15532_v49 = vld [vmem:[#allocation45_spill] sm:$0xff] }
 0x356   :  { %9140 = vmatprep.subr.bf16.mxu0 %v15522_v22  ;;  %9172 = vmatprep.subr.bf16.mxu1 %v15523_v21  ;;  %v15533_v22 = vld [vmem:[#allocation59_spill] sm:$0xff]  ;;  %v15534_v21 = vld [vmem:[#allocation46_spill] sm:$0xff] }
 0x359   :  { %9142 = vmatpush1.bf16.msra.mxu0 %v15524_v55  ;;  %9174 = vmatpush1.bf16.msra.mxu1 %v15525_v9  ;;  %v15535_v55 = vld [vmem:[#allocation60_spill] sm:$0xff] }
 0x35a   :  { %9144 = vmatprep.subr.bf16.mxu0 %v15526_v50  ;;  %9176 = vmatprep.subr.bf16.mxu1 %v15527_v20 }
 0x35d   :  { %9146 = vmatpush1.bf16.msra.mxu0 %v15528_v51  ;;  %9178 = vmatpush1.bf16.msra.mxu1 %v15529_v6 }
 0x35e   :  { %9148 = vmatprep.subr.bf16.mxu0 %v15530_v61  ;;  %9180 = vmatprep.subr.bf16.mxu1 %v15531_v48 }
 0x361   :  { %9150 = vmatpush1.bf16.msra.mxu0 %v15532_v49  ;;  %9182 = vmatpush1.bf16.msra.mxu1 %v15533_v22  ;;  %v15537_v22 = vld [vmem:[#allocation75_spill] sm:$0xff] }
 0x362   :  { %9184 = vmatprep.subr.bf16.mxu0 %v15534_v21  ;;  %9216 = vmatprep.subr.bf16.mxu1 %v15535_v55 }
 0x3f7   :  { %v1723_v9 = vpop.f32.mrb[4].mxu0  ;;  %v1794_v50 = vpop.f32.mrb[12].mxu1 }
 0x3f8   :  { %v11389_v20 = vadd.f32 %v1723_v9, %v15536_v46  ;;  %v1725_v25 = vpop.f32.mrb[5].mxu0  ;;  %v1796_v51 = vpop.f32.mrb[13].mxu1  ;;  %v11413_v53 = vadd.f32 %v1794_v50, %v15537_v22 }
 0x3f9   :  { %v11390_v6 = vadd.f32 %v1725_v25, %v15506_v5  ;;  %v11414_v49 = vadd.f32 %v1796_v51, %v13147_v52 }
 0x3fa   :  { %v8598_v28 = vmul.f32 -1.442695, %v11389_v20 }
 0x3fb   :  { %v8599_v61 = vmul.f32 -1.442695, %v11390_v6  ;;  %v8600_v48 = vmul.f32 -1.442695, %v11414_v49 }
 0x3fc   :  { %11746 = vpow2.f32 %v8598_v28 }
 0x3fd   :  { %11748 = vpow2.f32 %v8599_v61 }
 0x3fe   :  { %11750 = vpow2.f32 %v8600_v48 }
 0x3ff   :  { %11752 = vtanh.f32 %v11413_v53 }
 0x406   :  { %v11747_v21 = vpop.eup %11746 }
 0x407   :  { %v11749_v57 = vpop.eup %11748  ;;  %v1959_v55 = vadd.f32 1.0, %v11747_v21 }
 0x408   :  { %v1965_v12 = vadd.f32 1.0, %v11749_v57  ;;  %v11751_v9 = vpop.eup %11750 }
 0x409   :  { %11754 = vrcp.f32 %v1959_v55  ;;  %v11753_v46 = vpop.eup %11752  ;;  %v1972_v28 = vadd.f32 1.0, %v11751_v9 }
 0x40a   :  { %11756 = vrcp.f32 %v1965_v12 }
 0x40b   :  { %11758 = vrcp.f32 %v1972_v28 }
 0x413   :  { %v11755_v25 = vpop.eup %11754 }
 0x414   :  { %v11757_v20 = vpop.eup %11756  ;;  %v1976_v6 = vmul.f32 %v11755_v25, %v11753_v46 }
 0x415   :  { %v1975_v61 = vmul.f32 %v11757_v20, %v13254_v42  ;;  %v11759_v42 = vpop.eup %11758 }
 0x417   :  { %v13346_v51 = vadd.f32 %v1976_v6, %v1975_v61  ;;  %v1876_v49 = vpop.f32.mrb[18].mxu0  ;;  %v1947_v50 = vpop.f32.mrb[34].mxu1 }
 0x418   :  { %v11435_v21 = vadd.f32 %v1876_v49, %v13155_v58  ;;  %v1878_v48 = vpop.f32.mrb[19].mxu0  ;;  %v1949_v53 = vpop.f32.mrb[35].mxu1  ;;  %v11451_v20 = vadd.f32 %v1947_v50, %v13163_v63 }
 0x419   :  { %v11436_v57 = vadd.f32 %v1878_v48, %v15508_v17  ;;  %11760 = vtanh.f32 %v13346_v51  ;;  %v11452_v46 = vadd.f32 %v1949_v53, %v13166_v4 }
 0x41a   :  { %v8601_v12 = vmul.f32 -1.442695, %v11435_v21 }
 0x41b   :  { %v8602_v55 = vmul.f32 -1.442695, %v11436_v57  ;;  %v8603_v25 = vmul.f32 -1.442695, %v11452_v46 }
 0x41c   :  { %11762 = vpow2.f32 %v8601_v12 }
 0x41d   :  { %11764 = vpow2.f32 %v8602_v55 }
 0x41e   :  { %11766 = vpow2.f32 %v8603_v25 }
 0x41f   :  { %11768 = vtanh.f32 %v11451_v20  ;;  %v15540_v20 = vld [vmem:[#allocation34_spill] sm:$0xff] }
 0x423   :  { %v11761_v9 = vpop.eup %11760 }
 0x424   :  { %v13353_v6 = vmul.f32 %v11761_v9, %v11759_v42 }
 0x426   :  { %15538 = vst [vmem:[#allocation71_spill] sm:$0xff] %v13353_v6  ;;  %v11763_v28 = vpop.eup %11762  ;;  %2080 = vmatmul.mubr.f32.vlgmr.msra.gmra.mrb[6].mxu0 %v13353_v6  ;;  %2151 = vmatmul.mubr.f32.vlgmr.msra.gmra.mrb[14].mxu1 %v13353_v6  ;;  %v15554_v6 = vld [vmem:[#allocation41_spill] sm:$0xff] }
 0x427   :  { %v11765_v61 = vpop.eup %11764  ;;  %v1983_v49 = vadd.f32 1.0, %v11763_v28  ;;  %9186 = vmatpush1.bf16.msra.mxu0 %v12907_v27  ;;  %9218 = vmatpush1.bf16.msra.mxu1 %v13024_v15  ;;  %v15541_v28 = vld [vmem:[#allocation48_spill] sm:$0xff] }
 0x428   :  { %v1989_v21 = vadd.f32 1.0, %v11765_v61  ;;  %9188 = vmatprep.subr.bf16.mxu0 %v12913_v37  ;;  %9220 = vmatprep.subr.bf16.mxu1 %v13028_v38  ;;  %v11767_v50 = vpop.eup %11766  ;;  %v15542_v61 = vld [vmem:[#allocation35_spill] sm:$0xff] }
 0x429   :  { %11770 = vrcp.f32 %v1983_v49  ;;  %2232 = vmatprep.mubr.f32.mxu0 %v15463_v40  ;;  %2303 = vmatprep.mubr.f32.mxu1 %v15463_v40  ;;  %v11769_v48 = vpop.eup %11768  ;;  %v1996_v55 = vadd.f32 1.0, %v11767_v50  ;;  %v15543_v49 = vld [vmem:[#allocation49_spill] sm:$0xff]  ;;  %v15545_v50 = vld [vmem:[#allocation50_spill] sm:$0xff] }
 0x42a   :  { %11772 = vrcp.f32 %v1989_v21  ;;  %v15544_v21 = vld [vmem:[#allocation36_spill] sm:$0xff] }
 0x42b   :  { %9190 = vmatpush1.bf16.msra.mxu0 %v12922_v47  ;;  %9222 = vmatpush1.bf16.msra.mxu1 %v13034_v18  ;;  %11774 = vrcp.f32 %v1996_v55  ;;  %v15550_v55 = vld [vmem:[#allocation39_spill] sm:$0xff] }
 0x42c   :  { %9192 = vmatprep.subr.bf16.mxu0 %v12929_v54  ;;  %9224 = vmatprep.subr.bf16.mxu1 %v13038_v8 }
 0x42f   :  { %9194 = vmatpush1.bf16.msra.mxu0 %v12938_v62  ;;  %9226 = vmatpush1.bf16.msra.mxu1 %v13044_v35 }
 0x430   :  { %9196 = vmatprep.subr.bf16.mxu0 %v12945_v11  ;;  %9228 = vmatprep.subr.bf16.mxu1 %v13047_v16 }
 0x433   :  { %v11771_v53 = vpop.eup %11770  ;;  %9198 = vmatpush1.bf16.msra.mxu0 %v12953_v24  ;;  %9230 = vmatpush1.bf16.msra.mxu1 %v13052_v29 }
 0x434   :  { %v11773_v57 = vpop.eup %11772  ;;  %v2000_v12 = vmul.f32 %v11771_v53, %v11769_v48  ;;  %9200 = vmatprep.subr.bf16.mxu0 %v12960_v36  ;;  %9232 = vmatprep.subr.bf16.mxu1 %v13055_v2  ;;  %v15546_v48 = vld [vmem:[#allocation37_spill] sm:$0xff]  ;;  %v15547_v53 = vld [vmem:[#allocation51_spill] sm:$0xff] }
 0x435   :  { %v1999_v46 = vmul.f32 %v11773_v57, %v13284_v10  ;;  %v11775_v10 = vpop.eup %11774  ;;  %v15548_v57 = vld [vmem:[#allocation38_spill] sm:$0xff] }
 0x437   :  { %v13376_v42 = vadd.f32 %v2000_v12, %v1999_v46  ;;  %9202 = vmatpush1.bf16.msra.mxu0 %v12968_v3  ;;  %9234 = vmatpush1.bf16.msra.mxu1 %v13060_v33  ;;  %v15549_v12 = vld [vmem:[#allocation52_spill] sm:$0xff]  ;;  %v15551_v46 = vld [vmem:[#allocation53_spill] sm:$0xff] }
 0x438   :  { %9204 = vmatprep.subr.bf16.mxu0 %v12975_v59  ;;  %9236 = vmatprep.subr.bf16.mxu1 %v13063_v41 }
 0x439   :  { %11776 = vtanh.f32 %v13376_v42 }
 0x43b   :  { %9206 = vmatpush1.bf16.msra.mxu0 %v12983_v13  ;;  %9238 = vmatpush1.bf16.msra.mxu1 %v13068_v39 }
 0x43c   :  { %9208 = vmatprep.subr.bf16.mxu0 %v12990_v31  ;;  %9240 = vmatprep.subr.bf16.mxu1 %v13071_v0 }
 0x43f   :  { %9210 = vmatpush1.bf16.msra.mxu0 %v12998_v43  ;;  %9242 = vmatpush1.bf16.msra.mxu1 %v13076_v45 }
 0x440   :  { %9212 = vmatprep.subr.bf16.mxu0 %v13005_v60  ;;  %9244 = vmatprep.subr.bf16.mxu1 %v13079_v34 }
 0x443   :  { %v11777_v9 = vpop.eup %11776  ;;  %9214 = vmatpush1.bf16.msra.mxu0 %v13013_v19  ;;  %9246 = vmatpush1.bf16.msra.mxu1 %v13084_v56 }
 0x444   :  { %v13393_v25 = vmul.f32 %v11777_v9, %v11775_v10  ;;  %9248 = vmatprep.subr.bf16.mxu0 %v12767_v14  ;;  %9280 = vmatprep.subr.bf16.mxu1 %v12812_v32  ;;  %v15552_v10 = vld [vmem:[#allocation40_spill] sm:$0xff]  ;;  %v15553_v9 = vld [vmem:[#allocation54_spill] sm:$0xff] }
 0x446   :  { %15539 = vst [vmem:[#allocation76_spill] sm:$0xff] %v13393_v25  ;;  %2233 = vmatmul.mubr.f32.vlgmr.msra.gmra.mrb[16].mxu0 %v13393_v25  ;;  %2304 = vmatmul.mubr.f32.vlgmr.msra.gmra.mrb[32].mxu1 %v13393_v25  ;;  %v15555_v25 = vld [vmem:[#allocation55_spill] sm:$0xff] }
 0x447   :  { %9250 = vmatpush1.bf16.msra.mxu0 %v12808_v23  ;;  %9282 = vmatpush1.bf16.msra.mxu1 %v12905_v26 }
 0x448   :  { %9252 = vmatprep.subr.bf16.mxu0 %v15482_v7  ;;  %9284 = vmatprep.subr.bf16.mxu1 %v12911_v30 }
 0x449   :  { %2436 = vmatprep.mubr.f32.mxu0 %v15463_v40  ;;  %2507 = vmatprep.mubr.f32.mxu1 %v15463_v40 }
 0x44b   :  { %9254 = vmatpush1.bf16.msra.mxu0 %v15483_v1  ;;  %9286 = vmatpush1.bf16.msra.mxu1 %v12920_v44 }
 0x44c   :  { %9256 = vmatprep.subr.bf16.mxu0 %v15540_v20  ;;  %9288 = vmatprep.subr.bf16.mxu1 %v15541_v28 }
 0x44f   :  { %9258 = vmatpush1.bf16.msra.mxu0 %v15542_v61  ;;  %9290 = vmatpush1.bf16.msra.mxu1 %v15543_v49 }
 0x450   :  { %9260 = vmatprep.subr.bf16.mxu0 %v15544_v21  ;;  %9292 = vmatprep.subr.bf16.mxu1 %v15545_v50  ;;  %v15556_v50 = vld [vmem:[#allocation42_spill] sm:$0xff]  ;;  %v15566_v21 = vld [vmem:[#allocation72_spill] sm:$0xff] }
 0x453   :  { %9262 = vmatpush1.bf16.msra.mxu0 %v15546_v48  ;;  %9294 = vmatpush1.bf16.msra.mxu1 %v15547_v53  ;;  %v15557_v48 = vld [vmem:[#allocation56_spill] sm:$0xff]  ;;  %v15558_v53 = vld [vmem:[#allocation43_spill] sm:$0xff] }
 0x454   :  { %9264 = vmatprep.subr.bf16.mxu0 %v15548_v57  ;;  %9296 = vmatprep.subr.bf16.mxu1 %v15549_v12  ;;  %v15559_v57 = vld [vmem:[#allocation57_spill] sm:$0xff]  ;;  %v15560_v12 = vld [vmem:[#allocation44_spill] sm:$0xff] }
 0x457   :  { %9266 = vmatpush1.bf16.msra.mxu0 %v15550_v55  ;;  %9298 = vmatpush1.bf16.msra.mxu1 %v15551_v46  ;;  %v15561_v55 = vld [vmem:[#allocation58_spill] sm:$0xff]  ;;  %v15562_v46 = vld [vmem:[#allocation45_spill] sm:$0xff] }
 0x458   :  { %9268 = vmatprep.subr.bf16.mxu0 %v15552_v10  ;;  %9300 = vmatprep.subr.bf16.mxu1 %v15553_v9  ;;  %v15563_v10 = vld [vmem:[#allocation59_spill] sm:$0xff]  ;;  %v15564_v9 = vld [vmem:[#allocation46_spill] sm:$0xff] }
 0x45b   :  { %9270 = vmatpush1.bf16.msra.mxu0 %v15554_v6  ;;  %9302 = vmatpush1.bf16.msra.mxu1 %v15555_v25  ;;  %v15565_v6 = vld [vmem:[#allocation60_spill] sm:$0xff] }
 0x45c   :  { %9272 = vmatprep.subr.bf16.mxu0 %v15556_v50  ;;  %9304 = vmatprep.subr.bf16.mxu1 %v15557_v48 }
 0x45f   :  { %9274 = vmatpush1.bf16.msra.mxu0 %v15558_v53  ;;  %9306 = vmatpush1.bf16.msra.mxu1 %v15559_v57 }
 0x460   :  { %9276 = vmatprep.subr.bf16.mxu0 %v15560_v12  ;;  %9308 = vmatprep.subr.bf16.mxu1 %v15561_v55 }
 0x463   :  { %9278 = vmatpush1.bf16.msra.mxu0 %v15562_v46  ;;  %9310 = vmatpush1.bf16.msra.mxu1 %v15563_v10 }
 0x464   :  { %9312 = vmatprep.subr.bf16.mxu0 %v15564_v9  ;;  %9344 = vmatprep.subr.bf16.mxu1 %v15565_v6 }
 0x4f9   :  { %v2081_v25 = vpop.f32.mrb[6].mxu0  ;;  %v2152_v50 = vpop.f32.mrb[14].mxu1 }
 0x4fa   :  { %v11391_v48 = vadd.f32 %v2081_v25, %v15566_v21  ;;  %v2083_v49 = vpop.f32.mrb[7].mxu0  ;;  %v2154_v53 = vpop.f32.mrb[15].mxu1  ;;  %v11415_v10 = vadd.f32 %v2152_v50, %v15537_v22 }
 0x4fb   :  { %v11392_v57 = vadd.f32 %v2083_v49, %v15506_v5  ;;  %v11416_v46 = vadd.f32 %v2154_v53, %v13147_v52 }
 0x4fc   :  { %v8604_v61 = vmul.f32 -1.442695, %v11391_v48 }
 0x4fd   :  { %v8605_v12 = vmul.f32 -1.442695, %v11392_v57  ;;  %v8606_v55 = vmul.f32 -1.442695, %v11416_v46 }
 0x4fe   :  { %11778 = vpow2.f32 %v8604_v61 }
 0x4ff   :  { %11780 = vpow2.f32 %v8605_v12 }
 0x500   :  { %11782 = vpow2.f32 %v8606_v55 }
 0x501   :  { %11784 = vtanh.f32 %v11415_v10 }
 0x508   :  { %v11779_v9 = vpop.eup %11778 }
 0x509   :  { %v11781_v28 = vpop.eup %11780  ;;  %v2317_v6 = vadd.f32 1.0, %v11779_v9 }
 0x50a   :  { %v2323_v20 = vadd.f32 1.0, %v11781_v28  ;;  %v11783_v25 = vpop.eup %11782 }
 0x50b   :  { %11786 = vrcp.f32 %v2317_v6  ;;  %v11785_v21 = vpop.eup %11784  ;;  %v2330_v61 = vadd.f32 1.0, %v11783_v25 }
 0x50c   :  { %11788 = vrcp.f32 %v2323_v20 }
 0x50d   :  { %11790 = vrcp.f32 %v2330_v61 }
 0x515   :  { %v11787_v49 = vpop.eup %11786 }
 0x516   :  { %v11789_v48 = vpop.eup %11788  ;;  %v2334_v57 = vmul.f32 %v11787_v49, %v11785_v21 }
 0x517   :  { %v2333_v12 = vmul.f32 %v11789_v48, %v13346_v51  ;;  %v11791_v51 = vpop.eup %11790 }
 0x519   :  { %v13438_v53 = vadd.f32 %v2334_v57, %v2333_v12  ;;  %v2234_v46 = vpop.f32.mrb[16].mxu0  ;;  %v2305_v50 = vpop.f32.mrb[32].mxu1 }
 0x51a   :  { %v11433_v9 = vadd.f32 %v2234_v46, %v13155_v58  ;;  %v2236_v55 = vpop.f32.mrb[17].mxu0  ;;  %v2307_v10 = vpop.f32.mrb[33].mxu1  ;;  %v11449_v48 = vadd.f32 %v2305_v50, %v13163_v63 }
 0x51b   :  { %v11434_v6 = vadd.f32 %v2236_v55, %v15508_v17  ;;  %11792 = vtanh.f32 %v13438_v53  ;;  %v11450_v21 = vadd.f32 %v2307_v10, %v13166_v4 }
 0x51c   :  { %v8607_v20 = vmul.f32 -1.442695, %v11433_v9 }
 0x51d   :  { %v8608_v28 = vmul.f32 -1.442695, %v11434_v6  ;;  %v8609_v49 = vmul.f32 -1.442695, %v11450_v21 }
 0x51e   :  { %11794 = vpow2.f32 %v8607_v20 }
 0x51f   :  { %11796 = vpow2.f32 %v8608_v28 }
 0x520   :  { %11798 = vpow2.f32 %v8609_v49 }
 0x521   :  { %11800 = vtanh.f32 %v11449_v48  ;;  %v15569_v48 = vld [vmem:[#allocation34_spill] sm:$0xff] }
 0x525   :  { %v11793_v25 = vpop.eup %11792 }
 0x526   :  { %v13445_v57 = vmul.f32 %v11793_v25, %v11791_v51 }
 0x528   :  { %15567 = vst [vmem:[#allocation75_spill] sm:$0xff] %v13445_v57  ;;  %v11795_v61 = vpop.eup %11794  ;;  %2437 = vmatmul.mubr.f32.vlgmr.msra.gmra.mrb[24].mxu0 %v13445_v57  ;;  %2508 = vmatmul.mubr.f32.vlgmr.msra.gmra.mrb[16].mxu1 %v13445_v57  ;;  %v15583_v57 = vld [vmem:[#allocation41_spill] sm:$0xff] }
 0x529   :  { %v11797_v12 = vpop.eup %11796  ;;  %v2341_v46 = vadd.f32 1.0, %v11795_v61  ;;  %9314 = vmatpush1.bf16.msra.mxu0 %v12907_v27  ;;  %9346 = vmatpush1.bf16.msra.mxu1 %v13024_v15  ;;  %v15570_v61 = vld [vmem:[#allocation48_spill] sm:$0xff] }
 0x52a   :  { %v2347_v9 = vadd.f32 1.0, %v11797_v12  ;;  %9316 = vmatprep.subr.bf16.mxu0 %v12913_v37  ;;  %9348 = vmatprep.subr.bf16.mxu1 %v13028_v38  ;;  %v11799_v50 = vpop.eup %11798  ;;  %v15571_v12 = vld [vmem:[#allocation35_spill] sm:$0xff] }
 0x52b   :  { %11802 = vrcp.f32 %v2341_v46  ;;  %2588 = vmatprep.mubr.f32.mxu0 %v15463_v40  ;;  %2659 = vmatprep.mubr.f32.mxu1 %v15463_v40  ;;  %v11801_v55 = vpop.eup %11800  ;;  %v2354_v28 = vadd.f32 1.0, %v11799_v50  ;;  %v15572_v46 = vld [vmem:[#allocation49_spill] sm:$0xff]  ;;  %v15574_v50 = vld [vmem:[#allocation50_spill] sm:$0xff] }
 0x52c   :  { %11804 = vrcp.f32 %v2347_v9  ;;  %v15573_v9 = vld [vmem:[#allocation36_spill] sm:$0xff] }
 0x52d   :  { %9318 = vmatpush1.bf16.msra.mxu0 %v12922_v47  ;;  %9350 = vmatpush1.bf16.msra.mxu1 %v13034_v18  ;;  %11806 = vrcp.f32 %v2354_v28  ;;  %v15579_v28 = vld [vmem:[#allocation39_spill] sm:$0xff] }
 0x52e   :  { %9320 = vmatprep.subr.bf16.mxu0 %v12929_v54  ;;  %9352 = vmatprep.subr.bf16.mxu1 %v13038_v8 }
 0x531   :  { %9322 = vmatpush1.bf16.msra.mxu0 %v12938_v62  ;;  %9354 = vmatpush1.bf16.msra.mxu1 %v13044_v35 }
 0x532   :  { %9324 = vmatprep.subr.bf16.mxu0 %v12945_v11  ;;  %9356 = vmatprep.subr.bf16.mxu1 %v13047_v16 }
 0x535   :  { %v11803_v10 = vpop.eup %11802  ;;  %9326 = vmatpush1.bf16.msra.mxu0 %v12953_v24  ;;  %9358 = vmatpush1.bf16.msra.mxu1 %v13052_v29 }
 0x536   :  { %v11805_v6 = vpop.eup %11804  ;;  %v2358_v20 = vmul.f32 %v11803_v10, %v11801_v55  ;;  %9328 = vmatprep.subr.bf16.mxu0 %v12960_v36  ;;  %9360 = vmatprep.subr.bf16.mxu1 %v13055_v2  ;;  %v15575_v55 = vld [vmem:[#allocation37_spill] sm:$0xff]  ;;  %v15576_v10 = vld [vmem:[#allocation51_spill] sm:$0xff] }
 0x537   :  { %v2357_v21 = vmul.f32 %v11805_v6, %v13376_v42  ;;  %v11807_v42 = vpop.eup %11806  ;;  %v15577_v6 = vld [vmem:[#allocation38_spill] sm:$0xff] }
 0x539   :  { %v13468_v51 = vadd.f32 %v2358_v20, %v2357_v21  ;;  %9330 = vmatpush1.bf16.msra.mxu0 %v12968_v3  ;;  %9362 = vmatpush1.bf16.msra.mxu1 %v13060_v33  ;;  %v15578_v20 = vld [vmem:[#allocation52_spill] sm:$0xff]  ;;  %v15580_v21 = vld [vmem:[#allocation53_spill] sm:$0xff] }
 0x53a   :  { %9332 = vmatprep.subr.bf16.mxu0 %v12975_v59  ;;  %9364 = vmatprep.subr.bf16.mxu1 %v13063_v41 }
 0x53b   :  { %11808 = vtanh.f32 %v13468_v51 }
 0x53d   :  { %9334 = vmatpush1.bf16.msra.mxu0 %v12983_v13  ;;  %9366 = vmatpush1.bf16.msra.mxu1 %v13068_v39 }
 0x53e   :  { %9336 = vmatprep.subr.bf16.mxu0 %v12990_v31  ;;  %9368 = vmatprep.subr.bf16.mxu1 %v13071_v0 }
 0x541   :  { %9338 = vmatpush1.bf16.msra.mxu0 %v12998_v43  ;;  %9370 = vmatpush1.bf16.msra.mxu1 %v13076_v45 }
 0x542   :  { %9340 = vmatprep.subr.bf16.mxu0 %v13005_v60  ;;  %9372 = vmatprep.subr.bf16.mxu1 %v13079_v34 }
 0x545   :  { %v11809_v25 = vpop.eup %11808  ;;  %9342 = vmatpush1.bf16.msra.mxu0 %v13013_v19  ;;  %9374 = vmatpush1.bf16.msra.mxu1 %v13084_v56 }
 0x546   :  { %v13485_v49 = vmul.f32 %v11809_v25, %v11807_v42  ;;  %9376 = vmatprep.subr.bf16.mxu0 %v12767_v14  ;;  %9408 = vmatprep.subr.bf16.mxu1 %v12812_v32  ;;  %v15581_v42 = vld [vmem:[#allocation40_spill] sm:$0xff]  ;;  %v15582_v25 = vld [vmem:[#allocation54_spill] sm:$0xff] }
 0x548   :  { %15568 = vst [vmem:[#allocation79_spill] sm:$0xff] %v13485_v49  ;;  %2589 = vmatmul.mubr.f32.vlgmr.msra.gmra.mrb[14].mxu0 %v13485_v49  ;;  %2660 = vmatmul.mubr.f32.vlgmr.msra.gmra.mrb[30].mxu1 %v13485_v49  ;;  %v15584_v49 = vld [vmem:[#allocation55_spill] sm:$0xff] }
 0x549   :  { %9378 = vmatpush1.bf16.msra.mxu0 %v12808_v23  ;;  %9410 = vmatpush1.bf16.msra.mxu1 %v12905_v26 }
 0x54a   :  { %9380 = vmatprep.subr.bf16.mxu0 %v15482_v7  ;;  %9412 = vmatprep.subr.bf16.mxu1 %v12911_v30 }
 0x54b   :  { %2792 = vmatprep.mubr.f32.mxu0 %v15463_v40  ;;  %2863 = vmatprep.mubr.f32.mxu1 %v15463_v40 }
 0x54d   :  { %9382 = vmatpush1.bf16.msra.mxu0 %v15483_v1  ;;  %9414 = vmatpush1.bf16.msra.mxu1 %v12920_v44 }
 0x54e   :  { %9384 = vmatprep.subr.bf16.mxu0 %v15569_v48  ;;  %9416 = vmatprep.subr.bf16.mxu1 %v15570_v61 }
 0x551   :  { %9386 = vmatpush1.bf16.msra.mxu0 %v15571_v12  ;;  %9418 = vmatpush1.bf16.msra.mxu1 %v15572_v46 }
 0x552   :  { %9388 = vmatprep.subr.bf16.mxu0 %v15573_v9  ;;  %9420 = vmatprep.subr.bf16.mxu1 %v15574_v50  ;;  %v15585_v50 = vld [vmem:[#allocation42_spill] sm:$0xff] }
 0x555   :  { %9390 = vmatpush1.bf16.msra.mxu0 %v15575_v55  ;;  %9422 = vmatpush1.bf16.msra.mxu1 %v15576_v10  ;;  %v15586_v55 = vld [vmem:[#allocation56_spill] sm:$0xff]  ;;  %v15587_v10 = vld [vmem:[#allocation43_spill] sm:$0xff] }
 0x556   :  { %9392 = vmatprep.subr.bf16.mxu0 %v15577_v6  ;;  %9424 = vmatprep.subr.bf16.mxu1 %v15578_v20  ;;  %v15588_v6 = vld [vmem:[#allocation57_spill] sm:$0xff]  ;;  %v15589_v20 = vld [vmem:[#allocation44_spill] sm:$0xff] }
 0x559   :  { %9394 = vmatpush1.bf16.msra.mxu0 %v15579_v28  ;;  %9426 = vmatpush1.bf16.msra.mxu1 %v15580_v21  ;;  %v15590_v28 = vld [vmem:[#allocation58_spill] sm:$0xff]  ;;  %v15591_v21 = vld [vmem:[#allocation45_spill] sm:$0xff] }
 0x55a   :  { %9396 = vmatprep.subr.bf16.mxu0 %v15581_v42  ;;  %9428 = vmatprep.subr.bf16.mxu1 %v15582_v25  ;;  %v15592_v42 = vld [vmem:[#allocation59_spill] sm:$0xff]  ;;  %v15593_v25 = vld [vmem:[#allocation46_spill] sm:$0xff] }
 0x55d   :  { %9398 = vmatpush1.bf16.msra.mxu0 %v15583_v57  ;;  %9430 = vmatpush1.bf16.msra.mxu1 %v15584_v49  ;;  %v15594_v57 = vld [vmem:[#allocation60_spill] sm:$0xff] }
 0x55e   :  { %9400 = vmatprep.subr.bf16.mxu0 %v15585_v50  ;;  %9432 = vmatprep.subr.bf16.mxu1 %v15586_v55  ;;  %v15595_v49 = vld [vmem:[#allocation72_spill] sm:$0xff]  ;;  %v15596_v50 = vld [vmem:[#allocation61_spill] sm:$0xff]  ;;  %v15597_v55 = vld [vmem:[#allocation62_spill] sm:$0xff] }
 0x55f   :  { %v356_v9 = vadd.f32 %v15596_v50, %v15595_v49 }
 0x561   :  { %9402 = vmatpush1.bf16.msra.mxu0 %v15587_v10  ;;  %9434 = vmatpush1.bf16.msra.mxu1 %v15588_v6  ;;  %v358_v10 = vadd.f32 %v15597_v55, %v15506_v5 }
 0x562   :  { %9404 = vmatprep.subr.bf16.mxu0 %v15589_v20  ;;  %9436 = vmatprep.subr.bf16.mxu1 %v15590_v28 }
 0x565   :  { %9406 = vmatpush1.bf16.msra.mxu0 %v15591_v21  ;;  %9438 = vmatpush1.bf16.msra.mxu1 %v15592_v42 }
 0x566   :  { %9440 = vmatprep.subr.bf16.mxu0 %v15593_v25  ;;  %9472 = vmatprep.subr.bf16.mxu1 %v15594_v57 }
 0x5fb   :  { %v2438_v46 = vpop.f32.mrb[24].mxu0  ;;  %v2509_v6 = vpop.f32.mrb[16].mxu1 }
 0x5fc   :  { %v2514_v12 = vadd.f32 %v2438_v46, %v356_v9  ;;  %v2440_v20 = vpop.f32.mrb[25].mxu0  ;;  %v2511_v61 = vpop.f32.mrb[17].mxu1  ;;  %v11417_v57 = vadd.f32 %v2509_v6, %v15537_v22 }
 0x5fd   :  { %v2515_v28 = vadd.f32 %v2440_v20, %v358_v10  ;;  %v11418_v25 = vadd.f32 %v2511_v61, %v13147_v52 }
 0x5fe   :  { %v8610_v48 = vmul.f32 -1.442695, %v2514_v12 }
 0x5ff   :  { %v8611_v21 = vmul.f32 -1.442695, %v2515_v28  ;;  %v8612_v42 = vmul.f32 -1.442695, %v11418_v25 }
 0x600   :  { %11810 = vpow2.f32 %v8610_v48 }
 0x601   :  { %11812 = vpow2.f32 %v8611_v21 }
 0x602   :  { %11814 = vpow2.f32 %v8612_v42 }
 0x603   :  { %11816 = vtanh.f32 %v11417_v57 }
 0x60a   :  { %v11811_v44 = vpop.eup %11810 }
 0x60b   :  { %v11813_v50 = vpop.eup %11812  ;;  %v2673_v49 = vadd.f32 1.0, %v11811_v44 }
 0x60c   :  { %v2679_v55 = vadd.f32 1.0, %v11813_v50  ;;  %v11815_v46 = vpop.eup %11814 }
 0x60d   :  { %11818 = vrcp.f32 %v2673_v49  ;;  %v11817_v9 = vpop.eup %11816  ;;  %v2686_v48 = vadd.f32 1.0, %v11815_v46 }
 0x60e   :  { %11820 = vrcp.f32 %v2679_v55 }
 0x60f   :  { %11822 = vrcp.f32 %v2686_v48 }
 0x617   :  { %v11819_v10 = vpop.eup %11818 }
 0x618   :  { %v11821_v12 = vpop.eup %11820  ;;  %v2690_v20 = vmul.f32 %v11819_v10, %v11817_v9 }
 0x619   :  { %v2689_v28 = vmul.f32 %v11821_v12, %v13438_v53  ;;  %v11823_v53 = vpop.eup %11822 }
 0x61b   :  { %v13532_v61 = vadd.f32 %v2690_v20, %v2689_v28  ;;  %v2590_v21 = vpop.f32.mrb[14].mxu0  ;;  %v2661_v6 = vpop.f32.mrb[30].mxu1 }
 0x61c   :  { %v11431_v44 = vadd.f32 %v2590_v21, %v13155_v58  ;;  %v2592_v42 = vpop.f32.mrb[15].mxu0  ;;  %v2663_v57 = vpop.f32.mrb[31].mxu1  ;;  %v11447_v10 = vadd.f32 %v2661_v6, %v13163_v63 }
 0x61d   :  { %v11432_v49 = vadd.f32 %v2592_v42, %v15508_v17  ;;  %11824 = vtanh.f32 %v13532_v61  ;;  %v11448_v55 = vadd.f32 %v2663_v57, %v13166_v4 }
 0x61e   :  { %v8613_v25 = vmul.f32 -1.442695, %v11431_v44 }
 0x61f   :  { %v8614_v50 = vmul.f32 -1.442695, %v11432_v49  ;;  %v8615_v9 = vmul.f32 -1.442695, %v11448_v55 }
 0x620   :  { %11826 = vpow2.f32 %v8613_v25 }
 0x621   :  { %11828 = vpow2.f32 %v8614_v50 }
 0x622   :  { %11830 = vpow2.f32 %v8615_v9  ;;  %v15600_v9 = vld [vmem:[#allocation47_spill] sm:$0xff] }
 0x623   :  { %11832 = vtanh.f32 %v11447_v10  ;;  %v15601_v10 = vld [vmem:[#allocation34_spill] sm:$0xff] }
 0x627   :  { %v11825_v46 = vpop.eup %11824 }
 0x628   :  { %v13539_v12 = vmul.f32 %v11825_v46, %v11823_v53 }
 0x62a   :  { %15598 = vst [vmem:[#allocation61_spill] sm:$0xff] %v13539_v12  ;;  %v11827_v20 = vpop.eup %11826  ;;  %2793 = vmatmul.mubr.f32.vlgmr.msra.gmra.mrb[26].mxu0 %v13539_v12  ;;  %2864 = vmatmul.mubr.f32.vlgmr.msra.gmra.mrb[18].mxu1 %v13539_v12  ;;  %v15615_v12 = vld [vmem:[#allocation41_spill] sm:$0xff] }
 0x62b   :  { %v11829_v48 = vpop.eup %11828  ;;  %v2697_v28 = vadd.f32 1.0, %v11827_v20  ;;  %9442 = vmatpush1.bf16.msra.mxu0 %v12907_v27  ;;  %9474 = vmatpush1.bf16.msra.mxu1 %v13024_v15  ;;  %v15602_v20 = vld [vmem:[#allocation48_spill] sm:$0xff] }
 0x62c   :  { %v2703_v21 = vadd.f32 1.0, %v11829_v48  ;;  %9444 = vmatprep.subr.bf16.mxu0 %v12913_v37  ;;  %9476 = vmatprep.subr.bf16.mxu1 %v13028_v38  ;;  %v11831_v6 = vpop.eup %11830  ;;  %v15603_v48 = vld [vmem:[#allocation35_spill] sm:$0xff] }
 0x62d   :  { %11834 = vrcp.f32 %v2697_v28  ;;  %2944 = vmatprep.mubr.f32.mxu0 %v15463_v40  ;;  %3015 = vmatprep.mubr.f32.mxu1 %v15463_v40  ;;  %v11833_v44 = vpop.eup %11832  ;;  %v2710_v25 = vadd.f32 1.0, %v11831_v6  ;;  %v15604_v28 = vld [vmem:[#allocation49_spill] sm:$0xff]  ;;  %v15606_v6 = vld [vmem:[#allocation50_spill] sm:$0xff] }
 0x62e   :  { %11836 = vrcp.f32 %v2703_v21  ;;  %v15605_v21 = vld [vmem:[#allocation36_spill] sm:$0xff] }
 0x62f   :  { %9446 = vmatpush1.bf16.msra.mxu0 %v12922_v47  ;;  %9478 = vmatpush1.bf16.msra.mxu1 %v13034_v18  ;;  %11838 = vrcp.f32 %v2710_v25  ;;  %v15611_v25 = vld [vmem:[#allocation39_spill] sm:$0xff] }
 0x630   :  { %9448 = vmatprep.subr.bf16.mxu0 %v12929_v54  ;;  %9480 = vmatprep.subr.bf16.mxu1 %v13038_v8 }
 0x633   :  { %9450 = vmatpush1.bf16.msra.mxu0 %v12938_v62  ;;  %9482 = vmatpush1.bf16.msra.mxu1 %v13044_v35 }
 0x634   :  { %9452 = vmatprep.subr.bf16.mxu0 %v12945_v11  ;;  %9484 = vmatprep.subr.bf16.mxu1 %v13047_v16 }
 0x637   :  { %v11835_v42 = vpop.eup %11834  ;;  %9454 = vmatpush1.bf16.msra.mxu0 %v12953_v24  ;;  %9486 = vmatpush1.bf16.msra.mxu1 %v13052_v29 }
 0x638   :  { %v11837_v57 = vpop.eup %11836  ;;  %v2714_v49 = vmul.f32 %v11835_v42, %v11833_v44  ;;  %9456 = vmatprep.subr.bf16.mxu0 %v12960_v36  ;;  %9488 = vmatprep.subr.bf16.mxu1 %v13055_v2  ;;  %v15607_v44 = vld [vmem:[#allocation37_spill] sm:$0xff]  ;;  %v15608_v42 = vld [vmem:[#allocation51_spill] sm:$0xff] }
 0x639   :  { %v2713_v50 = vmul.f32 %v11837_v57, %v13468_v51  ;;  %v11839_v51 = vpop.eup %11838  ;;  %v15609_v57 = vld [vmem:[#allocation38_spill] sm:$0xff] }
 0x63b   :  { %v13562_v55 = vadd.f32 %v2714_v49, %v2713_v50  ;;  %9458 = vmatpush1.bf16.msra.mxu0 %v12968_v3  ;;  %9490 = vmatpush1.bf16.msra.mxu1 %v13060_v33  ;;  %v15610_v49 = vld [vmem:[#allocation52_spill] sm:$0xff]  ;;  %v15612_v50 = vld [vmem:[#allocation53_spill] sm:$0xff] }
 0x63c   :  { %9460 = vmatprep.subr.bf16.mxu0 %v12975_v59  ;;  %9492 = vmatprep.subr.bf16.mxu1 %v13063_v41 }
 0x63d   :  { %11840 = vtanh.f32 %v13562_v55 }
 0x63f   :  { %9462 = vmatpush1.bf16.msra.mxu0 %v12983_v13  ;;  %9494 = vmatpush1.bf16.msra.mxu1 %v13068_v39 }
 0x640   :  { %9464 = vmatprep.subr.bf16.mxu0 %v12990_v31  ;;  %9496 = vmatprep.subr.bf16.mxu1 %v13071_v0 }
 0x643   :  { %9466 = vmatpush1.bf16.msra.mxu0 %v12998_v43  ;;  %9498 = vmatpush1.bf16.msra.mxu1 %v13076_v45 }
 0x644   :  { %9468 = vmatprep.subr.bf16.mxu0 %v13005_v60  ;;  %9500 = vmatprep.subr.bf16.mxu1 %v13079_v34 }
 0x647   :  { %v11841_v53 = vpop.eup %11840  ;;  %9470 = vmatpush1.bf16.msra.mxu0 %v13013_v19  ;;  %9502 = vmatpush1.bf16.msra.mxu1 %v13084_v56 }
 0x648   :  { %v13579_v46 = vmul.f32 %v11841_v53, %v11839_v51  ;;  %9504 = vmatprep.subr.bf16.mxu0 %v12767_v14  ;;  %9536 = vmatprep.subr.bf16.mxu1 %v12812_v32  ;;  %v15613_v51 = vld [vmem:[#allocation40_spill] sm:$0xff]  ;;  %v15614_v53 = vld [vmem:[#allocation54_spill] sm:$0xff] }
 0x64a   :  { %15599 = vst [vmem:[#allocation62_spill] sm:$0xff] %v13579_v46  ;;  %2945 = vmatmul.mubr.f32.vlgmr.msra.gmra.mrb[12].mxu0 %v13579_v46  ;;  %3016 = vmatmul.mubr.f32.vlgmr.msra.gmra.mrb[28].mxu1 %v13579_v46  ;;  %v15616_v46 = vld [vmem:[#allocation55_spill] sm:$0xff] }
 0x64b   :  { %9506 = vmatpush1.bf16.msra.mxu0 %v12808_v23  ;;  %9538 = vmatpush1.bf16.msra.mxu1 %v12905_v26 }
 0x64c   :  { %9508 = vmatprep.subr.bf16.mxu0 %v15482_v7  ;;  %9540 = vmatprep.subr.bf16.mxu1 %v12911_v30 }
 0x64d   :  { %3148 = vmatprep.mubr.f32.mxu0 %v15463_v40  ;;  %3219 = vmatprep.mubr.f32.mxu1 %v15463_v40 }
 0x64f   :  { %9510 = vmatpush1.bf16.msra.mxu0 %v15483_v1  ;;  %9542 = vmatpush1.bf16.msra.mxu1 %v15600_v9 }
 0x650   :  { %9512 = vmatprep.subr.bf16.mxu0 %v15601_v10  ;;  %9544 = vmatprep.subr.bf16.mxu1 %v15602_v20 }
 0x653   :  { %9514 = vmatpush1.bf16.msra.mxu0 %v15603_v48  ;;  %9546 = vmatpush1.bf16.msra.mxu1 %v15604_v28 }
 0x654   :  { %9516 = vmatprep.subr.bf16.mxu0 %v15605_v21  ;;  %9548 = vmatprep.subr.bf16.mxu1 %v15606_v6  ;;  %v15617_v6 = vld [vmem:[#allocation42_spill] sm:$0xff] }
 0x657   :  { %9518 = vmatpush1.bf16.msra.mxu0 %v15607_v44  ;;  %9550 = vmatpush1.bf16.msra.mxu1 %v15608_v42  ;;  %v15618_v44 = vld [vmem:[#allocation56_spill] sm:$0xff]  ;;  %v15619_v42 = vld [vmem:[#allocation43_spill] sm:$0xff] }
 0x658   :  { %9520 = vmatprep.subr.bf16.mxu0 %v15609_v57  ;;  %9552 = vmatprep.subr.bf16.mxu1 %v15610_v49  ;;  %v15620_v57 = vld [vmem:[#allocation57_spill] sm:$0xff]  ;;  %v15621_v49 = vld [vmem:[#allocation44_spill] sm:$0xff] }
 0x65b   :  { %9522 = vmatpush1.bf16.msra.mxu0 %v15611_v25  ;;  %9554 = vmatpush1.bf16.msra.mxu1 %v15612_v50  ;;  %v15622_v25 = vld [vmem:[#allocation58_spill] sm:$0xff]  ;;  %v15623_v50 = vld [vmem:[#allocation45_spill] sm:$0xff] }
 0x65c   :  { %9524 = vmatprep.subr.bf16.mxu0 %v15613_v51  ;;  %9556 = vmatprep.subr.bf16.mxu1 %v15614_v53  ;;  %v15624_v51 = vld [vmem:[#allocation59_spill] sm:$0xff]  ;;  %v15625_v53 = vld [vmem:[#allocation46_spill] sm:$0xff] }
 0x65f   :  { %9526 = vmatpush1.bf16.msra.mxu0 %v15615_v12  ;;  %9558 = vmatpush1.bf16.msra.mxu1 %v15616_v46  ;;  %v15626_v12 = vld [vmem:[#allocation60_spill] sm:$0xff] }
 0x660   :  { %9528 = vmatprep.subr.bf16.mxu0 %v15617_v6  ;;  %9560 = vmatprep.subr.bf16.mxu1 %v15618_v44  ;;  %v15627_v46 = vld [vmem:[#allocation72_spill] sm:$0xff]  ;;  %v15628_v6 = vld [vmem:[#allocation63_spill] sm:$0xff] }
 0x661   :  { %v362_v21 = vadd.f32 %v15628_v6, %v15627_v46  ;;  %v15629_v44 = vld [vmem:[#allocation64_spill] sm:$0xff] }
 0x663   :  { %9530 = vmatpush1.bf16.msra.mxu0 %v15619_v42  ;;  %9562 = vmatpush1.bf16.msra.mxu1 %v15620_v57  ;;  %v364_v42 = vadd.f32 %v15629_v44, %v15506_v5 }
 0x664   :  { %9532 = vmatprep.subr.bf16.mxu0 %v15621_v49  ;;  %9564 = vmatprep.subr.bf16.mxu1 %v15622_v25 }
 0x667   :  { %9534 = vmatpush1.bf16.msra.mxu0 %v15623_v50  ;;  %9566 = vmatpush1.bf16.msra.mxu1 %v15624_v51 }
 0x668   :  { %9568 = vmatprep.subr.bf16.mxu0 %v15625_v53  ;;  %9600 = vmatprep.subr.bf16.mxu1 %v15626_v12 }
 0x6fd   :  { %v2794_v28 = vpop.f32.mrb[26].mxu0  ;;  %v2865_v57 = vpop.f32.mrb[18].mxu1 }
 0x6fe   :  { %v2870_v48 = vadd.f32 %v2794_v28, %v362_v21  ;;  %v2796_v49 = vpop.f32.mrb[27].mxu0  ;;  %v2867_v20 = vpop.f32.mrb[19].mxu1  ;;  %v11419_v12 = vadd.f32 %v2865_v57, %v15537_v22 }
 0x6ff   :  { %v2871_v25 = vadd.f32 %v2796_v49, %v364_v42  ;;  %v11420_v53 = vadd.f32 %v2867_v20, %v13147_v52 }
 0x700   :  { %v8616_v10 = vmul.f32 -1.442695, %v2870_v48 }
 0x701   :  { %v8617_v50 = vmul.f32 -1.442695, %v2871_v25  ;;  %v8618_v51 = vmul.f32 -1.442695, %v11420_v53 }
 0x702   :  { %11842 = vpow2.f32 %v8616_v10 }
 0x703   :  { %11844 = vpow2.f32 %v8617_v50 }
 0x704   :  { %11846 = vpow2.f32 %v8618_v51 }
 0x705   :  { %11848 = vtanh.f32 %v11419_v12 }
 0x70c   :  { %v11843_v9 = vpop.eup %11842 }
 0x70d   :  { %v11845_v6 = vpop.eup %11844  ;;  %v3029_v46 = vadd.f32 1.0, %v11843_v9 }
 0x70e   :  { %v3035_v44 = vadd.f32 1.0, %v11845_v6  ;;  %v11847_v28 = vpop.eup %11846 }
 0x70f   :  { %11850 = vrcp.f32 %v3029_v46  ;;  %v11849_v21 = vpop.eup %11848  ;;  %v3042_v10 = vadd.f32 1.0, %v11847_v28 }
 0x710   :  { %11852 = vrcp.f32 %v3035_v44 }
 0x711   :  { %11854 = vrcp.f32 %v3042_v10 }
 0x719   :  { %v11851_v42 = vpop.eup %11850 }
 0x71a   :  { %v11853_v48 = vpop.eup %11852  ;;  %v3046_v49 = vmul.f32 %v11851_v42, %v11849_v21 }
 0x71b   :  { %v3045_v25 = vmul.f32 %v11853_v48, %v13532_v61  ;;  %v11855_v61 = vpop.eup %11854 }
 0x71d   :  { %v13626_v20 = vadd.f32 %v3046_v49, %v3045_v25  ;;  %v2946_v50 = vpop.f32.mrb[12].mxu0  ;;  %v3017_v57 = vpop.f32.mrb[28].mxu1 }
 0x71e   :  { %v11429_v9 = vadd.f32 %v2946_v50, %v13155_v58  ;;  %v2948_v51 = vpop.f32.mrb[13].mxu0  ;;  %v3019_v12 = vpop.f32.mrb[29].mxu1  ;;  %v11445_v42 = vadd.f32 %v3017_v57, %v13163_v63 }
 0x71f   :  { %v11430_v46 = vadd.f32 %v2948_v51, %v15508_v17  ;;  %11856 = vtanh.f32 %v13626_v20  ;;  %v11446_v44 = vadd.f32 %v3019_v12, %v13166_v4 }
 0x720   :  { %v8619_v53 = vmul.f32 -1.442695, %v11429_v9 }
 0x721   :  { %v8620_v6 = vmul.f32 -1.442695, %v11430_v46  ;;  %v8621_v21 = vmul.f32 -1.442695, %v11446_v44 }
 0x722   :  { %11858 = vpow2.f32 %v8619_v53 }
 0x723   :  { %11860 = vpow2.f32 %v8620_v6 }
 0x724   :  { %11862 = vpow2.f32 %v8621_v21  ;;  %v15632_v21 = vld [vmem:[#allocation48_spill] sm:$0xff] }
 0x725   :  { %11864 = vtanh.f32 %v11445_v42  ;;  %v15633_v42 = vld [vmem:[#allocation35_spill] sm:$0xff] }
 0x729   :  { %v11857_v28 = vpop.eup %11856 }
 0x72a   :  { %v13633_v48 = vmul.f32 %v11857_v28, %v11855_v61 }
 0x72c   :  { %v11859_v49 = vpop.eup %11858  ;;  %3149 = vmatmul.mubr.f32.vlgmr.msra.gmra.mrb[28].mxu0 %v13633_v48  ;;  %3220 = vmatmul.mubr.f32.vlgmr.msra.gmra.mrb[20].mxu1 %v13633_v48 }
 0x72d   :  { %v11861_v10 = vpop.eup %11860  ;;  %v3053_v25 = vadd.f32 1.0, %v11859_v49  ;;  %9570 = vmatpush1.bf16.msra.mxu0 %v12907_v27  ;;  %9602 = vmatpush1.bf16.msra.mxu1 %v13024_v15  ;;  %v15638_v49 = vld [vmem:[#allocation51_spill] sm:$0xff] }
 0x72e   :  { %v3059_v50 = vadd.f32 1.0, %v11861_v10  ;;  %9572 = vmatprep.subr.bf16.mxu0 %v12913_v37  ;;  %9604 = vmatprep.subr.bf16.mxu1 %v13028_v38  ;;  %v11863_v57 = vpop.eup %11862  ;;  %v15639_v10 = vld [vmem:[#allocation38_spill] sm:$0xff] }
 0x72f   :  { %11866 = vrcp.f32 %v3053_v25  ;;  %3300 = vmatprep.mubr.f32.mxu0 %v15463_v40  ;;  %3371 = vmatprep.mubr.f32.mxu1 %v15463_v40  ;;  %v11865_v9 = vpop.eup %11864  ;;  %v3066_v53 = vadd.f32 1.0, %v11863_v57  ;;  %v15641_v25 = vld [vmem:[#allocation39_spill] sm:$0xff]  ;;  %v15643_v57 = vld [vmem:[#allocation40_spill] sm:$0xff] }
 0x730   :  { %11868 = vrcp.f32 %v3059_v50  ;;  %v15642_v50 = vld [vmem:[#allocation53_spill] sm:$0xff] }
 0x731   :  { %9574 = vmatpush1.bf16.msra.mxu0 %v12922_v47  ;;  %9606 = vmatpush1.bf16.msra.mxu1 %v13034_v18  ;;  %11870 = vrcp.f32 %v3066_v53  ;;  %v15648_v53 = vld [vmem:[#allocation56_spill] sm:$0xff] }
 0x732   :  { %9576 = vmatprep.subr.bf16.mxu0 %v12929_v54  ;;  %9608 = vmatprep.subr.bf16.mxu1 %v13038_v8 }
 0x735   :  { %9578 = vmatpush1.bf16.msra.mxu0 %v12938_v62  ;;  %9610 = vmatpush1.bf16.msra.mxu1 %v13044_v35 }
 0x736   :  { %9580 = vmatprep.subr.bf16.mxu0 %v12945_v11  ;;  %9612 = vmatprep.subr.bf16.mxu1 %v13047_v16 }
 0x739   :  { %v11867_v51 = vpop.eup %11866  ;;  %9582 = vmatpush1.bf16.msra.mxu0 %v12953_v24  ;;  %9614 = vmatpush1.bf16.msra.mxu1 %v13052_v29 }
 0x73a   :  { %v11869_v12 = vpop.eup %11868  ;;  %v3070_v46 = vmul.f32 %v11867_v51, %v11865_v9  ;;  %9584 = vmatprep.subr.bf16.mxu0 %v12960_v36  ;;  %9616 = vmatprep.subr.bf16.mxu1 %v13055_v2  ;;  %v15644_v9 = vld [vmem:[#allocation54_spill] sm:$0xff]  ;;  %v15645_v51 = vld [vmem:[#allocation41_spill] sm:$0xff] }
 0x73b   :  { %v3069_v6 = vmul.f32 %v11869_v12, %v13562_v55  ;;  %v11871_v55 = vpop.eup %11870  ;;  %v15646_v12 = vld [vmem:[#allocation55_spill] sm:$0xff] }
 0x73d   :  { %v13656_v44 = vadd.f32 %v3070_v46, %v3069_v6  ;;  %9586 = vmatpush1.bf16.msra.mxu0 %v12968_v3  ;;  %9618 = vmatpush1.bf16.msra.mxu1 %v13060_v33  ;;  %v15647_v46 = vld [vmem:[#allocation42_spill] sm:$0xff]  ;;  %v15649_v6 = vld [vmem:[#allocation43_spill] sm:$0xff] }
 0x73e   :  { %9588 = vmatprep.subr.bf16.mxu0 %v12975_v59  ;;  %9620 = vmatprep.subr.bf16.mxu1 %v13063_v41 }
 0x73f   :  { %11872 = vtanh.f32 %v13656_v44 }
 0x741   :  { %9590 = vmatpush1.bf16.msra.mxu0 %v12983_v13  ;;  %9622 = vmatpush1.bf16.msra.mxu1 %v13068_v39 }
 0x742   :  { %9592 = vmatprep.subr.bf16.mxu0 %v12990_v31  ;;  %9624 = vmatprep.subr.bf16.mxu1 %v13071_v0 }
 0x745   :  { %9594 = vmatpush1.bf16.msra.mxu0 %v12998_v43  ;;  %9626 = vmatpush1.bf16.msra.mxu1 %v13076_v45 }
 0x746   :  { %9596 = vmatprep.subr.bf16.mxu0 %v13005_v60  ;;  %9628 = vmatprep.subr.bf16.mxu1 %v13079_v34 }
 0x749   :  { %v11873_v61 = vpop.eup %11872  ;;  %9598 = vmatpush1.bf16.msra.mxu0 %v13013_v19  ;;  %9630 = vmatpush1.bf16.msra.mxu1 %v13084_v56 }
 0x74a   :  { %v13673_v28 = vmul.f32 %v11873_v61, %v11871_v55  ;;  %9632 = vmatprep.subr.bf16.mxu0 %v12767_v14  ;;  %9664 = vmatprep.subr.bf16.mxu1 %v12812_v32  ;;  %v15630_v14 = vld [vmem:[#allocation47_spill] sm:$0xff]  ;;  %v15631_v32 = vld [vmem:[#allocation34_spill] sm:$0xff]  ;;  %v15650_v55 = vld [vmem:[#allocation57_spill] sm:$0xff] }
 0x74b   :  { %v15651_v61 = vld [vmem:[#allocation44_spill] sm:$0xff] }
 0x74c   :  { %3301 = vmatmul.mubr.f32.vlgmr.msra.gmra.mrb[10].mxu0 %v13673_v28  ;;  %3372 = vmatmul.mubr.f32.vlgmr.msra.gmra.mrb[26].mxu1 %v13673_v28 }
 0x74d   :  { %9634 = vmatpush1.bf16.msra.mxu0 %v12808_v23  ;;  %9666 = vmatpush1.bf16.msra.mxu1 %v12905_v26  ;;  %v15634_v23 = vld [vmem:[#allocation49_spill] sm:$0xff]  ;;  %v15635_v26 = vld [vmem:[#allocation36_spill] sm:$0xff] }
 0x74e   :  { %9636 = vmatprep.subr.bf16.mxu0 %v15482_v7  ;;  %9668 = vmatprep.subr.bf16.mxu1 %v12911_v30  ;;  %v15636_v7 = vld [vmem:[#allocation50_spill] sm:$0xff]  ;;  %v15637_v30 = vld [vmem:[#allocation37_spill] sm:$0xff] }
 0x74f   :  { %3504 = vmatprep.mubr.f32.mxu0 %v15463_v40  ;;  %3575 = vmatprep.mubr.f32.mxu1 %v15463_v40 }
 0x751   :  { %9638 = vmatpush1.bf16.msra.mxu0 %v15483_v1  ;;  %9670 = vmatpush1.bf16.msra.mxu1 %v15630_v14  ;;  %v15640_v1 = vld [vmem:[#allocation52_spill] sm:$0xff]  ;;  %v15652_v14 = vld [vmem:[#allocation58_spill] sm:$0xff] }
 0x752   :  { %9640 = vmatprep.subr.bf16.mxu0 %v15631_v32  ;;  %9672 = vmatprep.subr.bf16.mxu1 %v15632_v21  ;;  %v15653_v32 = vld [vmem:[#allocation45_spill] sm:$0xff]  ;;  %v15654_v21 = vld [vmem:[#allocation59_spill] sm:$0xff] }
 0x755   :  { %9642 = vmatpush1.bf16.msra.mxu0 %v15633_v42  ;;  %9674 = vmatpush1.bf16.msra.mxu1 %v15634_v23  ;;  %v15655_v42 = vld [vmem:[#allocation46_spill] sm:$0xff]  ;;  %v15656_v23 = vld [vmem:[#allocation60_spill] sm:$0xff] }
 0x756   :  { %9644 = vmatprep.subr.bf16.mxu0 %v15635_v26  ;;  %9676 = vmatprep.subr.bf16.mxu1 %v15636_v7  ;;  %v15657_v26 = vld [vmem:[#allocation72_spill] sm:$0xff]  ;;  %v15658_v7 = vld [vmem:[#allocation65_spill] sm:$0xff] }
 0x759   :  { %9646 = vmatpush1.bf16.msra.mxu0 %v15637_v30  ;;  %9678 = vmatpush1.bf16.msra.mxu1 %v15638_v49  ;;  %v368_v30 = vadd.f32 %v15658_v7, %v15657_v26  ;;  %v15659_v49 = vld [vmem:[#allocation66_spill] sm:$0xff] }
 0x75a   :  { %9648 = vmatprep.subr.bf16.mxu0 %v15639_v10  ;;  %9680 = vmatprep.subr.bf16.mxu1 %v15640_v1  ;;  %v370_v10 = vadd.f32 %v15659_v49, %v15506_v5 }
 0x75d   :  { %9650 = vmatpush1.bf16.msra.mxu0 %v15641_v25  ;;  %9682 = vmatpush1.bf16.msra.mxu1 %v15642_v50 }
 0x75e   :  { %9652 = vmatprep.subr.bf16.mxu0 %v15643_v57  ;;  %9684 = vmatprep.subr.bf16.mxu1 %v15644_v9 }
 0x761   :  { %9654 = vmatpush1.bf16.msra.mxu0 %v15645_v51  ;;  %9686 = vmatpush1.bf16.msra.mxu1 %v15646_v12 }
 0x762   :  { %9656 = vmatprep.subr.bf16.mxu0 %v15647_v46  ;;  %9688 = vmatprep.subr.bf16.mxu1 %v15648_v53 }
 0x765   :  { %9658 = vmatpush1.bf16.msra.mxu0 %v15649_v6  ;;  %9690 = vmatpush1.bf16.msra.mxu1 %v15650_v55 }
 0x766   :  { %9660 = vmatprep.subr.bf16.mxu0 %v15651_v61  ;;  %9692 = vmatprep.subr.bf16.mxu1 %v15652_v14 }
 0x769   :  { %9662 = vmatpush1.bf16.msra.mxu0 %v15653_v32  ;;  %9694 = vmatpush1.bf16.msra.mxu1 %v15654_v21 }
 0x76a   :  { %9696 = vmatprep.subr.bf16.mxu0 %v15655_v42  ;;  %9728 = vmatprep.subr.bf16.mxu1 %v15656_v23 }
 0x7ff   :  { %v3150_v1 = vpop.f32.mrb[28].mxu0  ;;  %v3221_v25 = vpop.f32.mrb[20].mxu1 }
 0x800   :  { %v3226_v50 = vadd.f32 %v3150_v1, %v368_v30  ;;  %v3152_v57 = vpop.f32.mrb[29].mxu0  ;;  %v3223_v9 = vpop.f32.mrb[21].mxu1  ;;  %v11421_v55 = vadd.f32 %v3221_v25, %v15537_v22 }
 0x801   :  { %v3227_v51 = vadd.f32 %v3152_v57, %v370_v10  ;;  %v11422_v53 = vadd.f32 %v3223_v9, %v13147_v52 }
 0x802   :  { %v8622_v12 = vmul.f32 -1.442695, %v3226_v50 }
 0x803   :  { %v8623_v46 = vmul.f32 -1.442695, %v3227_v51  ;;  %v8624_v6 = vmul.f32 -1.442695, %v11422_v53 }
 0x804   :  { %11874 = vpow2.f32 %v8622_v12 }
 0x805   :  { %11876 = vpow2.f32 %v8623_v46 }
 0x806   :  { %11878 = vpow2.f32 %v8624_v6 }
 0x807   :  { %11880 = vtanh.f32 %v11421_v55 }
 0x80e   :  { %v11875_v61 = vpop.eup %11874 }
 0x80f   :  { %v11877_v14 = vpop.eup %11876  ;;  %v3385_v32 = vadd.f32 1.0, %v11875_v61 }
 0x810   :  { %v3391_v21 = vadd.f32 1.0, %v11877_v14  ;;  %v11879_v42 = vpop.eup %11878 }
 0x811   :  { %11882 = vrcp.f32 %v3385_v32  ;;  %v11881_v23 = vpop.eup %11880  ;;  %v3398_v10 = vadd.f32 1.0, %v11879_v42 }
 0x812   :  { %11884 = vrcp.f32 %v3391_v21 }
 0x813   :  { %11886 = vrcp.f32 %v3398_v10  ;;  %v3879_v10 = vld [vmem:[#allocation17 + $0x50] sm:$0xff] }
 0x81b   :  { %v11883_v7 = vpop.eup %11882 }
 0x81c   :  { %v11885_v30 = vpop.eup %11884  ;;  %v3402_v49 = vmul.f32 %v11883_v7, %v11881_v23 }
 0x81d   :  { %v3401_v1 = vmul.f32 %v11885_v30, %v13626_v20  ;;  %v11887_v20 = vpop.eup %11886 }
 0x81f   :  { %v13720_v50 = vadd.f32 %v3402_v49, %v3401_v1  ;;  %v3302_v57 = vpop.f32.mrb[10].mxu0  ;;  %v3373_v25 = vpop.f32.mrb[26].mxu1  ;;  %v3883_v1 = vld [vmem:[#allocation17 + $0x70] sm:$0xff] }
 0x820   :  { %v11427_v9 = vadd.f32 %v3302_v57, %v13155_v58  ;;  %v3304_v51 = vpop.f32.mrb[11].mxu0  ;;  %v3375_v12 = vpop.f32.mrb[27].mxu1  ;;  %v11443_v32 = vadd.f32 %v3373_v25, %v13163_v63  ;;  %v9797_v57 = vpack.c.bf16 %v3883_v1, %v3879_v10  ;;  %v3886_v25 = vld [vmem:[#allocation17 + $0x88] sm:$0xff]  ;;  %v3915_v10 = vld [vmem:[#allocation17 + $0x170] sm:$0xff] }
 0x821   :  { %v11428_v46 = vadd.f32 %v3304_v51, %v15508_v17  ;;  %11888 = vtanh.f32 %v13720_v50  ;;  %v11444_v55 = vadd.f32 %v3375_v12, %v13166_v4  ;;  %v3888_v51 = vld [vmem:[#allocation17 + $0x98] sm:$0xff]  ;;  %v3918_v1 = vld [vmem:[#allocation17 + $0x188] sm:$0xff] }
 0x822   :  { %v8625_v53 = vmul.f32 -1.442695, %v11427_v9  ;;  %v3890_v9 = vld [vmem:[#allocation17 + $0xa8] sm:$0xff] }
 0x823   :  { %v8626_v6 = vmul.f32 -1.442695, %v11428_v46  ;;  %v8627_v14 = vmul.f32 -1.442695, %v11444_v55  ;;  %v9767_v12 = vpack.c.bf16 %v3890_v9, %v3886_v25  ;;  %v3892_v46 = vld [vmem:[#allocation17 + $0xb8] sm:$0xff]  ;;  %v3922_v25 = vld [vmem:[#allocation17 + $0x1a8] sm:$0xff] }
 0x824   :  { %11890 = vpow2.f32 %v8625_v53  ;;  %v3885_v53 = vld [vmem:[#allocation17 + $0x80] sm:$0xff]  ;;  %v9799_v55 = vpack.c.bf16 %v3892_v46, %v3888_v51  ;;  %v3920_v9 = vld [vmem:[#allocation17 + $0x198] sm:$0xff] }
 0x825   :  { %11892 = vpow2.f32 %v8626_v6  ;;  %v3889_v6 = vld [vmem:[#allocation17 + $0xa0] sm:$0xff]  ;;  %v3924_v51 = vld [vmem:[#allocation17 + $0x1b8] sm:$0xff] }
 0x826   :  { %11894 = vpow2.f32 %v8627_v14  ;;  %v3891_v14 = vld [vmem:[#allocation17 + $0xb0] sm:$0xff]  ;;  %v9815_v46 = vpack.c.bf16 %v3924_v51, %v3920_v9 }
 0x827   :  { %11896 = vtanh.f32 %v11443_v32 }
 0x82b   :  { %v11889_v61 = vpop.eup %11888 }
 0x82c   :  { %v13727_v21 = vmul.f32 %v11889_v61, %v11887_v20  ;;  %v9769_v20 = vpack.c.bf16 %v3889_v6, %v3885_v53  ;;  %v3887_v61 = vld [vmem:[#allocation17 + $0x90] sm:$0xff]  ;;  %v3917_v53 = vld [vmem:[#allocation17 + $0x180] sm:$0xff] }
 0x82d   :  { %v9801_v32 = vpack.c.bf16 %v3891_v14, %v3887_v61  ;;  %v3921_v6 = vld [vmem:[#allocation17 + $0x1a0] sm:$0xff]  ;;  %v3923_v61 = vld [vmem:[#allocation17 + $0x1b0] sm:$0xff]  ;;  %v3926_v14 = vld [vmem:[#allocation17 + $0x1c8] sm:$0xff] }
 0x82e   :  { %v11891_v42 = vpop.eup %11890  ;;  %3505 = vmatmul.mubr.f32.vlgmr.msra.gmra.mrb[30].mxu0 %v13727_v21  ;;  %3576 = vmatmul.mubr.f32.vlgmr.msra.gmra.mrb[22].mxu1 %v13727_v21 }
 0x82f   :  { %v11893_v23 = vpop.eup %11892  ;;  %v3409_v7 = vadd.f32 1.0, %v11891_v42  ;;  %9698 = vmatpush1.bf16.msra.mxu0 %v12907_v27  ;;  %9730 = vmatpush1.bf16.msra.mxu1 %v13024_v15  ;;  %v3894_v42 = vld [vmem:[#allocation17 + $0xc8] sm:$0xff] }
 0x830   :  { %v3415_v30 = vadd.f32 1.0, %v11893_v23  ;;  %9700 = vmatprep.subr.bf16.mxu0 %v12913_v37  ;;  %9732 = vmatprep.subr.bf16.mxu1 %v13028_v38  ;;  %v11895_v27 = vpop.eup %11894  ;;  %v3898_v23 = vld [vmem:[#allocation17 + $0xe8] sm:$0xff] }
 0x831   :  { %11898 = vrcp.f32 %v3409_v7  ;;  %3656 = vmatprep.mubr.f32.mxu0 %v15463_v40  ;;  %3727 = vmatprep.mubr.f32.mxu1 %v15463_v40  ;;  %v11897_v37 = vpop.eup %11896  ;;  %v3896_v7 = vld [vmem:[#allocation17 + $0xd8] sm:$0xff] }
 0x832   :  { %11900 = vrcp.f32 %v3415_v30  ;;  %v9771_v30 = vpack.c.bf16 %v3898_v23, %v3894_v42 }
 0x833   :  { %9702 = vmatpush1.bf16.msra.mxu0 %v12922_v47  ;;  %9734 = vmatpush1.bf16.msra.mxu1 %v13034_v18 }
 0x834   :  { %9704 = vmatprep.subr.bf16.mxu0 %v12929_v54  ;;  %9736 = vmatprep.subr.bf16.mxu1 %v13038_v8  ;;  %v3422_v54 = vadd.f32 1.0, %v11895_v27  ;;  %v3900_v27 = vld [vmem:[#allocation17 + $0xf8] sm:$0xff] }
 0x836   :  { %11902 = vrcp.f32 %v3422_v54  ;;  %v3895_v54 = vld [vmem:[#allocation17 + $0xd0] sm:$0xff] }
 0x837   :  { %9706 = vmatpush1.bf16.msra.mxu0 %v12938_v62  ;;  %9738 = vmatpush1.bf16.msra.mxu1 %v13044_v35  ;;  %v3878_v35 = vld [vmem:[#allocation17 + $0x48] sm:$0xff] }
 0x838   :  { %9708 = vmatprep.subr.bf16.mxu0 %v12945_v11  ;;  %9740 = vmatprep.subr.bf16.mxu1 %v13047_v16  ;;  %v3882_v16 = vld [vmem:[#allocation17 + $0x68] sm:$0xff] }
 0x83b   :  { %v11899_v15 = vpop.eup %11898  ;;  %9710 = vmatpush1.bf16.msra.mxu0 %v12953_v24  ;;  %9742 = vmatpush1.bf16.msra.mxu1 %v13052_v29  ;;  %v3872_v24 = vld [vmem:[#allocation17 + $0x18] sm:$0xff] }
 0x83c   :  { %v11901_v47 = vpop.eup %11900  ;;  %v3426_v38 = vmul.f32 %v11899_v15, %v11897_v37  ;;  %9712 = vmatprep.subr.bf16.mxu0 %v12960_v36  ;;  %9744 = vmatprep.subr.bf16.mxu1 %v13055_v2  ;;  %v3880_v2 = vld [vmem:[#allocation17 + $0x58] sm:$0xff]  ;;  %v3893_v37 = vld [vmem:[#allocation17 + $0xc0] sm:$0xff] }
 0x83d   :  { %v3425_v62 = vmul.f32 %v11901_v47, %v13656_v44  ;;  %v3897_v15 = vld [vmem:[#allocation17 + $0xe0] sm:$0xff]  ;;  %v9803_v47 = vpack.c.bf16 %v3900_v27, %v3896_v7  ;;  %v3928_v7 = vld [vmem:[#allocation17 + $0x1d8] sm:$0xff] }
 0x83e   :  { %v3925_v27 = vld [vmem:[#allocation17 + $0x1c0] sm:$0xff] }
 0x83f   :  { %v13750_v18 = vadd.f32 %v3426_v38, %v3425_v62  ;;  %9714 = vmatpush1.bf16.msra.mxu0 %v12968_v3  ;;  %9746 = vmatpush1.bf16.msra.mxu1 %v13060_v33  ;;  %v3876_v3 = vld [vmem:[#allocation17 + $0x38] sm:$0xff]  ;;  %v9773_v38 = vpack.c.bf16 %v3897_v15, %v3893_v37  ;;  %v3899_v62 = vld [vmem:[#allocation17 + $0xf0] sm:$0xff]  ;;  %v3929_v15 = vld [vmem:[#allocation17 + $0x1e0] sm:$0xff] }
 0x840   :  { %9716 = vmatprep.subr.bf16.mxu0 %v12975_v59  ;;  %9748 = vmatprep.subr.bf16.mxu1 %v13063_v41  ;;  %v11903_v29 = vpop.eup %11902  ;;  %v3869_v59 = vld [vmem:[#allocation17] sm:$0xff]  ;;  %v9763_v41 = vpack.c.bf16 %v3882_v16, %v3878_v35  ;;  %v3914_v35 = vld [vmem:[#allocation17 + $0x168] sm:$0xff]  ;;  %v3912_v16 = vld [vmem:[#allocation17 + $0x158] sm:$0xff] }
 0x841   :  { %11904 = vtanh.f32 %v13750_v18 }
 0x843   :  { %9718 = vmatpush1.bf16.msra.mxu0 %v12983_v13  ;;  %9750 = vmatpush1.bf16.msra.mxu1 %v13068_v39  ;;  %v3870_v39 = vld [vmem:[#allocation17 + $0x8] sm:$0xff]  ;;  %v3873_v13 = vld [vmem:[#allocation17 + $0x20] sm:$0xff] }
 0x844   :  { %9720 = vmatprep.subr.bf16.mxu0 %v12990_v31  ;;  %9752 = vmatprep.subr.bf16.mxu1 %v13071_v0  ;;  %v9791_v31 = vpack.c.bf16 %v3876_v3, %v3872_v24  ;;  %v3884_v0 = vld [vmem:[#allocation17 + $0x78] sm:$0xff]  ;;  %v3901_v3 = vld [vmem:[#allocation17 + $0x100] sm:$0xff] }
 0x845   :  { %v9795_v44 = vpack.c.bf16 %v3884_v0, %v3880_v2  ;;  %v3909_v0 = vld [vmem:[#allocation17 + $0x140] sm:$0xff] }
 0x847   :  { %9722 = vmatpush1.bf16.msra.mxu0 %v12998_v43  ;;  %9754 = vmatpush1.bf16.msra.mxu1 %v13076_v45  ;;  %v3874_v45 = vld [vmem:[#allocation17 + $0x28] sm:$0xff]  ;;  %v9761_v43 = vpack.c.bf16 %v3873_v13, %v3869_v59  ;;  %v3905_v59 = vld [vmem:[#allocation17 + $0x120] sm:$0xff] }
 0x848   :  { %9724 = vmatprep.subr.bf16.mxu0 %v13005_v60  ;;  %9756 = vmatprep.subr.bf16.mxu1 %v13079_v34  ;;  %v9759_v36 = vpack.c.bf16 %v3874_v45, %v3870_v39  ;;  %v3871_v60 = vld [vmem:[#allocation17 + $0x10] sm:$0xff]  ;;  %v3877_v34 = vld [vmem:[#allocation17 + $0x40] sm:$0xff]  ;;  %v3906_v39 = vld [vmem:[#allocation17 + $0x128] sm:$0xff] }
 0x849   :  { %v3904_v45 = vld [vmem:[#allocation17 + $0x118] sm:$0xff] }
 0x84b   :  { %v11905_v33 = vpop.eup %11904  ;;  %9726 = vmatpush1.bf16.msra.mxu0 %v13013_v19  ;;  %9758 = vmatpush1.bf16.msra.mxu1 %v13084_v56  ;;  %v3875_v19 = vld [vmem:[#allocation17 + $0x30] sm:$0xff]  ;;  %v3881_v56 = vld [vmem:[#allocation17 + $0x60] sm:$0xff] }
 0x84c   :  { %v13767_v11 = vmul.f32 %v11905_v33, %v11903_v29  ;;  %9760 = vmatprep.subr.bf16.mxu0 %v9759_v36  ;;  %v9793_v8 = vpack.c.bf16 %v3875_v19, %v3871_v60  ;;  %9792 = vmatprep.subr.bf16.mxu1 %v9791_v31  ;;  %v9765_v49 = vpack.c.bf16 %v3881_v56, %v3877_v34  ;;  %v3902_v33 = vld [vmem:[#allocation17 + $0x108] sm:$0xff]  ;;  %v3908_v36 = vld [vmem:[#allocation17 + $0x138] sm:$0xff]  ;;  %v3907_v60 = vld [vmem:[#allocation17 + $0x130] sm:$0xff] }
 0x84d   :  { %v9805_v29 = vpack.c.bf16 %v3899_v62, %v3895_v54  ;;  %v9775_v24 = vpack.c.bf16 %v3906_v39, %v3902_v33  ;;  %v9807_v13 = vpack.c.bf16 %v3908_v36, %v3904_v45  ;;  %v9777_v31 = vpack.c.bf16 %v3905_v59, %v3901_v3  ;;  %v3913_v34 = vld [vmem:[#allocation17 + $0x160] sm:$0xff]  ;;  %v3802_v33 = vld [vmem:[#allocation16 + $0x28] sm:$0xff]  ;;  %v3800_v39 = vld [vmem:[#allocation16 + $0x18] sm:$0xff] }
 0x84e   :  { %3657 = vmatmul.mubr.f32.vlgmr.msra.gmra.mrb[8].mxu0 %v13767_v11  ;;  %3728 = vmatmul.mubr.f32.vlgmr.msra.gmra.mrb[24].mxu1 %v13767_v11  ;;  %v9789_v54 = vpack.c.bf16 %v3929_v15, %v3925_v27  ;;  %v15660_v3 = vld [vmem:[#allocation67_spill] sm:$0xff] }
 0x84f   :  { %3997 = vmatprep.mubr.f32.mxu0 %v15463_v40  ;;  %4110 = vmatprep.mubr.f32.mxu1 %v15463_v40  ;;  %v374_v59 = vadd.f32 %v15660_v3, %v15657_v26 }
 0x850   :  { %9762 = vmatpush1.bf16.msra.mxu0 %v9761_v43  ;;  %9794 = vmatpush1.bf16.msra.mxu1 %v9793_v8  ;;  %v3903_v43 = vld [vmem:[#allocation17 + $0x110] sm:$0xff]  ;;  %v3910_v8 = vld [vmem:[#allocation17 + $0x148] sm:$0xff] }
 0x851   :  { %9764 = vmatprep.subr.bf16.mxu0 %v9763_v41  ;;  %9796 = vmatprep.subr.bf16.mxu1 %v9795_v44  ;;  %v9809_v19 = vpack.c.bf16 %v3907_v60, %v3903_v43  ;;  %v9779_v2 = vpack.c.bf16 %v3914_v35, %v3910_v8  ;;  %v3916_v41 = vld [vmem:[#allocation17 + $0x178] sm:$0xff]  ;;  %v9781_v44 = vpack.c.bf16 %v3913_v34, %v3909_v0 }
 0x852   :  { %v9811_v56 = vpack.c.bf16 %v3916_v41, %v3912_v16 }
 0x854   :  { %9766 = vmatpush1.bf16.msra.mxu0 %v9765_v49  ;;  %9798 = vmatpush1.bf16.msra.mxu1 %v9797_v57  ;;  %v3911_v49 = vld [vmem:[#allocation17 + $0x150] sm:$0xff] }
 0x855   :  { %9768 = vmatprep.subr.bf16.mxu0 %v9767_v12  ;;  %9800 = vmatprep.subr.bf16.mxu1 %v9799_v55  ;;  %v9813_v57 = vpack.c.bf16 %v3915_v10, %v3911_v49  ;;  %v9783_v12 = vpack.c.bf16 %v3922_v25, %v3918_v1  ;;  %v3919_v55 = vld [vmem:[#allocation17 + $0x190] sm:$0xff] }
 0x856   :  { %v9817_v42 = vpack.c.bf16 %v3923_v61, %v3919_v55 }
 0x858   :  { %9770 = vmatpush1.bf16.msra.mxu0 %v9769_v20  ;;  %9802 = vmatpush1.bf16.msra.mxu1 %v9801_v32  ;;  %v9785_v20 = vpack.c.bf16 %v3921_v6, %v3917_v53  ;;  %v3930_v32 = vld [vmem:[#allocation17 + $0x1e8] sm:$0xff] }
 0x859   :  { %9772 = vmatprep.subr.bf16.mxu0 %v9771_v30  ;;  %9804 = vmatprep.subr.bf16.mxu1 %v9803_v47  ;;  %v9787_v23 = vpack.c.bf16 %v3930_v32, %v3926_v14  ;;  %v3932_v30 = vld [vmem:[#allocation17 + $0x1f8] sm:$0xff]  ;;  %v3927_v47 = vld [vmem:[#allocation17 + $0x1d0] sm:$0xff] }
 0x85a   :  { %v9819_v37 = vpack.c.bf16 %v3932_v30, %v3928_v7 }
 0x85c   :  { %9774 = vmatpush1.bf16.msra.mxu0 %v9773_v38  ;;  %9806 = vmatpush1.bf16.msra.mxu1 %v9805_v29  ;;  %v3931_v38 = vld [vmem:[#allocation17 + $0x1f0] sm:$0xff]  ;;  %v3798_v29 = vld [vmem:[#allocation16 + $0x8] sm:$0xff] }
 0x85d   :  { %9776 = vmatprep.subr.bf16.mxu0 %v9775_v24  ;;  %9808 = vmatprep.subr.bf16.mxu1 %v9807_v13  ;;  %v9821_v62 = vpack.c.bf16 %v3931_v38, %v3927_v47  ;;  %v9823_v45 = vpack.c.bf16 %v3802_v33, %v3798_v29  ;;  %v3804_v24 = vld [vmem:[#allocation16 + $0x38] sm:$0xff]  ;;  %v15661_v13 = vld [vmem:[#allocation68_spill] sm:$0xff] }
 0x85e   :  { %v9855_v36 = vpack.c.bf16 %v3804_v24, %v3800_v39  ;;  %v3801_v39 = vld [vmem:[#allocation16 + $0x20] sm:$0xff]  ;;  %v3803_v24 = vld [vmem:[#allocation16 + $0x30] sm:$0xff] }
 0x860   :  { %9778 = vmatpush1.bf16.msra.mxu0 %v9777_v31  ;;  %9810 = vmatpush1.bf16.msra.mxu1 %v9809_v19  ;;  %v376_v31 = vadd.f32 %v15661_v13, %v15506_v5  ;;  %v3808_v13 = vld [vmem:[#allocation16 + $0x58] sm:$0xff] }
 0x861   :  { %9780 = vmatprep.subr.bf16.mxu0 %v9779_v2  ;;  %9812 = vmatprep.subr.bf16.mxu1 %v9811_v56 }
 0x864   :  { %9782 = vmatpush1.bf16.msra.mxu0 %v9781_v44  ;;  %9814 = vmatpush1.bf16.msra.mxu1 %v9813_v57 }
 0x865   :  { %9784 = vmatprep.subr.bf16.mxu0 %v9783_v12  ;;  %9816 = vmatprep.subr.bf16.mxu1 %v9815_v46 }
 0x868   :  { %9786 = vmatpush1.bf16.msra.mxu0 %v9785_v20  ;;  %9818 = vmatpush1.bf16.msra.mxu1 %v9817_v42 }
 0x869   :  { %9788 = vmatprep.subr.bf16.mxu0 %v9787_v23  ;;  %9820 = vmatprep.subr.bf16.mxu1 %v9819_v37 }
 0x86c   :  { %9790 = vmatpush1.bf16.msra.mxu0 %v9789_v54  ;;  %9822 = vmatpush1.bf16.msra.mxu1 %v9821_v62 }
 0x86d   :  { %9824 = vmatprep.subr.bf16.mxu0 %v9823_v45  ;;  %9856 = vmatprep.subr.bf16.mxu1 %v9855_v36  ;;  %v3799_v45 = vld [vmem:[#allocation16 + $0x10] sm:$0xff]  ;;  %v3806_v36 = vld [vmem:[#allocation16 + $0x48] sm:$0xff] }
 0x901   :  { %v3506_v43 = vpop.f32.mrb[30].mxu0  ;;  %v3577_v60 = vpop.f32.mrb[22].mxu1 }
 0x902   :  { %v3582_v19 = vadd.f32 %v3506_v43, %v374_v59  ;;  %v3508_v8 = vpop.f32.mrb[31].mxu0  ;;  %v3579_v35 = vpop.f32.mrb[23].mxu1  ;;  %v11423_v56 = vadd.f32 %v3577_v60, %v15537_v22  ;;  %v3810_v59 = vld [vmem:[#allocation16 + $0x68] sm:$0xff] }
 0x903   :  { %v3583_v16 = vadd.f32 %v3508_v8, %v376_v31  ;;  %v11424_v0 = vadd.f32 %v3579_v35, %v13147_v52  ;;  %v3812_v31 = vld [vmem:[#allocation16 + $0x78] sm:$0xff]  ;;  %v3805_v8 = vld [vmem:[#allocation16 + $0x40] sm:$0xff] }
 0x904   :  { %v8628_v2 = vmul.f32 -1.442695, %v3582_v19  ;;  %v9857_v19 = vpack.c.bf16 %v3803_v24, %v3799_v45  ;;  %v3837_v45 = vld [vmem:[#allocation16 + $0x140] sm:$0xff] }
 0x905   :  { %v8629_v41 = vmul.f32 -1.442695, %v3583_v16  ;;  %v8630_v34 = vmul.f32 -1.442695, %v11424_v0  ;;  %v3809_v16 = vld [vmem:[#allocation16 + $0x60] sm:$0xff]  ;;  %v9859_v0 = vpack.c.bf16 %v3812_v31, %v3808_v13  ;;  %v3846_v31 = vld [vmem:[#allocation16 + $0x188] sm:$0xff] }
 0x906   :  { %11906 = vpow2.f32 %v8628_v2  ;;  %v3807_v2 = vld [vmem:[#allocation16 + $0x50] sm:$0xff]  ;;  %v3841_v24 = vld [vmem:[#allocation16 + $0x160] sm:$0xff] }
 0x907   :  { %11908 = vpow2.f32 %v8629_v41  ;;  %v9827_v41 = vpack.c.bf16 %v3810_v59, %v3806_v36  ;;  %v3839_v36 = vld [vmem:[#allocation16 + $0x150] sm:$0xff] }
 0x908   :  { %11910 = vpow2.f32 %v8630_v34  ;;  %v3814_v34 = vld [vmem:[#allocation16 + $0x88] sm:$0xff] }
 0x909   :  { %11912 = vtanh.f32 %v11423_v56  ;;  %v3818_v56 = vld [vmem:[#allocation16 + $0xa8] sm:$0xff] }
 0x910   :  { %v11907_v44 = vpop.eup %11906 }
 0x911   :  { %v11909_v26 = vpop.eup %11908  ;;  %v3741_v49 = vadd.f32 1.0, %v11907_v44  ;;  %v3816_v44 = vld [vmem:[#allocation16 + $0x98] sm:$0xff] }
 0x912   :  { %v3747_v5 = vadd.f32 1.0, %v11909_v26  ;;  %v11911_v10 = vpop.eup %11910  ;;  %v3820_v26 = vld [vmem:[#allocation16 + $0xb8] sm:$0xff] }
 0x913   :  { %11914 = vrcp.f32 %v3741_v49  ;;  %v11913_v1 = vpop.eup %11912  ;;  %v3754_v51 = vadd.f32 1.0, %v11911_v10  ;;  %v9829_v49 = vpack.c.bf16 %v3809_v16, %v3805_v8  ;;  %v3813_v10 = vld [vmem:[#allocation16 + $0x80] sm:$0xff]  ;;  %v3852_v8 = vld [vmem:[#allocation16 + $0x1b8] sm:$0xff] }
 0x914   :  { %11916 = vrcp.f32 %v3747_v5 }
 0x915   :  { %11918 = vrcp.f32 %v3754_v51  ;;  %v9863_v51 = vpack.c.bf16 %v3820_v26, %v3816_v44  ;;  %v3854_v44 = vld [vmem:[#allocation16 + $0x1c8] sm:$0xff] }
 0x916   :  { %v15664_v26 = vld [vmem:[#allocation76_spill] sm:$0xff] }
 0x91d   :  { %v11915_v57 = vpop.eup %11914 }
 0x91e   :  { %v11917_v25 = vpop.eup %11916  ;;  %v3758_v9 = vmul.f32 %v11915_v57, %v11913_v1  ;;  %v3817_v1 = vld [vmem:[#allocation16 + $0xa0] sm:$0xff]  ;;  %v3815_v57 = vld [vmem:[#allocation16 + $0x90] sm:$0xff] }
 0x91f   :  { %v3757_v12 = vmul.f32 %v11917_v25, %v13720_v50  ;;  %v11919_v42 = vpop.eup %11918  ;;  %v3819_v25 = vld [vmem:[#allocation16 + $0xb0] sm:$0xff] }
 0x921   :  { %v3658_v52 = vpop.f32.mrb[8].mxu0  ;;  %v3729_v46 = vpop.f32.mrb[24].mxu1  ;;  %v3759_v53 = vadd.f32 %v3758_v9, %v3757_v12  ;;  %v9831_v9 = vpack.c.bf16 %v3818_v56, %v3814_v34  ;;  %v3822_v12 = vld [vmem:[#allocation16 + $0xc8] sm:$0xff] }
 0x922   :  { %v11425_v22 = vadd.f32 %v3658_v52, %v13155_v58  ;;  %v3660_v6 = vpop.f32.mrb[9].mxu0  ;;  %v3731_v55 = vpop.f32.mrb[25].mxu1  ;;  %v11441_v7 = vadd.f32 %v3729_v46, %v13163_v63  ;;  %v3797_v63 = vld [vmem:[#allocation16] sm:$0xff]  ;;  %v3826_v52 = vld [vmem:[#allocation16 + $0xe8] sm:$0xff]  ;;  %v3824_v46 = vld [vmem:[#allocation16 + $0xd8] sm:$0xff] }
 0x923   :  { %v11426_v20 = vadd.f32 %v3660_v6, %v15508_v17  ;;  %11920 = vtanh.f32 %v3759_v53  ;;  %v11442_v32 = vadd.f32 %v3731_v55, %v13166_v4  ;;  %v9825_v60 = vpack.c.bf16 %v3801_v39, %v3797_v63  ;;  %v3828_v53 = vld [vmem:[#allocation16 + $0xf8] sm:$0xff]  ;;  %v3821_v55 = vld [vmem:[#allocation16 + $0xc0] sm:$0xff] }
 0x924   :  { %v8631_v61 = vmul.f32 -1.442695, %v11425_v22  ;;  %v9833_v22 = vpack.c.bf16 %v3817_v1, %v3813_v10  ;;  %v9865_v6 = vpack.c.bf16 %v3819_v25, %v3815_v57  ;;  %v3860_v10 = vld [vmem:[#allocation16 + $0x1f8] sm:$0xff]  ;;  %v3853_v25 = vld [vmem:[#allocation16 + $0x1c0] sm:$0xff] }
 0x925   :  { %v8632_v14 = vmul.f32 -1.442695, %v11426_v20  ;;  %v8633_v50 = vmul.f32 -1.442695, %v11442_v32  ;;  %v3825_v20 = vld [vmem:[#allocation16 + $0xe0] sm:$0xff]  ;;  %v9835_v32 = vpack.c.bf16 %v3826_v52, %v3822_v12  ;;  %v3859_v12 = vld [vmem:[#allocation16 + $0x1f0] sm:$0xff] }
 0x926   :  { %11922 = vpow2.f32 %v8631_v61  ;;  %v3823_v61 = vld [vmem:[#allocation16 + $0xd0] sm:$0xff] }
 0x927   :  { %11924 = vpow2.f32 %v8632_v14  ;;  %v3827_v14 = vld [vmem:[#allocation16 + $0xf0] sm:$0xff] }
 0x928   :  { %11926 = vpow2.f32 %v8633_v50  ;;  %v3832_v50 = vld [vmem:[#allocation16 + $0x118] sm:$0xff] }
 0x929   :  { %11928 = vtanh.f32 %v11441_v7  ;;  %v3836_v7 = vld [vmem:[#allocation16 + $0x138] sm:$0xff] }
 0x92d   :  { %v11921_v23 = vpop.eup %11920 }
 0x92e   :  { %v13784_v30 = vmul.f32 %v11921_v23, %v11919_v42  ;;  %v9867_v42 = vpack.c.bf16 %v3828_v53, %v3824_v46  ;;  %v3834_v23 = vld [vmem:[#allocation16 + $0x128] sm:$0xff] }
 0x92f   :  { %v15665_v53 = vld [vmem:[#allocation33_spill] sm:$0xff] }
 0x930   :  { %v11923_v27 = vpop.eup %11922 }
 0x931   :  { %v11925_v58 = vpop.eup %11924  ;;  %v3765_v37 = vadd.f32 1.0, %v11923_v27  ;;  %v9837_v27 = vpack.c.bf16 %v3825_v20, %v3821_v55  ;;  %v15666_v55 = vld [vmem:[#allocation78_spill] sm:$0xff]  ;;  %v15667_v20 = vld [vmem:[#allocation77_spill] sm:$0xff] }
 0x932   :  { %v3771_v17 = vadd.f32 1.0, %v11925_v58  ;;  %v11927_v15 = vpop.eup %11926  ;;  %v9869_v58 = vpack.c.bf16 %v3827_v14, %v3823_v61  ;;  %v15668_v61 = vld [vmem:[#allocation32_spill] sm:$0xff]  ;;  %v15669_v14 = vld [vmem:[#allocation71_spill] sm:$0xff] }
 0x933   :  { %11930 = vrcp.f32 %v3765_v37  ;;  %v11929_v47 = vpop.eup %11928  ;;  %v3778_v62 = vadd.f32 1.0, %v11927_v15  ;;  %v3829_v37 = vld [vmem:[#allocation16 + $0x100] sm:$0xff]  ;;  %v3831_v15 = vld [vmem:[#allocation16 + $0x110] sm:$0xff] }
 0x934   :  { %11932 = vrcp.f32 %v3771_v17  ;;  %v3833_v17 = vld [vmem:[#allocation16 + $0x120] sm:$0xff] }
 0x935   :  { %11934 = vrcp.f32 %v3778_v62  ;;  %v3842_v62 = vld [vmem:[#allocation16 + $0x168] sm:$0xff]  ;;  %v9841_v63 = vpack.c.bf16 %v3833_v17, %v3829_v37  ;;  %v4537_v17 = vld [vmem:[#allocation22 + $0x10] sm:$0xff] }
 0x93d   :  { %v11931_v38 = vpop.eup %11930 }
 0x93e   :  { %v11933_v54 = vpop.eup %11932  ;;  %v3782_v4 = vmul.f32 %v11931_v38, %v11929_v47  ;;  %v3835_v47 = vld [vmem:[#allocation16 + $0x130] sm:$0xff] }
 0x93f   :  { %v3781_v29 = vmul.f32 %v11933_v54, %v13750_v18  ;;  %v11935_v3 = vpop.eup %11934  ;;  %v3811_v18 = vld [vmem:[#allocation16 + $0x70] sm:$0xff]  ;;  %v9871_v54 = vpack.c.bf16 %v3836_v7, %v3832_v50  ;;  %v9873_v39 = vpack.c.bf16 %v3835_v47, %v3831_v15  ;;  %v4542_v7 = vld [vmem:[#allocation22 + $0x38] sm:$0xff] }
 0x940   :  { %v9861_v5 = vpack.c.bf16 %v3811_v18, %v3807_v2  ;;  %v3845_v2 = vld [vmem:[#allocation16 + $0x180] sm:$0xff]  ;;  %v4541_v15 = vld [vmem:[#allocation22 + $0x30] sm:$0xff]  ;;  %v4544_v47 = vld [vmem:[#allocation22 + $0x48] sm:$0xff] }
 0x941   :  { %v3783_v33 = vadd.f32 %v3782_v4, %v3781_v29  ;;  %v15662_v4 = vld [vmem:[#allocation62_spill] sm:$0xff]  ;;  %v3849_v18 = vld [vmem:[#allocation16 + $0x1a0] sm:$0xff] }
 0x942   :  { %v3840_v29 = vld [vmem:[#allocation16 + $0x158] sm:$0xff]  ;;  %v9849_v1 = vpack.c.bf16 %v3849_v18, %v3845_v2  ;;  %v4560_v18 = vld [vmem:[#allocation22 + $0xc8] sm:$0xff] }
 0x943   :  { %11936 = vtanh.f32 %v3783_v33  ;;  %v3844_v33 = vld [vmem:[#allocation16 + $0x178] sm:$0xff] }
 0x944   :  { %v9875_v13 = vpack.c.bf16 %v3844_v33, %v3840_v29  ;;  %v4547_v29 = vld [vmem:[#allocation22 + $0x60] sm:$0xff] }
 0x94d   :  { %v11937_v43 = vpop.eup %11936 }
 0x94e   :  { %v3785_v35 = vmul.f32 %v11937_v43, %v11935_v3  ;;  %v3843_v3 = vld [vmem:[#allocation16 + $0x170] sm:$0xff]  ;;  %v15663_v43 = vld [vmem:[#allocation79_spill] sm:$0xff] }
 0x94f   :  { %v9877_v16 = vpack.c.bf16 %v3843_v3, %v3839_v36  ;;  %v4552_v36 = vld [vmem:[#allocation22 + $0x88] sm:$0xff] }
 0x950   :  { %3998 = vmatmul.mubr.f32.vlgmr.msra.gmra.mrb[32].mxu0 %v3785_v35  ;;  %4111 = vmatmul.mubr.f32.vlgmr.msra.gmra.mrb[40].mxu1 %v3785_v35  ;;  %v9845_v35 = vpack.c.bf16 %v3841_v24, %v3837_v45  ;;  %v4549_v45 = vld [vmem:[#allocation22 + $0x70] sm:$0xff]  ;;  %v4556_v3 = vld [vmem:[#allocation22 + $0xa8] sm:$0xff] }
 0x951   :  { %9826 = vmatpush1.bf16.msra.mxu0 %v9825_v60  ;;  %9858 = vmatpush1.bf16.msra.mxu1 %v9857_v19  ;;  %v3850_v60 = vld [vmem:[#allocation16 + $0x1a8] sm:$0xff]  ;;  %v3848_v19 = vld [vmem:[#allocation16 + $0x198] sm:$0xff] }
 0x952   :  { %4003 = vmatprep.mubr.f32.mxu0 %v15463_v40  ;;  %4116 = vmatprep.mubr.f32.mxu1 %v15463_v40  ;;  %v9847_v34 = vpack.c.bf16 %v3850_v60, %v3846_v31  ;;  %v9879_v56 = vpack.c.bf16 %v3852_v8, %v3848_v19  ;;  %v4558_v31 = vld [vmem:[#allocation22 + $0xb8] sm:$0xff]  ;;  %v4555_v60 = vld [vmem:[#allocation22 + $0xa0] sm:$0xff] }
 0x953   :  { %9828 = vmatprep.subr.bf16.mxu0 %v9827_v41  ;;  %9860 = vmatprep.subr.bf16.mxu1 %v9859_v0  ;;  %v3847_v41 = vld [vmem:[#allocation16 + $0x190] sm:$0xff] }
 0x954   :  { %4004 = vmatmul.mubr.f32.gmra.mrb[34].mxu0 %v13767_v11  ;;  %4117 = vmatmul.mubr.f32.gmra.mrb[42].mxu1 %v13767_v11  ;;  %v3830_v11 = vld [vmem:[#allocation16 + $0x108] sm:$0xff]  ;;  %v3851_v0 = vld [vmem:[#allocation16 + $0x1b0] sm:$0xff] }
 0x955   :  { %9830 = vmatpush1.bf16.msra.mxu0 %v9829_v49  ;;  %9862 = vmatpush1.bf16.msra.mxu1 %v9861_v5  ;;  %v9839_v38 = vpack.c.bf16 %v3834_v23, %v3830_v11  ;;  %v3858_v49 = vld [vmem:[#allocation16 + $0x1e8] sm:$0xff]  ;;  %v3856_v5 = vld [vmem:[#allocation16 + $0x1d8] sm:$0xff]  ;;  %v9881_v57 = vpack.c.bf16 %v3851_v0, %v3847_v41 }
 0x956   :  { %4009 = vmatprep.mubr.f32.mxu0 %v15463_v40  ;;  %4122 = vmatprep.mubr.f32.mxu1 %v15463_v40  ;;  %v9851_v52 = vpack.c.bf16 %v3858_v49, %v3854_v44  ;;  %v9883_v46 = vpack.c.bf16 %v3860_v10, %v3856_v5  ;;  %v4540_v11 = vld [vmem:[#allocation22 + $0x28] sm:$0xff]  ;;  %v4538_v23 = vld [vmem:[#allocation22 + $0x18] sm:$0xff]  ;;  %v4559_v44 = vld [vmem:[#allocation22 + $0xc0] sm:$0xff] }
 0x957   :  { %9832 = vmatprep.subr.bf16.mxu0 %v9831_v9  ;;  %9864 = vmatprep.subr.bf16.mxu1 %v9863_v51  ;;  %v3857_v9 = vld [vmem:[#allocation16 + $0x1e0] sm:$0xff]  ;;  %v3855_v51 = vld [vmem:[#allocation16 + $0x1d0] sm:$0xff] }
 0x958   :  { %4010 = vmatmul.mubr.f32.gmra.mrb[36].mxu0 %v13673_v28  ;;  %4123 = vmatmul.mubr.f32.gmra.mrb[44].mxu1 %v13673_v28  ;;  %v3838_v28 = vld [vmem:[#allocation16 + $0x148] sm:$0xff]  ;;  %v4562_v0 = vld [vmem:[#allocation22 + $0xd8] sm:$0xff]  ;;  %v4561_v10 = vld [vmem:[#allocation22 + $0xd0] sm:$0xff] }
 0x959   :  { %9834 = vmatpush1.bf16.msra.mxu0 %v9833_v22  ;;  %9866 = vmatpush1.bf16.msra.mxu1 %v9865_v6  ;;  %v9843_v59 = vpack.c.bf16 %v3842_v62, %v3838_v28  ;;  %v9853_v22 = vpack.c.bf16 %v3857_v9, %v3853_v25  ;;  %v9885_v6 = vpack.c.bf16 %v3859_v12, %v3855_v51  ;;  %v4543_v62 = vld [vmem:[#allocation22 + $0x40] sm:$0xff]  ;;  %v4564_v41 = vld [vmem:[#allocation22 + $0xe8] sm:$0xff]  ;;  %v4570_v51 = vld [vmem:[#allocation22 + $0x118] sm:$0xff] }
 0x95a   :  { %4015 = vmatprep.mubr.f32.mxu0 %v15463_v40  ;;  %4128 = vmatprep.mubr.f32.mxu1 %v15463_v40  ;;  %v4568_v25 = vld [vmem:[#allocation22 + $0x108] sm:$0xff] }
 0x95b   :  { %9836 = vmatprep.subr.bf16.mxu0 %v9835_v32  ;;  %9868 = vmatprep.subr.bf16.mxu1 %v9867_v42  ;;  %v15670_v32 = vld [vmem:[#allocation75_spill] sm:$0xff]  ;;  %v15671_v42 = vld [vmem:[#allocation61_spill] sm:$0xff] }
 0x95c   :  { %4016 = vmatmul.mubr.f32.gmra.mrb[38].mxu0 %v15662_v4  ;;  %4129 = vmatmul.mubr.f32.gmra.mrb[46].mxu1 %v15662_v4  ;;  %v4550_v4 = vld [vmem:[#allocation22 + $0x78] sm:$0xff]  ;;  %v4572_v9 = vld [vmem:[#allocation22 + $0x128] sm:$0xff] }
 0x95d   :  { %9838 = vmatpush1.bf16.msra.mxu0 %v9837_v27  ;;  %9870 = vmatpush1.bf16.msra.mxu1 %v9869_v58  ;;  %v4535_v27 = vld [vmem:[#allocation22] sm:$0xff]  ;;  %v13851_v58 = vpack.c.bf16 %v4542_v7, %v4538_v23  ;;  %v13897_v12 = vpack.c.bf16 %v4572_v9, %v4568_v25  ;;  %v4600_v25 = vld [vmem:[#allocation23 + $0x8] sm:$0xff] }
 0x95e   :  { %4021 = vmatprep.mubr.f32.mxu0 %v15463_v40  ;;  %4134 = vmatprep.mubr.f32.mxu1 %v15463_v40  ;;  %v4575_v23 = vld [vmem:[#allocation22 + $0x140] sm:$0xff]  ;;  %v4604_v9 = vld [vmem:[#allocation23 + $0x28] sm:$0xff] }
 0x95f   :  { %9840 = vmatprep.subr.bf16.mxu0 %v9839_v38  ;;  %9872 = vmatprep.subr.bf16.mxu1 %v9871_v54  ;;  %15673 = vst [vmem:[#allocation64_spill] sm:$0xff] %v13851_v58  ;;  %v4548_v38 = vld [vmem:[#allocation22 + $0x68] sm:$0xff]  ;;  %v4546_v54 = vld [vmem:[#allocation22 + $0x58] sm:$0xff]  ;;  %15688 = vst [vmem:[#allocation54_spill] sm:$0xff] %v13897_v12 }
 0x960   :  { %4022 = vmatmul.mubr.f32.gmra.mrb[40].mxu0 %v15663_v43  ;;  %4135 = vmatmul.mubr.f32.gmra.mrb[48].mxu1 %v15663_v43  ;;  %v13861_v28 = vpack.c.bf16 %v4548_v38, %v4544_v47  ;;  %v13863_v33 = vpack.c.bf16 %v4550_v4, %v4546_v54  ;;  %v4551_v43 = vld [vmem:[#allocation22 + $0x80] sm:$0xff]  ;;  %v4584_v47 = vld [vmem:[#allocation22 + $0x188] sm:$0xff]  ;;  %v4586_v4 = vld [vmem:[#allocation22 + $0x198] sm:$0xff] }
 0x961   :  { %9842 = vmatpush1.bf16.msra.mxu0 %v9841_v63  ;;  %9874 = vmatpush1.bf16.msra.mxu1 %v9873_v39  ;;  %v13865_v63 = vpack.c.bf16 %v4547_v29, %v4543_v62  ;;  %v4545_v39 = vld [vmem:[#allocation22 + $0x50] sm:$0xff]  ;;  %v13877_v8 = vpack.c.bf16 %v4555_v60, %v4551_v43  ;;  %v4579_v7 = vld [vmem:[#allocation22 + $0x160] sm:$0xff]  ;;  %v4588_v54 = vld [vmem:[#allocation22 + $0x1a8] sm:$0xff] }
 0x962   :  { %4027 = vmatprep.mubr.f32.mxu0 %v15463_v40  ;;  %4140 = vmatprep.mubr.f32.mxu1 %v15463_v40  ;;  %15676 = vst [vmem:[#allocation48_spill] sm:$0xff] %v13861_v28  ;;  %15677 = vst [vmem:[#allocation35_spill] sm:$0xff] %v13863_v33  ;;  %v13868_v24 = vpack.c.bf16 %v4549_v45, %v4545_v39  ;;  %v4590_v62 = vld [vmem:[#allocation22 + $0x1b8] sm:$0xff]  ;;  %v13920_v29 = vpack.c.bf16 %v4588_v54, %v4584_v47  ;;  %v4583_v45 = vld [vmem:[#allocation22 + $0x180] sm:$0xff] }
 0x963   :  { %9844 = vmatprep.subr.bf16.mxu0 %v9843_v59  ;;  %9876 = vmatprep.subr.bf16.mxu1 %v9875_v13  ;;  %15678 = vst [vmem:[#allocation49_spill] sm:$0xff] %v13865_v63  ;;  %v4554_v59 = vld [vmem:[#allocation22 + $0x98] sm:$0xff]  ;;  %v13873_v13 = vpack.c.bf16 %v4556_v3, %v4552_v36  ;;  %15682 = vst [vmem:[#allocation51_spill] sm:$0xff] %v13877_v8  ;;  %v13922_v39 = vpack.c.bf16 %v4590_v62, %v4586_v4  ;;  %v4587_v36 = vld [vmem:[#allocation22 + $0x1a0] sm:$0xff] }
 0x964   :  { %4028 = vmatmul.mubr.f32.gmra.mrb[42].mxu0 %v15664_v26  ;;  %4141 = vmatmul.mubr.f32.gmra.mrb[50].mxu1 %v15664_v26  ;;  %15679 = vst [vmem:[#allocation36_spill] sm:$0xff] %v13868_v24  ;;  %v13875_v19 = vpack.c.bf16 %v4558_v31, %v4554_v59  ;;  %v4563_v26 = vld [vmem:[#allocation22 + $0xe0] sm:$0xff]  ;;  %15696 = vst [vmem:[#allocation58_spill] sm:$0xff] %v13920_v29  ;;  %v4585_v3 = vld [vmem:[#allocation22 + $0x190] sm:$0xff]  ;;  %v13925_v59 = vpack.c.bf16 %v4587_v36, %v4583_v45 }
 0x965   :  { %9846 = vmatpush1.bf16.msra.mxu0 %v9845_v35  ;;  %9878 = vmatpush1.bf16.msra.mxu1 %v9877_v16  ;;  %15680 = vst [vmem:[#allocation50_spill] sm:$0xff] %v13873_v13  ;;  %v4553_v35 = vld [vmem:[#allocation22 + $0x90] sm:$0xff]  ;;  %v13889_v5 = vpack.c.bf16 %v4563_v26, %v4559_v44  ;;  %15697 = vst [vmem:[#allocation45_spill] sm:$0xff] %v13922_v39  ;;  %v4592_v43 = vld [vmem:[#allocation22 + $0x1c8] sm:$0xff] }
 0x966   :  { %4033 = vmatprep.mubr.f32.mxu0 %v15463_v40  ;;  %4146 = vmatprep.mubr.f32.mxu1 %v15463_v40  ;;  %15681 = vst [vmem:[#allocation37_spill] sm:$0xff] %v13875_v19  ;;  %v4557_v16 = vld [vmem:[#allocation22 + $0xb0] sm:$0xff]  ;;  %15698 = vst [vmem:[#allocation59_spill] sm:$0xff] %v13925_v59  ;;  %v4596_v60 = vld [vmem:[#allocation22 + $0x1e8] sm:$0xff] }
 0x967   :  { %9848 = vmatprep.subr.bf16.mxu0 %v9847_v34  ;;  %9880 = vmatprep.subr.bf16.mxu1 %v9879_v56  ;;  %v13880_v2 = vpack.c.bf16 %v4557_v16, %v4553_v35  ;;  %v13885_v34 = vpack.c.bf16 %v4564_v41, %v4560_v18  ;;  %v4566_v56 = vld [vmem:[#allocation22 + $0xf8] sm:$0xff]  ;;  %15686 = vst [vmem:[#allocation53_spill] sm:$0xff] %v13889_v5  ;;  %v4589_v31 = vld [vmem:[#allocation22 + $0x1b0] sm:$0xff]  ;;  %v4595_v44 = vld [vmem:[#allocation22 + $0x1e0] sm:$0xff] }
 0x968   :  { %4034 = vmatmul.mubr.f32.gmra.mrb[44].mxu0 %v15665_v53  ;;  %4147 = vmatmul.mubr.f32.gmra.mrb[52].mxu1 %v15665_v53  ;;  %v13887_v49 = vpack.c.bf16 %v4566_v56, %v4562_v0  ;;  %v4571_v53 = vld [vmem:[#allocation22 + $0x120] sm:$0xff]  ;;  %v13929_v35 = vpack.c.bf16 %v4589_v31, %v4585_v3  ;;  %v13931_v16 = vpack.c.bf16 %v4596_v60, %v4592_v43  ;;  %v4594_v18 = vld [vmem:[#allocation22 + $0x1d8] sm:$0xff]  ;;  %v4593_v26 = vld [vmem:[#allocation22 + $0x1d0] sm:$0xff] }
 0x969   :  { %9850 = vmatpush1.bf16.msra.mxu0 %v9849_v1  ;;  %9882 = vmatpush1.bf16.msra.mxu1 %v9881_v57  ;;  %15683 = vst [vmem:[#allocation38_spill] sm:$0xff] %v13880_v2  ;;  %15684 = vst [vmem:[#allocation52_spill] sm:$0xff] %v13885_v34  ;;  %v4565_v1 = vld [vmem:[#allocation22 + $0xf0] sm:$0xff]  ;;  %v4598_v41 = vld [vmem:[#allocation22 + $0x1f8] sm:$0xff] }
 0x96a   :  { %4039 = vmatprep.mubr.f32.mxu0 %v15463_v40  ;;  %4152 = vmatprep.mubr.f32.mxu1 %v15463_v40  ;;  %15685 = vst [vmem:[#allocation39_spill] sm:$0xff] %v13887_v49  ;;  %v13892_v57 = vpack.c.bf16 %v4565_v1, %v4561_v10  ;;  %15699 = vst [vmem:[#allocation46_spill] sm:$0xff] %v13929_v35  ;;  %v4591_v0 = vld [vmem:[#allocation22 + $0x1c0] sm:$0xff]  ;;  %v13933_v56 = vpack.c.bf16 %v4598_v41, %v4594_v18  ;;  %v4597_v10 = vld [vmem:[#allocation22 + $0x1f0] sm:$0xff] }
 0x96b   :  { %9852 = vmatprep.subr.bf16.mxu0 %v9851_v52  ;;  %9884 = vmatprep.subr.bf16.mxu1 %v9883_v46  ;;  %v4574_v52 = vld [vmem:[#allocation22 + $0x138] sm:$0xff]  ;;  %v4567_v46 = vld [vmem:[#allocation22 + $0x100] sm:$0xff]  ;;  %15700 = vst [vmem:[#allocation60_spill] sm:$0xff] %v13931_v16  ;;  %v13936_v1 = vpack.c.bf16 %v4595_v44, %v4591_v0  ;;  %v15710_v45 = vld [vmem:[#allocation74_spill] sm:$0xff] }
 0x96c   :  { %4040 = vmatmul.mubr.f32.gmra.mrb[46].mxu0 %v15666_v55  ;;  %4153 = vmatmul.mubr.f32.gmra.mrb[54].mxu1 %v15666_v55  ;;  %15687 = vst [vmem:[#allocation40_spill] sm:$0xff] %v13892_v57  ;;  %v4569_v55 = vld [vmem:[#allocation22 + $0x110] sm:$0xff]  ;;  %15701 = vst [vmem:[#allocation72_spill] sm:$0xff] %v13933_v56  ;;  %v15712_v31 = vld [vmem:[#allocation73_spill] sm:$0xff] }
 0x96d   :  { %9854 = vmatpush1.bf16.msra.mxu0 %v9853_v22  ;;  %9886 = vmatpush1.bf16.msra.mxu1 %v9885_v6  ;;  %v13899_v22 = vpack.c.bf16 %v4574_v52, %v4570_v51  ;;  %v13901_v6 = vpack.c.bf16 %v4571_v53, %v4567_v46  ;;  %15702 = vst [vmem:[#allocation65_spill] sm:$0xff] %v13936_v1  ;;  %v4602_v51 = vld [vmem:[#allocation23 + $0x18] sm:$0xff] }
 0x96e   :  { %4223 = vmatprep.mubr.f32.mxu0 %v15463_v40  ;;  %4336 = vmatprep.mubr.f32.mxu1 %v15463_v40  ;;  %v13940_v52 = vpack.c.bf16 %v4597_v10, %v4593_v26  ;;  %v13942_v46 = vpack.c.bf16 %v4604_v9, %v4600_v25  ;;  %v4606_v53 = vld [vmem:[#allocation23 + $0x38] sm:$0xff] }
 0x96f   :  { %9920 = vmatprep.subr.bf16.mxu1 %v13851_v58  ;;  %15689 = vst [vmem:[#allocation41_spill] sm:$0xff] %v13899_v22  ;;  %15690 = vst [vmem:[#allocation55_spill] sm:$0xff] %v13901_v6 }
 0x970   :  { %4224 = vmatmul.mubr.f32.vlgmr.msra.gmra.mrb[32].mxu0 %v15667_v20  ;;  %4337 = vmatmul.mubr.f32.vlgmr.msra.gmra.mrb[40].mxu1 %v15667_v20  ;;  %v4573_v20 = vld [vmem:[#allocation22 + $0x130] sm:$0xff]  ;;  %15703 = vst [vmem:[#allocation66_spill] sm:$0xff] %v13940_v52  ;;  %15704 = vst [vmem:[#allocation67_spill] sm:$0xff] %v13942_v46 }
 0x971   :  { %4229 = vmatprep.mubr.f32.mxu0 %v15463_v40  ;;  %4342 = vmatprep.mubr.f32.mxu1 %v15463_v40 }
 0x974   :  { %4230 = vmatmul.mubr.f32.gmra.mrb[34].mxu0 %v15668_v61  ;;  %4343 = vmatmul.mubr.f32.gmra.mrb[42].mxu1 %v15668_v61  ;;  %v13904_v61 = vpack.c.bf16 %v4573_v20, %v4569_v55  ;;  %v13945_v55 = vpack.c.bf16 %v4606_v53, %v4602_v51  ;;  %v4385_v20 = vld [vmem:[#allocation20] sm:$0xf] }
 0x975   :  { %4235 = vmatprep.mubr.f32.mxu0 %v15463_v40  ;;  %4348 = vmatprep.mubr.f32.mxu1 %v15463_v40  ;;  %v13960_v36 = vrot.slane %v4385_v20, %v15710_v45  ;;  %v13964_v43 = vrot.slane %v4385_v20, %v15712_v31  ;;  %v4620_v45 = vld [vmem:[#allocation23 + $0xa8] sm:$0xff] }
 0x976   :  { %15691 = vst [vmem:[#allocation42_spill] sm:$0xff] %v13904_v61  ;;  %15705 = vst [vmem:[#allocation68_spill] sm:$0xff] %v13945_v55 }
 0x977   :  { %15711 = vst [vmem:[#allocation76_spill] sm:$0xff] %v13960_v36  ;;  %15713 = vst [vmem:[#allocation33_spill] sm:$0xff] %v13964_v43 }
 0x978   :  { %4236 = vmatmul.mubr.f32.gmra.mrb[36].mxu0 %v15669_v14  ;;  %4349 = vmatmul.mubr.f32.gmra.mrb[44].mxu1 %v15669_v14  ;;  %v4576_v14 = vld [vmem:[#allocation22 + $0x148] sm:$0xff] }
 0x979   :  { %4241 = vmatprep.mubr.f32.mxu0 %v15463_v40  ;;  %4354 = vmatprep.mubr.f32.mxu1 %v15463_v40 }
 0x97c   :  { %4242 = vmatmul.mubr.f32.gmra.mrb[38].mxu0 %v15670_v32  ;;  %4355 = vmatmul.mubr.f32.gmra.mrb[46].mxu1 %v15670_v32  ;;  %v4580_v32 = vld [vmem:[#allocation22 + $0x168] sm:$0xff] }
 0x97d   :  { %4247 = vmatprep.mubr.f32.mxu0 %v15463_v40  ;;  %4360 = vmatprep.mubr.f32.mxu1 %v15463_v40 }
 0x980   :  { %4248 = vmatmul.mubr.f32.gmra.mrb[40].mxu0 %v15671_v42  ;;  %4361 = vmatmul.mubr.f32.gmra.mrb[48].mxu1 %v15671_v42  ;;  %v4578_v42 = vld [vmem:[#allocation22 + $0x158] sm:$0xff] }
 0x981   :  { %4253 = vmatprep.mubr.f32.mxu0 %v15463_v40  ;;  %4366 = vmatprep.mubr.f32.mxu1 %v15463_v40 }
 0x984   :  { %4254 = vmatmul.mubr.f32.gmra.mrb[42].mxu0 %v13633_v48  ;;  %4367 = vmatmul.mubr.f32.gmra.mrb[50].mxu1 %v13633_v48  ;;  %v4536_v48 = vld [vmem:[#allocation22 + $0x8] sm:$0xff] }
 0x985   :  { %4259 = vmatprep.mubr.f32.mxu0 %v15463_v40  ;;  %4372 = vmatprep.mubr.f32.mxu1 %v15463_v40  ;;  %v13849_v50 = vpack.c.bf16 %v4540_v11, %v4536_v48  ;;  %v13909_v48 = vpack.c.bf16 %v4580_v32, %v4576_v14  ;;  %v4582_v11 = vld [vmem:[#allocation22 + $0x178] sm:$0xff]  ;;  %v15706_v14 = vld [vmem:[#allocation70_spill] sm:$0xff] }
 0x986   :  { %v13952_v32 = vrot.slane %v4385_v20, %v15706_v14 }
 0x987   :  { %15672 = vst [vmem:[#allocation63_spill] sm:$0xff] %v13849_v50  ;;  %9888 = vmatprep.subr.bf16.mxu0 %v13849_v50  ;;  %15692 = vst [vmem:[#allocation56_spill] sm:$0xff] %v13909_v48 }
 0x988   :  { %4260 = vmatmul.mubr.f32.gmra.mrb[44].mxu0 %v13727_v21  ;;  %4373 = vmatmul.mubr.f32.gmra.mrb[52].mxu1 %v13727_v21  ;;  %v4539_v21 = vld [vmem:[#allocation22 + $0x20] sm:$0xff]  ;;  %15707 = vst [vmem:[#allocation62_spill] sm:$0xff] %v13952_v32 }
 0x989   :  { %4265 = vmatprep.mubr.f32.mxu0 %v15463_v40  ;;  %4378 = vmatprep.mubr.f32.mxu1 %v15463_v40  ;;  %v13853_v37 = vpack.c.bf16 %v4539_v21, %v4535_v27  ;;  %v13911_v27 = vpack.c.bf16 %v4582_v11, %v4578_v42  ;;  %v13913_v21 = vpack.c.bf16 %v4579_v7, %v4575_v23  ;;  %v15708_v42 = vld [vmem:[#allocation69_spill] sm:$0xff] }
 0x98a   :  { %v13955_v11 = vrot.slane %v4385_v20, %v15708_v42 }
 0x98b   :  { %15674 = vst [vmem:[#allocation47_spill] sm:$0xff] %v13853_v37  ;;  %9890 = vmatpush1.bf16.msra.mxu0 %v13853_v37  ;;  %15693 = vst [vmem:[#allocation43_spill] sm:$0xff] %v13911_v27 }
 0x98c   :  { %4266 = vmatmul.mubr.f32.gmra.mrb[46].mxu0 %v13784_v30  ;;  %4379 = vmatmul.mubr.f32.gmra.mrb[54].mxu1 %v13784_v30  ;;  %v13856_v30 = vpack.c.bf16 %v4541_v15, %v4537_v17  ;;  %15694 = vst [vmem:[#allocation57_spill] sm:$0xff] %v13913_v21  ;;  %v4577_v17 = vld [vmem:[#allocation22 + $0x150] sm:$0xff]  ;;  %15709 = vst [vmem:[#allocation79_spill] sm:$0xff] %v13955_v11 }
 0x98d   :  { %4777 = vmatprep.mubr.f32.mxu0 %v15463_v40  ;;  %4848 = vmatprep.mubr.f32.mxu1 %v15463_v40  ;;  %v4581_v15 = vld [vmem:[#allocation22 + $0x170] sm:$0xff] }
 0x98e   :  { %15675 = vst [vmem:[#allocation34_spill] sm:$0xff] %v13856_v30  ;;  %9922 = vmatpush1.bf16.msra.mxu1 %v13856_v30  ;;  %9892 = vmatprep.subr.bf16.mxu0 %v13861_v28  ;;  %v13916_v38 = vpack.c.bf16 %v4581_v15, %v4577_v17 }
 0x98f   :  { %9924 = vmatprep.subr.bf16.mxu1 %v13863_v33  ;;  %9894 = vmatpush1.bf16.msra.mxu0 %v13865_v63 }
 0x990   :  { %9896 = vmatprep.subr.bf16.mxu0 %v13873_v13  ;;  %15695 = vst [vmem:[#allocation44_spill] sm:$0xff] %v13916_v38 }
 0x992   :  { %9926 = vmatpush1.bf16.msra.mxu1 %v13868_v24 }
 0x993   :  { %9928 = vmatprep.subr.bf16.mxu1 %v13875_v19  ;;  %9898 = vmatpush1.bf16.msra.mxu0 %v13877_v8 }
 0x994   :  { %9900 = vmatprep.subr.bf16.mxu0 %v13885_v34 }
 0x996   :  { %9930 = vmatpush1.bf16.msra.mxu1 %v13880_v2 }
 0x997   :  { %9932 = vmatprep.subr.bf16.mxu1 %v13887_v49  ;;  %9902 = vmatpush1.bf16.msra.mxu0 %v13889_v5 }
 0x998   :  { %9904 = vmatprep.subr.bf16.mxu0 %v13897_v12 }
 0x99a   :  { %9934 = vmatpush1.bf16.msra.mxu1 %v13892_v57 }
 0x99b   :  { %9936 = vmatprep.subr.bf16.mxu1 %v13899_v22  ;;  %9906 = vmatpush1.bf16.msra.mxu0 %v13901_v6 }
 0x99c   :  { %9908 = vmatprep.subr.bf16.mxu0 %v13909_v48 }
 0x99e   :  { %9938 = vmatpush1.bf16.msra.mxu1 %v13904_v61 }
 0x99f   :  { %9940 = vmatprep.subr.bf16.mxu1 %v13911_v27  ;;  %9910 = vmatpush1.bf16.msra.mxu0 %v13913_v21 }
 0x9a0   :  { %9912 = vmatprep.subr.bf16.mxu0 %v13920_v29 }
 0x9a2   :  { %9942 = vmatpush1.bf16.msra.mxu1 %v13916_v38 }
 0x9a3   :  { %9944 = vmatprep.subr.bf16.mxu1 %v13922_v39  ;;  %9914 = vmatpush1.bf16.msra.mxu0 %v13925_v59 }
 0x9a4   :  { %9916 = vmatprep.subr.bf16.mxu0 %v13931_v16 }
 0x9a6   :  { %9946 = vmatpush1.bf16.msra.mxu1 %v13929_v35 }
 0x9a7   :  { %9948 = vmatprep.subr.bf16.mxu1 %v13933_v56  ;;  %9918 = vmatpush1.bf16.msra.mxu0 %v13936_v1 }
 0x9a8   :  { %9952 = vmatprep.subr.bf16.mxu0 %v13942_v46 }
 0x9aa   :  { %9950 = vmatpush1.bf16.msra.mxu1 %v13940_v52 }
 0x9ab   :  { %9984 = vmatprep.subr.bf16.mxu1 %v13945_v55 }
 0xa43   :  { %v4225_v23 = vpop.f32.mrb[32].mxu0  ;;  %v4338_v7 = vpop.f32.mrb[40].mxu1 }
 0xa44   :  { %v4407_v17 = vadd.f32 %v13952_v32, %v4225_v23  ;;  %v4227_v15 = vpop.f32.mrb[33].mxu0  ;;  %v4340_v47 = vpop.f32.mrb[41].mxu1  ;;  %v4409_v18 = vadd.f32 %v13964_v43, %v4338_v7  ;;  %v4599_v7 = vld [vmem:[#allocation23] sm:$0xff]  ;;  %v4622_v43 = vld [vmem:[#allocation23 + $0xb8] sm:$0xff] }
 0xa45   :  { %v4408_v54 = vadd.f32 %v13955_v11, %v4227_v15  ;;  %v4410_v3 = vadd.f32 %v13960_v36, %v4340_v47  ;;  %v4603_v15 = vld [vmem:[#allocation23 + $0x20] sm:$0xff]  ;;  %v4601_v47 = vld [vmem:[#allocation23 + $0x10] sm:$0xff] }
 0xa46   :  { %v8634_v4 = vmul.f32 -1.442695, %v4407_v17 }
 0xa47   :  { %v8635_v62 = vmul.f32 -1.442695, %v4408_v54  ;;  %v8636_v60 = vmul.f32 -1.442695, %v4410_v3  ;;  %v4605_v54 = vld [vmem:[#allocation23 + $0x30] sm:$0xff]  ;;  %v4610_v3 = vld [vmem:[#allocation23 + $0x58] sm:$0xff] }
 0xa48   :  { %11938 = vpow2.f32 %v8634_v4  ;;  %v4608_v4 = vld [vmem:[#allocation23 + $0x48] sm:$0xff] }
 0xa49   :  { %11940 = vpow2.f32 %v8635_v62  ;;  %v4612_v62 = vld [vmem:[#allocation23 + $0x68] sm:$0xff] }
 0xa4a   :  { %11942 = vpow2.f32 %v8636_v60  ;;  %v4614_v60 = vld [vmem:[#allocation23 + $0x78] sm:$0xff] }
 0xa4b   :  { %11944 = vtanh.f32 %v4409_v18 }
 0xa52   :  { %v11939_v41 = vpop.eup %11938 }
 0xa53   :  { %v11941_v0 = vpop.eup %11940  ;;  %v4671_v44 = vadd.f32 1.0, %v11939_v41 }
 0xa54   :  { %v4677_v26 = vadd.f32 1.0, %v11941_v0  ;;  %v11943_v10 = vpop.eup %11942  ;;  %v13970_v0 = vpack.c.bf16 %v4603_v15, %v4599_v7 }
 0xa55   :  { %11946 = vrcp.f32 %v4671_v44  ;;  %v11945_v25 = vpop.eup %11944  ;;  %v4684_v23 = vadd.f32 1.0, %v11943_v10  ;;  %v13972_v44 = vpack.c.bf16 %v4605_v54, %v4601_v47  ;;  %v4611_v10 = vld [vmem:[#allocation23 + $0x60] sm:$0xff] }
 0xa56   :  { %11948 = vrcp.f32 %v4677_v26  ;;  %15715 = vst [vmem:[#allocation77_spill] sm:$0xff] %v13970_v0  ;;  %v4607_v26 = vld [vmem:[#allocation23 + $0x40] sm:$0xff] }
 0xa57   :  { %11950 = vrcp.f32 %v4684_v23  ;;  %15716 = vst [vmem:[#allocation32_spill] sm:$0xff] %v13972_v44  ;;  %v4613_v23 = vld [vmem:[#allocation23 + $0x70] sm:$0xff]  ;;  %v13984_v7 = vpack.c.bf16 %v4611_v10, %v4607_v26  ;;  %v4615_v47 = vld [vmem:[#allocation23 + $0x80] sm:$0xff] }
 0xa58   :  { %v4619_v54 = vld [vmem:[#allocation23 + $0xa0] sm:$0xff] }
 0xa59   :  { %15719 = vst [vmem:[#allocation61_spill] sm:$0xff] %v13984_v7  ;;  %v13998_v26 = vpack.c.bf16 %v4619_v54, %v4615_v47 }
 0xa5b   :  { %15723 = vst [vmem:[#allocation80_spill] sm:$0xff] %v13998_v26 }
 0xa5f   :  { %v11947_v9 = vpop.eup %11946 }
 0xa60   :  { %v11949_v51 = vpop.eup %11948  ;;  %v4688_v53 = vmul.f32 %v11947_v9, %v11945_v25  ;;  %v13976_v9 = vpack.c.bf16 %v4612_v62, %v4608_v4 }
 0xa61   :  { %v4687_v17 = vmul.f32 0.0, %v11949_v51  ;;  %v11951_v18 = vpop.eup %11950  ;;  %v13978_v51 = vpack.c.bf16 %v4614_v60, %v4610_v3  ;;  %v4617_v3 = vld [vmem:[#allocation23 + $0x90] sm:$0xff] }
 0xa62   :  { %15717 = vst [vmem:[#allocation71_spill] sm:$0xff] %v13976_v9  ;;  %v4621_v60 = vld [vmem:[#allocation23 + $0xb0] sm:$0xff] }
 0xa63   :  { %v13967_v20 = vadd.f32 %v4688_v53, %v4687_v17  ;;  %15718 = vst [vmem:[#allocation75_spill] sm:$0xff] %v13978_v51  ;;  %v4609_v53 = vld [vmem:[#allocation23 + $0x50] sm:$0xff]  ;;  %v4616_v17 = vld [vmem:[#allocation23 + $0x88] sm:$0xff] }
 0xa64   :  { %v13986_v15 = vpack.c.bf16 %v4613_v23, %v4609_v53  ;;  %v13990_v4 = vpack.c.bf16 %v4620_v45, %v4616_v17  ;;  %v14000_v45 = vpack.c.bf16 %v4621_v60, %v4617_v3  ;;  %v4625_v23 = vld [vmem:[#allocation23 + $0xd0] sm:$0xff]  ;;  %v4631_v3 = vld [vmem:[#allocation23 + $0x100] sm:$0xff] }
 0xa65   :  { %15714 = vst [vmem:[#allocation78_spill] sm:$0xff] %v13967_v20  ;;  %11952 = vtanh.f32 %v13967_v20  ;;  %v4618_v20 = vld [vmem:[#allocation23 + $0x98] sm:$0xff]  ;;  %v4629_v17 = vld [vmem:[#allocation23 + $0xf0] sm:$0xff]  ;;  %v4635_v60 = vld [vmem:[#allocation23 + $0x120] sm:$0xff] }
 0xa66   :  { %15720 = vst [vmem:[#allocation70_spill] sm:$0xff] %v13986_v15  ;;  %15721 = vst [vmem:[#allocation69_spill] sm:$0xff] %v13990_v4  ;;  %v13992_v62 = vpack.c.bf16 %v4622_v43, %v4618_v20  ;;  %v4623_v43 = vld [vmem:[#allocation23 + $0xc0] sm:$0xff]  ;;  %v14012_v54 = vpack.c.bf16 %v4629_v17, %v4625_v23 }
 0xa67   :  { %15724 = vst [vmem:[#allocation81_spill] sm:$0xff] %v14000_v45  ;;  %v4627_v20 = vld [vmem:[#allocation23 + $0xe0] sm:$0xff] }
 0xa68   :  { %15722 = vst [vmem:[#allocation73_spill] sm:$0xff] %v13992_v62  ;;  %v14010_v47 = vpack.c.bf16 %v4627_v20, %v4623_v43  ;;  %15728 = vst [vmem:[#allocation85_spill] sm:$0xff] %v14012_v54  ;;  %v14022_v43 = vpack.c.bf16 %v4635_v60, %v4631_v3  ;;  %v4639_v23 = vld [vmem:[#allocation23 + $0x140] sm:$0xff] }
 0xa69   :  { %v4643_v17 = vld [vmem:[#allocation23 + $0x160] sm:$0xff] }
 0xa6a   :  { %15727 = vst [vmem:[#allocation84_spill] sm:$0xff] %v14010_v47  ;;  %15731 = vst [vmem:[#allocation88_spill] sm:$0xff] %v14022_v43  ;;  %v14034_v3 = vpack.c.bf16 %v4643_v17, %v4639_v23 }
 0xa6c   :  { %15735 = vst [vmem:[#allocation92_spill] sm:$0xff] %v14034_v3 }
 0xa6f   :  { %v11953_v41 = vpop.eup %11952 }
 0xa70   :  { %v13974_v25 = vmul.f32 %v11953_v41, %v11951_v18  ;;  %v4624_v18 = vld [vmem:[#allocation23 + $0xc8] sm:$0xff] }
 0xa71   :  { %v4628_v41 = vld [vmem:[#allocation23 + $0xe8] sm:$0xff] }
 0xa72   :  { %4778 = vmatmul.mubr.f32.vlgmr.msra.gmra.mrb[48].mxu0 %v13974_v25  ;;  %4849 = vmatmul.mubr.f32.vlgmr.msra.gmra.mrb[56].mxu1 %v13974_v25  ;;  %v14004_v10 = vpack.c.bf16 %v4628_v41, %v4624_v18  ;;  %v4633_v18 = vld [vmem:[#allocation23 + $0x110] sm:$0xff] }
 0xa73   :  { %9954 = vmatpush1.bf16.msra.mxu0 %v13970_v0  ;;  %9986 = vmatpush1.bf16.msra.mxu1 %v13972_v44  ;;  %v4626_v0 = vld [vmem:[#allocation23 + $0xd8] sm:$0xff]  ;;  %v4637_v41 = vld [vmem:[#allocation23 + $0x130] sm:$0xff] }
 0xa74   :  { %9956 = vmatprep.subr.bf16.mxu0 %v13976_v9  ;;  %9988 = vmatprep.subr.bf16.mxu1 %v13978_v51  ;;  %v4630_v44 = vld [vmem:[#allocation23 + $0xf8] sm:$0xff]  ;;  %15725 = vst [vmem:[#allocation82_spill] sm:$0xff] %v14004_v10  ;;  %v4632_v51 = vld [vmem:[#allocation23 + $0x108] sm:$0xff]  ;;  %v14024_v20 = vpack.c.bf16 %v4637_v41, %v4633_v18  ;;  %v4647_v18 = vld [vmem:[#allocation23 + $0x180] sm:$0xff] }
 0xa75   :  { %4919 = vmatprep.mubr.f32.mxu0 %v15463_v40  ;;  %4990 = vmatprep.mubr.f32.mxu1 %v15463_v40  ;;  %v14006_v53 = vpack.c.bf16 %v4630_v44, %v4626_v0  ;;  %v4634_v9 = vld [vmem:[#allocation23 + $0x118] sm:$0xff]  ;;  %v4651_v41 = vld [vmem:[#allocation23 + $0x1a0] sm:$0xff] }
 0xa76   :  { %15732 = vst [vmem:[#allocation89_spill] sm:$0xff] %v14024_v20  ;;  %v14046_v23 = vpack.c.bf16 %v4651_v41, %v4647_v18 }
 0xa77   :  { %9958 = vmatpush1.bf16.msra.mxu0 %v13984_v7  ;;  %9990 = vmatpush1.bf16.msra.mxu1 %v13986_v15  ;;  %15726 = vst [vmem:[#allocation83_spill] sm:$0xff] %v14006_v53  ;;  %v4636_v7 = vld [vmem:[#allocation23 + $0x128] sm:$0xff]  ;;  %v4638_v15 = vld [vmem:[#allocation23 + $0x138] sm:$0xff] }
 0xa78   :  { %9960 = vmatprep.subr.bf16.mxu0 %v13990_v4  ;;  %9992 = vmatprep.subr.bf16.mxu1 %v13992_v62  ;;  %v14016_v0 = vpack.c.bf16 %v4636_v7, %v4632_v51  ;;  %v14018_v44 = vpack.c.bf16 %v4638_v15, %v4634_v9  ;;  %v4640_v62 = vld [vmem:[#allocation23 + $0x148] sm:$0xff]  ;;  %v4642_v4 = vld [vmem:[#allocation23 + $0x158] sm:$0xff]  ;;  %v4641_v7 = vld [vmem:[#allocation23 + $0x150] sm:$0xff]  ;;  %15739 = vst [vmem:[#allocation96_spill] sm:$0xff] %v14046_v23 }
 0xa79   :  { %v4645_v15 = vld [vmem:[#allocation23 + $0x170] sm:$0xff] }
 0xa7a   :  { %15729 = vst [vmem:[#allocation86_spill] sm:$0xff] %v14016_v0  ;;  %15730 = vst [vmem:[#allocation87_spill] sm:$0xff] %v14018_v44  ;;  %v14036_v60 = vpack.c.bf16 %v4645_v15, %v4641_v7  ;;  %v4655_v7 = vld [vmem:[#allocation23 + $0x1c0] sm:$0xff] }
 0xa7b   :  { %9962 = vmatpush1.bf16.msra.mxu0 %v13998_v26  ;;  %9994 = vmatpush1.bf16.msra.mxu1 %v14000_v45  ;;  %v4644_v26 = vld [vmem:[#allocation23 + $0x168] sm:$0xff]  ;;  %v4646_v45 = vld [vmem:[#allocation23 + $0x178] sm:$0xff]  ;;  %v4659_v15 = vld [vmem:[#allocation23 + $0x1e0] sm:$0xff] }
 0xa7c   :  { %9964 = vmatprep.subr.bf16.mxu0 %v14004_v10  ;;  %9996 = vmatprep.subr.bf16.mxu1 %v14006_v53  ;;  %v14028_v9 = vpack.c.bf16 %v4644_v26, %v4640_v62  ;;  %v14030_v51 = vpack.c.bf16 %v4646_v45, %v4642_v4  ;;  %v4648_v53 = vld [vmem:[#allocation23 + $0x188] sm:$0xff]  ;;  %v4650_v10 = vld [vmem:[#allocation23 + $0x198] sm:$0xff]  ;;  %15736 = vst [vmem:[#allocation93_spill] sm:$0xff] %v14036_v60  ;;  %v4649_v26 = vld [vmem:[#allocation23 + $0x190] sm:$0xff] }
 0xa7d   :  { %v4653_v45 = vld [vmem:[#allocation23 + $0x1b0] sm:$0xff]  ;;  %v14058_v18 = vpack.c.bf16 %v4659_v15, %v4655_v7 }
 0xa7e   :  { %15733 = vst [vmem:[#allocation90_spill] sm:$0xff] %v14028_v9  ;;  %15734 = vst [vmem:[#allocation91_spill] sm:$0xff] %v14030_v51  ;;  %v14048_v17 = vpack.c.bf16 %v4653_v45, %v4649_v26  ;;  %v4471_v26 = vld [vmem:[#allocation19] sm:$0xff] }
 0xa7f   :  { %9966 = vmatpush1.bf16.msra.mxu0 %v14010_v47  ;;  %9998 = vmatpush1.bf16.msra.mxu1 %v14012_v54  ;;  %v4652_v47 = vld [vmem:[#allocation23 + $0x1a8] sm:$0xff]  ;;  %v4654_v54 = vld [vmem:[#allocation23 + $0x1b8] sm:$0xff]  ;;  %15743 = vst [vmem:[#allocation100_spill] sm:$0xff] %v14058_v18 }
 0xa80   :  { %9968 = vmatprep.subr.bf16.mxu0 %v14016_v0  ;;  %10000 = vmatprep.subr.bf16.mxu1 %v14018_v44  ;;  %v14040_v4 = vpack.c.bf16 %v4652_v47, %v4648_v53  ;;  %v14042_v62 = vpack.c.bf16 %v4654_v54, %v4650_v10  ;;  %v4656_v44 = vld [vmem:[#allocation23 + $0x1c8] sm:$0xff]  ;;  %v4658_v0 = vld [vmem:[#allocation23 + $0x1d8] sm:$0xff]  ;;  %15740 = vst [vmem:[#allocation97_spill] sm:$0xff] %v14048_v17  ;;  %v4657_v47 = vld [vmem:[#allocation23 + $0x1d0] sm:$0xff] }
 0xa81   :  { %v4661_v54 = vld [vmem:[#allocation23 + $0x1f0] sm:$0xff]  ;;  %v4475_v45 = vld [vmem:[#allocation19 + $0x20] sm:$0xff] }
 0xa82   :  { %15737 = vst [vmem:[#allocation94_spill] sm:$0xff] %v14040_v4  ;;  %15738 = vst [vmem:[#allocation95_spill] sm:$0xff] %v14042_v62  ;;  %v14060_v41 = vpack.c.bf16 %v4661_v54, %v4657_v47  ;;  %v14070_v7 = vpack.c.bf16 %v4475_v45, %v4471_v26  ;;  %v4479_v47 = vld [vmem:[#allocation19 + $0x40] sm:$0xff] }
 0xa83   :  { %9970 = vmatpush1.bf16.msra.mxu0 %v14022_v43  ;;  %10002 = vmatpush1.bf16.msra.mxu1 %v14024_v20  ;;  %v4660_v43 = vld [vmem:[#allocation23 + $0x1e8] sm:$0xff]  ;;  %v4662_v20 = vld [vmem:[#allocation23 + $0x1f8] sm:$0xff] }
 0xa84   :  { %9972 = vmatprep.subr.bf16.mxu0 %v14028_v9  ;;  %10004 = vmatprep.subr.bf16.mxu1 %v14030_v51  ;;  %v14052_v10 = vpack.c.bf16 %v4660_v43, %v4656_v44  ;;  %v14054_v53 = vpack.c.bf16 %v4662_v20, %v4658_v0  ;;  %v4472_v51 = vld [vmem:[#allocation19 + $0x8] sm:$0xff]  ;;  %v4474_v9 = vld [vmem:[#allocation19 + $0x18] sm:$0xff]  ;;  %15744 = vst [vmem:[#allocation101_spill] sm:$0xff] %v14060_v41  ;;  %v4473_v43 = vld [vmem:[#allocation19 + $0x10] sm:$0xff] }
 0xa85   :  { %v4477_v20 = vld [vmem:[#allocation19 + $0x30] sm:$0xff]  ;;  %15747 = vst [vmem:[#allocation104_spill] sm:$0xff] %v14070_v7  ;;  %v4483_v54 = vld [vmem:[#allocation19 + $0x60] sm:$0xff] }
 0xa86   :  { %15741 = vst [vmem:[#allocation98_spill] sm:$0xff] %v14052_v10  ;;  %15742 = vst [vmem:[#allocation99_spill] sm:$0xff] %v14054_v53  ;;  %v14072_v15 = vpack.c.bf16 %v4477_v20, %v4473_v43  ;;  %v14084_v26 = vpack.c.bf16 %v4483_v54, %v4479_v47  ;;  %v4489_v43 = vld [vmem:[#allocation19 + $0x90] sm:$0xff] }
 0xa87   :  { %9974 = vmatpush1.bf16.msra.mxu0 %v14034_v3  ;;  %10006 = vmatpush1.bf16.msra.mxu1 %v14036_v60  ;;  %v4476_v3 = vld [vmem:[#allocation19 + $0x28] sm:$0xff]  ;;  %v4478_v60 = vld [vmem:[#allocation19 + $0x38] sm:$0xff]  ;;  %v4493_v20 = vld [vmem:[#allocation19 + $0xb0] sm:$0xff] }
 0xa88   :  { %9976 = vmatprep.subr.bf16.mxu0 %v14040_v4  ;;  %10008 = vmatprep.subr.bf16.mxu1 %v14042_v62  ;;  %v14064_v0 = vpack.c.bf16 %v4476_v3, %v4472_v51  ;;  %v14066_v44 = vpack.c.bf16 %v4478_v60, %v4474_v9  ;;  %v4480_v62 = vld [vmem:[#allocation19 + $0x48] sm:$0xff]  ;;  %v4482_v4 = vld [vmem:[#allocation19 + $0x58] sm:$0xff]  ;;  %15748 = vst [vmem:[#allocation105_spill] sm:$0xff] %v14072_v15  ;;  %v4481_v3 = vld [vmem:[#allocation19 + $0x50] sm:$0xff] }
 0xa89   :  { %v4485_v60 = vld [vmem:[#allocation19 + $0x70] sm:$0xff]  ;;  %15751 = vst [vmem:[#allocation108_spill] sm:$0xff] %v14084_v26 }
 0xa8a   :  { %15745 = vst [vmem:[#allocation102_spill] sm:$0xff] %v14064_v0  ;;  %15746 = vst [vmem:[#allocation103_spill] sm:$0xff] %v14066_v44 }
 0xa8b   :  { %9978 = vmatpush1.bf16.msra.mxu0 %v14046_v23  ;;  %10010 = vmatpush1.bf16.msra.mxu1 %v14048_v17  ;;  %v4484_v23 = vld [vmem:[#allocation19 + $0x68] sm:$0xff]  ;;  %v4486_v17 = vld [vmem:[#allocation19 + $0x78] sm:$0xff] }
 0xa8c   :  { %9980 = vmatprep.subr.bf16.mxu0 %v14052_v10  ;;  %10012 = vmatprep.subr.bf16.mxu1 %v14054_v53  ;;  %v14076_v9 = vpack.c.bf16 %v4484_v23, %v4480_v62  ;;  %v14078_v51 = vpack.c.bf16 %v4486_v17, %v4482_v4  ;;  %v4488_v53 = vld [vmem:[#allocation19 + $0x88] sm:$0xff]  ;;  %v4490_v10 = vld [vmem:[#allocation19 + $0x98] sm:$0xff]  ;;  %v14086_v62 = vpack.c.bf16 %v4485_v60, %v4481_v3  ;;  %v4487_v4 = vld [vmem:[#allocation19 + $0x80] sm:$0xff] }
 0xa8d   :  { %v4491_v23 = vld [vmem:[#allocation19 + $0xa0] sm:$0xff]  ;;  %v4497_v3 = vld [vmem:[#allocation19 + $0xd0] sm:$0xff] }
 0xa8e   :  { %15749 = vst [vmem:[#allocation106_spill] sm:$0xff] %v14076_v9  ;;  %15750 = vst [vmem:[#allocation107_spill] sm:$0xff] %v14078_v51  ;;  %v14098_v47 = vpack.c.bf16 %v4491_v23, %v4487_v4  ;;  %v4501_v60 = vld [vmem:[#allocation19 + $0xf0] sm:$0xff] }
 0xa8f   :  { %9982 = vmatpush1.bf16.msra.mxu0 %v14058_v18  ;;  %10014 = vmatpush1.bf16.msra.mxu1 %v14060_v41  ;;  %v4492_v18 = vld [vmem:[#allocation19 + $0xa8] sm:$0xff]  ;;  %v4494_v41 = vld [vmem:[#allocation19 + $0xb8] sm:$0xff]  ;;  %15752 = vst [vmem:[#allocation109_spill] sm:$0xff] %v14086_v62  ;;  %v14112_v23 = vpack.c.bf16 %v4501_v60, %v4497_v3  ;;  %v4511_v3 = vld [vmem:[#allocation19 + $0x140] sm:$0xff] }
 0xa90   :  { %10016 = vmatprep.subr.bf16.mxu0 %v14064_v0  ;;  %10048 = vmatprep.subr.bf16.mxu1 %v14066_v44  ;;  %v14090_v17 = vpack.c.bf16 %v4492_v18, %v4488_v53  ;;  %v14092_v45 = vpack.c.bf16 %v4494_v41, %v4490_v10  ;;  %v4496_v44 = vld [vmem:[#allocation19 + $0xc8] sm:$0xff]  ;;  %v4498_v0 = vld [vmem:[#allocation19 + $0xd8] sm:$0xff]  ;;  %15755 = vst [vmem:[#allocation112_spill] sm:$0xff] %v14098_v47  ;;  %v4495_v10 = vld [vmem:[#allocation19 + $0xc0] sm:$0xff] }
 0xa91   :  { %v14100_v53 = vpack.c.bf16 %v4493_v20, %v4489_v43  ;;  %v4499_v18 = vld [vmem:[#allocation19 + $0xe0] sm:$0xff]  ;;  %15760 = vst [vmem:[#allocation117_spill] sm:$0xff] %v14112_v23 }
 0xa92   :  { %4920 = vmatmul.mubr.f32.vlgmr.msra.gmra.mrb[48].mxu0 %v15463_v40  ;;  %4991 = vmatmul.mubr.f32.vlgmr.msra.gmra.mrb[56].mxu1 %v15463_v40  ;;  %15753 = vst [vmem:[#allocation110_spill] sm:$0xff] %v14090_v17  ;;  %15754 = vst [vmem:[#allocation111_spill] sm:$0xff] %v14092_v45  ;;  %v14110_v4 = vpack.c.bf16 %v4499_v18, %v4495_v10  ;;  %v4503_v43 = vld [vmem:[#allocation19 + $0x100] sm:$0xff] }
 0xa93   :  { %10018 = vmatpush1.bf16.msra.mxu0 %v14070_v7  ;;  %10050 = vmatpush1.bf16.msra.mxu1 %v14072_v15  ;;  %v4500_v7 = vld [vmem:[#allocation19 + $0xe8] sm:$0xff]  ;;  %v4502_v15 = vld [vmem:[#allocation19 + $0xf8] sm:$0xff]  ;;  %15756 = vst [vmem:[#allocation113_spill] sm:$0xff] %v14100_v53  ;;  %v4507_v20 = vld [vmem:[#allocation19 + $0x120] sm:$0xff] }
 0xa94   :  { %10020 = vmatprep.subr.bf16.mxu0 %v14076_v9  ;;  %10052 = vmatprep.subr.bf16.mxu1 %v14078_v51  ;;  %v14104_v41 = vpack.c.bf16 %v4500_v7, %v4496_v44  ;;  %v14106_v54 = vpack.c.bf16 %v4502_v15, %v4498_v0  ;;  %v4504_v51 = vld [vmem:[#allocation19 + $0x108] sm:$0xff]  ;;  %v4506_v9 = vld [vmem:[#allocation19 + $0x118] sm:$0xff]  ;;  %15759 = vst [vmem:[#allocation116_spill] sm:$0xff] %v14110_v4  ;;  %v4505_v7 = vld [vmem:[#allocation19 + $0x110] sm:$0xff] }
 0xa95   :  { %5094 = vmatprep.mubr.f32.mxu0 %v15463_v40  ;;  %5165 = vmatprep.mubr.f32.mxu1 %v15463_v40  ;;  %v4509_v15 = vld [vmem:[#allocation19 + $0x130] sm:$0xff]  ;;  %v14122_v10 = vpack.c.bf16 %v4507_v20, %v4503_v43  ;;  %v4515_v60 = vld [vmem:[#allocation19 + $0x160] sm:$0xff] }
 0xa96   :  { %15757 = vst [vmem:[#allocation114_spill] sm:$0xff] %v14104_v41  ;;  %15758 = vst [vmem:[#allocation115_spill] sm:$0xff] %v14106_v54  ;;  %v14124_v18 = vpack.c.bf16 %v4509_v15, %v4505_v7  ;;  %v14134_v43 = vpack.c.bf16 %v4515_v60, %v4511_v3  ;;  %v4519_v7 = vld [vmem:[#allocation19 + $0x180] sm:$0xff] }
 0xa97   :  { %10022 = vmatpush1.bf16.msra.mxu0 %v14084_v26  ;;  %10054 = vmatpush1.bf16.msra.mxu1 %v14086_v62  ;;  %v4508_v26 = vld [vmem:[#allocation19 + $0x128] sm:$0xff]  ;;  %v4510_v62 = vld [vmem:[#allocation19 + $0x138] sm:$0xff]  ;;  %15763 = vst [vmem:[#allocation120_spill] sm:$0xff] %v14122_v10  ;;  %v4523_v15 = vld [vmem:[#allocation19 + $0x1a0] sm:$0xff] }
 0xa98   :  { %10024 = vmatprep.subr.bf16.mxu0 %v14090_v17  ;;  %10056 = vmatprep.subr.bf16.mxu1 %v14092_v45  ;;  %v14116_v0 = vpack.c.bf16 %v4508_v26, %v4504_v51  ;;  %v14118_v44 = vpack.c.bf16 %v4510_v62, %v4506_v9  ;;  %v4512_v45 = vld [vmem:[#allocation19 + $0x148] sm:$0xff]  ;;  %v4514_v17 = vld [vmem:[#allocation19 + $0x158] sm:$0xff]  ;;  %15764 = vst [vmem:[#allocation121_spill] sm:$0xff] %v14124_v18  ;;  %v4513_v26 = vld [vmem:[#allocation19 + $0x150] sm:$0xff] }
 0xa99   :  { %v4517_v62 = vld [vmem:[#allocation19 + $0x170] sm:$0xff]  ;;  %15767 = vst [vmem:[#allocation124_spill] sm:$0xff] %v14134_v43  ;;  %v14146_v3 = vpack.c.bf16 %v4523_v15, %v4519_v7 }
 0xa9a   :  { %15761 = vst [vmem:[#allocation118_spill] sm:$0xff] %v14116_v0  ;;  %15762 = vst [vmem:[#allocation119_spill] sm:$0xff] %v14118_v44  ;;  %v14136_v20 = vpack.c.bf16 %v4517_v62, %v4513_v26  ;;  %v4527_v26 = vld [vmem:[#allocation19 + $0x1c0] sm:$0xff]  ;;  %v4533_v62 = vld [vmem:[#allocation19 + $0x1f0] sm:$0xff] }
 0xa9b   :  { %10026 = vmatpush1.bf16.msra.mxu0 %v14098_v47  ;;  %10058 = vmatpush1.bf16.msra.mxu1 %v14100_v53  ;;  %v4516_v47 = vld [vmem:[#allocation19 + $0x168] sm:$0xff]  ;;  %v4518_v53 = vld [vmem:[#allocation19 + $0x178] sm:$0xff]  ;;  %15771 = vst [vmem:[#allocation128_spill] sm:$0xff] %v14146_v3 }
 0xa9c   :  { %10028 = vmatprep.subr.bf16.mxu0 %v14104_v41  ;;  %10060 = vmatprep.subr.bf16.mxu1 %v14106_v54  ;;  %v14128_v9 = vpack.c.bf16 %v4516_v47, %v4512_v45  ;;  %v14130_v51 = vpack.c.bf16 %v4518_v53, %v4514_v17  ;;  %v4520_v54 = vld [vmem:[#allocation19 + $0x188] sm:$0xff]  ;;  %v4522_v41 = vld [vmem:[#allocation19 + $0x198] sm:$0xff]  ;;  %15768 = vst [vmem:[#allocation125_spill] sm:$0xff] %v14136_v20  ;;  %v4521_v47 = vld [vmem:[#allocation19 + $0x190] sm:$0xff] }
 0xa9d   :  { %v4525_v53 = vld [vmem:[#allocation19 + $0x1b0] sm:$0xff] }
 0xa9e   :  { %15765 = vst [vmem:[#allocation122_spill] sm:$0xff] %v14128_v9  ;;  %15766 = vst [vmem:[#allocation123_spill] sm:$0xff] %v14130_v51  ;;  %v14148_v60 = vpack.c.bf16 %v4525_v53, %v4521_v47 }
 0xa9f   :  { %10030 = vmatpush1.bf16.msra.mxu0 %v14110_v4  ;;  %10062 = vmatpush1.bf16.msra.mxu1 %v14112_v23  ;;  %v4524_v4 = vld [vmem:[#allocation19 + $0x1a8] sm:$0xff]  ;;  %v4526_v23 = vld [vmem:[#allocation19 + $0x1b8] sm:$0xff] }
 0xaa0   :  { %10032 = vmatprep.subr.bf16.mxu0 %v14116_v0  ;;  %10064 = vmatprep.subr.bf16.mxu1 %v14118_v44  ;;  %v14140_v17 = vpack.c.bf16 %v4524_v4, %v4520_v54  ;;  %v14142_v45 = vpack.c.bf16 %v4526_v23, %v4522_v41  ;;  %v4528_v44 = vld [vmem:[#allocation19 + $0x1c8] sm:$0xff]  ;;  %v4530_v0 = vld [vmem:[#allocation19 + $0x1d8] sm:$0xff]  ;;  %15772 = vst [vmem:[#allocation129_spill] sm:$0xff] %v14148_v60  ;;  %v4531_v4 = vld [vmem:[#allocation19 + $0x1e0] sm:$0xff] }
 0xaa1   :  { %v4529_v23 = vld [vmem:[#allocation19 + $0x1d0] sm:$0xff]  ;;  %v14158_v7 = vpack.c.bf16 %v4531_v4, %v4527_v26 }
 0xaa2   :  { %15769 = vst [vmem:[#allocation126_spill] sm:$0xff] %v14140_v17  ;;  %15770 = vst [vmem:[#allocation127_spill] sm:$0xff] %v14142_v45  ;;  %v14160_v15 = vpack.c.bf16 %v4533_v62, %v4529_v23 }
 0xaa3   :  { %10034 = vmatpush1.bf16.msra.mxu0 %v14122_v10  ;;  %10066 = vmatpush1.bf16.msra.mxu1 %v14124_v18  ;;  %v4532_v10 = vld [vmem:[#allocation19 + $0x1e8] sm:$0xff]  ;;  %v4534_v18 = vld [vmem:[#allocation19 + $0x1f8] sm:$0xff]  ;;  %15775 = vst [vmem:[#allocation132_spill] sm:$0xff] %v14158_v7 }
 0xaa4   :  { %10036 = vmatprep.subr.bf16.mxu0 %v14128_v9  ;;  %10068 = vmatprep.subr.bf16.mxu1 %v14130_v51  ;;  %v14152_v41 = vpack.c.bf16 %v4532_v10, %v4528_v44  ;;  %v14154_v54 = vpack.c.bf16 %v4534_v18, %v4530_v0  ;;  %15776 = vst [vmem:[#allocation133_spill] sm:$0xff] %v14160_v15 }
 0xaa6   :  { %15773 = vst [vmem:[#allocation130_spill] sm:$0xff] %v14152_v41  ;;  %15774 = vst [vmem:[#allocation131_spill] sm:$0xff] %v14154_v54 }
 0xaa7   :  { %10038 = vmatpush1.bf16.msra.mxu0 %v14134_v43  ;;  %10070 = vmatpush1.bf16.msra.mxu1 %v14136_v20 }
 0xaa8   :  { %10040 = vmatprep.subr.bf16.mxu0 %v14140_v17  ;;  %10072 = vmatprep.subr.bf16.mxu1 %v14142_v45 }
 0xaab   :  { %10042 = vmatpush1.bf16.msra.mxu0 %v14146_v3  ;;  %10074 = vmatpush1.bf16.msra.mxu1 %v14148_v60 }
 0xaac   :  { %10044 = vmatprep.subr.bf16.mxu0 %v14152_v41  ;;  %10076 = vmatprep.subr.bf16.mxu1 %v14154_v54 }
 0xaaf   :  { %10046 = vmatpush1.bf16.msra.mxu0 %v14158_v7  ;;  %10078 = vmatpush1.bf16.msra.mxu1 %v14160_v15 }
 0xab0   :  { %10080 = vmatprep.subr.bf16.mxu0 %v13849_v50  ;;  %10112 = vmatprep.subr.bf16.mxu1 %v13851_v58 }
 0xab2   :  { %5095 = vmatmul.mubr.f32.vlgmr.msra.gmra.mrb[34].mxu0 %v13974_v25  ;;  %5166 = vmatmul.mubr.f32.vlgmr.msra.gmra.mrb[42].mxu1 %v13974_v25  ;;  %v4663_v25 = vld [vmem:[%s15105_s13] sm:$0xf] }
 0xab3   :  { %10082 = vmatpush1.bf16.msra.mxu0 %v13853_v37  ;;  %10114 = vmatpush1.bf16.msra.mxu1 %v13856_v30  ;;  %v14208_v0 = vrot.slane %v4663_v25, %v15706_v14  ;;  %v14211_v44 = vrot.slane %v4663_v25, %v15708_v42 }
 0xab4   :  { %10084 = vmatprep.subr.bf16.mxu0 %v13861_v28  ;;  %10116 = vmatprep.subr.bf16.mxu1 %v13863_v33 }
 0xab5   :  { %5264 = vmatprep.mubr.f32.mxu0 %v15463_v40  ;;  %5335 = vmatprep.mubr.f32.mxu1 %v15463_v40  ;;  %15777 = vst [vmem:[#allocation134_spill] sm:$0xff] %v14208_v0  ;;  %15778 = vst [vmem:[#allocation135_spill] sm:$0xff] %v14211_v44 }
 0xab7   :  { %10086 = vmatpush1.bf16.msra.mxu0 %v13865_v63  ;;  %10118 = vmatpush1.bf16.msra.mxu1 %v13868_v24 }
 0xab8   :  { %10088 = vmatprep.subr.bf16.mxu0 %v13873_v13  ;;  %10120 = vmatprep.subr.bf16.mxu1 %v13875_v19 }
 0xabb   :  { %10090 = vmatpush1.bf16.msra.mxu0 %v13877_v8  ;;  %10122 = vmatpush1.bf16.msra.mxu1 %v13880_v2 }
 0xabc   :  { %10092 = vmatprep.subr.bf16.mxu0 %v13885_v34  ;;  %10124 = vmatprep.subr.bf16.mxu1 %v13887_v49 }
 0xabf   :  { %10094 = vmatpush1.bf16.msra.mxu0 %v13889_v5  ;;  %10126 = vmatpush1.bf16.msra.mxu1 %v13892_v57 }
 0xac0   :  { %10096 = vmatprep.subr.bf16.mxu0 %v13897_v12  ;;  %10128 = vmatprep.subr.bf16.mxu1 %v13899_v22 }
 0xac3   :  { %10098 = vmatpush1.bf16.msra.mxu0 %v13901_v6  ;;  %10130 = vmatpush1.bf16.msra.mxu1 %v13904_v61 }
 0xac4   :  { %10100 = vmatprep.subr.bf16.mxu0 %v13909_v48  ;;  %10132 = vmatprep.subr.bf16.mxu1 %v13911_v27 }
 0xac7   :  { %10102 = vmatpush1.bf16.msra.mxu0 %v13913_v21  ;;  %10134 = vmatpush1.bf16.msra.mxu1 %v13916_v38 }
 0xac8   :  { %10104 = vmatprep.subr.bf16.mxu0 %v13920_v29  ;;  %10136 = vmatprep.subr.bf16.mxu1 %v13922_v39 }
 0xacb   :  { %10106 = vmatpush1.bf16.msra.mxu0 %v13925_v59  ;;  %10138 = vmatpush1.bf16.msra.mxu1 %v13929_v35 }
 0xacc   :  { %10108 = vmatprep.subr.bf16.mxu0 %v13931_v16  ;;  %10140 = vmatprep.subr.bf16.mxu1 %v13933_v56 }
 0xacf   :  { %10110 = vmatpush1.bf16.msra.mxu0 %v13936_v1  ;;  %10142 = vmatpush1.bf16.msra.mxu1 %v13940_v52 }
 0xad0   :  { %10144 = vmatprep.subr.bf16.mxu0 %v13942_v46  ;;  %10176 = vmatprep.subr.bf16.mxu1 %v13945_v55  ;;  %v14216_v55 = vrot.slane %v4663_v25, %v15712_v31 }
 0xad2   :  { %15779 = vst [vmem:[#allocation136_spill] sm:$0xff] %v14216_v55 }
 0xb65   :  { %v4921_v10 = vpop.f32.mrb[48].mxu0  ;;  %v4992_v18 = vpop.f32.mrb[56].mxu1 }
 0xb66   :  { %v11485_v47 = vadd.f32 %v4921_v10, %v14208_v0  ;;  %v4923_v53 = vpop.f32.mrb[49].mxu0  ;;  %v4994_v26 = vpop.f32.mrb[57].mxu1  ;;  %v11487_v14 = vadd.f32 %v4992_v18, %v14216_v55 }
 0xb67   :  { %v11486_v4 = vadd.f32 %v4923_v53, %v14211_v44 }
 0xb68   :  { %v8637_v23 = vmul.f32 -1.442695, %v11485_v47 }
 0xb69   :  { %v8638_v62 = vmul.f32 -1.442695, %v11486_v4 }
 0xb6a   :  { %11954 = vpow2.f32 %v8637_v23 }
 0xb6b   :  { %11956 = vpow2.f32 %v8638_v62 }
 0xb6c   :  { %11958 = vtanh.f32 %v11487_v14 }
 0xb74   :  { %v11955_v46 = vpop.eup %11954 }
 0xb75   :  { %v11957_v42 = vpop.eup %11956  ;;  %v5004_v52 = vadd.f32 1.0, %v11955_v46 }
 0xb76   :  { %v5010_v1 = vadd.f32 1.0, %v11957_v42  ;;  %v11959_v10 = vpop.eup %11958  ;;  %v15780_v42 = vld [vmem:[#allocation33_spill] sm:$0xff] }
 0xb77   :  { %11960 = vrcp.f32 %v5004_v52 }
 0xb78   :  { %11962 = vrcp.f32 %v5010_v1 }
 0xb81   :  { %v11961_v0 = vpop.eup %11960 }
 0xb82   :  { %v11963_v56 = vpop.eup %11962  ;;  %v5021_v53 = vmul.f32 %v11961_v0, %v11959_v10 }
 0xb83   :  { %v5020_v47 = vmul.f32 0.0, %v11963_v56 }
 0xb85   :  { %v14219_v4 = vadd.f32 %v5021_v53, %v5020_v47  ;;  %v5096_v23 = vpop.f32.mrb[34].mxu0  ;;  %v5167_v62 = vpop.f32.mrb[42].mxu1 }
 0xb86   :  { %v11457_v31 = vadd.f32 %v5096_v23, %v13952_v32  ;;  %v5098_v44 = vpop.f32.mrb[35].mxu0  ;;  %v5169_v18 = vpop.f32.mrb[43].mxu1  ;;  %v11471_v0 = vadd.f32 %v5167_v62, %v15780_v42  ;;  %v15782_v62 = vld [vmem:[#allocation74_spill] sm:$0xff] }
 0xb87   :  { %v11458_v55 = vadd.f32 %v5098_v44, %v13955_v11  ;;  %v11472_v1 = vadd.f32 %v5169_v18, %v13960_v36 }
 0xb88   :  { %v8640_v46 = vmul.f32 -1.442695, %v11457_v31 }
 0xb89   :  { %v8641_v14 = vmul.f32 -1.442695, %v11458_v55  ;;  %v8642_v52 = vmul.f32 -1.442695, %v11472_v1  ;;  %v14230_v1 = vrot.slane %v4663_v25, %v15782_v62  ;;  %v15787_v25 = vld [vmem:[#allocation75_spill] sm:$0xff] }
 0xb8a   :  { %11964 = vpow2.f32 %v8640_v46  ;;  %v15795_v62 = vld [vmem:[#allocation83_spill] sm:$0xff] }
 0xb8b   :  { %11966 = vpow2.f32 %v8641_v14  ;;  %v15781_v14 = vld [vmem:[#allocation78_spill] sm:$0xff]  ;;  %15783 = vst [vmem:[#allocation33_spill] sm:$0xff] %v14230_v1 }
 0xb8c   :  { %11968 = vpow2.f32 %v8642_v52  ;;  %v11488_v52 = vadd.f32 %v4994_v26, %v14230_v1  ;;  %v15788_v26 = vld [vmem:[#allocation61_spill] sm:$0xff] }
 0xb8d   :  { %11970 = vtanh.f32 %v11471_v0 }
 0xb94   :  { %v11965_v56 = vpop.eup %11964 }
 0xb95   :  { %v11967_v10 = vpop.eup %11966  ;;  %v5179_v53 = vadd.f32 1.0, %v11965_v56 }
 0xb96   :  { %v5185_v47 = vadd.f32 1.0, %v11967_v10  ;;  %v11969_v23 = vpop.eup %11968  ;;  %v8639_v10 = vmul.f32 -1.442695, %v11488_v52 }
 0xb97   :  { %11972 = vrcp.f32 %v5179_v53  ;;  %v11971_v32 = vpop.eup %11970  ;;  %v5192_v46 = vadd.f32 1.0, %v11969_v23  ;;  %v15789_v23 = vld [vmem:[#allocation70_spill] sm:$0xff] }
 0xb98   :  { %11974 = vrcp.f32 %v5185_v47  ;;  %v15786_v47 = vld [vmem:[#allocation71_spill] sm:$0xff] }
 0xb99   :  { %11976 = vrcp.f32 %v5192_v46  ;;  %v15793_v46 = vld [vmem:[#allocation81_spill] sm:$0xff] }
 0xba1   :  { %v11973_v44 = vpop.eup %11972 }
 0xba2   :  { %v11975_v31 = vpop.eup %11974  ;;  %v5196_v55 = vmul.f32 %v11973_v44, %v11971_v32  ;;  %v15784_v32 = vld [vmem:[#allocation77_spill] sm:$0xff] }
 0xba3   :  { %v5195_v11 = vmul.f32 %v11975_v31, %v15781_v14  ;;  %v11977_v0 = vpop.eup %11976  ;;  %v15790_v44 = vld [vmem:[#allocation69_spill] sm:$0xff]  ;;  %v15794_v14 = vld [vmem:[#allocation82_spill] sm:$0xff] }
 0xba4   :  { %v15791_v31 = vld [vmem:[#allocation73_spill] sm:$0xff] }
 0xba5   :  { %v14226_v18 = vadd.f32 %v5196_v55, %v5195_v11  ;;  %v15785_v11 = vld [vmem:[#allocation32_spill] sm:$0xff] }
 0xba6   :  { %v15792_v55 = vld [vmem:[#allocation80_spill] sm:$0xff] }
 0xba7   :  { %11978 = vtanh.f32 %v14226_v18 }
 0xba8   :  { %11980 = vpow2.f32 %v8639_v10  ;;  %v15798_v10 = vld [vmem:[#allocation86_spill] sm:$0xff] }
 0xba9   :  { %11982 = vtanh.f32 %v14219_v4 }
 0xbb1   :  { %v11979_v56 = vpop.eup %11978 }
 0xbb2   :  { %v14233_v53 = vmul.f32 %v11979_v56, %v11977_v0  ;;  %v11981_v52 = vpop.eup %11980  ;;  %v15796_v0 = vld [vmem:[#allocation84_spill] sm:$0xff]  ;;  %v15797_v56 = vld [vmem:[#allocation85_spill] sm:$0xff] }
 0xbb4   :  { %5265 = vmatmul.mubr.f32.vlgmr.msra.gmra.mrb[50].mxu0 %v14233_v53  ;;  %5336 = vmatmul.mubr.f32.vlgmr.msra.gmra.mrb[58].mxu1 %v14233_v53 }
 0xbb5   :  { %10146 = vmatpush1.bf16.msra.mxu0 %v15784_v32  ;;  %10178 = vmatpush1.bf16.msra.mxu1 %v15785_v11 }
 0xbb6   :  { %10148 = vmatprep.subr.bf16.mxu0 %v15786_v47  ;;  %10180 = vmatprep.subr.bf16.mxu1 %v15787_v25 }
 0xbb7   :  { %5406 = vmatprep.mubr.f32.mxu0 %v15463_v40  ;;  %5477 = vmatprep.mubr.f32.mxu1 %v15463_v40 }
 0xbb9   :  { %10150 = vmatpush1.bf16.msra.mxu0 %v15788_v26  ;;  %10182 = vmatpush1.bf16.msra.mxu1 %v15789_v23  ;;  %v15799_v23 = vld [vmem:[#allocation87_spill] sm:$0xff] }
 0xbba   :  { %10152 = vmatprep.subr.bf16.mxu0 %v15790_v44  ;;  %10184 = vmatprep.subr.bf16.mxu1 %v15791_v31  ;;  %v5017_v44 = vadd.f32 1.0, %v11981_v52  ;;  %v15800_v31 = vld [vmem:[#allocation88_spill] sm:$0xff] }
 0xbbb   :  { %v15808_v52 = vld [vmem:[#allocation96_spill] sm:$0xff] }
 0xbbc   :  { %11984 = vrcp.f32 %v5017_v44  ;;  %v15813_v44 = vld [vmem:[#allocation101_spill] sm:$0xff] }
 0xbbd   :  { %10154 = vmatpush1.bf16.msra.mxu0 %v15792_v55  ;;  %10186 = vmatpush1.bf16.msra.mxu1 %v15793_v46  ;;  %v15801_v55 = vld [vmem:[#allocation89_spill] sm:$0xff]  ;;  %v15802_v46 = vld [vmem:[#allocation90_spill] sm:$0xff] }
 0xbbe   :  { %10156 = vmatprep.subr.bf16.mxu0 %v15794_v14  ;;  %10188 = vmatprep.subr.bf16.mxu1 %v15795_v62  ;;  %v15803_v14 = vld [vmem:[#allocation91_spill] sm:$0xff]  ;;  %v15804_v62 = vld [vmem:[#allocation92_spill] sm:$0xff] }
 0xbc1   :  { %10158 = vmatpush1.bf16.msra.mxu0 %v15796_v0  ;;  %10190 = vmatpush1.bf16.msra.mxu1 %v15797_v56  ;;  %v15805_v0 = vld [vmem:[#allocation93_spill] sm:$0xff]  ;;  %v15806_v56 = vld [vmem:[#allocation94_spill] sm:$0xff] }
 0xbc2   :  { %10160 = vmatprep.subr.bf16.mxu0 %v15798_v10  ;;  %10192 = vmatprep.subr.bf16.mxu1 %v15799_v23  ;;  %v15807_v10 = vld [vmem:[#allocation95_spill] sm:$0xff]  ;;  %v15809_v23 = vld [vmem:[#allocation97_spill] sm:$0xff] }
 0xbc5   :  { %10162 = vmatpush1.bf16.msra.mxu0 %v15800_v31  ;;  %10194 = vmatpush1.bf16.msra.mxu1 %v15801_v55  ;;  %v15810_v31 = vld [vmem:[#allocation98_spill] sm:$0xff]  ;;  %v15811_v55 = vld [vmem:[#allocation99_spill] sm:$0xff] }
 0xbc6   :  { %10164 = vmatprep.subr.bf16.mxu0 %v15802_v46  ;;  %10196 = vmatprep.subr.bf16.mxu1 %v15803_v14  ;;  %v11983_v46 = vpop.eup %11982  ;;  %v15812_v14 = vld [vmem:[#allocation100_spill] sm:$0xff] }
 0xbc7   :  { %v11985_v26 = vpop.eup %11984 }
 0xbc9   :  { %10166 = vmatpush1.bf16.msra.mxu0 %v15804_v62  ;;  %10198 = vmatpush1.bf16.msra.mxu1 %v15805_v0  ;;  %v14270_v62 = vmul.f32 %v11985_v26, %v11983_v46  ;;  %v15815_v0 = vld [vmem:[#allocation102_spill] sm:$0xff]  ;;  %v15821_v26 = vld [vmem:[#allocation108_spill] sm:$0xff]  ;;  %v15822_v46 = vld [vmem:[#allocation109_spill] sm:$0xff] }
 0xbca   :  { %10168 = vmatprep.subr.bf16.mxu0 %v15806_v56  ;;  %10200 = vmatprep.subr.bf16.mxu1 %v15807_v10  ;;  %v15816_v56 = vld [vmem:[#allocation103_spill] sm:$0xff] }
 0xbcb   :  { %15814 = vst [vmem:[#allocation78_spill] sm:$0xff] %v14270_v62 }
 0xbcd   :  { %10170 = vmatpush1.bf16.msra.mxu0 %v15808_v52  ;;  %10202 = vmatpush1.bf16.msra.mxu1 %v15809_v23  ;;  %v15817_v23 = vld [vmem:[#allocation104_spill] sm:$0xff]  ;;  %v15820_v52 = vld [vmem:[#allocation107_spill] sm:$0xff] }
 0xbce   :  { %10172 = vmatprep.subr.bf16.mxu0 %v15810_v31  ;;  %10204 = vmatprep.subr.bf16.mxu1 %v15811_v55  ;;  %v15818_v31 = vld [vmem:[#allocation105_spill] sm:$0xff]  ;;  %v15819_v55 = vld [vmem:[#allocation106_spill] sm:$0xff] }
 0xbd1   :  { %10174 = vmatpush1.bf16.msra.mxu0 %v15812_v14  ;;  %10206 = vmatpush1.bf16.msra.mxu1 %v15813_v44  ;;  %v15830_v44 = vld [vmem:[#allocation117_spill] sm:$0xff]  ;;  %v15831_v14 = vld [vmem:[#allocation118_spill] sm:$0xff] }
 0xbd2   :  { %10208 = vmatprep.subr.bf16.mxu0 %v15815_v0  ;;  %10240 = vmatprep.subr.bf16.mxu1 %v15816_v56  ;;  %v15823_v56 = vld [vmem:[#allocation110_spill] sm:$0xff]  ;;  %v15824_v0 = vld [vmem:[#allocation111_spill] sm:$0xff] }
 0xbd4   :  { %5407 = vmatmul.mubr.f32.vlgmr.msra.gmra.mrb[50].mxu0 %v14270_v62  ;;  %5478 = vmatmul.mubr.f32.vlgmr.msra.gmra.mrb[58].mxu1 %v14270_v62  ;;  %v15825_v62 = vld [vmem:[#allocation112_spill] sm:$0xff] }
 0xbd5   :  { %10210 = vmatpush1.bf16.msra.mxu0 %v15817_v23  ;;  %10242 = vmatpush1.bf16.msra.mxu1 %v15818_v31  ;;  %v15826_v23 = vld [vmem:[#allocation113_spill] sm:$0xff]  ;;  %v15827_v31 = vld [vmem:[#allocation114_spill] sm:$0xff] }
 0xbd6   :  { %10212 = vmatprep.subr.bf16.mxu0 %v15819_v55  ;;  %10244 = vmatprep.subr.bf16.mxu1 %v15820_v52  ;;  %v15828_v55 = vld [vmem:[#allocation115_spill] sm:$0xff]  ;;  %v15829_v52 = vld [vmem:[#allocation116_spill] sm:$0xff] }
 0xbd7   :  { %5581 = vmatprep.mubr.f32.mxu0 %v15463_v40  ;;  %5652 = vmatprep.mubr.f32.mxu1 %v15463_v40 }
 0xbd9   :  { %10214 = vmatpush1.bf16.msra.mxu0 %v15821_v26  ;;  %10246 = vmatpush1.bf16.msra.mxu1 %v15822_v46  ;;  %v15832_v26 = vld [vmem:[#allocation119_spill] sm:$0xff]  ;;  %v15833_v46 = vld [vmem:[#allocation120_spill] sm:$0xff] }
 0xbda   :  { %10216 = vmatprep.subr.bf16.mxu0 %v15823_v56  ;;  %10248 = vmatprep.subr.bf16.mxu1 %v15824_v0  ;;  %v15834_v56 = vld [vmem:[#allocation121_spill] sm:$0xff] }
 0xbdd   :  { %10218 = vmatpush1.bf16.msra.mxu0 %v15825_v62  ;;  %10250 = vmatpush1.bf16.msra.mxu1 %v15826_v23 }
 0xbde   :  { %10220 = vmatprep.subr.bf16.mxu0 %v15827_v31  ;;  %10252 = vmatprep.subr.bf16.mxu1 %v15828_v55 }
 0xbe1   :  { %10222 = vmatpush1.bf16.msra.mxu0 %v15829_v52  ;;  %10254 = vmatpush1.bf16.msra.mxu1 %v15830_v44 }
 0xbe2   :  { %10224 = vmatprep.subr.bf16.mxu0 %v15831_v14  ;;  %10256 = vmatprep.subr.bf16.mxu1 %v15832_v26 }
 0xbe5   :  { %10226 = vmatpush1.bf16.msra.mxu0 %v15833_v46  ;;  %10258 = vmatpush1.bf16.msra.mxu1 %v15834_v56 }
 0xbe6   :  { %10228 = vmatprep.subr.bf16.mxu0 %v14128_v9  ;;  %10260 = vmatprep.subr.bf16.mxu1 %v14130_v51 }
 0xbe9   :  { %10230 = vmatpush1.bf16.msra.mxu0 %v14134_v43  ;;  %10262 = vmatpush1.bf16.msra.mxu1 %v14136_v20 }
 0xbea   :  { %10232 = vmatprep.subr.bf16.mxu0 %v14140_v17  ;;  %10264 = vmatprep.subr.bf16.mxu1 %v14142_v45 }
 0xbed   :  { %10234 = vmatpush1.bf16.msra.mxu0 %v14146_v3  ;;  %10266 = vmatpush1.bf16.msra.mxu1 %v14148_v60 }
 0xbee   :  { %10236 = vmatprep.subr.bf16.mxu0 %v14152_v41  ;;  %10268 = vmatprep.subr.bf16.mxu1 %v14154_v54 }
 0xbf1   :  { %10238 = vmatpush1.bf16.msra.mxu0 %v14158_v7  ;;  %10270 = vmatpush1.bf16.msra.mxu1 %v14160_v15 }
 0xbf2   :  { %10272 = vmatprep.subr.bf16.mxu0 %v13849_v50  ;;  %10304 = vmatprep.subr.bf16.mxu1 %v13851_v58 }
 0xbf4   :  { %5582 = vmatmul.mubr.f32.vlgmr.msra.gmra.mrb[36].mxu0 %v14233_v53  ;;  %5653 = vmatmul.mubr.f32.vlgmr.msra.gmra.mrb[44].mxu1 %v14233_v53  ;;  %v15835_v53 = vld [vmem:[#allocation72_spill] sm:$0xff] }
 0xbf5   :  { %10274 = vmatpush1.bf16.msra.mxu0 %v13853_v37  ;;  %10306 = vmatpush1.bf16.msra.mxu1 %v13856_v30 }
 0xbf6   :  { %10276 = vmatprep.subr.bf16.mxu0 %v13861_v28  ;;  %10308 = vmatprep.subr.bf16.mxu1 %v13863_v33 }
 0xbf7   :  { %5751 = vmatprep.mubr.f32.mxu0 %v15463_v40  ;;  %5822 = vmatprep.mubr.f32.mxu1 %v15463_v40 }
 0xbf9   :  { %10278 = vmatpush1.bf16.msra.mxu0 %v13865_v63  ;;  %10310 = vmatpush1.bf16.msra.mxu1 %v13868_v24 }
 0xbfa   :  { %10280 = vmatprep.subr.bf16.mxu0 %v13873_v13  ;;  %10312 = vmatprep.subr.bf16.mxu1 %v13875_v19 }
 0xbfd   :  { %10282 = vmatpush1.bf16.msra.mxu0 %v13877_v8  ;;  %10314 = vmatpush1.bf16.msra.mxu1 %v13880_v2 }
 0xbfe   :  { %10284 = vmatprep.subr.bf16.mxu0 %v13885_v34  ;;  %10316 = vmatprep.subr.bf16.mxu1 %v13887_v49 }
 0xc01   :  { %10286 = vmatpush1.bf16.msra.mxu0 %v13889_v5  ;;  %10318 = vmatpush1.bf16.msra.mxu1 %v13892_v57 }
 0xc02   :  { %10288 = vmatprep.subr.bf16.mxu0 %v13897_v12  ;;  %10320 = vmatprep.subr.bf16.mxu1 %v13899_v22  ;;  %v15841_v12 = vld [vmem:[#allocation135_spill] sm:$0xff] }
 0xc05   :  { %10290 = vmatpush1.bf16.msra.mxu0 %v13901_v6  ;;  %10322 = vmatpush1.bf16.msra.mxu1 %v13904_v61  ;;  %v15836_v61 = vld [vmem:[#allocation65_spill] sm:$0xff]  ;;  %v15840_v6 = vld [vmem:[#allocation134_spill] sm:$0xff] }
 0xc06   :  { %10292 = vmatprep.subr.bf16.mxu0 %v13909_v48  ;;  %10324 = vmatprep.subr.bf16.mxu1 %v13911_v27  ;;  %v15837_v48 = vld [vmem:[#allocation66_spill] sm:$0xff]  ;;  %v15838_v27 = vld [vmem:[#allocation67_spill] sm:$0xff] }
 0xc09   :  { %10294 = vmatpush1.bf16.msra.mxu0 %v13913_v21  ;;  %10326 = vmatpush1.bf16.msra.mxu1 %v13916_v38  ;;  %v15839_v21 = vld [vmem:[#allocation68_spill] sm:$0xff] }
 0xc0a   :  { %10296 = vmatprep.subr.bf16.mxu0 %v13920_v29  ;;  %10328 = vmatprep.subr.bf16.mxu1 %v13922_v39 }
 0xc0d   :  { %10298 = vmatpush1.bf16.msra.mxu0 %v13925_v59  ;;  %10330 = vmatpush1.bf16.msra.mxu1 %v13929_v35 }
 0xc0e   :  { %10300 = vmatprep.subr.bf16.mxu0 %v13931_v16  ;;  %10332 = vmatprep.subr.bf16.mxu1 %v15835_v53  ;;  %v15842_v53 = vld [vmem:[#allocation136_spill] sm:$0xff] }
 0xc11   :  { %10302 = vmatpush1.bf16.msra.mxu0 %v15836_v61  ;;  %10334 = vmatpush1.bf16.msra.mxu1 %v15837_v48 }
 0xc12   :  { %10336 = vmatprep.subr.bf16.mxu0 %v15838_v27  ;;  %10368 = vmatprep.subr.bf16.mxu1 %v15839_v21 }
 0xca7   :  { %v5408_v38 = vpop.f32.mrb[50].mxu0  ;;  %v5479_v29 = vpop.f32.mrb[58].mxu1 }
 0xca8   :  { %v11489_v39 = vadd.f32 %v5408_v38, %v15840_v6  ;;  %v5410_v22 = vpop.f32.mrb[51].mxu0  ;;  %v5481_v59 = vpop.f32.mrb[59].mxu1  ;;  %v11491_v61 = vadd.f32 %v5479_v29, %v15842_v53 }
 0xca9   :  { %v11490_v35 = vadd.f32 %v5410_v22, %v15841_v12  ;;  %v15844_v12 = vld [vmem:[#allocation79_spill] sm:$0xff] }
 0xcaa   :  { %v8643_v57 = vmul.f32 -1.442695, %v11489_v39 }
 0xcab   :  { %v8644_v16 = vmul.f32 -1.442695, %v11490_v35  ;;  %v15843_v35 = vld [vmem:[#allocation62_spill] sm:$0xff] }
 0xcac   :  { %11986 = vpow2.f32 %v8643_v57 }
 0xcad   :  { %11988 = vpow2.f32 %v8644_v16 }
 0xcae   :  { %11990 = vtanh.f32 %v11491_v61 }
 0xcb6   :  { %v11987_v5 = vpop.eup %11986 }
 0xcb7   :  { %v11989_v48 = vpop.eup %11988  ;;  %v5491_v49 = vadd.f32 1.0, %v11987_v5 }
 0xcb8   :  { %v5497_v27 = vadd.f32 1.0, %v11989_v48  ;;  %v11991_v21 = vpop.eup %11990 }
 0xcb9   :  { %11992 = vrcp.f32 %v5491_v49 }
 0xcba   :  { %11994 = vrcp.f32 %v5497_v27 }
 0xcc3   :  { %v11993_v34 = vpop.eup %11992 }
 0xcc4   :  { %v11995_v38 = vpop.eup %11994  ;;  %v5508_v6 = vmul.f32 %v11993_v34, %v11991_v21 }
 0xcc5   :  { %v5507_v2 = vmul.f32 %v11995_v38, %v14219_v4 }
 0xcc7   :  { %v14350_v22 = vadd.f32 %v5508_v6, %v5507_v2  ;;  %v5583_v39 = vpop.f32.mrb[36].mxu0  ;;  %v5654_v57 = vpop.f32.mrb[44].mxu1 }
 0xcc8   :  { %v11459_v16 = vadd.f32 %v5583_v39, %v15843_v35  ;;  %v5585_v29 = vpop.f32.mrb[37].mxu0  ;;  %v5656_v53 = vpop.f32.mrb[45].mxu1  ;;  %v11473_v34 = vadd.f32 %v5654_v57, %v15780_v42  ;;  %v11492_v57 = vadd.f32 %v5481_v59, %v14230_v1  ;;  %v15845_v59 = vld [vmem:[#allocation61_spill] sm:$0xff] }
 0xcc9   :  { %v11460_v5 = vadd.f32 %v5585_v29, %v15844_v12  ;;  %v11474_v49 = vadd.f32 %v5656_v53, %v13960_v36 }
 0xcca   :  { %v8646_v61 = vmul.f32 -1.442695, %v11459_v16 }
 0xccb   :  { %v8647_v48 = vmul.f32 -1.442695, %v11460_v5  ;;  %v8648_v27 = vmul.f32 -1.442695, %v11474_v49 }
 0xccc   :  { %11996 = vpow2.f32 %v8646_v61 }
 0xccd   :  { %11998 = vpow2.f32 %v8647_v48 }
 0xcce   :  { %12000 = vpow2.f32 %v8648_v27 }
 0xccf   :  { %12002 = vtanh.f32 %v11473_v34  ;;  %v8645_v34 = vmul.f32 -1.442695, %v11492_v57  ;;  %v15856_v57 = vld [vmem:[#allocation87_spill] sm:$0xff] }
 0xcd6   :  { %v11997_v21 = vpop.eup %11996 }
 0xcd7   :  { %v11999_v2 = vpop.eup %11998  ;;  %v5666_v6 = vadd.f32 1.0, %v11997_v21 }
 0xcd8   :  { %v5672_v4 = vadd.f32 1.0, %v11999_v2  ;;  %v12001_v38 = vpop.eup %12000  ;;  %v15847_v2 = vld [vmem:[#allocation69_spill] sm:$0xff] }
 0xcd9   :  { %12004 = vrcp.f32 %v5666_v6  ;;  %v12003_v39 = vpop.eup %12002  ;;  %v5679_v61 = vadd.f32 1.0, %v12001_v38  ;;  %v15848_v6 = vld [vmem:[#allocation73_spill] sm:$0xff] }
 0xcda   :  { %12006 = vrcp.f32 %v5672_v4  ;;  %v15849_v4 = vld [vmem:[#allocation80_spill] sm:$0xff]  ;;  %v15850_v38 = vld [vmem:[#allocation81_spill] sm:$0xff] }
 0xcdb   :  { %12008 = vrcp.f32 %v5679_v61  ;;  %v15854_v61 = vld [vmem:[#allocation85_spill] sm:$0xff] }
 0xce3   :  { %v12005_v29 = vpop.eup %12004 }
 0xce4   :  { %v12007_v16 = vpop.eup %12006  ;;  %v5683_v5 = vmul.f32 %v12005_v29, %v12003_v39  ;;  %v15851_v39 = vld [vmem:[#allocation82_spill] sm:$0xff]  ;;  %v15852_v29 = vld [vmem:[#allocation83_spill] sm:$0xff] }
 0xce5   :  { %v5682_v48 = vmul.f32 %v12007_v16, %v14226_v18  ;;  %v12009_v49 = vpop.eup %12008  ;;  %v15846_v18 = vld [vmem:[#allocation70_spill] sm:$0xff] }
 0xce7   :  { %v14357_v53 = vadd.f32 %v5683_v5, %v5682_v48  ;;  %v15853_v5 = vld [vmem:[#allocation84_spill] sm:$0xff]  ;;  %v15855_v48 = vld [vmem:[#allocation86_spill] sm:$0xff] }
 0xce9   :  { %12010 = vtanh.f32 %v14357_v53 }
 0xcea   :  { %12012 = vpow2.f32 %v8645_v34  ;;  %v15858_v34 = vld [vmem:[#allocation89_spill] sm:$0xff] }
 0xceb   :  { %12014 = vtanh.f32 %v14350_v22 }
 0xcf3   :  { %v12011_v27 = vpop.eup %12010 }
 0xcf4   :  { %v14361_v21 = vmul.f32 %v12011_v27, %v12009_v49  ;;  %v12013_v16 = vpop.eup %12012  ;;  %v15857_v27 = vld [vmem:[#allocation88_spill] sm:$0xff] }
 0xcf5   :  { %v5504_v49 = vadd.f32 1.0, %v12013_v16  ;;  %v15864_v16 = vld [vmem:[#allocation96_spill] sm:$0xff] }
 0xcf6   :  { %5752 = vmatmul.mubr.f32.vlgmr.msra.gmra.mrb[52].mxu0 %v14361_v21  ;;  %5823 = vmatmul.mubr.f32.vlgmr.msra.gmra.mrb[60].mxu1 %v14361_v21 }
 0xcf7   :  { %10338 = vmatpush1.bf16.msra.mxu0 %v15784_v32  ;;  %10370 = vmatpush1.bf16.msra.mxu1 %v15785_v11  ;;  %12016 = vrcp.f32 %v5504_v49  ;;  %v15869_v49 = vld [vmem:[#allocation101_spill] sm:$0xff] }
 0xcf8   :  { %10340 = vmatprep.subr.bf16.mxu0 %v15786_v47  ;;  %10372 = vmatprep.subr.bf16.mxu1 %v15787_v25 }
 0xcf9   :  { %5893 = vmatprep.mubr.f32.mxu0 %v15463_v40  ;;  %5964 = vmatprep.mubr.f32.mxu1 %v15463_v40 }
 0xcfb   :  { %10342 = vmatpush1.bf16.msra.mxu0 %v15845_v59  ;;  %10374 = vmatpush1.bf16.msra.mxu1 %v15846_v18 }
 0xcfc   :  { %10344 = vmatprep.subr.bf16.mxu0 %v15847_v2  ;;  %10376 = vmatprep.subr.bf16.mxu1 %v15848_v6 }
 0xcff   :  { %10346 = vmatpush1.bf16.msra.mxu0 %v15849_v4  ;;  %10378 = vmatpush1.bf16.msra.mxu1 %v15850_v38  ;;  %v15859_v38 = vld [vmem:[#allocation90_spill] sm:$0xff] }
 0xd00   :  { %10348 = vmatprep.subr.bf16.mxu0 %v15851_v39  ;;  %10380 = vmatprep.subr.bf16.mxu1 %v15852_v29  ;;  %v15860_v39 = vld [vmem:[#allocation91_spill] sm:$0xff]  ;;  %v15861_v29 = vld [vmem:[#allocation92_spill] sm:$0xff] }
 0xd03   :  { %10350 = vmatpush1.bf16.msra.mxu0 %v15853_v5  ;;  %10382 = vmatpush1.bf16.msra.mxu1 %v15854_v61  ;;  %v15862_v5 = vld [vmem:[#allocation93_spill] sm:$0xff]  ;;  %v15863_v61 = vld [vmem:[#allocation94_spill] sm:$0xff] }
 0xd04   :  { %10352 = vmatprep.subr.bf16.mxu0 %v15855_v48  ;;  %10384 = vmatprep.subr.bf16.mxu1 %v15856_v57  ;;  %v15867_v57 = vld [vmem:[#allocation99_spill] sm:$0xff] }
 0xd07   :  { %10354 = vmatpush1.bf16.msra.mxu0 %v15857_v27  ;;  %10386 = vmatpush1.bf16.msra.mxu1 %v15858_v34  ;;  %v15865_v27 = vld [vmem:[#allocation97_spill] sm:$0xff]  ;;  %v15866_v34 = vld [vmem:[#allocation98_spill] sm:$0xff] }
 0xd08   :  { %10356 = vmatprep.subr.bf16.mxu0 %v15859_v38  ;;  %10388 = vmatprep.subr.bf16.mxu1 %v15860_v39  ;;  %v12015_v38 = vpop.eup %12014  ;;  %v15868_v39 = vld [vmem:[#allocation100_spill] sm:$0xff] }
 0xd09   :  { %v12017_v48 = vpop.eup %12016 }
 0xd0b   :  { %10358 = vmatpush1.bf16.msra.mxu0 %v15861_v29  ;;  %10390 = vmatpush1.bf16.msra.mxu1 %v15862_v5  ;;  %v14398_v29 = vmul.f32 %v12017_v48, %v12015_v38  ;;  %v15870_v5 = vld [vmem:[#allocation102_spill] sm:$0xff]  ;;  %v15876_v38 = vld [vmem:[#allocation108_spill] sm:$0xff]  ;;  %v15877_v48 = vld [vmem:[#allocation109_spill] sm:$0xff] }
 0xd0c   :  { %10360 = vmatprep.subr.bf16.mxu0 %v15863_v61  ;;  %10392 = vmatprep.subr.bf16.mxu1 %v15807_v10  ;;  %v15871_v61 = vld [vmem:[#allocation103_spill] sm:$0xff] }
 0xd0f   :  { %10362 = vmatpush1.bf16.msra.mxu0 %v15864_v16  ;;  %10394 = vmatpush1.bf16.msra.mxu1 %v15865_v27  ;;  %v15872_v27 = vld [vmem:[#allocation104_spill] sm:$0xff]  ;;  %v15875_v16 = vld [vmem:[#allocation107_spill] sm:$0xff] }
 0xd10   :  { %10364 = vmatprep.subr.bf16.mxu0 %v15866_v34  ;;  %10396 = vmatprep.subr.bf16.mxu1 %v15867_v57  ;;  %v15873_v34 = vld [vmem:[#allocation105_spill] sm:$0xff]  ;;  %v15874_v57 = vld [vmem:[#allocation106_spill] sm:$0xff] }
 0xd13   :  { %10366 = vmatpush1.bf16.msra.mxu0 %v15868_v39  ;;  %10398 = vmatpush1.bf16.msra.mxu1 %v15869_v49 }
 0xd14   :  { %10400 = vmatprep.subr.bf16.mxu0 %v15870_v5  ;;  %10432 = vmatprep.subr.bf16.mxu1 %v15871_v61  ;;  %v15878_v61 = vld [vmem:[#allocation110_spill] sm:$0xff] }
 0xd16   :  { %5894 = vmatmul.mubr.f32.vlgmr.msra.gmra.mrb[52].mxu0 %v14398_v29  ;;  %5965 = vmatmul.mubr.f32.vlgmr.msra.gmra.mrb[60].mxu1 %v14398_v29 }
 0xd17   :  { %10402 = vmatpush1.bf16.msra.mxu0 %v15872_v27  ;;  %10434 = vmatpush1.bf16.msra.mxu1 %v15873_v34 }
 0xd18   :  { %10404 = vmatprep.subr.bf16.mxu0 %v15874_v57  ;;  %10436 = vmatprep.subr.bf16.mxu1 %v15875_v16 }
 0xd19   :  { %6068 = vmatprep.mubr.f32.mxu0 %v15463_v40  ;;  %6139 = vmatprep.mubr.f32.mxu1 %v15463_v40 }
 0xd1b   :  { %10406 = vmatpush1.bf16.msra.mxu0 %v15876_v38  ;;  %10438 = vmatpush1.bf16.msra.mxu1 %v15877_v48 }
 0xd1c   :  { %10408 = vmatprep.subr.bf16.mxu0 %v15878_v61  ;;  %10440 = vmatprep.subr.bf16.mxu1 %v15824_v0 }
 0xd1f   :  { %10410 = vmatpush1.bf16.msra.mxu0 %v15825_v62  ;;  %10442 = vmatpush1.bf16.msra.mxu1 %v15826_v23 }
 0xd20   :  { %10412 = vmatprep.subr.bf16.mxu0 %v15827_v31  ;;  %10444 = vmatprep.subr.bf16.mxu1 %v15828_v55 }
 0xd23   :  { %10414 = vmatpush1.bf16.msra.mxu0 %v15829_v52  ;;  %10446 = vmatpush1.bf16.msra.mxu1 %v15830_v44 }
 0xd24   :  { %10416 = vmatprep.subr.bf16.mxu0 %v15831_v14  ;;  %10448 = vmatprep.subr.bf16.mxu1 %v15832_v26 }
 0xd27   :  { %10418 = vmatpush1.bf16.msra.mxu0 %v15833_v46  ;;  %10450 = vmatpush1.bf16.msra.mxu1 %v15834_v56 }
 0xd28   :  { %10420 = vmatprep.subr.bf16.mxu0 %v14128_v9  ;;  %10452 = vmatprep.subr.bf16.mxu1 %v14130_v51 }
 0xd2b   :  { %10422 = vmatpush1.bf16.msra.mxu0 %v14134_v43  ;;  %10454 = vmatpush1.bf16.msra.mxu1 %v14136_v20 }
 0xd2c   :  { %10424 = vmatprep.subr.bf16.mxu0 %v14140_v17  ;;  %10456 = vmatprep.subr.bf16.mxu1 %v14142_v45 }
 0xd2f   :  { %10426 = vmatpush1.bf16.msra.mxu0 %v14146_v3  ;;  %10458 = vmatpush1.bf16.msra.mxu1 %v14148_v60 }
 0xd30   :  { %10428 = vmatprep.subr.bf16.mxu0 %v14152_v41  ;;  %10460 = vmatprep.subr.bf16.mxu1 %v14154_v54 }
 0xd33   :  { %10430 = vmatpush1.bf16.msra.mxu0 %v14158_v7  ;;  %10462 = vmatpush1.bf16.msra.mxu1 %v14160_v15  ;;  %v15903_v7 = vld [vmem:[#allocation135_spill] sm:$0xff] }
 0xd34   :  { %10464 = vmatprep.subr.bf16.mxu0 %v13849_v50  ;;  %10496 = vmatprep.subr.bf16.mxu1 %v13851_v58  ;;  %v15884_v58 = vld [vmem:[#allocation54_spill] sm:$0xff] }
 0xd35   :  { %v15902_v50 = vld [vmem:[#allocation134_spill] sm:$0xff] }
 0xd36   :  { %6069 = vmatmul.mubr.f32.vlgmr.msra.gmra.mrb[38].mxu0 %v14361_v21  ;;  %6140 = vmatmul.mubr.f32.vlgmr.msra.gmra.mrb[46].mxu1 %v14361_v21  ;;  %v15879_v21 = vld [vmem:[#allocation38_spill] sm:$0xff] }
 0xd37   :  { %10466 = vmatpush1.bf16.msra.mxu0 %v13853_v37  ;;  %10498 = vmatpush1.bf16.msra.mxu1 %v13856_v30  ;;  %v15880_v30 = vld [vmem:[#allocation52_spill] sm:$0xff] }
 0xd38   :  { %10468 = vmatprep.subr.bf16.mxu0 %v13861_v28  ;;  %10500 = vmatprep.subr.bf16.mxu1 %v13863_v33  ;;  %v15881_v28 = vld [vmem:[#allocation39_spill] sm:$0xff]  ;;  %v15882_v33 = vld [vmem:[#allocation53_spill] sm:$0xff]  ;;  %v15883_v37 = vld [vmem:[#allocation40_spill] sm:$0xff] }
 0xd39   :  { %6238 = vmatprep.mubr.f32.mxu0 %v15463_v40  ;;  %6309 = vmatprep.mubr.f32.mxu1 %v15463_v40 }
 0xd3b   :  { %10470 = vmatpush1.bf16.msra.mxu0 %v13865_v63  ;;  %10502 = vmatpush1.bf16.msra.mxu1 %v13868_v24  ;;  %v15885_v63 = vld [vmem:[#allocation41_spill] sm:$0xff]  ;;  %v15886_v24 = vld [vmem:[#allocation55_spill] sm:$0xff] }
 0xd3c   :  { %10472 = vmatprep.subr.bf16.mxu0 %v13873_v13  ;;  %10504 = vmatprep.subr.bf16.mxu1 %v13875_v19  ;;  %v15887_v13 = vld [vmem:[#allocation42_spill] sm:$0xff]  ;;  %v15888_v19 = vld [vmem:[#allocation56_spill] sm:$0xff] }
 0xd3f   :  { %10474 = vmatpush1.bf16.msra.mxu0 %v13877_v8  ;;  %10506 = vmatpush1.bf16.msra.mxu1 %v15879_v21  ;;  %v15889_v8 = vld [vmem:[#allocation43_spill] sm:$0xff]  ;;  %v15890_v21 = vld [vmem:[#allocation57_spill] sm:$0xff] }
 0xd40   :  { %10476 = vmatprep.subr.bf16.mxu0 %v15880_v30  ;;  %10508 = vmatprep.subr.bf16.mxu1 %v15881_v28  ;;  %v15891_v30 = vld [vmem:[#allocation44_spill] sm:$0xff]  ;;  %v15892_v28 = vld [vmem:[#allocation58_spill] sm:$0xff] }
 0xd43   :  { %10478 = vmatpush1.bf16.msra.mxu0 %v15882_v33  ;;  %10510 = vmatpush1.bf16.msra.mxu1 %v15883_v37  ;;  %v15893_v33 = vld [vmem:[#allocation45_spill] sm:$0xff]  ;;  %v15894_v37 = vld [vmem:[#allocation59_spill] sm:$0xff] }
 0xd44   :  { %10480 = vmatprep.subr.bf16.mxu0 %v15884_v58  ;;  %10512 = vmatprep.subr.bf16.mxu1 %v15885_v63  ;;  %v15895_v58 = vld [vmem:[#allocation46_spill] sm:$0xff]  ;;  %v15896_v63 = vld [vmem:[#allocation60_spill] sm:$0xff] }
 0xd47   :  { %10482 = vmatpush1.bf16.msra.mxu0 %v15886_v24  ;;  %10514 = vmatpush1.bf16.msra.mxu1 %v15887_v13  ;;  %v15897_v24 = vld [vmem:[#allocation72_spill] sm:$0xff]  ;;  %v15898_v13 = vld [vmem:[#allocation65_spill] sm:$0xff] }
 0xd48   :  { %10484 = vmatprep.subr.bf16.mxu0 %v15888_v19  ;;  %10516 = vmatprep.subr.bf16.mxu1 %v15889_v8  ;;  %v15899_v19 = vld [vmem:[#allocation66_spill] sm:$0xff]  ;;  %v15900_v8 = vld [vmem:[#allocation67_spill] sm:$0xff] }
 0xd4b   :  { %10486 = vmatpush1.bf16.msra.mxu0 %v15890_v21  ;;  %10518 = vmatpush1.bf16.msra.mxu1 %v15891_v30  ;;  %v15901_v21 = vld [vmem:[#allocation68_spill] sm:$0xff] }
 0xd4c   :  { %10488 = vmatprep.subr.bf16.mxu0 %v15892_v28  ;;  %10520 = vmatprep.subr.bf16.mxu1 %v15893_v33 }
 0xd4f   :  { %10490 = vmatpush1.bf16.msra.mxu0 %v15894_v37  ;;  %10522 = vmatpush1.bf16.msra.mxu1 %v15895_v58 }
 0xd50   :  { %10492 = vmatprep.subr.bf16.mxu0 %v15896_v63  ;;  %10524 = vmatprep.subr.bf16.mxu1 %v15897_v24 }
 0xd53   :  { %10494 = vmatpush1.bf16.msra.mxu0 %v15898_v13  ;;  %10526 = vmatpush1.bf16.msra.mxu1 %v15899_v19  ;;  %v15904_v19 = vld [vmem:[#allocation136_spill] sm:$0xff] }
 0xd54   :  { %10528 = vmatprep.subr.bf16.mxu0 %v15900_v8  ;;  %10560 = vmatprep.subr.bf16.mxu1 %v15901_v21 }
 0xde9   :  { %v5895_v30 = vpop.f32.mrb[52].mxu0  ;;  %v5966_v28 = vpop.f32.mrb[60].mxu1 }
 0xdea   :  { %v11493_v33 = vadd.f32 %v5895_v30, %v15902_v50  ;;  %v5897_v15 = vpop.f32.mrb[53].mxu0  ;;  %v5968_v37 = vpop.f32.mrb[61].mxu1  ;;  %v11495_v41 = vadd.f32 %v5966_v28, %v15904_v19 }
 0xdeb   :  { %v11494_v58 = vadd.f32 %v5897_v15, %v15903_v7  ;;  %v11496_v13 = vadd.f32 %v5968_v37, %v14230_v1 }
 0xdec   :  { %v8649_v54 = vmul.f32 -1.442695, %v11493_v33 }
 0xded   :  { %v8650_v63 = vmul.f32 -1.442695, %v11494_v58  ;;  %v8651_v24 = vmul.f32 -1.442695, %v11496_v13 }
 0xdee   :  { %12018 = vpow2.f32 %v8649_v54 }
 0xdef   :  { %12020 = vpow2.f32 %v8650_v63 }
 0xdf0   :  { %12022 = vpow2.f32 %v8651_v24 }
 0xdf1   :  { %12024 = vtanh.f32 %v11495_v41 }
 0xdf8   :  { %v12019_v8 = vpop.eup %12018 }
 0xdf9   :  { %v12021_v60 = vpop.eup %12020  ;;  %v5978_v21 = vadd.f32 1.0, %v12019_v8 }
 0xdfa   :  { %v5984_v3 = vadd.f32 1.0, %v12021_v60  ;;  %v12023_v30 = vpop.eup %12022 }
 0xdfb   :  { %12026 = vrcp.f32 %v5978_v21  ;;  %v12025_v50 = vpop.eup %12024  ;;  %v5991_v54 = vadd.f32 1.0, %v12023_v30 }
 0xdfc   :  { %12028 = vrcp.f32 %v5984_v3 }
 0xdfd   :  { %12030 = vrcp.f32 %v5991_v54 }
 0xe05   :  { %v12027_v15 = vpop.eup %12026 }
 0xe06   :  { %v12029_v33 = vpop.eup %12028  ;;  %v5995_v58 = vmul.f32 %v12027_v15, %v12025_v50 }
 0xe07   :  { %v5994_v63 = vmul.f32 %v12029_v33, %v14350_v22  ;;  %v12031_v22 = vpop.eup %12030  ;;  %v15905_v33 = vld [vmem:[#allocation78_spill] sm:$0xff] }
 0xe09   :  { %v14479_v37 = vadd.f32 %v5995_v58, %v5994_v63  ;;  %v6070_v13 = vpop.f32.mrb[38].mxu0  ;;  %v6141_v28 = vpop.f32.mrb[46].mxu1  ;;  %v5512_v58 = vadd.f32 %v14398_v29, %v15905_v33  ;;  %v15909_v33 = vld [vmem:[#allocation84_spill] sm:$0xff] }
 0xe0a   :  { %v11461_v8 = vadd.f32 %v6070_v13, %v15843_v35  ;;  %v6072_v24 = vpop.f32.mrb[39].mxu0  ;;  %v6143_v41 = vpop.f32.mrb[47].mxu1  ;;  %v11475_v54 = vadd.f32 %v6141_v28, %v15780_v42 }
 0xe0b   :  { %v11462_v60 = vadd.f32 %v6072_v24, %v15844_v12  ;;  %12032 = vtanh.f32 %v14479_v37  ;;  %v11476_v50 = vadd.f32 %v6143_v41, %v13960_v36 }
 0xe0c   :  { %v8652_v3 = vmul.f32 -1.442695, %v11461_v8 }
 0xe0d   :  { %v8653_v21 = vmul.f32 -1.442695, %v11462_v60  ;;  %v8654_v15 = vmul.f32 -1.442695, %v11476_v50 }
 0xe0e   :  { %12034 = vpow2.f32 %v8652_v3 }
 0xe0f   :  { %12036 = vpow2.f32 %v8653_v21 }
 0xe10   :  { %12038 = vpow2.f32 %v8654_v15 }
 0xe11   :  { %12040 = vtanh.f32 %v11475_v54  ;;  %v15911_v54 = vld [vmem:[#allocation86_spill] sm:$0xff] }
 0xe15   :  { %v12033_v30 = vpop.eup %12032 }
 0xe16   :  { %v5998_v63 = vmul.f32 %v12033_v30, %v12031_v22 }
 0xe18   :  { %v12035_v13 = vpop.eup %12034  ;;  %v14488_v35 = vadd.f32 %v5998_v63, %v5512_v58  ;;  %v15910_v58 = vld [vmem:[#allocation85_spill] sm:$0xff] }
 0xe19   :  { %v12037_v24 = vpop.eup %12036  ;;  %v6153_v12 = vadd.f32 1.0, %v12035_v13  ;;  %v15912_v13 = vld [vmem:[#allocation87_spill] sm:$0xff] }
 0xe1a   :  { %v6159_v8 = vadd.f32 1.0, %v12037_v24  ;;  %v12039_v41 = vpop.eup %12038  ;;  %v15913_v24 = vld [vmem:[#allocation88_spill] sm:$0xff] }
 0xe1b   :  { %12042 = vrcp.f32 %v6153_v12  ;;  %v12041_v60 = vpop.eup %12040  ;;  %v6166_v36 = vadd.f32 1.0, %v12039_v41  ;;  %v15906_v12 = vld [vmem:[#allocation81_spill] sm:$0xff]  ;;  %v15915_v41 = vld [vmem:[#allocation90_spill] sm:$0xff] }
 0xe1c   :  { %12044 = vrcp.f32 %v6159_v8  ;;  %v15914_v8 = vld [vmem:[#allocation89_spill] sm:$0xff] }
 0xe1d   :  { %12046 = vrcp.f32 %v6166_v36  ;;  %v15907_v36 = vld [vmem:[#allocation82_spill] sm:$0xff] }
 0xe25   :  { %v12043_v3 = vpop.eup %12042 }
 0xe26   :  { %v12045_v21 = vpop.eup %12044  ;;  %v6170_v50 = vmul.f32 %v12043_v3, %v12041_v60  ;;  %v15916_v60 = vld [vmem:[#allocation91_spill] sm:$0xff]  ;;  %v15917_v3 = vld [vmem:[#allocation92_spill] sm:$0xff] }
 0xe27   :  { %v6169_v29 = vmul.f32 %v12045_v21, %v14357_v53  ;;  %v12047_v22 = vpop.eup %12046  ;;  %v15908_v53 = vld [vmem:[#allocation83_spill] sm:$0xff]  ;;  %v15918_v21 = vld [vmem:[#allocation93_spill] sm:$0xff] }
 0xe29   :  { %v14491_v28 = vadd.f32 %v6170_v50, %v6169_v29  ;;  %v15919_v50 = vld [vmem:[#allocation94_spill] sm:$0xff]  ;;  %v15920_v29 = vld [vmem:[#allocation96_spill] sm:$0xff] }
 0xe2b   :  { %12048 = vtanh.f32 %v14491_v28 }
 0xe35   :  { %v12049_v30 = vpop.eup %12048 }
 0xe36   :  { %v14494_v15 = vmul.f32 %v12049_v30, %v12047_v22  ;;  %v15921_v22 = vld [vmem:[#allocation97_spill] sm:$0xff]  ;;  %v15922_v30 = vld [vmem:[#allocation98_spill] sm:$0xff] }
 0xe38   :  { %6239 = vmatmul.mubr.f32.vlgmr.msra.gmra.mrb[54].mxu0 %v14494_v15  ;;  %6310 = vmatmul.mubr.f32.vlgmr.msra.gmra.mrb[62].mxu1 %v14494_v15 }
 0xe39   :  { %10530 = vmatpush1.bf16.msra.mxu0 %v15784_v32  ;;  %10562 = vmatpush1.bf16.msra.mxu1 %v15785_v11 }
 0xe3a   :  { %10532 = vmatprep.subr.bf16.mxu0 %v15786_v47  ;;  %10564 = vmatprep.subr.bf16.mxu1 %v15787_v25 }
 0xe3b   :  { %6380 = vmatprep.mubr.f32.mxu0 %v15463_v40  ;;  %6451 = vmatprep.mubr.f32.mxu1 %v15463_v40 }
 0xe3d   :  { %10534 = vmatpush1.bf16.msra.mxu0 %v15845_v59  ;;  %10566 = vmatpush1.bf16.msra.mxu1 %v15846_v18 }
 0xe3e   :  { %10536 = vmatprep.subr.bf16.mxu0 %v15847_v2  ;;  %10568 = vmatprep.subr.bf16.mxu1 %v15848_v6 }
 0xe41   :  { %10538 = vmatpush1.bf16.msra.mxu0 %v15849_v4  ;;  %10570 = vmatpush1.bf16.msra.mxu1 %v15906_v12 }
 0xe42   :  { %10540 = vmatprep.subr.bf16.mxu0 %v15907_v36  ;;  %10572 = vmatprep.subr.bf16.mxu1 %v15908_v53 }
 0xe45   :  { %10542 = vmatpush1.bf16.msra.mxu0 %v15909_v33  ;;  %10574 = vmatpush1.bf16.msra.mxu1 %v15910_v58 }
 0xe46   :  { %10544 = vmatprep.subr.bf16.mxu0 %v15911_v54  ;;  %10576 = vmatprep.subr.bf16.mxu1 %v15912_v13 }
 0xe49   :  { %10546 = vmatpush1.bf16.msra.mxu0 %v15913_v24  ;;  %10578 = vmatpush1.bf16.msra.mxu1 %v15914_v8  ;;  %v15923_v24 = vld [vmem:[#allocation99_spill] sm:$0xff] }
 0xe4a   :  { %10548 = vmatprep.subr.bf16.mxu0 %v15915_v41  ;;  %10580 = vmatprep.subr.bf16.mxu1 %v15916_v60 }
 0xe4d   :  { %10550 = vmatpush1.bf16.msra.mxu0 %v15917_v3  ;;  %10582 = vmatpush1.bf16.msra.mxu1 %v15918_v21  ;;  %v15924_v3 = vld [vmem:[#allocation103_spill] sm:$0xff] }
 0xe4e   :  { %10552 = vmatprep.subr.bf16.mxu0 %v15919_v50  ;;  %10584 = vmatprep.subr.bf16.mxu1 %v15807_v10 }
 0xe51   :  { %10554 = vmatpush1.bf16.msra.mxu0 %v15920_v29  ;;  %10586 = vmatpush1.bf16.msra.mxu1 %v15921_v22 }
 0xe52   :  { %10556 = vmatprep.subr.bf16.mxu0 %v15922_v30  ;;  %10588 = vmatprep.subr.bf16.mxu1 %v15923_v24 }
 0xe55   :  { %10558 = vmatpush1.bf16.msra.mxu0 %v15868_v39  ;;  %10590 = vmatpush1.bf16.msra.mxu1 %v15869_v49 }
 0xe56   :  { %10592 = vmatprep.subr.bf16.mxu0 %v15870_v5  ;;  %10624 = vmatprep.subr.bf16.mxu1 %v15924_v3 }
 0xe58   :  { %6381 = vmatmul.mubr.f32.vlgmr.msra.gmra.mrb[54].mxu0 %v5998_v63  ;;  %6452 = vmatmul.mubr.f32.vlgmr.msra.gmra.mrb[62].mxu1 %v5998_v63  ;;  %v15925_v63 = vld [vmem:[#allocation128_spill] sm:$0xff] }
 0xe59   :  { %10594 = vmatpush1.bf16.msra.mxu0 %v15872_v27  ;;  %10626 = vmatpush1.bf16.msra.mxu1 %v15873_v34 }
 0xe5a   :  { %10596 = vmatprep.subr.bf16.mxu0 %v15874_v57  ;;  %10628 = vmatprep.subr.bf16.mxu1 %v15875_v16 }
 0xe5b   :  { %6555 = vmatprep.mubr.f32.mxu0 %v15463_v40  ;;  %6626 = vmatprep.mubr.f32.mxu1 %v15463_v40 }
 0xe5d   :  { %10598 = vmatpush1.bf16.msra.mxu0 %v15876_v38  ;;  %10630 = vmatpush1.bf16.msra.mxu1 %v15877_v48 }
 0xe5e   :  { %10600 = vmatprep.subr.bf16.mxu0 %v15878_v61  ;;  %10632 = vmatprep.subr.bf16.mxu1 %v15824_v0 }
 0xe61   :  { %10602 = vmatpush1.bf16.msra.mxu0 %v15825_v62  ;;  %10634 = vmatpush1.bf16.msra.mxu1 %v15826_v23 }
 0xe62   :  { %10604 = vmatprep.subr.bf16.mxu0 %v15827_v31  ;;  %10636 = vmatprep.subr.bf16.mxu1 %v15828_v55 }
 0xe65   :  { %10606 = vmatpush1.bf16.msra.mxu0 %v15829_v52  ;;  %10638 = vmatpush1.bf16.msra.mxu1 %v15830_v44 }
 0xe66   :  { %10608 = vmatprep.subr.bf16.mxu0 %v15831_v14  ;;  %10640 = vmatprep.subr.bf16.mxu1 %v15832_v26  ;;  %v15926_v14 = vld [vmem:[#allocation129_spill] sm:$0xff]  ;;  %v15927_v26 = vld [vmem:[#allocation130_spill] sm:$0xff] }
 0xe69   :  { %10610 = vmatpush1.bf16.msra.mxu0 %v15833_v46  ;;  %10642 = vmatpush1.bf16.msra.mxu1 %v15834_v56  ;;  %v15928_v46 = vld [vmem:[#allocation131_spill] sm:$0xff]  ;;  %v15929_v56 = vld [vmem:[#allocation132_spill] sm:$0xff] }
 0xe6a   :  { %10612 = vmatprep.subr.bf16.mxu0 %v14128_v9  ;;  %10644 = vmatprep.subr.bf16.mxu1 %v14130_v51  ;;  %v15930_v9 = vld [vmem:[#allocation133_spill] sm:$0xff]  ;;  %v15931_v51 = vld [vmem:[#allocation63_spill] sm:$0xff] }
 0xe6d   :  { %10614 = vmatpush1.bf16.msra.mxu0 %v14134_v43  ;;  %10646 = vmatpush1.bf16.msra.mxu1 %v14136_v20  ;;  %v15932_v43 = vld [vmem:[#allocation64_spill] sm:$0xff]  ;;  %v15965_v20 = vld [vmem:[#allocation134_spill] sm:$0xff] }
 0xe6e   :  { %10616 = vmatprep.subr.bf16.mxu0 %v14140_v17  ;;  %10648 = vmatprep.subr.bf16.mxu1 %v14142_v45  ;;  %v15933_v45 = vld [vmem:[#allocation47_spill] sm:$0xff]  ;;  %v15947_v17 = vld [vmem:[#allocation54_spill] sm:$0xff] }
 0xe71   :  { %10618 = vmatpush1.bf16.msra.mxu0 %v15925_v63  ;;  %10650 = vmatpush1.bf16.msra.mxu1 %v15926_v14  ;;  %v15934_v63 = vld [vmem:[#allocation34_spill] sm:$0xff]  ;;  %v15935_v14 = vld [vmem:[#allocation48_spill] sm:$0xff] }
 0xe72   :  { %10620 = vmatprep.subr.bf16.mxu0 %v15927_v26  ;;  %10652 = vmatprep.subr.bf16.mxu1 %v15928_v46  ;;  %v15936_v26 = vld [vmem:[#allocation35_spill] sm:$0xff]  ;;  %v15946_v46 = vld [vmem:[#allocation40_spill] sm:$0xff] }
 0xe75   :  { %10622 = vmatpush1.bf16.msra.mxu0 %v15929_v56  ;;  %10654 = vmatpush1.bf16.msra.mxu1 %v15930_v9  ;;  %v15937_v9 = vld [vmem:[#allocation49_spill] sm:$0xff] }
 0xe76   :  { %10656 = vmatprep.subr.bf16.mxu0 %v15931_v51  ;;  %10688 = vmatprep.subr.bf16.mxu1 %v15932_v43  ;;  %v15938_v51 = vld [vmem:[#allocation36_spill] sm:$0xff]  ;;  %v15939_v43 = vld [vmem:[#allocation50_spill] sm:$0xff]  ;;  %v15940_v56 = vld [vmem:[#allocation37_spill] sm:$0xff] }
 0xe78   :  { %6556 = vmatmul.mubr.f32.vlgmr.msra.gmra.mrb[40].mxu0 %v14494_v15  ;;  %6627 = vmatmul.mubr.f32.vlgmr.msra.gmra.mrb[48].mxu1 %v14494_v15  ;;  %v15941_v15 = vld [vmem:[#allocation51_spill] sm:$0xff] }
 0xe79   :  { %10658 = vmatpush1.bf16.msra.mxu0 %v15933_v45  ;;  %10690 = vmatpush1.bf16.msra.mxu1 %v15934_v63  ;;  %v15942_v45 = vld [vmem:[#allocation38_spill] sm:$0xff]  ;;  %v15943_v63 = vld [vmem:[#allocation52_spill] sm:$0xff] }
 0xe7a   :  { %10660 = vmatprep.subr.bf16.mxu0 %v15935_v14  ;;  %10692 = vmatprep.subr.bf16.mxu1 %v15936_v26  ;;  %v15944_v14 = vld [vmem:[#allocation39_spill] sm:$0xff]  ;;  %v15945_v26 = vld [vmem:[#allocation53_spill] sm:$0xff] }
 0xe7b   :  { %6725 = vmatprep.mubr.f32.mxu0 %v15463_v40  ;;  %6796 = vmatprep.mubr.f32.mxu1 %v15463_v40 }
 0xe7d   :  { %10662 = vmatpush1.bf16.msra.mxu0 %v15937_v9  ;;  %10694 = vmatpush1.bf16.msra.mxu1 %v15938_v51  ;;  %v15948_v9 = vld [vmem:[#allocation41_spill] sm:$0xff]  ;;  %v15949_v51 = vld [vmem:[#allocation55_spill] sm:$0xff] }
 0xe7e   :  { %10664 = vmatprep.subr.bf16.mxu0 %v15939_v43  ;;  %10696 = vmatprep.subr.bf16.mxu1 %v15940_v56  ;;  %v15950_v43 = vld [vmem:[#allocation42_spill] sm:$0xff]  ;;  %v15951_v56 = vld [vmem:[#allocation56_spill] sm:$0xff] }
 0xe81   :  { %10666 = vmatpush1.bf16.msra.mxu0 %v15941_v15  ;;  %10698 = vmatpush1.bf16.msra.mxu1 %v15942_v45  ;;  %v15952_v15 = vld [vmem:[#allocation43_spill] sm:$0xff]  ;;  %v15953_v45 = vld [vmem:[#allocation57_spill] sm:$0xff] }
 0xe82   :  { %10668 = vmatprep.subr.bf16.mxu0 %v15943_v63  ;;  %10700 = vmatprep.subr.bf16.mxu1 %v15944_v14  ;;  %v15954_v63 = vld [vmem:[#allocation44_spill] sm:$0xff]  ;;  %v15955_v14 = vld [vmem:[#allocation58_spill] sm:$0xff] }
 0xe85   :  { %10670 = vmatpush1.bf16.msra.mxu0 %v15945_v26  ;;  %10702 = vmatpush1.bf16.msra.mxu1 %v15946_v46  ;;  %v15956_v26 = vld [vmem:[#allocation45_spill] sm:$0xff]  ;;  %v15957_v46 = vld [vmem:[#allocation59_spill] sm:$0xff] }
 0xe86   :  { %10672 = vmatprep.subr.bf16.mxu0 %v15947_v17  ;;  %10704 = vmatprep.subr.bf16.mxu1 %v15948_v9  ;;  %v15958_v17 = vld [vmem:[#allocation46_spill] sm:$0xff]  ;;  %v15959_v9 = vld [vmem:[#allocation60_spill] sm:$0xff] }
 0xe89   :  { %10674 = vmatpush1.bf16.msra.mxu0 %v15949_v51  ;;  %10706 = vmatpush1.bf16.msra.mxu1 %v15950_v43  ;;  %v15960_v51 = vld [vmem:[#allocation72_spill] sm:$0xff]  ;;  %v15961_v43 = vld [vmem:[#allocation65_spill] sm:$0xff] }
 0xe8a   :  { %10676 = vmatprep.subr.bf16.mxu0 %v15951_v56  ;;  %10708 = vmatprep.subr.bf16.mxu1 %v15952_v15  ;;  %v15962_v56 = vld [vmem:[#allocation66_spill] sm:$0xff]  ;;  %v15963_v15 = vld [vmem:[#allocation67_spill] sm:$0xff] }
 0xe8d   :  { %10678 = vmatpush1.bf16.msra.mxu0 %v15953_v45  ;;  %10710 = vmatpush1.bf16.msra.mxu1 %v15954_v63  ;;  %v15964_v45 = vld [vmem:[#allocation68_spill] sm:$0xff] }
 0xe8e   :  { %10680 = vmatprep.subr.bf16.mxu0 %v15955_v14  ;;  %10712 = vmatprep.subr.bf16.mxu1 %v15956_v26 }
 0xe91   :  { %10682 = vmatpush1.bf16.msra.mxu0 %v15957_v46  ;;  %10714 = vmatpush1.bf16.msra.mxu1 %v15958_v17 }
 0xe92   :  { %10684 = vmatprep.subr.bf16.mxu0 %v15959_v9  ;;  %10716 = vmatprep.subr.bf16.mxu1 %v15960_v51 }
 0xe95   :  { %10686 = vmatpush1.bf16.msra.mxu0 %v15961_v43  ;;  %10718 = vmatpush1.bf16.msra.mxu1 %v15962_v56 }
 0xe96   :  { %10720 = vmatprep.subr.bf16.mxu0 %v15963_v15  ;;  %10752 = vmatprep.subr.bf16.mxu1 %v15964_v45 }
 0xf2b   :  { %v6382_v63 = vpop.f32.mrb[54].mxu0  ;;  %v6453_v14 = vpop.f32.mrb[62].mxu1 }
 0xf2c   :  { %v11497_v26 = vadd.f32 %v6382_v63, %v15965_v20  ;;  %v6384_v44 = vpop.f32.mrb[55].mxu0  ;;  %v6455_v46 = vpop.f32.mrb[63].mxu1  ;;  %v11499_v56 = vadd.f32 %v6453_v14, %v15904_v19  ;;  %v15966_v19 = vld [vmem:[#allocation62_spill] sm:$0xff] }
 0xf2d   :  { %v11498_v17 = vadd.f32 %v6384_v44, %v15903_v7  ;;  %v11500_v43 = vadd.f32 %v6455_v46, %v14230_v1 }
 0xf2e   :  { %v8655_v52 = vmul.f32 -1.442695, %v11497_v26 }
 0xf2f   :  { %v8656_v9 = vmul.f32 -1.442695, %v11498_v17  ;;  %v8657_v51 = vmul.f32 -1.442695, %v11500_v43 }
 0xf30   :  { %12050 = vpow2.f32 %v8655_v52 }
 0xf31   :  { %12052 = vpow2.f32 %v8656_v9 }
 0xf32   :  { %12054 = vpow2.f32 %v8657_v51 }
 0xf33   :  { %12056 = vtanh.f32 %v11499_v56 }
 0xf3a   :  { %v12051_v15 = vpop.eup %12050 }
 0xf3b   :  { %v12053_v55 = vpop.eup %12052  ;;  %v6465_v45 = vadd.f32 1.0, %v12051_v15 }
 0xf3c   :  { %v6471_v31 = vadd.f32 1.0, %v12053_v55  ;;  %v12055_v63 = vpop.eup %12054  ;;  %v15967_v55 = vld [vmem:[#allocation79_spill] sm:$0xff] }
 0xf3d   :  { %12058 = vrcp.f32 %v6465_v45  ;;  %v12057_v20 = vpop.eup %12056  ;;  %v6478_v52 = vadd.f32 1.0, %v12055_v63 }
 0xf3e   :  { %12060 = vrcp.f32 %v6471_v31 }
 0xf3f   :  { %12062 = vrcp.f32 %v6478_v52 }
 0xf47   :  { %v12059_v44 = vpop.eup %12058 }
 0xf48   :  { %v12061_v26 = vpop.eup %12060  ;;  %v6482_v17 = vmul.f32 %v12059_v44, %v12057_v20  ;;  %v15968_v20 = vld [vmem:[#allocation76_spill] sm:$0xff] }
 0xf49   :  { %v6481_v9 = vmul.f32 %v12061_v26, %v14479_v37  ;;  %v12063_v37 = vpop.eup %12062 }
 0xf4b   :  { %v14607_v46 = vadd.f32 %v6482_v17, %v6481_v9  ;;  %v6557_v43 = vpop.f32.mrb[40].mxu0  ;;  %v6628_v14 = vpop.f32.mrb[48].mxu1 }
 0xf4c   :  { %v11463_v15 = vadd.f32 %v6557_v43, %v15966_v19  ;;  %v6559_v51 = vpop.f32.mrb[41].mxu0  ;;  %v6630_v56 = vpop.f32.mrb[49].mxu1  ;;  %v11477_v17 = vadd.f32 %v6628_v14, %v15780_v42 }
 0xf4d   :  { %v11464_v45 = vadd.f32 %v6559_v51, %v15967_v55  ;;  %12064 = vtanh.f32 %v14607_v46  ;;  %v11478_v63 = vadd.f32 %v6630_v56, %v15968_v20 }
 0xf4e   :  { %v8658_v31 = vmul.f32 -1.442695, %v11463_v15 }
 0xf4f   :  { %v8659_v1 = vmul.f32 -1.442695, %v11464_v45  ;;  %v8660_v26 = vmul.f32 -1.442695, %v11478_v63 }
 0xf50   :  { %12066 = vpow2.f32 %v8658_v31 }
 0xf51   :  { %12068 = vpow2.f32 %v8659_v1 }
 0xf52   :  { %12070 = vpow2.f32 %v8660_v26 }
 0xf53   :  { %12072 = vtanh.f32 %v11477_v17  ;;  %v15972_v17 = vld [vmem:[#allocation115_spill] sm:$0xff] }
 0xf57   :  { %v12065_v44 = vpop.eup %12064 }
 0xf58   :  { %v6485_v52 = vmul.f32 %v12065_v44, %v12063_v37 }
 0xf5a   :  { %v12067_v9 = vpop.eup %12066  ;;  %v14615_v43 = vadd.f32 %v6485_v52, %v14488_v35 }
 0xf5b   :  { %v12069_v19 = vpop.eup %12068  ;;  %v6640_v51 = vadd.f32 1.0, %v12067_v9  ;;  %v15974_v9 = vld [vmem:[#allocation117_spill] sm:$0xff] }
 0xf5c   :  { %v6646_v15 = vadd.f32 1.0, %v12069_v19  ;;  %v12071_v1 = vpop.eup %12070  ;;  %v15969_v19 = vld [vmem:[#allocation88_spill] sm:$0xff] }
 0xf5d   :  { %12074 = vrcp.f32 %v6640_v51  ;;  %v12073_v45 = vpop.eup %12072  ;;  %v6653_v63 = vadd.f32 1.0, %v12071_v1  ;;  %v15975_v51 = vld [vmem:[#allocation118_spill] sm:$0xff]  ;;  %v15977_v1 = vld [vmem:[#allocation120_spill] sm:$0xff] }
 0xf5e   :  { %12076 = vrcp.f32 %v6646_v15  ;;  %v15976_v15 = vld [vmem:[#allocation119_spill] sm:$0xff] }
 0xf5f   :  { %12078 = vrcp.f32 %v6653_v63  ;;  %v15981_v63 = vld [vmem:[#allocation124_spill] sm:$0xff] }
 0xf67   :  { %v12075_v56 = vpop.eup %12074 }
 0xf68   :  { %v12077_v31 = vpop.eup %12076  ;;  %v6657_v20 = vmul.f32 %v12075_v56, %v12073_v45  ;;  %v15978_v45 = vld [vmem:[#allocation121_spill] sm:$0xff]  ;;  %v15979_v56 = vld [vmem:[#allocation122_spill] sm:$0xff] }
 0xf69   :  { %v6656_v14 = vmul.f32 %v12077_v31, %v14491_v28  ;;  %v12079_v35 = vpop.eup %12078  ;;  %v15970_v28 = vld [vmem:[#allocation92_spill] sm:$0xff]  ;;  %v15980_v31 = vld [vmem:[#allocation123_spill] sm:$0xff] }
 0xf6b   :  { %v14618_v37 = vadd.f32 %v6657_v20, %v6656_v14  ;;  %v15971_v20 = vld [vmem:[#allocation114_spill] sm:$0xff]  ;;  %v15982_v14 = vld [vmem:[#allocation125_spill] sm:$0xff] }
 0xf6d   :  { %12080 = vtanh.f32 %v14618_v37 }
 0xf77   :  { %v12081_v44 = vpop.eup %12080 }
 0xf78   :  { %v14621_v26 = vmul.f32 %v12081_v44, %v12079_v35  ;;  %v15983_v35 = vld [vmem:[#allocation126_spill] sm:$0xff]  ;;  %v15984_v44 = vld [vmem:[#allocation127_spill] sm:$0xff] }
 0xf7a   :  { %6726 = vmatmul.mubr.f32.vlgmr.msra.gmra.mrb[56].mxu0 %v14621_v26  ;;  %6797 = vmatmul.mubr.f32.vlgmr.msra.gmra.mrb[64].mxu1 %v14621_v26 }
 0xf7b   :  { %10722 = vmatpush1.bf16.msra.mxu0 %v15784_v32  ;;  %10754 = vmatpush1.bf16.msra.mxu1 %v15785_v11 }
 0xf7c   :  { %10724 = vmatprep.subr.bf16.mxu0 %v15786_v47  ;;  %10756 = vmatprep.subr.bf16.mxu1 %v15787_v25 }
 0xf7d   :  { %6867 = vmatprep.mubr.f32.mxu0 %v15463_v40  ;;  %6938 = vmatprep.mubr.f32.mxu1 %v15463_v40 }
 0xf7f   :  { %10726 = vmatpush1.bf16.msra.mxu0 %v15845_v59  ;;  %10758 = vmatpush1.bf16.msra.mxu1 %v15846_v18 }
 0xf80   :  { %10728 = vmatprep.subr.bf16.mxu0 %v15847_v2  ;;  %10760 = vmatprep.subr.bf16.mxu1 %v15848_v6 }
 0xf83   :  { %10730 = vmatpush1.bf16.msra.mxu0 %v15849_v4  ;;  %10762 = vmatpush1.bf16.msra.mxu1 %v15906_v12 }
 0xf84   :  { %10732 = vmatprep.subr.bf16.mxu0 %v15907_v36  ;;  %10764 = vmatprep.subr.bf16.mxu1 %v15908_v53 }
 0xf87   :  { %10734 = vmatpush1.bf16.msra.mxu0 %v15909_v33  ;;  %10766 = vmatpush1.bf16.msra.mxu1 %v15910_v58 }
 0xf88   :  { %10736 = vmatprep.subr.bf16.mxu0 %v15911_v54  ;;  %10768 = vmatprep.subr.bf16.mxu1 %v15912_v13 }
 0xf8b   :  { %10738 = vmatpush1.bf16.msra.mxu0 %v15969_v19  ;;  %10770 = vmatpush1.bf16.msra.mxu1 %v15914_v8 }
 0xf8c   :  { %10740 = vmatprep.subr.bf16.mxu0 %v15915_v41  ;;  %10772 = vmatprep.subr.bf16.mxu1 %v15916_v60 }
 0xf8f   :  { %10742 = vmatpush1.bf16.msra.mxu0 %v15970_v28  ;;  %10774 = vmatpush1.bf16.msra.mxu1 %v15918_v21 }
 0xf90   :  { %10744 = vmatprep.subr.bf16.mxu0 %v15919_v50  ;;  %10776 = vmatprep.subr.bf16.mxu1 %v15807_v10 }
 0xf93   :  { %10746 = vmatpush1.bf16.msra.mxu0 %v15920_v29  ;;  %10778 = vmatpush1.bf16.msra.mxu1 %v15921_v22 }
 0xf94   :  { %10748 = vmatprep.subr.bf16.mxu0 %v15922_v30  ;;  %10780 = vmatprep.subr.bf16.mxu1 %v15923_v24 }
 0xf97   :  { %10750 = vmatpush1.bf16.msra.mxu0 %v15868_v39  ;;  %10782 = vmatpush1.bf16.msra.mxu1 %v15869_v49 }
 0xf98   :  { %10784 = vmatprep.subr.bf16.mxu0 %v15870_v5  ;;  %10816 = vmatprep.subr.bf16.mxu1 %v15924_v3 }
 0xf9a   :  { %6868 = vmatmul.mubr.f32.vlgmr.msra.gmra.mrb[56].mxu0 %v6485_v52  ;;  %6939 = vmatmul.mubr.f32.vlgmr.msra.gmra.mrb[64].mxu1 %v6485_v52  ;;  %v15973_v52 = vld [vmem:[#allocation116_spill] sm:$0xff] }
 0xf9b   :  { %10786 = vmatpush1.bf16.msra.mxu0 %v15872_v27  ;;  %10818 = vmatpush1.bf16.msra.mxu1 %v15873_v34 }
 0xf9c   :  { %10788 = vmatprep.subr.bf16.mxu0 %v15874_v57  ;;  %10820 = vmatprep.subr.bf16.mxu1 %v15875_v16 }
 0xf9d   :  { %7042 = vmatprep.mubr.f32.mxu0 %v15463_v40  ;;  %7113 = vmatprep.mubr.f32.mxu1 %v15463_v40 }
 0xf9f   :  { %10790 = vmatpush1.bf16.msra.mxu0 %v15876_v38  ;;  %10822 = vmatpush1.bf16.msra.mxu1 %v15877_v48 }
 0xfa0   :  { %10792 = vmatprep.subr.bf16.mxu0 %v15878_v61  ;;  %10824 = vmatprep.subr.bf16.mxu1 %v15824_v0 }
 0xfa3   :  { %10794 = vmatpush1.bf16.msra.mxu0 %v15825_v62  ;;  %10826 = vmatpush1.bf16.msra.mxu1 %v15826_v23 }
 0xfa4   :  { %10796 = vmatprep.subr.bf16.mxu0 %v15971_v20  ;;  %10828 = vmatprep.subr.bf16.mxu1 %v15972_v17 }
 0xfa7   :  { %10798 = vmatpush1.bf16.msra.mxu0 %v15973_v52  ;;  %10830 = vmatpush1.bf16.msra.mxu1 %v15974_v9  ;;  %v15985_v9 = vld [vmem:[#allocation128_spill] sm:$0xff] }
 0xfa8   :  { %10800 = vmatprep.subr.bf16.mxu0 %v15975_v51  ;;  %10832 = vmatprep.subr.bf16.mxu1 %v15976_v15  ;;  %v15986_v51 = vld [vmem:[#allocation129_spill] sm:$0xff]  ;;  %v15987_v15 = vld [vmem:[#allocation130_spill] sm:$0xff] }
 0xfab   :  { %10802 = vmatpush1.bf16.msra.mxu0 %v15977_v1  ;;  %10834 = vmatpush1.bf16.msra.mxu1 %v15978_v45  ;;  %v15988_v1 = vld [vmem:[#allocation131_spill] sm:$0xff]  ;;  %v15989_v45 = vld [vmem:[#allocation132_spill] sm:$0xff] }
 0xfac   :  { %10804 = vmatprep.subr.bf16.mxu0 %v15979_v56  ;;  %10836 = vmatprep.subr.bf16.mxu1 %v15980_v31  ;;  %v15990_v56 = vld [vmem:[#allocation133_spill] sm:$0xff]  ;;  %v15991_v31 = vld [vmem:[#allocation63_spill] sm:$0xff] }
 0xfaf   :  { %10806 = vmatpush1.bf16.msra.mxu0 %v15981_v63  ;;  %10838 = vmatpush1.bf16.msra.mxu1 %v15982_v14  ;;  %v15992_v63 = vld [vmem:[#allocation64_spill] sm:$0xff]  ;;  %v16025_v14 = vld [vmem:[#allocation134_spill] sm:$0xff] }
 0xfb0   :  { %10808 = vmatprep.subr.bf16.mxu0 %v15983_v35  ;;  %10840 = vmatprep.subr.bf16.mxu1 %v15984_v44  ;;  %v15993_v44 = vld [vmem:[#allocation47_spill] sm:$0xff]  ;;  %v16007_v35 = vld [vmem:[#allocation54_spill] sm:$0xff] }
 0xfb3   :  { %10810 = vmatpush1.bf16.msra.mxu0 %v15985_v9  ;;  %10842 = vmatpush1.bf16.msra.mxu1 %v15986_v51  ;;  %v15994_v9 = vld [vmem:[#allocation34_spill] sm:$0xff]  ;;  %v15995_v51 = vld [vmem:[#allocation48_spill] sm:$0xff] }
 0xfb4   :  { %10812 = vmatprep.subr.bf16.mxu0 %v15987_v15  ;;  %10844 = vmatprep.subr.bf16.mxu1 %v15988_v1  ;;  %v15996_v15 = vld [vmem:[#allocation35_spill] sm:$0xff]  ;;  %v16006_v1 = vld [vmem:[#allocation40_spill] sm:$0xff] }
 0xfb7   :  { %10814 = vmatpush1.bf16.msra.mxu0 %v15989_v45  ;;  %10846 = vmatpush1.bf16.msra.mxu1 %v15990_v56  ;;  %v15997_v56 = vld [vmem:[#allocation49_spill] sm:$0xff] }
 0xfb8   :  { %10848 = vmatprep.subr.bf16.mxu0 %v15991_v31  ;;  %10880 = vmatprep.subr.bf16.mxu1 %v15992_v63  ;;  %v15998_v31 = vld [vmem:[#allocation36_spill] sm:$0xff]  ;;  %v15999_v63 = vld [vmem:[#allocation50_spill] sm:$0xff]  ;;  %v16000_v45 = vld [vmem:[#allocation37_spill] sm:$0xff] }
 0xfba   :  { %7043 = vmatmul.mubr.f32.vlgmr.msra.gmra.mrb[42].mxu0 %v14621_v26  ;;  %7114 = vmatmul.mubr.f32.vlgmr.msra.gmra.mrb[50].mxu1 %v14621_v26  ;;  %v16001_v26 = vld [vmem:[#allocation51_spill] sm:$0xff] }
 0xfbb   :  { %10850 = vmatpush1.bf16.msra.mxu0 %v15993_v44  ;;  %10882 = vmatpush1.bf16.msra.mxu1 %v15994_v9  ;;  %v16002_v44 = vld [vmem:[#allocation38_spill] sm:$0xff]  ;;  %v16003_v9 = vld [vmem:[#allocation52_spill] sm:$0xff] }
 0xfbc   :  { %10852 = vmatprep.subr.bf16.mxu0 %v15995_v51  ;;  %10884 = vmatprep.subr.bf16.mxu1 %v15996_v15  ;;  %v16004_v51 = vld [vmem:[#allocation39_spill] sm:$0xff]  ;;  %v16005_v15 = vld [vmem:[#allocation53_spill] sm:$0xff] }
 0xfbd   :  { %7212 = vmatprep.mubr.f32.mxu0 %v15463_v40  ;;  %7283 = vmatprep.mubr.f32.mxu1 %v15463_v40 }
 0xfbf   :  { %10854 = vmatpush1.bf16.msra.mxu0 %v15997_v56  ;;  %10886 = vmatpush1.bf16.msra.mxu1 %v15998_v31  ;;  %v16008_v56 = vld [vmem:[#allocation41_spill] sm:$0xff]  ;;  %v16009_v31 = vld [vmem:[#allocation55_spill] sm:$0xff] }
 0xfc0   :  { %10856 = vmatprep.subr.bf16.mxu0 %v15999_v63  ;;  %10888 = vmatprep.subr.bf16.mxu1 %v16000_v45  ;;  %v16010_v63 = vld [vmem:[#allocation42_spill] sm:$0xff]  ;;  %v16011_v45 = vld [vmem:[#allocation56_spill] sm:$0xff] }
 0xfc3   :  { %10858 = vmatpush1.bf16.msra.mxu0 %v16001_v26  ;;  %10890 = vmatpush1.bf16.msra.mxu1 %v16002_v44  ;;  %v16012_v26 = vld [vmem:[#allocation43_spill] sm:$0xff]  ;;  %v16013_v44 = vld [vmem:[#allocation57_spill] sm:$0xff] }
 0xfc4   :  { %10860 = vmatprep.subr.bf16.mxu0 %v16003_v9  ;;  %10892 = vmatprep.subr.bf16.mxu1 %v16004_v51  ;;  %v16014_v9 = vld [vmem:[#allocation44_spill] sm:$0xff]  ;;  %v16015_v51 = vld [vmem:[#allocation58_spill] sm:$0xff] }
 0xfc7   :  { %10862 = vmatpush1.bf16.msra.mxu0 %v16005_v15  ;;  %10894 = vmatpush1.bf16.msra.mxu1 %v16006_v1  ;;  %v16016_v15 = vld [vmem:[#allocation45_spill] sm:$0xff]  ;;  %v16017_v1 = vld [vmem:[#allocation59_spill] sm:$0xff] }
 0xfc8   :  { %10864 = vmatprep.subr.bf16.mxu0 %v16007_v35  ;;  %10896 = vmatprep.subr.bf16.mxu1 %v16008_v56  ;;  %v16018_v35 = vld [vmem:[#allocation46_spill] sm:$0xff]  ;;  %v16019_v56 = vld [vmem:[#allocation60_spill] sm:$0xff] }
 0xfcb   :  { %10866 = vmatpush1.bf16.msra.mxu0 %v16009_v31  ;;  %10898 = vmatpush1.bf16.msra.mxu1 %v16010_v63  ;;  %v16020_v31 = vld [vmem:[#allocation72_spill] sm:$0xff]  ;;  %v16021_v63 = vld [vmem:[#allocation65_spill] sm:$0xff] }
 0xfcc   :  { %10868 = vmatprep.subr.bf16.mxu0 %v16011_v45  ;;  %10900 = vmatprep.subr.bf16.mxu1 %v16012_v26  ;;  %v16022_v45 = vld [vmem:[#allocation66_spill] sm:$0xff]  ;;  %v16023_v26 = vld [vmem:[#allocation67_spill] sm:$0xff] }
 0xfcf   :  { %10870 = vmatpush1.bf16.msra.mxu0 %v16013_v44  ;;  %10902 = vmatpush1.bf16.msra.mxu1 %v16014_v9  ;;  %v16024_v44 = vld [vmem:[#allocation68_spill] sm:$0xff] }
 0xfd0   :  { %10872 = vmatprep.subr.bf16.mxu0 %v16015_v51  ;;  %10904 = vmatprep.subr.bf16.mxu1 %v16016_v15 }
 0xfd3   :  { %10874 = vmatpush1.bf16.msra.mxu0 %v16017_v1  ;;  %10906 = vmatpush1.bf16.msra.mxu1 %v16018_v35 }
 0xfd4   :  { %10876 = vmatprep.subr.bf16.mxu0 %v16019_v56  ;;  %10908 = vmatprep.subr.bf16.mxu1 %v16020_v31  ;;  %v16026_v31 = vld [vmem:[#allocation33_spill] sm:$0xff] }
 0xfd7   :  { %10878 = vmatpush1.bf16.msra.mxu0 %v16021_v63  ;;  %10910 = vmatpush1.bf16.msra.mxu1 %v16022_v45  ;;  %v16027_v45 = vld [vmem:[#allocation136_spill] sm:$0xff] }
 0xfd8   :  { %10912 = vmatprep.subr.bf16.mxu0 %v16023_v26  ;;  %10944 = vmatprep.subr.bf16.mxu1 %v16024_v44 }
0x106d   :  { %v6869_v9 = vpop.f32.mrb[56].mxu0  ;;  %v6940_v51 = vpop.f32.mrb[64].mxu1 }
0x106e   :  { %v11501_v15 = vadd.f32 %v6869_v9, %v16025_v14  ;;  %v6871_v52 = vpop.f32.mrb[57].mxu0  ;;  %v6942_v1 = vpop.f32.mrb[65].mxu1  ;;  %v11503_v23 = vadd.f32 %v6940_v51, %v16027_v45  ;;  %v16028_v45 = vld [vmem:[#allocation62_spill] sm:$0xff] }
0x106f   :  { %v11502_v35 = vadd.f32 %v6871_v52, %v15903_v7  ;;  %v11504_v63 = vadd.f32 %v6942_v1, %v16026_v31 }
0x1070   :  { %v8661_v17 = vmul.f32 -1.442695, %v11501_v15 }
0x1071   :  { %v8662_v56 = vmul.f32 -1.442695, %v11502_v35  ;;  %v8663_v20 = vmul.f32 -1.442695, %v11504_v63 }
0x1072   :  { %12082 = vpow2.f32 %v8661_v17 }
0x1073   :  { %12084 = vpow2.f32 %v8662_v56 }
0x1074   :  { %12086 = vpow2.f32 %v8663_v20 }
0x1075   :  { %12088 = vtanh.f32 %v11503_v23 }
0x107c   :  { %v12083_v26 = vpop.eup %12082 }
0x107d   :  { %v12085_v62 = vpop.eup %12084  ;;  %v6952_v44 = vadd.f32 1.0, %v12083_v26 }
0x107e   :  { %v6958_v0 = vadd.f32 1.0, %v12085_v62  ;;  %v12087_v9 = vpop.eup %12086 }
0x107f   :  { %12090 = vrcp.f32 %v6952_v44  ;;  %v12089_v14 = vpop.eup %12088  ;;  %v6965_v17 = vadd.f32 1.0, %v12087_v9 }
0x1080   :  { %12092 = vrcp.f32 %v6958_v0 }
0x1081   :  { %12094 = vrcp.f32 %v6965_v17 }
0x1089   :  { %v12091_v52 = vpop.eup %12090 }
0x108a   :  { %v12093_v15 = vpop.eup %12092  ;;  %v6969_v35 = vmul.f32 %v12091_v52, %v12089_v14  ;;  %v16029_v14 = vld [vmem:[#allocation76_spill] sm:$0xff] }
0x108b   :  { %v6968_v56 = vmul.f32 %v12093_v15, %v14607_v46  ;;  %v12095_v46 = vpop.eup %12094 }
0x108d   :  { %v14734_v1 = vadd.f32 %v6969_v35, %v6968_v56  ;;  %v7044_v63 = vpop.f32.mrb[42].mxu0  ;;  %v7115_v51 = vpop.f32.mrb[50].mxu1 }
0x108e   :  { %v11465_v26 = vadd.f32 %v7044_v63, %v16028_v45  ;;  %v7046_v20 = vpop.f32.mrb[43].mxu0  ;;  %v7117_v23 = vpop.f32.mrb[51].mxu1  ;;  %v11479_v35 = vadd.f32 %v7115_v51, %v15780_v42 }
0x108f   :  { %v11466_v62 = vadd.f32 %v7046_v20, %v15967_v55  ;;  %12096 = vtanh.f32 %v14734_v1  ;;  %v11480_v9 = vadd.f32 %v7117_v23, %v16029_v14 }
0x1090   :  { %v8664_v0 = vmul.f32 -1.442695, %v11465_v26 }
0x1091   :  { %v8665_v44 = vmul.f32 -1.442695, %v11466_v62  ;;  %v8666_v15 = vmul.f32 -1.442695, %v11480_v9 }
0x1092   :  { %12098 = vpow2.f32 %v8664_v0 }
0x1093   :  { %12100 = vpow2.f32 %v8665_v44 }
0x1094   :  { %12102 = vpow2.f32 %v8666_v15 }
0x1095   :  { %12104 = vtanh.f32 %v11479_v35  ;;  %v16033_v35 = vld [vmem:[#allocation114_spill] sm:$0xff] }
0x1099   :  { %v12097_v52 = vpop.eup %12096 }
0x109a   :  { %v6972_v17 = vmul.f32 %v12097_v52, %v12095_v46 }
0x109c   :  { %v12099_v56 = vpop.eup %12098  ;;  %v14742_v63 = vadd.f32 %v6972_v17, %v14615_v43 }
0x109d   :  { %v12101_v45 = vpop.eup %12100  ;;  %v7127_v20 = vadd.f32 1.0, %v12099_v56  ;;  %v16035_v56 = vld [vmem:[#allocation116_spill] sm:$0xff] }
0x109e   :  { %v7133_v26 = vadd.f32 1.0, %v12101_v45  ;;  %v12103_v62 = vpop.eup %12102  ;;  %v16031_v45 = vld [vmem:[#allocation112_spill] sm:$0xff] }
0x109f   :  { %12106 = vrcp.f32 %v7127_v20  ;;  %v12105_v0 = vpop.eup %12104  ;;  %v7140_v9 = vadd.f32 1.0, %v12103_v62  ;;  %v16036_v20 = vld [vmem:[#allocation117_spill] sm:$0xff]  ;;  %v16038_v62 = vld [vmem:[#allocation119_spill] sm:$0xff] }
0x10a0   :  { %12108 = vrcp.f32 %v7133_v26  ;;  %v16037_v26 = vld [vmem:[#allocation118_spill] sm:$0xff] }
0x10a1   :  { %12110 = vrcp.f32 %v7140_v9  ;;  %v16042_v9 = vld [vmem:[#allocation123_spill] sm:$0xff] }
0x10a9   :  { %v12107_v23 = vpop.eup %12106 }
0x10aa   :  { %v12109_v44 = vpop.eup %12108  ;;  %v7144_v14 = vmul.f32 %v12107_v23, %v12105_v0  ;;  %v16039_v0 = vld [vmem:[#allocation120_spill] sm:$0xff]  ;;  %v16040_v23 = vld [vmem:[#allocation121_spill] sm:$0xff] }
0x10ab   :  { %v7143_v51 = vmul.f32 %v12109_v44, %v14618_v37  ;;  %v12111_v43 = vpop.eup %12110  ;;  %v16030_v37 = vld [vmem:[#allocation111_spill] sm:$0xff]  ;;  %v16041_v44 = vld [vmem:[#allocation122_spill] sm:$0xff] }
0x10ad   :  { %v14745_v46 = vadd.f32 %v7144_v14, %v7143_v51  ;;  %v16032_v14 = vld [vmem:[#allocation113_spill] sm:$0xff]  ;;  %v16043_v51 = vld [vmem:[#allocation124_spill] sm:$0xff] }
0x10af   :  { %12112 = vtanh.f32 %v14745_v46 }
0x10b9   :  { %v12113_v52 = vpop.eup %12112 }
0x10ba   :  { %v14748_v15 = vmul.f32 %v12113_v52, %v12111_v43  ;;  %v16044_v43 = vld [vmem:[#allocation125_spill] sm:$0xff]  ;;  %v16045_v52 = vld [vmem:[#allocation126_spill] sm:$0xff] }
0x10bc   :  { %7213 = vmatmul.mubr.f32.vlgmr.msra.gmra.mrb[58].mxu0 %v14748_v15  ;;  %7284 = vmatmul.mubr.f32.vlgmr.msra.gmra.mrb[66].mxu1 %v14748_v15 }
0x10bd   :  { %10914 = vmatpush1.bf16.msra.mxu0 %v15784_v32  ;;  %10946 = vmatpush1.bf16.msra.mxu1 %v15785_v11 }
0x10be   :  { %10916 = vmatprep.subr.bf16.mxu0 %v15786_v47  ;;  %10948 = vmatprep.subr.bf16.mxu1 %v15787_v25 }
0x10bf   :  { %7354 = vmatprep.mubr.f32.mxu0 %v15463_v40  ;;  %7425 = vmatprep.mubr.f32.mxu1 %v15463_v40 }
0x10c1   :  { %10918 = vmatpush1.bf16.msra.mxu0 %v15845_v59  ;;  %10950 = vmatpush1.bf16.msra.mxu1 %v15846_v18 }
0x10c2   :  { %10920 = vmatprep.subr.bf16.mxu0 %v15847_v2  ;;  %10952 = vmatprep.subr.bf16.mxu1 %v15848_v6 }
0x10c5   :  { %10922 = vmatpush1.bf16.msra.mxu0 %v15849_v4  ;;  %10954 = vmatpush1.bf16.msra.mxu1 %v15906_v12 }
0x10c6   :  { %10924 = vmatprep.subr.bf16.mxu0 %v15907_v36  ;;  %10956 = vmatprep.subr.bf16.mxu1 %v15908_v53 }
0x10c9   :  { %10926 = vmatpush1.bf16.msra.mxu0 %v15909_v33  ;;  %10958 = vmatpush1.bf16.msra.mxu1 %v15910_v58 }
0x10ca   :  { %10928 = vmatprep.subr.bf16.mxu0 %v15911_v54  ;;  %10960 = vmatprep.subr.bf16.mxu1 %v15912_v13 }
0x10cd   :  { %10930 = vmatpush1.bf16.msra.mxu0 %v15969_v19  ;;  %10962 = vmatpush1.bf16.msra.mxu1 %v15914_v8 }
0x10ce   :  { %10932 = vmatprep.subr.bf16.mxu0 %v15915_v41  ;;  %10964 = vmatprep.subr.bf16.mxu1 %v15916_v60 }
0x10d1   :  { %10934 = vmatpush1.bf16.msra.mxu0 %v15970_v28  ;;  %10966 = vmatpush1.bf16.msra.mxu1 %v15918_v21 }
0x10d2   :  { %10936 = vmatprep.subr.bf16.mxu0 %v15919_v50  ;;  %10968 = vmatprep.subr.bf16.mxu1 %v15807_v10 }
0x10d5   :  { %10938 = vmatpush1.bf16.msra.mxu0 %v15920_v29  ;;  %10970 = vmatpush1.bf16.msra.mxu1 %v15921_v22 }
0x10d6   :  { %10940 = vmatprep.subr.bf16.mxu0 %v15922_v30  ;;  %10972 = vmatprep.subr.bf16.mxu1 %v15923_v24 }
0x10d9   :  { %10942 = vmatpush1.bf16.msra.mxu0 %v15868_v39  ;;  %10974 = vmatpush1.bf16.msra.mxu1 %v15869_v49 }
0x10da   :  { %10976 = vmatprep.subr.bf16.mxu0 %v15870_v5  ;;  %11008 = vmatprep.subr.bf16.mxu1 %v15924_v3 }
0x10dc   :  { %7355 = vmatmul.mubr.f32.vlgmr.msra.gmra.mrb[58].mxu0 %v6972_v17  ;;  %7426 = vmatmul.mubr.f32.vlgmr.msra.gmra.mrb[66].mxu1 %v6972_v17  ;;  %v16034_v17 = vld [vmem:[#allocation115_spill] sm:$0xff] }
0x10dd   :  { %10978 = vmatpush1.bf16.msra.mxu0 %v15872_v27  ;;  %11010 = vmatpush1.bf16.msra.mxu1 %v15873_v34 }
0x10de   :  { %10980 = vmatprep.subr.bf16.mxu0 %v15874_v57  ;;  %11012 = vmatprep.subr.bf16.mxu1 %v15875_v16 }
0x10df   :  { %7529 = vmatprep.mubr.f32.mxu0 %v15463_v40  ;;  %7600 = vmatprep.mubr.f32.mxu1 %v15463_v40 }
0x10e1   :  { %10982 = vmatpush1.bf16.msra.mxu0 %v15876_v38  ;;  %11014 = vmatpush1.bf16.msra.mxu1 %v15877_v48 }
0x10e2   :  { %10984 = vmatprep.subr.bf16.mxu0 %v15878_v61  ;;  %11016 = vmatprep.subr.bf16.mxu1 %v16030_v37 }
0x10e5   :  { %10986 = vmatpush1.bf16.msra.mxu0 %v16031_v45  ;;  %11018 = vmatpush1.bf16.msra.mxu1 %v16032_v14 }
0x10e6   :  { %10988 = vmatprep.subr.bf16.mxu0 %v16033_v35  ;;  %11020 = vmatprep.subr.bf16.mxu1 %v16034_v17 }
0x10e9   :  { %10990 = vmatpush1.bf16.msra.mxu0 %v16035_v56  ;;  %11022 = vmatpush1.bf16.msra.mxu1 %v16036_v20  ;;  %v16046_v56 = vld [vmem:[#allocation127_spill] sm:$0xff]  ;;  %v16047_v20 = vld [vmem:[#allocation128_spill] sm:$0xff] }
0x10ea   :  { %10992 = vmatprep.subr.bf16.mxu0 %v16037_v26  ;;  %11024 = vmatprep.subr.bf16.mxu1 %v16038_v62  ;;  %v16048_v26 = vld [vmem:[#allocation129_spill] sm:$0xff]  ;;  %v16049_v62 = vld [vmem:[#allocation130_spill] sm:$0xff] }
0x10ed   :  { %10994 = vmatpush1.bf16.msra.mxu0 %v16039_v0  ;;  %11026 = vmatpush1.bf16.msra.mxu1 %v16040_v23  ;;  %v16050_v0 = vld [vmem:[#allocation131_spill] sm:$0xff]  ;;  %v16051_v23 = vld [vmem:[#allocation132_spill] sm:$0xff] }
0x10ee   :  { %10996 = vmatprep.subr.bf16.mxu0 %v16041_v44  ;;  %11028 = vmatprep.subr.bf16.mxu1 %v16042_v9  ;;  %v16052_v44 = vld [vmem:[#allocation133_spill] sm:$0xff]  ;;  %v16053_v9 = vld [vmem:[#allocation63_spill] sm:$0xff] }
0x10f1   :  { %10998 = vmatpush1.bf16.msra.mxu0 %v16043_v51  ;;  %11030 = vmatpush1.bf16.msra.mxu1 %v16044_v43  ;;  %v16054_v51 = vld [vmem:[#allocation64_spill] sm:$0xff]  ;;  %v16087_v43 = vld [vmem:[#allocation134_spill] sm:$0xff] }
0x10f2   :  { %11000 = vmatprep.subr.bf16.mxu0 %v16045_v52  ;;  %11032 = vmatprep.subr.bf16.mxu1 %v16046_v56  ;;  %v16055_v56 = vld [vmem:[#allocation47_spill] sm:$0xff]  ;;  %v16069_v52 = vld [vmem:[#allocation54_spill] sm:$0xff] }
0x10f5   :  { %11002 = vmatpush1.bf16.msra.mxu0 %v16047_v20  ;;  %11034 = vmatpush1.bf16.msra.mxu1 %v16048_v26  ;;  %v16056_v20 = vld [vmem:[#allocation34_spill] sm:$0xff]  ;;  %v16057_v26 = vld [vmem:[#allocation48_spill] sm:$0xff] }
0x10f6   :  { %11004 = vmatprep.subr.bf16.mxu0 %v16049_v62  ;;  %11036 = vmatprep.subr.bf16.mxu1 %v16050_v0  ;;  %v16058_v62 = vld [vmem:[#allocation35_spill] sm:$0xff]  ;;  %v16068_v0 = vld [vmem:[#allocation40_spill] sm:$0xff] }
0x10f9   :  { %11006 = vmatpush1.bf16.msra.mxu0 %v16051_v23  ;;  %11038 = vmatpush1.bf16.msra.mxu1 %v16052_v44  ;;  %v16059_v44 = vld [vmem:[#allocation49_spill] sm:$0xff] }
0x10fa   :  { %11040 = vmatprep.subr.bf16.mxu0 %v16053_v9  ;;  %11072 = vmatprep.subr.bf16.mxu1 %v16054_v51  ;;  %v16060_v9 = vld [vmem:[#allocation36_spill] sm:$0xff]  ;;  %v16061_v51 = vld [vmem:[#allocation50_spill] sm:$0xff]  ;;  %v16062_v23 = vld [vmem:[#allocation37_spill] sm:$0xff] }
0x10fc   :  { %7530 = vmatmul.mubr.f32.vlgmr.msra.gmra.mrb[44].mxu0 %v14748_v15  ;;  %7601 = vmatmul.mubr.f32.vlgmr.msra.gmra.mrb[52].mxu1 %v14748_v15  ;;  %v16063_v15 = vld [vmem:[#allocation51_spill] sm:$0xff] }
0x10fd   :  { %11042 = vmatpush1.bf16.msra.mxu0 %v16055_v56  ;;  %11074 = vmatpush1.bf16.msra.mxu1 %v16056_v20  ;;  %v16064_v56 = vld [vmem:[#allocation38_spill] sm:$0xff]  ;;  %v16065_v20 = vld [vmem:[#allocation52_spill] sm:$0xff] }
0x10fe   :  { %11044 = vmatprep.subr.bf16.mxu0 %v16057_v26  ;;  %11076 = vmatprep.subr.bf16.mxu1 %v16058_v62  ;;  %v16066_v26 = vld [vmem:[#allocation39_spill] sm:$0xff]  ;;  %v16067_v62 = vld [vmem:[#allocation53_spill] sm:$0xff] }
0x10ff   :  { %7699 = vmatprep.mubr.f32.mxu0 %v15463_v40  ;;  %7770 = vmatprep.mubr.f32.mxu1 %v15463_v40 }
0x1101   :  { %11046 = vmatpush1.bf16.msra.mxu0 %v16059_v44  ;;  %11078 = vmatpush1.bf16.msra.mxu1 %v16060_v9  ;;  %v16070_v44 = vld [vmem:[#allocation41_spill] sm:$0xff]  ;;  %v16071_v9 = vld [vmem:[#allocation55_spill] sm:$0xff] }
0x1102   :  { %11048 = vmatprep.subr.bf16.mxu0 %v16061_v51  ;;  %11080 = vmatprep.subr.bf16.mxu1 %v16062_v23  ;;  %v16072_v51 = vld [vmem:[#allocation42_spill] sm:$0xff]  ;;  %v16073_v23 = vld [vmem:[#allocation56_spill] sm:$0xff] }
0x1105   :  { %11050 = vmatpush1.bf16.msra.mxu0 %v16063_v15  ;;  %11082 = vmatpush1.bf16.msra.mxu1 %v16064_v56  ;;  %v16074_v15 = vld [vmem:[#allocation43_spill] sm:$0xff]  ;;  %v16075_v56 = vld [vmem:[#allocation57_spill] sm:$0xff] }
0x1106   :  { %11052 = vmatprep.subr.bf16.mxu0 %v16065_v20  ;;  %11084 = vmatprep.subr.bf16.mxu1 %v16066_v26  ;;  %v16076_v20 = vld [vmem:[#allocation44_spill] sm:$0xff]  ;;  %v16077_v26 = vld [vmem:[#allocation58_spill] sm:$0xff] }
0x1109   :  { %11054 = vmatpush1.bf16.msra.mxu0 %v16067_v62  ;;  %11086 = vmatpush1.bf16.msra.mxu1 %v16068_v0  ;;  %v16078_v62 = vld [vmem:[#allocation45_spill] sm:$0xff]  ;;  %v16079_v0 = vld [vmem:[#allocation59_spill] sm:$0xff] }
0x110a   :  { %11056 = vmatprep.subr.bf16.mxu0 %v16069_v52  ;;  %11088 = vmatprep.subr.bf16.mxu1 %v16070_v44  ;;  %v16080_v52 = vld [vmem:[#allocation46_spill] sm:$0xff]  ;;  %v16081_v44 = vld [vmem:[#allocation60_spill] sm:$0xff] }
0x110d   :  { %11058 = vmatpush1.bf16.msra.mxu0 %v16071_v9  ;;  %11090 = vmatpush1.bf16.msra.mxu1 %v16072_v51  ;;  %v16082_v9 = vld [vmem:[#allocation72_spill] sm:$0xff]  ;;  %v16083_v51 = vld [vmem:[#allocation65_spill] sm:$0xff] }
0x110e   :  { %11060 = vmatprep.subr.bf16.mxu0 %v16073_v23  ;;  %11092 = vmatprep.subr.bf16.mxu1 %v16074_v15  ;;  %v16084_v23 = vld [vmem:[#allocation66_spill] sm:$0xff]  ;;  %v16085_v15 = vld [vmem:[#allocation67_spill] sm:$0xff] }
0x1111   :  { %11062 = vmatpush1.bf16.msra.mxu0 %v16075_v56  ;;  %11094 = vmatpush1.bf16.msra.mxu1 %v16076_v20  ;;  %v16086_v56 = vld [vmem:[#allocation68_spill] sm:$0xff] }
0x1112   :  { %11064 = vmatprep.subr.bf16.mxu0 %v16077_v26  ;;  %11096 = vmatprep.subr.bf16.mxu1 %v16078_v62 }
0x1115   :  { %11066 = vmatpush1.bf16.msra.mxu0 %v16079_v0  ;;  %11098 = vmatpush1.bf16.msra.mxu1 %v16080_v52 }
0x1116   :  { %11068 = vmatprep.subr.bf16.mxu0 %v16081_v44  ;;  %11100 = vmatprep.subr.bf16.mxu1 %v16082_v9 }
0x1119   :  { %11070 = vmatpush1.bf16.msra.mxu0 %v16083_v51  ;;  %11102 = vmatpush1.bf16.msra.mxu1 %v16084_v23  ;;  %v16088_v23 = vld [vmem:[#allocation136_spill] sm:$0xff] }
0x111a   :  { %11104 = vmatprep.subr.bf16.mxu0 %v16085_v15  ;;  %11136 = vmatprep.subr.bf16.mxu1 %v16086_v56 }
0x11af   :  { %v7356_v20 = vpop.f32.mrb[58].mxu0  ;;  %v7427_v26 = vpop.f32.mrb[66].mxu1 }
0x11b0   :  { %v11505_v62 = vadd.f32 %v7356_v20, %v16087_v43  ;;  %v7358_v17 = vpop.f32.mrb[59].mxu0  ;;  %v7429_v0 = vpop.f32.mrb[67].mxu1  ;;  %v11507_v14 = vadd.f32 %v7427_v26, %v16088_v23  ;;  %v16089_v23 = vld [vmem:[#allocation62_spill] sm:$0xff] }
0x11b1   :  { %v11506_v52 = vadd.f32 %v7358_v17, %v15903_v7  ;;  %v11508_v51 = vadd.f32 %v7429_v0, %v16026_v31 }
0x11b2   :  { %v8667_v35 = vmul.f32 -1.442695, %v11505_v62 }
0x11b3   :  { %v8668_v44 = vmul.f32 -1.442695, %v11506_v52  ;;  %v8669_v9 = vmul.f32 -1.442695, %v11508_v51 }
0x11b4   :  { %12114 = vpow2.f32 %v8667_v35 }
0x11b5   :  { %12116 = vpow2.f32 %v8668_v44 }
0x11b6   :  { %12118 = vpow2.f32 %v8669_v9 }
0x11b7   :  { %12120 = vtanh.f32 %v11507_v14 }
0x11be   :  { %v12115_v15 = vpop.eup %12114 }
0x11bf   :  { %v12117_v45 = vpop.eup %12116  ;;  %v7439_v56 = vadd.f32 1.0, %v12115_v15 }
0x11c0   :  { %v7445_v37 = vadd.f32 1.0, %v12117_v45  ;;  %v12119_v20 = vpop.eup %12118 }
0x11c1   :  { %12122 = vrcp.f32 %v7439_v56  ;;  %v12121_v43 = vpop.eup %12120  ;;  %v7452_v35 = vadd.f32 1.0, %v12119_v20 }
0x11c2   :  { %12124 = vrcp.f32 %v7445_v37 }
0x11c3   :  { %12126 = vrcp.f32 %v7452_v35 }
0x11cb   :  { %v12123_v17 = vpop.eup %12122 }
0x11cc   :  { %v12125_v62 = vpop.eup %12124  ;;  %v7456_v52 = vmul.f32 %v12123_v17, %v12121_v43  ;;  %v16090_v43 = vld [vmem:[#allocation76_spill] sm:$0xff] }
0x11cd   :  { %v7455_v44 = vmul.f32 %v12125_v62, %v14734_v1  ;;  %v12127_v1 = vpop.eup %12126 }
0x11cf   :  { %v14861_v0 = vadd.f32 %v7456_v52, %v7455_v44  ;;  %v7531_v51 = vpop.f32.mrb[44].mxu0  ;;  %v7602_v26 = vpop.f32.mrb[52].mxu1 }
0x11d0   :  { %v11467_v15 = vadd.f32 %v7531_v51, %v16089_v23  ;;  %v7533_v9 = vpop.f32.mrb[45].mxu0  ;;  %v7604_v14 = vpop.f32.mrb[53].mxu1  ;;  %v11481_v52 = vadd.f32 %v7602_v26, %v15780_v42 }
0x11d1   :  { %v11468_v45 = vadd.f32 %v7533_v9, %v15967_v55  ;;  %12128 = vtanh.f32 %v14861_v0  ;;  %v11482_v20 = vadd.f32 %v7604_v14, %v16090_v43 }
0x11d2   :  { %v8670_v37 = vmul.f32 -1.442695, %v11467_v15 }
0x11d3   :  { %v8671_v56 = vmul.f32 -1.442695, %v11468_v45  ;;  %v8672_v62 = vmul.f32 -1.442695, %v11482_v20 }
0x11d4   :  { %12130 = vpow2.f32 %v8670_v37 }
0x11d5   :  { %12132 = vpow2.f32 %v8671_v56 }
0x11d6   :  { %12134 = vpow2.f32 %v8672_v62 }
0x11d7   :  { %12136 = vtanh.f32 %v11481_v52  ;;  %v16103_v52 = vld [vmem:[#allocation123_spill] sm:$0xff] }
0x11db   :  { %v12129_v17 = vpop.eup %12128 }
0x11dc   :  { %v7459_v35 = vmul.f32 %v12129_v17, %v12127_v1 }
0x11de   :  { %v12131_v44 = vpop.eup %12130  ;;  %v14869_v51 = vadd.f32 %v7459_v35, %v14742_v63 }
0x11df   :  { %v12133_v23 = vpop.eup %12132  ;;  %v7614_v9 = vadd.f32 1.0, %v12131_v44  ;;  %v16105_v44 = vld [vmem:[#allocation125_spill] sm:$0xff] }
0x11e0   :  { %v7620_v15 = vadd.f32 1.0, %v12133_v23  ;;  %v12135_v45 = vpop.eup %12134  ;;  %v16098_v23 = vld [vmem:[#allocation118_spill] sm:$0xff] }
0x11e1   :  { %12138 = vrcp.f32 %v7614_v9  ;;  %v12137_v37 = vpop.eup %12136  ;;  %v7627_v20 = vadd.f32 1.0, %v12135_v45  ;;  %v16106_v9 = vld [vmem:[#allocation126_spill] sm:$0xff]  ;;  %v16108_v45 = vld [vmem:[#allocation128_spill] sm:$0xff] }
0x11e2   :  { %12140 = vrcp.f32 %v7620_v15  ;;  %v16107_v15 = vld [vmem:[#allocation127_spill] sm:$0xff] }
0x11e3   :  { %12142 = vrcp.f32 %v7627_v20  ;;  %v16112_v20 = vld [vmem:[#allocation132_spill] sm:$0xff] }
0x11eb   :  { %v12139_v14 = vpop.eup %12138 }
0x11ec   :  { %v12141_v56 = vpop.eup %12140  ;;  %v7631_v43 = vmul.f32 %v12139_v14, %v12137_v37  ;;  %v16109_v37 = vld [vmem:[#allocation129_spill] sm:$0xff]  ;;  %v16110_v14 = vld [vmem:[#allocation130_spill] sm:$0xff] }
0x11ed   :  { %v7630_v26 = vmul.f32 %v12141_v56, %v14745_v46  ;;  %v12143_v63 = vpop.eup %12142  ;;  %v16097_v46 = vld [vmem:[#allocation117_spill] sm:$0xff]  ;;  %v16111_v56 = vld [vmem:[#allocation131_spill] sm:$0xff] }
0x11ef   :  { %v14872_v1 = vadd.f32 %v7631_v43, %v7630_v26  ;;  %v16102_v43 = vld [vmem:[#allocation122_spill] sm:$0xff]  ;;  %v16113_v26 = vld [vmem:[#allocation133_spill] sm:$0xff] }
0x11f1   :  { %12144 = vtanh.f32 %v14872_v1 }
0x11fb   :  { %v12145_v17 = vpop.eup %12144 }
0x11fc   :  { %v14875_v62 = vmul.f32 %v12145_v17, %v12143_v63  ;;  %v16114_v63 = vld [vmem:[#allocation63_spill] sm:$0xff]  ;;  %v16115_v17 = vld [vmem:[#allocation64_spill] sm:$0xff] }
0x11fe   :  { %7700 = vmatmul.mubr.f32.vlgmr.msra.gmra.mrb[60].mxu0 %v14875_v62  ;;  %7771 = vmatmul.mubr.f32.vlgmr.msra.gmra.mrb[68].mxu1 %v14875_v62 }
0x11ff   :  { %11106 = vmatpush1.bf16.msra.mxu0 %v15784_v32  ;;  %11138 = vmatpush1.bf16.msra.mxu1 %v15785_v11 }
0x1200   :  { %11108 = vmatprep.subr.bf16.mxu0 %v15786_v47  ;;  %11140 = vmatprep.subr.bf16.mxu1 %v15787_v25 }
0x1201   :  { %7841 = vmatprep.mubr.f32.mxu0 %v15463_v40  ;;  %7912 = vmatprep.mubr.f32.mxu1 %v15463_v40 }
0x1203   :  { %11110 = vmatpush1.bf16.msra.mxu0 %v15845_v59  ;;  %11142 = vmatpush1.bf16.msra.mxu1 %v15846_v18 }
0x1204   :  { %11112 = vmatprep.subr.bf16.mxu0 %v15847_v2  ;;  %11144 = vmatprep.subr.bf16.mxu1 %v15848_v6 }
0x1207   :  { %11114 = vmatpush1.bf16.msra.mxu0 %v15849_v4  ;;  %11146 = vmatpush1.bf16.msra.mxu1 %v15906_v12 }
0x1208   :  { %11116 = vmatprep.subr.bf16.mxu0 %v15907_v36  ;;  %11148 = vmatprep.subr.bf16.mxu1 %v15908_v53 }
0x120b   :  { %11118 = vmatpush1.bf16.msra.mxu0 %v15909_v33  ;;  %11150 = vmatpush1.bf16.msra.mxu1 %v15910_v58 }
0x120c   :  { %11120 = vmatprep.subr.bf16.mxu0 %v15911_v54  ;;  %11152 = vmatprep.subr.bf16.mxu1 %v15912_v13 }
0x120f   :  { %11122 = vmatpush1.bf16.msra.mxu0 %v15969_v19  ;;  %11154 = vmatpush1.bf16.msra.mxu1 %v15914_v8 }
0x1210   :  { %11124 = vmatprep.subr.bf16.mxu0 %v15915_v41  ;;  %11156 = vmatprep.subr.bf16.mxu1 %v15916_v60 }
0x1213   :  { %11126 = vmatpush1.bf16.msra.mxu0 %v15970_v28  ;;  %11158 = vmatpush1.bf16.msra.mxu1 %v15918_v21 }
0x1214   :  { %11128 = vmatprep.subr.bf16.mxu0 %v15919_v50  ;;  %11160 = vmatprep.subr.bf16.mxu1 %v15807_v10 }
0x1217   :  { %11130 = vmatpush1.bf16.msra.mxu0 %v15920_v29  ;;  %11162 = vmatpush1.bf16.msra.mxu1 %v15921_v22 }
0x1218   :  { %11132 = vmatprep.subr.bf16.mxu0 %v15922_v30  ;;  %11164 = vmatprep.subr.bf16.mxu1 %v15923_v24 }
0x121b   :  { %11134 = vmatpush1.bf16.msra.mxu0 %v15868_v39  ;;  %11166 = vmatpush1.bf16.msra.mxu1 %v15869_v49 }
0x121c   :  { %11168 = vmatprep.subr.bf16.mxu0 %v15870_v5  ;;  %11200 = vmatprep.subr.bf16.mxu1 %v15924_v3  ;;  %v16091_v5 = vld [vmem:[#allocation111_spill] sm:$0xff]  ;;  %v16092_v3 = vld [vmem:[#allocation112_spill] sm:$0xff] }
0x121e   :  { %7842 = vmatmul.mubr.f32.vlgmr.msra.gmra.mrb[60].mxu0 %v7459_v35  ;;  %7913 = vmatmul.mubr.f32.vlgmr.msra.gmra.mrb[68].mxu1 %v7459_v35  ;;  %v16104_v35 = vld [vmem:[#allocation124_spill] sm:$0xff] }
0x121f   :  { %11170 = vmatpush1.bf16.msra.mxu0 %v15872_v27  ;;  %11202 = vmatpush1.bf16.msra.mxu1 %v15873_v34  ;;  %v16093_v27 = vld [vmem:[#allocation113_spill] sm:$0xff]  ;;  %v16094_v34 = vld [vmem:[#allocation114_spill] sm:$0xff] }
0x1220   :  { %11172 = vmatprep.subr.bf16.mxu0 %v15874_v57  ;;  %11204 = vmatprep.subr.bf16.mxu1 %v15875_v16  ;;  %v16095_v57 = vld [vmem:[#allocation115_spill] sm:$0xff]  ;;  %v16096_v16 = vld [vmem:[#allocation116_spill] sm:$0xff] }
0x1221   :  { %8016 = vmatprep.mubr.f32.mxu0 %v15463_v40  ;;  %8087 = vmatprep.mubr.f32.mxu1 %v15463_v40 }
0x1223   :  { %11174 = vmatpush1.bf16.msra.mxu0 %v15876_v38  ;;  %11206 = vmatpush1.bf16.msra.mxu1 %v15877_v48  ;;  %v16099_v38 = vld [vmem:[#allocation119_spill] sm:$0xff]  ;;  %v16100_v48 = vld [vmem:[#allocation120_spill] sm:$0xff] }
0x1224   :  { %11176 = vmatprep.subr.bf16.mxu0 %v15878_v61  ;;  %11208 = vmatprep.subr.bf16.mxu1 %v16091_v5  ;;  %v16101_v61 = vld [vmem:[#allocation121_spill] sm:$0xff]  ;;  %v16116_v5 = vld [vmem:[#allocation47_spill] sm:$0xff] }
0x1227   :  { %11178 = vmatpush1.bf16.msra.mxu0 %v16092_v3  ;;  %11210 = vmatpush1.bf16.msra.mxu1 %v16093_v27  ;;  %v16117_v3 = vld [vmem:[#allocation34_spill] sm:$0xff]  ;;  %v16118_v27 = vld [vmem:[#allocation48_spill] sm:$0xff] }
0x1228   :  { %11180 = vmatprep.subr.bf16.mxu0 %v16094_v34  ;;  %11212 = vmatprep.subr.bf16.mxu1 %v16095_v57  ;;  %v16119_v34 = vld [vmem:[#allocation35_spill] sm:$0xff]  ;;  %v16120_v57 = vld [vmem:[#allocation49_spill] sm:$0xff] }
0x122b   :  { %11182 = vmatpush1.bf16.msra.mxu0 %v16096_v16  ;;  %11214 = vmatpush1.bf16.msra.mxu1 %v16097_v46  ;;  %v16121_v16 = vld [vmem:[#allocation36_spill] sm:$0xff]  ;;  %v16122_v46 = vld [vmem:[#allocation50_spill] sm:$0xff] }
0x122c   :  { %11184 = vmatprep.subr.bf16.mxu0 %v16098_v23  ;;  %11216 = vmatprep.subr.bf16.mxu1 %v16099_v38  ;;  %v16123_v23 = vld [vmem:[#allocation37_spill] sm:$0xff]  ;;  %v16125_v38 = vld [vmem:[#allocation38_spill] sm:$0xff] }
0x122f   :  { %11186 = vmatpush1.bf16.msra.mxu0 %v16100_v48  ;;  %11218 = vmatpush1.bf16.msra.mxu1 %v16101_v61  ;;  %v16126_v48 = vld [vmem:[#allocation52_spill] sm:$0xff]  ;;  %v16127_v61 = vld [vmem:[#allocation39_spill] sm:$0xff] }
0x1230   :  { %11188 = vmatprep.subr.bf16.mxu0 %v16102_v43  ;;  %11220 = vmatprep.subr.bf16.mxu1 %v16103_v52  ;;  %v16128_v43 = vld [vmem:[#allocation53_spill] sm:$0xff]  ;;  %v16129_v52 = vld [vmem:[#allocation40_spill] sm:$0xff] }
0x1233   :  { %11190 = vmatpush1.bf16.msra.mxu0 %v16104_v35  ;;  %11222 = vmatpush1.bf16.msra.mxu1 %v16105_v44  ;;  %v16130_v35 = vld [vmem:[#allocation54_spill] sm:$0xff]  ;;  %v16131_v44 = vld [vmem:[#allocation41_spill] sm:$0xff] }
0x1234   :  { %11192 = vmatprep.subr.bf16.mxu0 %v16106_v9  ;;  %11224 = vmatprep.subr.bf16.mxu1 %v16107_v15  ;;  %v16132_v9 = vld [vmem:[#allocation55_spill] sm:$0xff]  ;;  %v16133_v15 = vld [vmem:[#allocation42_spill] sm:$0xff] }
0x1237   :  { %11194 = vmatpush1.bf16.msra.mxu0 %v16108_v45  ;;  %11226 = vmatpush1.bf16.msra.mxu1 %v16109_v37  ;;  %v16134_v45 = vld [vmem:[#allocation56_spill] sm:$0xff]  ;;  %v16135_v37 = vld [vmem:[#allocation43_spill] sm:$0xff] }
0x1238   :  { %11196 = vmatprep.subr.bf16.mxu0 %v16110_v14  ;;  %11228 = vmatprep.subr.bf16.mxu1 %v16111_v56  ;;  %v16136_v14 = vld [vmem:[#allocation57_spill] sm:$0xff]  ;;  %v16137_v56 = vld [vmem:[#allocation44_spill] sm:$0xff] }
0x123b   :  { %11198 = vmatpush1.bf16.msra.mxu0 %v16112_v20  ;;  %11230 = vmatpush1.bf16.msra.mxu1 %v16113_v26  ;;  %v16138_v20 = vld [vmem:[#allocation58_spill] sm:$0xff]  ;;  %v16139_v26 = vld [vmem:[#allocation45_spill] sm:$0xff] }
0x123c   :  { %11232 = vmatprep.subr.bf16.mxu0 %v16114_v63  ;;  %11264 = vmatprep.subr.bf16.mxu1 %v16115_v17  ;;  %v16140_v63 = vld [vmem:[#allocation59_spill] sm:$0xff]  ;;  %v16141_v17 = vld [vmem:[#allocation46_spill] sm:$0xff] }
0x123e   :  { %8017 = vmatmul.mubr.f32.vlgmr.msra.gmra.mrb[46].mxu0 %v14875_v62  ;;  %8088 = vmatmul.mubr.f32.vlgmr.msra.gmra.mrb[54].mxu1 %v14875_v62  ;;  %v16124_v62 = vld [vmem:[#allocation51_spill] sm:$0xff] }
0x123f   :  { %11234 = vmatpush1.bf16.msra.mxu0 %v16116_v5  ;;  %11266 = vmatpush1.bf16.msra.mxu1 %v16117_v3  ;;  %v16142_v5 = vld [vmem:[#allocation60_spill] sm:$0xff] }
0x1240   :  { %11236 = vmatprep.subr.bf16.mxu0 %v16118_v27  ;;  %11268 = vmatprep.subr.bf16.mxu1 %v16119_v34  ;;  %v16143_v3 = vld [vmem:[#allocation72_spill] sm:$0xff]  ;;  %v16144_v27 = vld [vmem:[#allocation65_spill] sm:$0xff]  ;;  %v16145_v34 = vld [vmem:[#allocation66_spill] sm:$0xff] }
0x1241   :  { %8186 = vmatprep.mubr.f32.mxu0 %v15463_v40  ;;  %8257 = vmatprep.mubr.f32.mxu1 %v15463_v40 }
0x1243   :  { %11238 = vmatpush1.bf16.msra.mxu0 %v16120_v57  ;;  %11270 = vmatpush1.bf16.msra.mxu1 %v16121_v16  ;;  %v16146_v57 = vld [vmem:[#allocation67_spill] sm:$0xff]  ;;  %v16147_v16 = vld [vmem:[#allocation68_spill] sm:$0xff] }
0x1244   :  { %11240 = vmatprep.subr.bf16.mxu0 %v16122_v46  ;;  %11272 = vmatprep.subr.bf16.mxu1 %v16123_v23 }
0x1247   :  { %11242 = vmatpush1.bf16.msra.mxu0 %v16124_v62  ;;  %11274 = vmatpush1.bf16.msra.mxu1 %v16125_v38  ;;  %v16148_v62 = vld [vmem:[#allocation134_spill] sm:$0xff] }
0x1248   :  { %11244 = vmatprep.subr.bf16.mxu0 %v16126_v48  ;;  %11276 = vmatprep.subr.bf16.mxu1 %v16127_v61 }
0x124b   :  { %11246 = vmatpush1.bf16.msra.mxu0 %v16128_v43  ;;  %11278 = vmatpush1.bf16.msra.mxu1 %v16129_v52 }
0x124c   :  { %11248 = vmatprep.subr.bf16.mxu0 %v16130_v35  ;;  %11280 = vmatprep.subr.bf16.mxu1 %v16131_v44 }
0x124f   :  { %11250 = vmatpush1.bf16.msra.mxu0 %v16132_v9  ;;  %11282 = vmatpush1.bf16.msra.mxu1 %v16133_v15  ;;  %v16149_v15 = vld [vmem:[#allocation136_spill] sm:$0xff] }
0x1250   :  { %11252 = vmatprep.subr.bf16.mxu0 %v16134_v45  ;;  %11284 = vmatprep.subr.bf16.mxu1 %v16135_v37 }
0x1253   :  { %11254 = vmatpush1.bf16.msra.mxu0 %v16136_v14  ;;  %11286 = vmatpush1.bf16.msra.mxu1 %v16137_v56 }
0x1254   :  { %11256 = vmatprep.subr.bf16.mxu0 %v16138_v20  ;;  %11288 = vmatprep.subr.bf16.mxu1 %v16139_v26 }
0x1257   :  { %11258 = vmatpush1.bf16.msra.mxu0 %v16140_v63  ;;  %11290 = vmatpush1.bf16.msra.mxu1 %v16141_v17 }
0x1258   :  { %11260 = vmatprep.subr.bf16.mxu0 %v16142_v5  ;;  %11292 = vmatprep.subr.bf16.mxu1 %v16143_v3 }
0x125b   :  { %11262 = vmatpush1.bf16.msra.mxu0 %v16144_v27  ;;  %11294 = vmatpush1.bf16.msra.mxu1 %v16145_v34 }
0x125c   :  { %11296 = vmatprep.subr.bf16.mxu0 %v16146_v57  ;;  %11328 = vmatprep.subr.bf16.mxu1 %v16147_v16 }
0x12f1   :  { %v7843_v46 = vpop.f32.mrb[60].mxu0  ;;  %v7914_v23 = vpop.f32.mrb[68].mxu1 }
0x12f2   :  { %v11509_v38 = vadd.f32 %v7843_v46, %v16148_v62  ;;  %v7845_v48 = vpop.f32.mrb[61].mxu0  ;;  %v7916_v61 = vpop.f32.mrb[69].mxu1  ;;  %v11511_v45 = vadd.f32 %v7914_v23, %v16149_v15  ;;  %v16150_v23 = vld [vmem:[#allocation62_spill] sm:$0xff] }
0x12f3   :  { %v11510_v43 = vadd.f32 %v7845_v48, %v15903_v7  ;;  %v11512_v44 = vadd.f32 %v7916_v61, %v16026_v31 }
0x12f4   :  { %v8673_v52 = vmul.f32 -1.442695, %v11509_v38 }
0x12f5   :  { %v8674_v35 = vmul.f32 -1.442695, %v11510_v43  ;;  %v8675_v9 = vmul.f32 -1.442695, %v11512_v44  ;;  %v16151_v44 = vld [vmem:[#allocation76_spill] sm:$0xff] }
0x12f6   :  { %12146 = vpow2.f32 %v8673_v52 }
0x12f7   :  { %12148 = vpow2.f32 %v8674_v35 }
0x12f8   :  { %12150 = vpow2.f32 %v8675_v9 }
0x12f9   :  { %12152 = vtanh.f32 %v11511_v45 }
0x1300   :  { %v12147_v37 = vpop.eup %12146 }
0x1301   :  { %v12149_v14 = vpop.eup %12148  ;;  %v7926_v56 = vadd.f32 1.0, %v12147_v37 }
0x1302   :  { %v7932_v20 = vadd.f32 1.0, %v12149_v14  ;;  %v12151_v26 = vpop.eup %12150 }
0x1303   :  { %12154 = vrcp.f32 %v7926_v56  ;;  %v12153_v63 = vpop.eup %12152  ;;  %v7939_v27 = vadd.f32 1.0, %v12151_v26 }
0x1304   :  { %12156 = vrcp.f32 %v7932_v20 }
0x1305   :  { %12158 = vrcp.f32 %v7939_v27 }
0x130d   :  { %v12155_v17 = vpop.eup %12154 }
0x130e   :  { %v12157_v5 = vpop.eup %12156  ;;  %v7943_v3 = vmul.f32 %v12155_v17, %v12153_v63 }
0x130f   :  { %v7942_v34 = vmul.f32 %v12157_v5, %v14861_v0  ;;  %v12159_v0 = vpop.eup %12158 }
0x1311   :  { %v14988_v57 = vadd.f32 %v7943_v3, %v7942_v34  ;;  %v8018_v16 = vpop.f32.mrb[46].mxu0  ;;  %v8089_v46 = vpop.f32.mrb[54].mxu1 }
0x1312   :  { %v11469_v38 = vadd.f32 %v8018_v16, %v16150_v23  ;;  %v8020_v48 = vpop.f32.mrb[47].mxu0  ;;  %v8091_v61 = vpop.f32.mrb[55].mxu1  ;;  %v11483_v14 = vadd.f32 %v8089_v46, %v15780_v42 }
0x1313   :  { %v11470_v43 = vadd.f32 %v8020_v48, %v15967_v55  ;;  %12160 = vtanh.f32 %v14988_v57  ;;  %v11484_v9 = vadd.f32 %v8091_v61, %v16151_v44 }
0x1314   :  { %v8676_v52 = vmul.f32 -1.442695, %v11469_v38 }
0x1315   :  { %v8677_v35 = vmul.f32 -1.442695, %v11470_v43  ;;  %v8678_v37 = vmul.f32 -1.442695, %v11484_v9 }
0x1316   :  { %12162 = vpow2.f32 %v8676_v52 }
0x1317   :  { %12164 = vpow2.f32 %v8677_v35 }
0x1318   :  { %12166 = vpow2.f32 %v8678_v37 }
0x1319   :  { %12168 = vtanh.f32 %v11483_v14 }
0x131d   :  { %v12161_v45 = vpop.eup %12160 }
0x131e   :  { %v7946_v56 = vmul.f32 %v12161_v45, %v12159_v0 }
0x1320   :  { %v12163_v20 = vpop.eup %12162  ;;  %v14996_v26 = vadd.f32 %v7946_v56, %v14869_v51 }
0x1321   :  { %v12165_v63 = vpop.eup %12164  ;;  %v8101_v55 = vadd.f32 1.0, %v12163_v20 }
0x1322   :  { %v8107_v17 = vadd.f32 1.0, %v12165_v63  ;;  %v12167_v5 = vpop.eup %12166 }
0x1323   :  { %12170 = vrcp.f32 %v8101_v55  ;;  %v12169_v3 = vpop.eup %12168  ;;  %v8114_v23 = vadd.f32 1.0, %v12167_v5 }
0x1324   :  { %12172 = vrcp.f32 %v8107_v17 }
0x1325   :  { %12174 = vrcp.f32 %v8114_v23 }
0x132d   :  { %v12171_v27 = vpop.eup %12170 }
0x132e   :  { %v12173_v34 = vpop.eup %12172  ;;  %v8118_v16 = vmul.f32 %v12171_v27, %v12169_v3  ;;  %v8682_v3 = vld [vmem:[%s15107_s15] ss:$0 sm:$0xff] }
0x132f   :  { %v8117_v42 = vmul.f32 %v12173_v34, %v14872_v1  ;;  %v12175_v51 = vpop.eup %12174 }
0x1331   :  { %v8119_v46 = vadd.f32 %v8118_v16, %v8117_v42 }
0x1333   :  { %12176 = vtanh.f32 %v8119_v46 }
0x133d   :  { %v12177_v38 = vpop.eup %12176 }
0x133e   :  { %v8121_v48 = vmul.f32 %v12177_v38, %v12175_v51 }
0x1340   :  { %8187 = vmatmul.mubr.f32.vlgmr.msra.gmra.mrb[62].mxu0 %v8121_v48  ;;  %8258 = vmatmul.mubr.f32.vlgmr.msra.gmra.mrb[70].mxu1 %v8121_v48 }
0x1341   :  { %11298 = vmatpush1.bf16.msra.mxu0 %v15784_v32  ;;  %11330 = vmatpush1.bf16.msra.mxu1 %v15785_v11  ;;  %v8435_v32 = vld [vmem:[%s15106_s14] sm:$0xff]  ;;  %v8436_v11 = vld [vmem:[%s15106_s14 + $0x8] sm:$0xff] }
0x1342   :  { %11300 = vmatprep.subr.bf16.mxu0 %v15786_v47  ;;  %11332 = vmatprep.subr.bf16.mxu1 %v15787_v25  ;;  %v11360_v47 = vpack.c.bf16 %v8436_v11, %v8435_v32  ;;  %v12487_v25 = vmov 0.0|0.0  }
0x1343   :  { %8328 = vmatprep.mubr.f32.mxu0 %v15463_v40  ;;  %8399 = vmatprep.mubr.f32.mxu1 %v15463_v40 }
0x1345   :  { %11302 = vmatpush1.bf16.msra.mxu0 %v15845_v59  ;;  %11334 = vmatpush1.bf16.msra.mxu1 %v15846_v18  ;;  %v8438_v59 = vld [vmem:[%s15106_s14 + $0x18] sm:$0xff] }
0x1346   :  { %11304 = vmatprep.subr.bf16.mxu0 %v15847_v2  ;;  %11336 = vmatprep.subr.bf16.mxu1 %v15848_v6  ;;  %v8439_v2 = vld [vmem:[%s15106_s14 + $0x20] sm:$0xff]  ;;  %v8440_v6 = vld [vmem:[%s15106_s14 + $0x28] sm:$0xff] }
0x1349   :  { %11306 = vmatpush1.bf16.msra.mxu0 %v15849_v4  ;;  %11338 = vmatpush1.bf16.msra.mxu1 %v15906_v12  ;;  %v11366_v4 = vpack.c.bf16 %v8440_v6, %v8439_v2 }
0x134a   :  { %11308 = vmatprep.subr.bf16.mxu0 %v15907_v36  ;;  %11340 = vmatprep.subr.bf16.mxu1 %v15908_v53  ;;  %v8443_v36 = vld [vmem:[%s15106_s14 + $0x40] sm:$0xff]  ;;  %v8444_v53 = vld [vmem:[%s15106_s14 + $0x48] sm:$0xff] }
0x134d   :  { %11310 = vmatpush1.bf16.msra.mxu0 %v15909_v33  ;;  %11342 = vmatpush1.bf16.msra.mxu1 %v15910_v58  ;;  %v11372_v33 = vpack.c.bf16 %v8444_v53, %v8443_v36  ;;  %v8445_v58 = vld [vmem:[%s15106_s14 + $0x50] sm:$0xff] }
0x134e   :  { %11312 = vmatprep.subr.bf16.mxu0 %v15911_v54  ;;  %11344 = vmatprep.subr.bf16.mxu1 %v15912_v13  ;;  %v8446_v54 = vld [vmem:[%s15106_s14 + $0x58] sm:$0xff] }
0x134f   :  { %v11375_v13 = vpack.c.bf16 %v8446_v54, %v8445_v58 }
0x1351   :  { %11314 = vmatpush1.bf16.msra.mxu0 %v15969_v19  ;;  %11346 = vmatpush1.bf16.msra.mxu1 %v15914_v8  ;;  %v8448_v8 = vld [vmem:[%s15106_s14 + $0x68] sm:$0xff] }
0x1352   :  { %11316 = vmatprep.subr.bf16.mxu0 %v15915_v41  ;;  %11348 = vmatprep.subr.bf16.mxu1 %v15916_v60  ;;  %v8449_v60 = vld [vmem:[%s15106_s14 + $0x70] sm:$0xff] }
0x1355   :  { %11318 = vmatpush1.bf16.msra.mxu0 %v15970_v28  ;;  %11350 = vmatpush1.bf16.msra.mxu1 %v15918_v21 }
0x1356   :  { %11320 = vmatprep.subr.bf16.mxu0 %v15919_v50  ;;  %11352 = vmatprep.subr.bf16.mxu1 %v15807_v10  ;;  %v8437_v10 = vld [vmem:[%s15106_s14 + $0x10] sm:$0xff] }
0x1357   :  { %v11363_v18 = vpack.c.bf16 %v8438_v59, %v8437_v10 }
0x1359   :  { %11322 = vmatpush1.bf16.msra.mxu0 %v15920_v29  ;;  %11354 = vmatpush1.bf16.msra.mxu1 %v15921_v22 }
0x135a   :  { %11324 = vmatprep.subr.bf16.mxu0 %v15922_v30  ;;  %11356 = vmatprep.subr.bf16.mxu1 %v15923_v24  ;;  %v8447_v24 = vld [vmem:[%s15106_s14 + $0x60] sm:$0xff] }
0x135b   :  { %v11378_v41 = vpack.c.bf16 %v8448_v8, %v8447_v24 }
0x135d   :  { %11326 = vmatpush1.bf16.msra.mxu0 %v15868_v39  ;;  %11358 = vmatpush1.bf16.msra.mxu1 %v15869_v49  ;;  %v8441_v39 = vld [vmem:[%s15106_s14 + $0x30] sm:$0xff]  ;;  %v8442_v49 = vld [vmem:[%s15106_s14 + $0x38] sm:$0xff] }
0x135e   :  { %11359 = vmatprep.subr.bf16.mxu0 %v12487_v25  ;;  %v11369_v12 = vpack.c.bf16 %v8442_v49, %v8441_v39 }
0x1360   :  { %8329 = vmatmul.mubr.f32.vlgmr.msra.gmra.mrb[62].mxu0 %v7946_v56  ;;  %8400 = vmatmul.mubr.f32.vlgmr.msra.gmra.mrb[70].mxu1 %v7946_v56 }
0x1361   :  { %11361 = vmatpush3.bf16.msra.mxu0 %v11360_v47  ;;  %8732 = vmatprep.mubr.msk.f32.mxu0 %vm12488_vm1, %v15463_v40  ;;  %v8450_v40 = vld [vmem:[%s15106_s14 + $0x78] sm:$0xff] }
0x1362   :  { %11362 = vmatprep.subr.bf16.mxu0 %v12487_v25  ;;  %v11381_v21 = vpack.c.bf16 %v8450_v40, %v8449_v60 }
0x1365   :  { %11364 = vmatpush3.bf16.msra.mxu0 %v11363_v18 }
0x1366   :  { %11365 = vmatprep.subr.bf16.mxu0 %v12487_v25 }
0x1369   :  { %11367 = vmatpush3.bf16.msra.mxu0 %v11366_v4 }
0x136a   :  { %11368 = vmatprep.subr.bf16.mxu0 %v12487_v25 }
0x136d   :  { %11370 = vmatpush3.bf16.msra.mxu0 %v11369_v12 }
0x136e   :  { %11371 = vmatprep.subr.bf16.mxu0 %v12487_v25 }
0x1371   :  { %11373 = vmatpush3.bf16.msra.mxu0 %v11372_v33 }
0x1372   :  { %11374 = vmatprep.subr.bf16.mxu0 %v12487_v25 }
0x1375   :  { %11376 = vmatpush3.bf16.msra.mxu0 %v11375_v13 }
0x1376   :  { %11377 = vmatprep.subr.bf16.mxu0 %v12487_v25 }
0x1379   :  { %11379 = vmatpush3.bf16.msra.mxu0 %v11378_v41 }
0x137a   :  { %11380 = vmatprep.subr.bf16.mxu0 %v12487_v25 }
0x137d   :  { %11382 = vmatpush3.bf16.msra.mxu0 %v11381_v21 }
0x1433   :  { %v8330_v50 = vpop.f32.mrb[62].mxu0  ;;  %v8401_v29 = vpop.f32.mrb[70].mxu1 }
0x1434   :  { %v11513_v22 = vadd.f32 %v8330_v50, %v16148_v62  ;;  %v8332_v30 = vpop.f32.mrb[63].mxu0  ;;  %v8403_v19 = vpop.f32.mrb[71].mxu1  ;;  %v11515_v35 = vadd.f32 %v8401_v29, %v16149_v15 }
0x1435   :  { %v11514_v28 = vadd.f32 %v8332_v30, %v15903_v7  ;;  %v11516_v43 = vadd.f32 %v8403_v19, %v16026_v31 }
0x1436   :  { %v8679_v1 = vmul.f32 -1.442695, %v11513_v22 }
0x1437   :  { %v8680_v61 = vmul.f32 -1.442695, %v11514_v28  ;;  %v8681_v52 = vmul.f32 -1.442695, %v11516_v43 }
0x1438   :  { %12178 = vpow2.f32 %v8679_v1 }
0x1439   :  { %12180 = vpow2.f32 %v8680_v61 }
0x143a   :  { %12182 = vpow2.f32 %v8681_v52 }
0x143b   :  { %12184 = vtanh.f32 %v11515_v35 }
0x1442   :  { %v12179_v44 = vpop.eup %12178 }
0x1443   :  { %v12181_v9 = vpop.eup %12180  ;;  %v8413_v0 = vadd.f32 1.0, %v12179_v44 }
0x1444   :  { %v8419_v45 = vadd.f32 1.0, %v12181_v9  ;;  %v12183_v62 = vpop.eup %12182 }
0x1445   :  { %12186 = vrcp.f32 %v8413_v0  ;;  %v12185_v37 = vpop.eup %12184  ;;  %v8426_v20 = vadd.f32 1.0, %v12183_v62 }
0x1446   :  { %12188 = vrcp.f32 %v8419_v45 }
0x1447   :  { %12190 = vrcp.f32 %v8426_v20 }
0x144f   :  { %v12187_v7 = vpop.eup %12186 }
0x1450   :  { %v12189_v14 = vpop.eup %12188  ;;  %v8430_v56 = vmul.f32 %v12187_v7, %v12185_v37 }
0x1451   :  { %v8429_v63 = vmul.f32 %v12189_v14, %v14988_v57  ;;  %v12191_v15 = vpop.eup %12190 }
0x1453   :  { %v8431_v31 = vadd.f32 %v8430_v56, %v8429_v63 }
0x1455   :  { %12192 = vtanh.f32 %v8431_v31 }
0x145f   :  { %v12193_v55 = vpop.eup %12192 }
0x1460   :  { %v8433_v17 = vmul.f32 %v12193_v55, %v12191_v15 }
0x1462   :  { %v8434_v5 = vadd.f32 %v8433_v17, %v14996_v26 }
0x1464   :  { %8733 = vmatmul.mubr.f32.vlgmr.msra.gmra.mrb[64].mxu0 %v8434_v5 }
0x1537   :  { %v8524_v27 = vpop.f32.mrb[64].mxu0 }
0x1538   :  { %v8525_v34 = vadd.f32 %v8682_v3, %v8524_v27  ;;  %v8734_v16 = vpop.f32.mrb[65].mxu0 }
0x153a   :  { %8528 = vst [vmem:[%s16152_s26] sm:$0xff] %v8525_v34 }
0x153b   :  { %8533 = vsyncpa [#allocation7], 1 }
0x153c   :  { %8534 = vsyncpa [#allocation9], 1 }
0x153d   :  { %8535 = vsyncpa [#allocation12], 1 }
0x153e   :  { %8536 = vsyncpa [#allocation15], 1 }
0x153f   :  { %8537 = vsyncpa [#allocation18], 1 }
0x1540   :  { %8538 = vsyncpa [#allocation21], 1 }
0x1541   :  { %8539 = vsyncpa [#allocation24], 1 }

</bundles_post_ra>
